<compile_context>
chip_gen: v6e
topology: v6e:2x2x1
jax: 0.10.0
libtpu: 0.0.40
codegen_flags: <defaults>
</compile_context>

<pallas_src>
import functools

import jax
import jax.numpy as jnp
from jax import lax
from jax.experimental import pallas as pl
from jax.experimental.pallas import tpu as pltpu


def _round_up(x, m):
    return (x + m - 1) // m * m


# ----------------------------- Pallas kernel -------------------------------
def lstm_kernel(n_ref, gin_ref, whh_ref, sizes_ref, out_ref, h_sc, c_sc, sel_sc):
    """One (batch-chunk, time-chunk) grid step of the LSTM recurrence.

    n_ref     : (1,)  int32 SMEM scalar-prefetch: max effective sequence length
    gin_ref   : (T_BLK, B_BLK, 4*Hp)  pre-projected input gates (x@Wih + b)
    whh_ref   : (Hp, 4*Hp)            recurrent weights (padded, gate-aligned)
    sizes_ref : (B_BLK, 1) int32      per-row sequence lengths
    out_ref   : (B_BLK, Hp)           selected/masked final hidden state
    h_sc/c_sc/sel_sc : (B_BLK, Hp) f32 scratch carried across time chunks
    """
    T_BLK, B_BLK, _ = gin_ref.shape
    Hp = out_ref.shape[1]
    t_chunk = pl.program_id(1)
    n_t_chunks = pl.num_programs(1)

    @pl.when(t_chunk == 0)
    def _init():
        z = jnp.zeros((B_BLK, Hp), jnp.float32)
        h_sc[...] = z
        c_sc[...] = z
        sel_sc[...] = z

    t0 = t_chunk * T_BLK

    # Skip whole chunks past the longest real sequence: they cannot change
    # sel (idx never matches t >= max(sizes)); pure wasted MXU/EUP otherwise.
    @pl.when(t0 < n_ref[0])
    def _compute():
        whh = whh_ref[...]                               # (Hp, 4*Hp), resident
        sizes = sizes_ref[...]                           # (B_BLK, 1) int32
        # last valid step per row; -1 for empty rows (never matched -> zero)
        idx = sizes - (sizes > 0).astype(jnp.int32)

        def step(s, carry):
            h, c, sel = carry
            # input projection + bias were precomputed; only h @ Whh remains
            # on the serial critical path (K = Hp).
            gates = gin_ref[s] + jnp.dot(
                h, whh,
                preferred_element_type=jnp.float32,
                precision=lax.Precision.HIGHEST,
            )                                            # (B_BLK, 4*Hp)
            i_g = jax.nn.sigmoid(gates[:, 0 * Hp:1 * Hp])
            f_g = jax.nn.sigmoid(gates[:, 1 * Hp:2 * Hp])
            g_g = jnp.tanh(gates[:, 2 * Hp:3 * Hp])
            o_g = jax.nn.sigmoid(gates[:, 3 * Hp:4 * Hp])
            c_new = f_g * c + i_g * g_g
            h_new = o_g * jnp.tanh(c_new)
            sel = jnp.where(idx == t0 + s, h_new, sel)
            return h_new, c_new, sel

        h, c, sel = lax.fori_loop(
            0, T_BLK, step,
            (h_sc[...], c_sc[...], sel_sc[...]),
            unroll=True,                                 # bounded: T_BLK steps
        )
        h_sc[...] = h
        c_sc[...] = c
        sel_sc[...] = sel

    @pl.when(t_chunk == n_t_chunks - 1)
    def _finalize():
        out_ref[...] = sel_sc[...]


def lstm_all_steps(gates_in, whh_pad, sizes_p, n_eff, *, t_blk, b_blk):
    """gates_in: (Tp, Bp, 4*Hp) f32; whh_pad: (Hp, 4*Hp); sizes_p: (Bp,1) i32."""
    Tp, Bp, G4 = gates_in.shape
    Hp = G4 // 4
    grid = (Bp // b_blk, Tp // t_blk)

    return pl.pallas_call(
        lstm_kernel,
        out_shape=jax.ShapeDtypeStruct((Bp, Hp), jnp.float32),
        grid_spec=pltpu.PrefetchScalarGridSpec(
            num_scalar_prefetch=1,
            grid=grid,
            in_specs=[
                pl.BlockSpec((t_blk, b_blk, 4 * Hp), lambda b, t, n: (t, b, 0)),
                pl.BlockSpec((Hp, 4 * Hp), lambda b, t, n: (0, 0)),
                pl.BlockSpec((b_blk, 1), lambda b, t, n: (b, 0)),
            ],
            out_specs=pl.BlockSpec((b_blk, Hp), lambda b, t, n: (b, 0)),
            scratch_shapes=[pltpu.VMEM((b_blk, Hp), jnp.float32)] * 3,
        ),
        compiler_params=pltpu.CompilerParams(
            # batch chunks are independent (megacore-splittable on v7x);
            # time chunks carry the recurrence -> arbitrary.
            dimension_semantics=("parallel", "arbitrary"),
        ),
    )(n_eff, gates_in, whh_pad, sizes_p)


# --------------------------- wrapper (glue in JAX) --------------------------
@jax.jit
def lstm_instruction_encoder(x, sizes, params):
    """Forward pass matching LSTMInstructionEncoder.forward (inference)."""
    emb = params["emb"]                       # (dict_size, E), padding row = 0
    wih_t = params["wih_t"]                   # (E, 4H)
    whh_t = params["whh_t"]                   # (H, 4H)
    bias = params["bih"] + params["bhh"]      # (4H,)

    B, T = x.shape
    V, E = emb.shape
    H = whh_t.shape[0]

    Hp = _round_up(H, 128)                    # per-gate lane-aligned slot
    b_blk = min(_round_up(B, 8), 128)
    Bp = _round_up(B, b_blk)
    t_blk = min(max(T, 1), 16)                # bounded per-chunk unroll
    Tp = _round_up(T, t_blk)

    # Pre-project the embedding table to gate space once (dict_size is tiny):
    # row padding_idx is all-zeros so its projected row == bias, exactly as
    # the reference (zero embedding + bias).  emb_dropout: identity at eval.
    gate_tbl = jnp.dot(emb.astype(jnp.float32), wih_t,
                       precision=lax.Precision.HIGHEST) + bias       # (V, 4H)
    gate_tbl = gate_tbl.reshape(V, 4, H)
    gate_tbl = jnp.pad(gate_tbl, ((0, 0), (0, 0), (0, Hp - H)))
    gate_tbl = gate_tbl.reshape(V, 4 * Hp)

    # Gate-aligned, zero-padded recurrent weights (pad lanes provably inert).
    whh_pad = whh_t.reshape(H, 4, H)
    whh_pad = jnp.pad(whh_pad, ((0, Hp - H), (0, 0), (0, Hp - H)))
    whh_pad = whh_pad.reshape(Hp, 4 * Hp)

    # Input gates for ALL timesteps via a pure gather, laid out (T, B, 4*Hp).
    gates_in = jnp.take(gate_tbl, x.T, axis=0)                       # (T,B,4Hp)
    gates_in = jnp.pad(gates_in, ((0, Tp - T), (0, Bp - B), (0, 0)))

    sizes_p = jnp.pad(sizes.astype(jnp.int32), (0, Bp - B))[:, None]  # (Bp,1)
    n_eff = jnp.minimum(jnp.max(sizes_p), T).astype(jnp.int32).reshape(1)

    out = lstm_all_steps(gates_in, whh_pad, sizes_p, n_eff,
                         t_blk=t_blk, b_blk=b_blk)                   # (Bp,Hp)
    # rows with sizes == 0 are already zero (never selected in-kernel).
    return out[:B, :H]


# --------------------------- pure-JAX reference -----------------------------
def reference_forward(x, sizes, params):
    emb = params["emb"]
    e = jnp.take(emb, x, axis=0).astype(jnp.float32)  # (B, T, E)
    B, T, E = e.shape
    H = params["whh_t"].shape[0]
    wih_t, whh_t = params["wih_t"], params["whh_t"]
    bih, bhh = params["bih"], params["bhh"]

    def step(carry, x_t):
        h, c = carry
        gates = (jnp.dot(x_t, wih_t, precision=lax.Precision.HIGHEST) + bih
                 + jnp.dot(h, whh_t, precision=lax.Precision.HIGHEST) + bhh)
        i_g = jax.nn.sigmoid(gates[:, :H])
        f_g = jax.nn.sigmoid(gates[:, H:2 * H])
        g_g = jnp.tanh(gates[:, 2 * H:3 * H])
        o_g = jax.nn.sigmoid(gates[:, 3 * H:])
        c_new = f_g * c + i_g * g_g
        h_new = o_g * jnp.tanh(c_new)
        return (h_new, c_new), h_new

    h0 = jnp.zeros((B, H), jnp.float32)
    c0 = jnp.zeros((B, H), jnp.float32)
    (_, _), hs = jax.lax.scan(step, (h0, c0), jnp.transpose(e, (1, 0, 2)))

    mask = (sizes > 0).astype(jnp.int32)
    idx = sizes - mask
    h = hs[idx, jnp.arange(B), :]
    return h * mask.astype(jnp.float32)[:, None]


# --------------------------------- params -----------------------------------
def make_params(key, dict_size, emb_size, out_size, padding_idx):
    kE, k1, k2, k3, k4 = jax.random.split(key, 5)
    H = out_size
    scale = 1.0 / jnp.sqrt(H)
    emb = jax.random.normal(kE, (dict_size, emb_size), jnp.float32)
    emb = emb.at[padding_idx].set(0.0)                 # padding_idx row zeroed
    # PyTorch LSTM gate order [i, f, g, o]; store transposed weights for x @ W.
    wih_t = jax.random.uniform(k1, (emb_size, 4 * H), jnp.float32, -scale, scale)
    whh_t = jax.random.uniform(k2, (H, 4 * H), jnp.float32, -scale, scale)
    bih = jax.random.uniform(k3, (4 * H,), jnp.float32, -scale, scale)
    bhh = jax.random.uniform(k4, (4 * H,), jnp.float32, -scale, scale)
    return {"emb": emb, "wih_t": wih_t, "whh_t": whh_t, "bih": bih, "bhh": bhh}


# --------------------------------- main -------------------------------------
if __name__ == "__main__":
    dict_size, emb_size, out_size, padding_idx = 50, 32, 32, 0
    B, T = 2, 8

    key = jax.random.PRNGKey(0)
    kp, kx = jax.random.split(key)
    params = make_params(kp, dict_size, emb_size, out_size, padding_idx)

    x = jax.random.randint(kx, (B, T), 1, dict_size, dtype=jnp.int32)
    # pad the tail of sequence 1 with padding_idx beyond its length
    sizes = jnp.array([T, 5], dtype=jnp.int32)
    x = x.at[1, 5:].set(padding_idx)

    out = lstm_instruction_encoder(x, sizes, params)
    out = jax.block_until_ready(out)

    ref = reference_forward(x, sizes, params)
    assert out.shape == (B, out_size)
    assert jnp.allclose(out, ref, atol=2e-3, rtol=2e-3), (
        f"max abs err {jnp.max(jnp.abs(out - ref))}"
    )
    print("KERNEL_OK")
</pallas_src>

<mosaic_0001>
module attributes {stable_mosaic.version = 11 : i64} {
  func.func @lstm_kernel(%arg0: i32, %arg1: i32, %arg2: memref<1xi32, #tpu.memory_space<smem>>, %arg3: memref<8x8x512xf32, #tpu.memory_space<vmem>>, %arg4: memref<128x512xf32, #tpu.memory_space<vmem>>, %arg5: memref<8x1xi32, #tpu.memory_space<vmem>>, %arg6: memref<8x128xf32, #tpu.memory_space<vmem>>, %arg7: memref<8x128xf32, #tpu.memory_space<vmem>>, %arg8: memref<8x128xf32, #tpu.memory_space<vmem>>, %arg9: memref<8x128xf32, #tpu.memory_space<vmem>>) attributes {dimension_semantics = [#tpu.dimension_semantics<parallel>, #tpu.dimension_semantics<arbitrary>], iteration_bounds = array<i64: 1, 1>, scalar_prefetch = 1 : i64, scratch_operands = 3 : i64, tpu.core_type = #tpu.core_type<tc>, window_params = [{transform_indices = @transform_0, window_bounds = array<i64: 8, 8, 512>}, {pipeline_mode = #tpu.pipeline_mode<synchronous>, transform_indices = @transform_1, window_bounds = array<i64: 128, 512>}, {transform_indices = @transform_2, window_bounds = array<i64: 8, 1>}, {transform_indices = @transform_3, window_bounds = array<i64: 8, 128>}]} {
    %c0_i32 = arith.constant 0 : i32
    %0 = arith.cmpi eq, %arg1, %c0_i32 : i32
    %1 = arith.extui %0 : i1 to i32
    %c0_i32_0 = arith.constant 0 : i32
    %2 = arith.cmpi ne, %1, %c0_i32_0 : i32
    scf.if %2 {
      %cst = arith.constant 0.000000e+00 : f32
      %11 = vector.broadcast %cst : f32 to vector<8x128xf32>
      %c0_4 = arith.constant 0 : index
      %c0_5 = arith.constant 0 : index
      %12 = vector.load %arg7[%c0_4, %c0_5] : memref<8x128xf32, #tpu.memory_space<vmem>>, vector<8x128xf32>
      tpu.vector_store %arg7[%c0_4, %c0_5], %11 {strides = array<i32>} : memref<8x128xf32, #tpu.memory_space<vmem>>, vector<8x128xf32>,
      %c0_6 = arith.constant 0 : index
      %c0_7 = arith.constant 0 : index
      %13 = vector.load %arg8[%c0_6, %c0_7] : memref<8x128xf32, #tpu.memory_space<vmem>>, vector<8x128xf32>
      tpu.vector_store %arg8[%c0_6, %c0_7], %11 {strides = array<i32>} : memref<8x128xf32, #tpu.memory_space<vmem>>, vector<8x128xf32>,
      %c0_8 = arith.constant 0 : index
      %c0_9 = arith.constant 0 : index
      %14 = vector.load %arg9[%c0_8, %c0_9] : memref<8x128xf32, #tpu.memory_space<vmem>>, vector<8x128xf32>
      tpu.vector_store %arg9[%c0_8, %c0_9], %11 {strides = array<i32>} : memref<8x128xf32, #tpu.memory_space<vmem>>, vector<8x128xf32>,
    } else {
    }
    %c8_i32 = arith.constant 8 : i32
    %3 = arith.muli %arg1, %c8_i32 : i32
    %c0 = arith.constant 0 : index
    %4 = memref.load %arg2[%c0] : memref<1xi32, #tpu.memory_space<smem>>
    %5 = arith.cmpi slt, %3, %4 : i32
    %6 = arith.extui %5 : i1 to i32
    %c0_i32_1 = arith.constant 0 : i32
    %7 = arith.cmpi ne, %6, %c0_i32_1 : i32
    scf.if %7 {
      %c0_4 = arith.constant 0 : index
      %c0_5 = arith.constant 0 : index
      %11 = vector.load %arg4[%c0_4, %c0_5] : memref<128x512xf32, #tpu.memory_space<vmem>>, vector<128x512xf32>
      %c0_6 = arith.constant 0 : index
      %c0_7 = arith.constant 0 : index
      %12 = vector.load %arg5[%c0_6, %c0_7] : memref<8x1xi32, #tpu.memory_space<vmem>>, vector<8x1xi32>
      %c0_i32_8 = arith.constant 0 : i32
      %13 = vector.broadcast %c0_i32_8 : i32 to vector<8x1xi32>
      %14 = arith.cmpi sgt, %12, %13 : vector<8x1xi32>
      %15 = arith.extui %14 : vector<8x1xi1> to vector<8x1xi32>
      %16 = arith.subi %12, %15 : vector<8x1xi32>
      %c0_9 = arith.constant 0 : index
      %c0_10 = arith.constant 0 : index
      %17 = vector.load %arg7[%c0_9, %c0_10] : memref<8x128xf32, #tpu.memory_space<vmem>>, vector<8x128xf32>
      %c0_11 = arith.constant 0 : index
      %c0_12 = arith.constant 0 : index
      %18 = vector.load %arg8[%c0_11, %c0_12] : memref<8x128xf32, #tpu.memory_space<vmem>>, vector<8x128xf32>
      %c0_13 = arith.constant 0 : index
      %c0_14 = arith.constant 0 : index
      %19 = vector.load %arg9[%c0_13, %c0_14] : memref<8x128xf32, #tpu.memory_space<vmem>>, vector<8x128xf32>
      %c0_i32_15 = arith.constant 0 : i32
      %20 = arith.index_cast %c0_i32_15 : i32 to index
      %c0_16 = arith.constant 0 : index
      %c0_17 = arith.constant 0 : index
      %21 = vector.load %arg3[%20, %c0_16, %c0_17] : memref<8x8x512xf32, #tpu.memory_space<vmem>>, vector<1x8x512xf32>
      %22 = vector.shape_cast %21 : vector<1x8x512xf32> to vector<8x512xf32>
      %cst = arith.constant dense<0.000000e+00> : vector<8x512xf32>
      %23 = tpu.matmul %17, %11, %cst {dimension_numbers = #tpu.dot_dimension_numbers<[1], [0], [0], [1], [0, 0, 1, 1], [], []>, precision = #tpu.contract_precision<fp32>} : vector<8x128xf32>, vector<128x512xf32>, vector<8x512xf32> -> vector<8x512xf32>
      %24 = arith.addf %22, %23 : vector<8x512xf32>
      %25 = vector.extract_strided_slice %24 {offsets = [0, 0], sizes = [8, 128], strides = [1, 1]} : vector<8x512xf32> to vector<8x128xf32>
      %26 = arith.negf %25 : vector<8x128xf32>
      %27 = math.exp %26 : vector<8x128xf32>
      %cst_18 = arith.constant 1.000000e+00 : f32
      %28 = vector.broadcast %cst_18 : f32 to vector<8x128xf32>
      %29 = arith.addf %28, %27 : vector<8x128xf32>
      %30 = arith.divf %28, %29 : vector<8x128xf32>
      %31 = vector.extract_strided_slice %24 {offsets = [0, 128], sizes = [8, 128], strides = [1, 1]} : vector<8x512xf32> to vector<8x128xf32>
      %32 = arith.negf %31 : vector<8x128xf32>
      %33 = math.exp %32 : vector<8x128xf32>
      %cst_19 = arith.constant 1.000000e+00 : f32
      %34 = vector.broadcast %cst_19 : f32 to vector<8x128xf32>
      %35 = arith.addf %34, %33 : vector<8x128xf32>
      %36 = arith.divf %34, %35 : vector<8x128xf32>
      %37 = vector.extract_strided_slice %24 {offsets = [0, 256], sizes = [8, 128], strides = [1, 1]} : vector<8x512xf32> to vector<8x128xf32>
      %38 = math.tanh %37 : vector<8x128xf32>
      %39 = vector.extract_strided_slice %24 {offsets = [0, 384], sizes = [8, 128], strides = [1, 1]} : vector<8x512xf32> to vector<8x128xf32>
      %40 = arith.negf %39 : vector<8x128xf32>
      %41 = math.exp %40 : vector<8x128xf32>
      %cst_20 = arith.constant 1.000000e+00 : f32
      %42 = vector.broadcast %cst_20 : f32 to vector<8x128xf32>
      %43 = arith.addf %42, %41 : vector<8x128xf32>
      %44 = arith.divf %42, %43 : vector<8x128xf32>
      %45 = arith.mulf %36, %18 : vector<8x128xf32>
      %46 = arith.mulf %30, %38 : vector<8x128xf32>
      %47 = arith.addf %45, %46 : vector<8x128xf32>
      %48 = math.tanh %47 : vector<8x128xf32>
      %49 = arith.mulf %44, %48 : vector<8x128xf32>
      %50 = arith.addi %3, %c0_i32_15 : i32
      %51 = vector.broadcast %50 : i32 to vector<8x1xi32>
      %52 = arith.cmpi eq, %16, %51 : vector<8x1xi32>
      %53 = vector.shape_cast %52 : vector<8x1xi1> to vector<8x1xi1>
      %54 = vector.broadcast %53 : vector<8x1xi1> to vector<8x128xi1>
      %55 = arith.select %54, %49, %19 : vector<8x128xi1>, vector<8x128xf32>
      %c1_i32 = arith.constant 1 : i32
      %56 = arith.index_cast %c1_i32 : i32 to index
      %c0_21 = arith.constant 0 : index
      %c0_22 = arith.constant 0 : index
      %57 = vector.load %arg3[%56, %c0_21, %c0_22] : memref<8x8x512xf32, #tpu.memory_space<vmem>>, vector<1x8x512xf32>
      %58 = vector.shape_cast %57 : vector<1x8x512xf32> to vector<8x512xf32>
      %cst_23 = arith.constant dense<0.000000e+00> : vector<8x512xf32>
      %59 = tpu.matmul %49, %11, %cst_23 {dimension_numbers = #tpu.dot_dimension_numbers<[1], [0], [0], [1], [0, 0, 1, 1], [], []>, precision = #tpu.contract_precision<fp32>} : vector<8x128xf32>, vector<128x512xf32>, vector<8x512xf32> -> vector<8x512xf32>
      %60 = arith.addf %58, %59 : vector<8x512xf32>
      %61 = vector.extract_strided_slice %60 {offsets = [0, 0], sizes = [8, 128], strides = [1, 1]} : vector<8x512xf32> to vector<8x128xf32>
      %62 = arith.negf %61 : vector<8x128xf32>
      %63 = math.exp %62 : vector<8x128xf32>
      %cst_24 = arith.constant 1.000000e+00 : f32
      %64 = vector.broadcast %cst_24 : f32 to vector<8x128xf32>
      %65 = arith.addf %64, %63 : vector<8x128xf32>
      %66 = arith.divf %64, %65 : vector<8x128xf32>
      %67 = vector.extract_strided_slice %60 {offsets = [0, 128], sizes = [8, 128], strides = [1, 1]} : vector<8x512xf32> to vector<8x128xf32>
      %68 = arith.negf %67 : vector<8x128xf32>
      %69 = math.exp %68 : vector<8x128xf32>
      %cst_25 = arith.constant 1.000000e+00 : f32
      %70 = vector.broadcast %cst_25 : f32 to vector<8x128xf32>
      %71 = arith.addf %70, %69 : vector<8x128xf32>
      %72 = arith.divf %70, %71 : vector<8x128xf32>
      %73 = vector.extract_strided_slice %60 {offsets = [0, 256], sizes = [8, 128], strides = [1, 1]} : vector<8x512xf32> to vector<8x128xf32>
      %74 = math.tanh %73 : vector<8x128xf32>
      %75 = vector.extract_strided_slice %60 {offsets = [0, 384], sizes = [8, 128], strides = [1, 1]} : vector<8x512xf32> to vector<8x128xf32>
      %76 = arith.negf %75 : vector<8x128xf32>
      %77 = math.exp %76 : vector<8x128xf32>
      %cst_26 = arith.constant 1.000000e+00 : f32
      %78 = vector.broadcast %cst_26 : f32 to vector<8x128xf32>
      %79 = arith.addf %78, %77 : vector<8x128xf32>
      %80 = arith.divf %78, %79 : vector<8x128xf32>
      %81 = arith.mulf %72, %47 : vector<8x128xf32>
      %82 = arith.mulf %66, %74 : vector<8x128xf32>
      %83 = arith.addf %81, %82 : vector<8x128xf32>
      %84 = math.tanh %83 : vector<8x128xf32>
      %85 = arith.mulf %80, %84 : vector<8x128xf32>
      %86 = arith.addi %3, %c1_i32 : i32
      %87 = vector.broadcast %86 : i32 to vector<8x1xi32>
      %88 = arith.cmpi eq, %16, %87 : vector<8x1xi32>
      %89 = vector.shape_cast %88 : vector<8x1xi1> to vector<8x1xi1>
      %90 = vector.broadcast %89 : vector<8x1xi1> to vector<8x128xi1>
      %91 = arith.select %90, %85, %55 : vector<8x128xi1>, vector<8x128xf32>
      %c2_i32 = arith.constant 2 : i32
      %92 = arith.index_cast %c2_i32 : i32 to index
      %c0_27 = arith.constant 0 : index
      %c0_28 = arith.constant 0 : index
      %93 = vector.load %arg3[%92, %c0_27, %c0_28] : memref<8x8x512xf32, #tpu.memory_space<vmem>>, vector<1x8x512xf32>
      %94 = vector.shape_cast %93 : vector<1x8x512xf32> to vector<8x512xf32>
      %cst_29 = arith.constant dense<0.000000e+00> : vector<8x512xf32>
      %95 = tpu.matmul %85, %11, %cst_29 {dimension_numbers = #tpu.dot_dimension_numbers<[1], [0], [0], [1], [0, 0, 1, 1], [], []>, precision = #tpu.contract_precision<fp32>} : vector<8x128xf32>, vector<128x512xf32>, vector<8x512xf32> -> vector<8x512xf32>
      %96 = arith.addf %94, %95 : vector<8x512xf32>
      %97 = vector.extract_strided_slice %96 {offsets = [0, 0], sizes = [8, 128], strides = [1, 1]} : vector<8x512xf32> to vector<8x128xf32>
      %98 = arith.negf %97 : vector<8x128xf32>
      %99 = math.exp %98 : vector<8x128xf32>
      %cst_30 = arith.constant 1.000000e+00 : f32
      %100 = vector.broadcast %cst_30 : f32 to vector<8x128xf32>
      %101 = arith.addf %100, %99 : vector<8x128xf32>
      %102 = arith.divf %100, %101 : vector<8x128xf32>
      %103 = vector.extract_strided_slice %96 {offsets = [0, 128], sizes = [8, 128], strides = [1, 1]} : vector<8x512xf32> to vector<8x128xf32>
      %104 = arith.negf %103 : vector<8x128xf32>
      %105 = math.exp %104 : vector<8x128xf32>
      %cst_31 = arith.constant 1.000000e+00 : f32
      %106 = vector.broadcast %cst_31 : f32 to vector<8x128xf32>
      %107 = arith.addf %106, %105 : vector<8x128xf32>
      %108 = arith.divf %106, %107 : vector<8x128xf32>
      %109 = vector.extract_strided_slice %96 {offsets = [0, 256], sizes = [8, 128], strides = [1, 1]} : vector<8x512xf32> to vector<8x128xf32>
      %110 = math.tanh %109 : vector<8x128xf32>
      %111 = vector.extract_strided_slice %96 {offsets = [0, 384], sizes = [8, 128], strides = [1, 1]} : vector<8x512xf32> to vector<8x128xf32>
      %112 = arith.negf %111 : vector<8x128xf32>
      %113 = math.exp %112 : vector<8x128xf32>
      %cst_32 = arith.constant 1.000000e+00 : f32
      %114 = vector.broadcast %cst_32 : f32 to vector<8x128xf32>
      %115 = arith.addf %114, %113 : vector<8x128xf32>
      %116 = arith.divf %114, %115 : vector<8x128xf32>
      %117 = arith.mulf %108, %83 : vector<8x128xf32>
      %118 = arith.mulf %102, %110 : vector<8x128xf32>
      %119 = arith.addf %117, %118 : vector<8x128xf32>
      %120 = math.tanh %119 : vector<8x128xf32>
      %121 = arith.mulf %116, %120 : vector<8x128xf32>
      %122 = arith.addi %3, %c2_i32 : i32
      %123 = vector.broadcast %122 : i32 to vector<8x1xi32>
      %124 = arith.cmpi eq, %16, %123 : vector<8x1xi32>
      %125 = vector.shape_cast %124 : vector<8x1xi1> to vector<8x1xi1>
      %126 = vector.broadcast %125 : vector<8x1xi1> to vector<8x128xi1>
      %127 = arith.select %126, %121, %91 : vector<8x128xi1>, vector<8x128xf32>
      %c3_i32 = arith.constant 3 : i32
      %128 = arith.index_cast %c3_i32 : i32 to index
      %c0_33 = arith.constant 0 : index
      %c0_34 = arith.constant 0 : index
      %129 = vector.load %arg3[%128, %c0_33, %c0_34] : memref<8x8x512xf32, #tpu.memory_space<vmem>>, vector<1x8x512xf32>
      %130 = vector.shape_cast %129 : vector<1x8x512xf32> to vector<8x512xf32>
      %cst_35 = arith.constant dense<0.000000e+00> : vector<8x512xf32>
      %131 = tpu.matmul %121, %11, %cst_35 {dimension_numbers = #tpu.dot_dimension_numbers<[1], [0], [0], [1], [0, 0, 1, 1], [], []>, precision = #tpu.contract_precision<fp32>} : vector<8x128xf32>, vector<128x512xf32>, vector<8x512xf32> -> vector<8x512xf32>
      %132 = arith.addf %130, %131 : vector<8x512xf32>
      %133 = vector.extract_strided_slice %132 {offsets = [0, 0], sizes = [8, 128], strides = [1, 1]} : vector<8x512xf32> to vector<8x128xf32>
      %134 = arith.negf %133 : vector<8x128xf32>
      %135 = math.exp %134 : vector<8x128xf32>
      %cst_36 = arith.constant 1.000000e+00 : f32
      %136 = vector.broadcast %cst_36 : f32 to vector<8x128xf32>
      %137 = arith.addf %136, %135 : vector<8x128xf32>
      %138 = arith.divf %136, %137 : vector<8x128xf32>
      %139 = vector.extract_strided_slice %132 {offsets = [0, 128], sizes = [8, 128], strides = [1, 1]} : vector<8x512xf32> to vector<8x128xf32>
      %140 = arith.negf %139 : vector<8x128xf32>
      %141 = math.exp %140 : vector<8x128xf32>
      %cst_37 = arith.constant 1.000000e+00 : f32
      %142 = vector.broadcast %cst_37 : f32 to vector<8x128xf32>
      %143 = arith.addf %142, %141 : vector<8x128xf32>
      %144 = arith.divf %142, %143 : vector<8x128xf32>
      %145 = vector.extract_strided_slice %132 {offsets = [0, 256], sizes = [8, 128], strides = [1, 1]} : vector<8x512xf32> to vector<8x128xf32>
      %146 = math.tanh %145 : vector<8x128xf32>
      %147 = vector.extract_strided_slice %132 {offsets = [0, 384], sizes = [8, 128], strides = [1, 1]} : vector<8x512xf32> to vector<8x128xf32>
      %148 = arith.negf %147 : vector<8x128xf32>
      %149 = math.exp %148 : vector<8x128xf32>
      %cst_38 = arith.constant 1.000000e+00 : f32
      %150 = vector.broadcast %cst_38 : f32 to vector<8x128xf32>
      %151 = arith.addf %150, %149 : vector<8x128xf32>
      %152 = arith.divf %150, %151 : vector<8x128xf32>
      %153 = arith.mulf %144, %119 : vector<8x128xf32>
      %154 = arith.mulf %138, %146 : vector<8x128xf32>
      %155 = arith.addf %153, %154 : vector<8x128xf32>
      %156 = math.tanh %155 : vector<8x128xf32>
      %157 = arith.mulf %152, %156 : vector<8x128xf32>
      %158 = arith.addi %3, %c3_i32 : i32
      %159 = vector.broadcast %158 : i32 to vector<8x1xi32>
      %160 = arith.cmpi eq, %16, %159 : vector<8x1xi32>
      %161 = vector.shape_cast %160 : vector<8x1xi1> to vector<8x1xi1>
      %162 = vector.broadcast %161 : vector<8x1xi1> to vector<8x128xi1>
      %163 = arith.select %162, %157, %127 : vector<8x128xi1>, vector<8x128xf32>
      %c4_i32 = arith.constant 4 : i32
      %164 = arith.index_cast %c4_i32 : i32 to index
      %c0_39 = arith.constant 0 : index
      %c0_40 = arith.constant 0 : index
      %165 = vector.load %arg3[%164, %c0_39, %c0_40] : memref<8x8x512xf32, #tpu.memory_space<vmem>>, vector<1x8x512xf32>
      %166 = vector.shape_cast %165 : vector<1x8x512xf32> to vector<8x512xf32>
      %cst_41 = arith.constant dense<0.000000e+00> : vector<8x512xf32>
      %167 = tpu.matmul %157, %11, %cst_41 {dimension_numbers = #tpu.dot_dimension_numbers<[1], [0], [0], [1], [0, 0, 1, 1], [], []>, precision = #tpu.contract_precision<fp32>} : vector<8x128xf32>, vector<128x512xf32>, vector<8x512xf32> -> vector<8x512xf32>
      %168 = arith.addf %166, %167 : vector<8x512xf32>
      %169 = vector.extract_strided_slice %168 {offsets = [0, 0], sizes = [8, 128], strides = [1, 1]} : vector<8x512xf32> to vector<8x128xf32>
      %170 = arith.negf %169 : vector<8x128xf32>
      %171 = math.exp %170 : vector<8x128xf32>
      %cst_42 = arith.constant 1.000000e+00 : f32
      %172 = vector.broadcast %cst_42 : f32 to vector<8x128xf32>
      %173 = arith.addf %172, %171 : vector<8x128xf32>
      %174 = arith.divf %172, %173 : vector<8x128xf32>
      %175 = vector.extract_strided_slice %168 {offsets = [0, 128], sizes = [8, 128], strides = [1, 1]} : vector<8x512xf32> to vector<8x128xf32>
      %176 = arith.negf %175 : vector<8x128xf32>
      %177 = math.exp %176 : vector<8x128xf32>
      %cst_43 = arith.constant 1.000000e+00 : f32
      %178 = vector.broadcast %cst_43 : f32 to vector<8x128xf32>
      %179 = arith.addf %178, %177 : vector<8x128xf32>
      %180 = arith.divf %178, %179 : vector<8x128xf32>
      %181 = vector.extract_strided_slice %168 {offsets = [0, 256], sizes = [8, 128], strides = [1, 1]} : vector<8x512xf32> to vector<8x128xf32>
      %182 = math.tanh %181 : vector<8x128xf32>
      %183 = vector.extract_strided_slice %168 {offsets = [0, 384], sizes = [8, 128], strides = [1, 1]} : vector<8x512xf32> to vector<8x128xf32>
      %184 = arith.negf %183 : vector<8x128xf32>
      %185 = math.exp %184 : vector<8x128xf32>
      %cst_44 = arith.constant 1.000000e+00 : f32
      %186 = vector.broadcast %cst_44 : f32 to vector<8x128xf32>
      %187 = arith.addf %186, %185 : vector<8x128xf32>
      %188 = arith.divf %186, %187 : vector<8x128xf32>
      %189 = arith.mulf %180, %155 : vector<8x128xf32>
      %190 = arith.mulf %174, %182 : vector<8x128xf32>
      %191 = arith.addf %189, %190 : vector<8x128xf32>
      %192 = math.tanh %191 : vector<8x128xf32>
      %193 = arith.mulf %188, %192 : vector<8x128xf32>
      %194 = arith.addi %3, %c4_i32 : i32
      %195 = vector.broadcast %194 : i32 to vector<8x1xi32>
      %196 = arith.cmpi eq, %16, %195 : vector<8x1xi32>
      %197 = vector.shape_cast %196 : vector<8x1xi1> to vector<8x1xi1>
      %198 = vector.broadcast %197 : vector<8x1xi1> to vector<8x128xi1>
      %199 = arith.select %198, %193, %163 : vector<8x128xi1>, vector<8x128xf32>
      %c5_i32 = arith.constant 5 : i32
      %200 = arith.index_cast %c5_i32 : i32 to index
      %c0_45 = arith.constant 0 : index
      %c0_46 = arith.constant 0 : index
      %201 = vector.load %arg3[%200, %c0_45, %c0_46] : memref<8x8x512xf32, #tpu.memory_space<vmem>>, vector<1x8x512xf32>
      %202 = vector.shape_cast %201 : vector<1x8x512xf32> to vector<8x512xf32>
      %cst_47 = arith.constant dense<0.000000e+00> : vector<8x512xf32>
      %203 = tpu.matmul %193, %11, %cst_47 {dimension_numbers = #tpu.dot_dimension_numbers<[1], [0], [0], [1], [0, 0, 1, 1], [], []>, precision = #tpu.contract_precision<fp32>} : vector<8x128xf32>, vector<128x512xf32>, vector<8x512xf32> -> vector<8x512xf32>
      %204 = arith.addf %202, %203 : vector<8x512xf32>
      %205 = vector.extract_strided_slice %204 {offsets = [0, 0], sizes = [8, 128], strides = [1, 1]} : vector<8x512xf32> to vector<8x128xf32>
      %206 = arith.negf %205 : vector<8x128xf32>
      %207 = math.exp %206 : vector<8x128xf32>
      %cst_48 = arith.constant 1.000000e+00 : f32
      %208 = vector.broadcast %cst_48 : f32 to vector<8x128xf32>
      %209 = arith.addf %208, %207 : vector<8x128xf32>
      %210 = arith.divf %208, %209 : vector<8x128xf32>
      %211 = vector.extract_strided_slice %204 {offsets = [0, 128], sizes = [8, 128], strides = [1, 1]} : vector<8x512xf32> to vector<8x128xf32>
      %212 = arith.negf %211 : vector<8x128xf32>
      %213 = math.exp %212 : vector<8x128xf32>
      %cst_49 = arith.constant 1.000000e+00 : f32
      %214 = vector.broadcast %cst_49 : f32 to vector<8x128xf32>
      %215 = arith.addf %214, %213 : vector<8x128xf32>
      %216 = arith.divf %214, %215 : vector<8x128xf32>
      %217 = vector.extract_strided_slice %204 {offsets = [0, 256], sizes = [8, 128], strides = [1, 1]} : vector<8x512xf32> to vector<8x128xf32>
      %218 = math.tanh %217 : vector<8x128xf32>
      %219 = vector.extract_strided_slice %204 {offsets = [0, 384], sizes = [8, 128], strides = [1, 1]} : vector<8x512xf32> to vector<8x128xf32>
      %220 = arith.negf %219 : vector<8x128xf32>
      %221 = math.exp %220 : vector<8x128xf32>
      %cst_50 = arith.constant 1.000000e+00 : f32
      %222 = vector.broadcast %cst_50 : f32 to vector<8x128xf32>
      %223 = arith.addf %222, %221 : vector<8x128xf32>
      %224 = arith.divf %222, %223 : vector<8x128xf32>
      %225 = arith.mulf %216, %191 : vector<8x128xf32>
      %226 = arith.mulf %210, %218 : vector<8x128xf32>
      %227 = arith.addf %225, %226 : vector<8x128xf32>
      %228 = math.tanh %227 : vector<8x128xf32>
      %229 = arith.mulf %224, %228 : vector<8x128xf32>
      %230 = arith.addi %3, %c5_i32 : i32
      %231 = vector.broadcast %230 : i32 to vector<8x1xi32>
      %232 = arith.cmpi eq, %16, %231 : vector<8x1xi32>
      %233 = vector.shape_cast %232 : vector<8x1xi1> to vector<8x1xi1>
      %234 = vector.broadcast %233 : vector<8x1xi1> to vector<8x128xi1>
      %235 = arith.select %234, %229, %199 : vector<8x128xi1>, vector<8x128xf32>
      %c6_i32 = arith.constant 6 : i32
      %236 = arith.index_cast %c6_i32 : i32 to index
      %c0_51 = arith.constant 0 : index
      %c0_52 = arith.constant 0 : index
      %237 = vector.load %arg3[%236, %c0_51, %c0_52] : memref<8x8x512xf32, #tpu.memory_space<vmem>>, vector<1x8x512xf32>
      %238 = vector.shape_cast %237 : vector<1x8x512xf32> to vector<8x512xf32>
      %cst_53 = arith.constant dense<0.000000e+00> : vector<8x512xf32>
      %239 = tpu.matmul %229, %11, %cst_53 {dimension_numbers = #tpu.dot_dimension_numbers<[1], [0], [0], [1], [0, 0, 1, 1], [], []>, precision = #tpu.contract_precision<fp32>} : vector<8x128xf32>, vector<128x512xf32>, vector<8x512xf32> -> vector<8x512xf32>
      %240 = arith.addf %238, %239 : vector<8x512xf32>
      %241 = vector.extract_strided_slice %240 {offsets = [0, 0], sizes = [8, 128], strides = [1, 1]} : vector<8x512xf32> to vector<8x128xf32>
      %242 = arith.negf %241 : vector<8x128xf32>
      %243 = math.exp %242 : vector<8x128xf32>
      %cst_54 = arith.constant 1.000000e+00 : f32
      %244 = vector.broadcast %cst_54 : f32 to vector<8x128xf32>
      %245 = arith.addf %244, %243 : vector<8x128xf32>
      %246 = arith.divf %244, %245 : vector<8x128xf32>
      %247 = vector.extract_strided_slice %240 {offsets = [0, 128], sizes = [8, 128], strides = [1, 1]} : vector<8x512xf32> to vector<8x128xf32>
      %248 = arith.negf %247 : vector<8x128xf32>
      %249 = math.exp %248 : vector<8x128xf32>
      %cst_55 = arith.constant 1.000000e+00 : f32
      %250 = vector.broadcast %cst_55 : f32 to vector<8x128xf32>
      %251 = arith.addf %250, %249 : vector<8x128xf32>
      %252 = arith.divf %250, %251 : vector<8x128xf32>
      %253 = vector.extract_strided_slice %240 {offsets = [0, 256], sizes = [8, 128], strides = [1, 1]} : vector<8x512xf32> to vector<8x128xf32>
      %254 = math.tanh %253 : vector<8x128xf32>
      %255 = vector.extract_strided_slice %240 {offsets = [0, 384], sizes = [8, 128], strides = [1, 1]} : vector<8x512xf32> to vector<8x128xf32>
      %256 = arith.negf %255 : vector<8x128xf32>
      %257 = math.exp %256 : vector<8x128xf32>
      %cst_56 = arith.constant 1.000000e+00 : f32
      %258 = vector.broadcast %cst_56 : f32 to vector<8x128xf32>
      %259 = arith.addf %258, %257 : vector<8x128xf32>
      %260 = arith.divf %258, %259 : vector<8x128xf32>
      %261 = arith.mulf %252, %227 : vector<8x128xf32>
      %262 = arith.mulf %246, %254 : vector<8x128xf32>
      %263 = arith.addf %261, %262 : vector<8x128xf32>
      %264 = math.tanh %263 : vector<8x128xf32>
      %265 = arith.mulf %260, %264 : vector<8x128xf32>
      %266 = arith.addi %3, %c6_i32 : i32
      %267 = vector.broadcast %266 : i32 to vector<8x1xi32>
      %268 = arith.cmpi eq, %16, %267 : vector<8x1xi32>
      %269 = vector.shape_cast %268 : vector<8x1xi1> to vector<8x1xi1>
      %270 = vector.broadcast %269 : vector<8x1xi1> to vector<8x128xi1>
      %271 = arith.select %270, %265, %235 : vector<8x128xi1>, vector<8x128xf32>
      %c7_i32 = arith.constant 7 : i32
      %272 = arith.index_cast %c7_i32 : i32 to index
      %c0_57 = arith.constant 0 : index
      %c0_58 = arith.constant 0 : index
      %273 = vector.load %arg3[%272, %c0_57, %c0_58] : memref<8x8x512xf32, #tpu.memory_space<vmem>>, vector<1x8x512xf32>
      %274 = vector.shape_cast %273 : vector<1x8x512xf32> to vector<8x512xf32>
      %cst_59 = arith.constant dense<0.000000e+00> : vector<8x512xf32>
      %275 = tpu.matmul %265, %11, %cst_59 {dimension_numbers = #tpu.dot_dimension_numbers<[1], [0], [0], [1], [0, 0, 1, 1], [], []>, precision = #tpu.contract_precision<fp32>} : vector<8x128xf32>, vector<128x512xf32>, vector<8x512xf32> -> vector<8x512xf32>
      %276 = arith.addf %274, %275 : vector<8x512xf32>
      %277 = vector.extract_strided_slice %276 {offsets = [0, 0], sizes = [8, 128], strides = [1, 1]} : vector<8x512xf32> to vector<8x128xf32>
      %278 = arith.negf %277 : vector<8x128xf32>
      %279 = math.exp %278 : vector<8x128xf32>
      %cst_60 = arith.constant 1.000000e+00 : f32
      %280 = vector.broadcast %cst_60 : f32 to vector<8x128xf32>
      %281 = arith.addf %280, %279 : vector<8x128xf32>
      %282 = arith.divf %280, %281 : vector<8x128xf32>
      %283 = vector.extract_strided_slice %276 {offsets = [0, 128], sizes = [8, 128], strides = [1, 1]} : vector<8x512xf32> to vector<8x128xf32>
      %284 = arith.negf %283 : vector<8x128xf32>
      %285 = math.exp %284 : vector<8x128xf32>
      %cst_61 = arith.constant 1.000000e+00 : f32
      %286 = vector.broadcast %cst_61 : f32 to vector<8x128xf32>
      %287 = arith.addf %286, %285 : vector<8x128xf32>
      %288 = arith.divf %286, %287 : vector<8x128xf32>
      %289 = vector.extract_strided_slice %276 {offsets = [0, 256], sizes = [8, 128], strides = [1, 1]} : vector<8x512xf32> to vector<8x128xf32>
      %290 = math.tanh %289 : vector<8x128xf32>
      %291 = vector.extract_strided_slice %276 {offsets = [0, 384], sizes = [8, 128], strides = [1, 1]} : vector<8x512xf32> to vector<8x128xf32>
      %292 = arith.negf %291 : vector<8x128xf32>
      %293 = math.exp %292 : vector<8x128xf32>
      %cst_62 = arith.constant 1.000000e+00 : f32
      %294 = vector.broadcast %cst_62 : f32 to vector<8x128xf32>
      %295 = arith.addf %294, %293 : vector<8x128xf32>
      %296 = arith.divf %294, %295 : vector<8x128xf32>
      %297 = arith.mulf %288, %263 : vector<8x128xf32>
      %298 = arith.mulf %282, %290 : vector<8x128xf32>
      %299 = arith.addf %297, %298 : vector<8x128xf32>
      %300 = math.tanh %299 : vector<8x128xf32>
      %301 = arith.mulf %296, %300 : vector<8x128xf32>
      %302 = arith.addi %3, %c7_i32 : i32
      %303 = vector.broadcast %302 : i32 to vector<8x1xi32>
      %304 = arith.cmpi eq, %16, %303 : vector<8x1xi32>
      %305 = vector.shape_cast %304 : vector<8x1xi1> to vector<8x1xi1>
      %306 = vector.broadcast %305 : vector<8x1xi1> to vector<8x128xi1>
      %307 = arith.select %306, %301, %271 : vector<8x128xi1>, vector<8x128xf32>
      %c8_i32_63 = arith.constant 8 : i32
      %c0_64 = arith.constant 0 : index
      %c0_65 = arith.constant 0 : index
      %308 = vector.load %arg7[%c0_64, %c0_65] : memref<8x128xf32, #tpu.memory_space<vmem>>, vector<8x128xf32>
      tpu.vector_store %arg7[%c0_64, %c0_65], %301 {strides = array<i32>} : memref<8x128xf32, #tpu.memory_space<vmem>>, vector<8x128xf32>,
      %c0_66 = arith.constant 0 : index
      %c0_67 = arith.constant 0 : index
      %309 = vector.load %arg8[%c0_66, %c0_67] : memref<8x128xf32, #tpu.memory_space<vmem>>, vector<8x128xf32>
      tpu.vector_store %arg8[%c0_66, %c0_67], %299 {strides = array<i32>} : memref<8x128xf32, #tpu.memory_space<vmem>>, vector<8x128xf32>,
      %c0_68 = arith.constant 0 : index
      %c0_69 = arith.constant 0 : index
      %310 = vector.load %arg9[%c0_68, %c0_69] : memref<8x128xf32, #tpu.memory_space<vmem>>, vector<8x128xf32>
      tpu.vector_store %arg9[%c0_68, %c0_69], %307 {strides = array<i32>} : memref<8x128xf32, #tpu.memory_space<vmem>>, vector<8x128xf32>,
    } else {
    }
    %c0_i32_2 = arith.constant 0 : i32
    %8 = arith.cmpi eq, %arg1, %c0_i32_2 : i32
    %9 = arith.extui %8 : i1 to i32
    %c0_i32_3 = arith.constant 0 : i32
    %10 = arith.cmpi ne, %9, %c0_i32_3 : i32
    scf.if %10 {
      %c0_4 = arith.constant 0 : index
      %c0_5 = arith.constant 0 : index
      %11 = vector.load %arg9[%c0_4, %c0_5] : memref<8x128xf32, #tpu.memory_space<vmem>>, vector<8x128xf32>
      %c0_6 = arith.constant 0 : index
      %c0_7 = arith.constant 0 : index
      %12 = vector.load %arg6[%c0_6, %c0_7] : memref<8x128xf32, #tpu.memory_space<vmem>>, vector<8x128xf32>
      tpu.vector_store %arg6[%c0_6, %c0_7], %11 {strides = array<i32>} : memref<8x128xf32, #tpu.memory_space<vmem>>, vector<8x128xf32>,
    } else {
    }
    return
  }
  func.func @transform_0(%arg0: i32, %arg1: i32, %arg2: memref<1xi32, #tpu.memory_space<smem>>) -> (i32, i32, i32) {
    %c0_i32 = arith.constant 0 : i32
    %c0_i32_0 = arith.constant 0 : i32
    return %arg1, %arg0, %c0_i32 : i32, i32, i32
  }
  func.func @transform_1(%arg0: i32, %arg1: i32, %arg2: memref<1xi32, #tpu.memory_space<smem>>) -> (i32, i32) {
    %c0_i32 = arith.constant 0 : i32
    %c0_i32_0 = arith.constant 0 : i32
    %c0_i32_1 = arith.constant 0 : i32
    return %c0_i32, %c0_i32_0 : i32, i32
  }
  func.func @transform_2(%arg0: i32, %arg1: i32, %arg2: memref<1xi32, #tpu.memory_space<smem>>) -> (i32, i32) {
    %c0_i32 = arith.constant 0 : i32
    %c0_i32_0 = arith.constant 0 : i32
    return %arg0, %c0_i32 : i32, i32
  }
  func.func @transform_3(%arg0: i32, %arg1: i32, %arg2: memref<1xi32, #tpu.memory_space<smem>>) -> (i32, i32) {
    %c0_i32 = arith.constant 0 : i32
    %c0_i32_0 = arith.constant 0 : i32
    return %arg0, %c0_i32 : i32, i32
  }
}

</mosaic_0001>

<bundles_post_ra>
// kernel: lstm_instruction_encoder.1
= control target key start
LH: loop header
LB: loop body
LE: loop exit
PB: predicated region body
PF: predicated region fallthrough
CT: control target
= control target key end

     0   :  { %v14313_v0 = vmov 0.0   ;;  %s18930_s0 = inlined_call_operand.<no memory space> [shape: s32[1], index: 0, kind: input, shape index: {}]   ;;  %s18931_s1 = inlined_call_operand.vmem [shape: f32[8,8,512], index: 1, kind: input, shape index: {}]   ;;  %s18932_s2 = inlined_call_operand.vmem [shape: f32[128,512], index: 2, kind: input, shape index: {}]   ;;  %s18933_s3 = inlined_call_operand.vmem [shape: s32[8,1], index: 3, kind: input, shape index: {}]   ;;  %s18934_s4 = inlined_call_operand.vmem [shape: f32[8,128], index: 4, kind: output, shape index: {}]  }
   0x1   :  { %20 = vst [vmem:[#allocation2] sm:$0xff] %v14313_v0  ;;  %21 = vst [vmem:[#allocation3] sm:$0xff] %v14313_v0  ;;  %p14127_p0 = scmp.le.s32.totalorder %s18930_s0, 0 }
   0x2   :  { %22 = vst [vmem:[#allocation4] sm:$0xff] %v14313_v0 }
   0x3   :  { %28 = sbr.rel (%p14127_p0) target bundleno = 3373 (0xd2d), region = 21 }
   0x8   :  { %v90_v1 = vld [vmem:[%s18932_s2 + $0x1e8] sm:$0xff]  ;;  %v89_v2 = vld [vmem:[%s18932_s2 + $0x1e0] sm:$0xff]  ;;  %v18935_v10 = vmov 0.0  }
   0x9   :  { %v86_v3 = vld [vmem:[%s18932_s2 + $0x1c8] sm:$0xff]  ;;  %v14353_v4 = vand.u32 4294901760, %v90_v1  ;;  %v14355_v5 = vand.u32 4294901760, %v89_v2  ;;  %v85_v7 = vld [vmem:[%s18932_s2 + $0x1c0] sm:$0xff]  ;;  %200 = vmatprep.mubr.f32.mxu0 %v18935_v10  ;;  %436 = vmatprep.mubr.f32.mxu1 %v18935_v10 }
   0xa   :  { %v14357_v6 = vand.u32 4294901760, %v86_v3  ;;  %v82_v8 = vld [vmem:[%s18932_s2 + $0x1a8] sm:$0xff]  ;;  %v81_v9 = vld [vmem:[%s18932_s2 + $0x1a0] sm:$0xff]  ;;  %v14370_v11 = vand.u32 4294901760, %v85_v7 }
   0xb   :  { %19688 = vst [vmem:[#allocation7_spill] sm:$0xff] %v14353_v4  ;;  %19689 = vst [vmem:[#allocation8_spill] sm:$0xff] %v14355_v5  ;;  %v14372_v12 = vand.u32 4294901760, %v82_v8  ;;  %v14374_v13 = vand.u32 4294901760, %v81_v9  ;;  %v78_v14 = vld [vmem:[%s18932_s2 + $0x188] sm:$0xff]  ;;  %v77_v15 = vld [vmem:[%s18932_s2 + $0x180] sm:$0xff]  ;;  %105 = vmatprep.subr.mxu0 %v14353_v4  ;;  %v14393_v20 = vsub.f32 %v90_v1, %v14353_v4  ;;  %v14415_v25 = vsub.f32 %v89_v2, %v14355_v5 }
   0xc   :  { %19690 = vst [vmem:[#allocation9_spill] sm:$0xff] %v14357_v6  ;;  %19691 = vst [vmem:[#allocation10_spill] sm:$0xff] %v14370_v11  ;;  %v74_v16 = vld [vmem:[%s18932_s2 + $0x168] sm:$0xff]  ;;  %v14386_v17 = vand.u32 4294901760, %v78_v14  ;;  %v14388_v18 = vand.u32 4294901760, %v77_v15  ;;  %v14398_v21 = vld [vmem:[%s18932_s2 + $0x160] sm:$0xff]  ;;  %107 = vmatpush1.msra.mxu0 %v14355_v5  ;;  %v14421_v27 = vsub.f32 %v86_v3, %v14357_v6  ;;  %v14446_v33 = vsub.f32 %v85_v7, %v14370_v11 }
   0xd   :  { %19692 = vst [vmem:[#allocation11_spill] sm:$0xff] %v14372_v12  ;;  %19693 = vst [vmem:[#allocation12_spill] sm:$0xff] %v14374_v13  ;;  %v14390_v19 = vand.u32 4294901760, %v74_v16  ;;  %v14403_v22 = vld [vmem:[%s18932_s2 + $0x148] sm:$0xff]  ;;  %v14408_v23 = vld [vmem:[%s18932_s2 + $0x140] sm:$0xff]  ;;  %v14412_v24 = vand.u32 4294901760, %v14398_v21  ;;  %109 = vmatprep.subr.mxu0 %v14357_v6  ;;  %v14459_v37 = vsub.f32 %v82_v8, %v14372_v12  ;;  %v14476_v42 = vsub.f32 %v81_v9, %v14374_v13 }
   0xe   :  { %19694 = vst [vmem:[#allocation13_spill] sm:$0xff] %v14386_v17  ;;  %19695 = vst [vmem:[#allocation14_spill] sm:$0xff] %v14388_v18  ;;  %v14418_v26 = vand.u32 4294901760, %v14403_v22  ;;  %v14426_v28 = vld [vmem:[%s18932_s2 + $0x128] sm:$0xff]  ;;  %v14431_v29 = vld [vmem:[%s18932_s2 + $0x120] sm:$0xff]  ;;  %v14440_v31 = vand.u32 4294901760, %v14393_v20  ;;  %111 = vmatpush1.msra.mxu0 %v14370_v11  ;;  %v14490_v47 = vsub.f32 %v78_v14, %v14386_v17  ;;  %v14535_v61 = vsub.f32 %v77_v15, %v14388_v18 }
   0xf   :  { %19696 = vst [vmem:[#allocation15_spill] sm:$0xff] %v14390_v19  ;;  %19697 = vst [vmem:[#allocation16_spill] sm:$0xff] %v14393_v20  ;;  %v14436_v30 = vld [vmem:[%s18932_s2 + $0x108] sm:$0xff]  ;;  %v14443_v32 = vand.u32 4294901760, %v14408_v23  ;;  %v14449_v34 = vand.u32 4294901760, %v14426_v28  ;;  %v14453_v35 = vand.u32 4294901760, %v14415_v25  ;;  %113 = vmatprep.subr.mxu0 %v14372_v12  ;;  %v14552_v2 = vsub.f32 %v74_v16, %v14390_v19 }
  0x10   :  { %19698 = vst [vmem:[#allocation17_spill] sm:$0xff] %v14412_v24  ;;  %19699 = vst [vmem:[#allocation18_spill] sm:$0xff] %v14415_v25  ;;  %v14456_v36 = vand.u32 4294901760, %v14421_v27  ;;  %v14462_v38 = vand.u32 4294901760, %v14431_v29  ;;  %v14467_v39 = vld [vmem:[%s18932_s2 + $0x100] sm:$0xff]  ;;  %v215_v40 = vsub.f32 %v14393_v20, %v14440_v31  ;;  %v14473_v41 = vand.u32 4294901760, %v14446_v33  ;;  %115 = vmatpush1.msra.mxu0 %v14374_v13 }
  0x11   :  { %19700 = vst [vmem:[#allocation19_spill] sm:$0xff] %v14418_v26  ;;  %19701 = vst [vmem:[#allocation20_spill] sm:$0xff] %v14421_v27  ;;  %v14479_v43 = vand.u32 4294901760, %v14436_v30  ;;  %v221_v44 = vsub.f32 %v14415_v25, %v14453_v35  ;;  %v14487_v46 = vand.u32 4294901760, %v14459_v37  ;;  %v14495_v48 = vld [vmem:[%s18932_s2 + $0xe8] sm:$0xff]  ;;  %117 = vmatprep.subr.mxu0 %v14386_v17  ;;  %v14503_v51 = vand.u32 4294901760, %v14476_v42 }
  0x12   :  { %19702 = vst [vmem:[#allocation21_spill] sm:$0xff] %v14440_v31  ;;  %19703 = vst [vmem:[#allocation22_spill] sm:$0xff] %v14443_v32  ;;  %v227_v45 = vsub.f32 %v14421_v27, %v14456_v36  ;;  %v14498_v49 = vand.u32 4294901760, %v215_v40  ;;  %v233_v50 = vsub.f32 %v14446_v33, %v14473_v41  ;;  %v14506_v52 = vand.u32 4294901760, %v14467_v39  ;;  %v14511_v53 = vld [vmem:[%s18932_s2 + $0xe0] sm:$0xff]  ;;  %119 = vmatpush1.msra.mxu0 %v14388_v18  ;;  %v14526_v58 = vld [vmem:[%s18932_s2 + $0xc8] sm:$0xff] }
  0x13   :  { %19704 = vst [vmem:[#allocation23_spill] sm:$0xff] %v14446_v33  ;;  %19705 = vst [vmem:[#allocation24_spill] sm:$0xff] %v14449_v34  ;;  %v14514_v54 = vand.u32 4294901760, %v221_v44  ;;  %v239_v56 = vsub.f32 %v14459_v37, %v14487_v46  ;;  %v14521_v57 = vand.u32 4294901760, %v14490_v47  ;;  %121 = vmatprep.subr.mxu0 %v14390_v19  ;;  %v245_v60 = vsub.f32 %v14476_v42, %v14503_v51  ;;  %v14543_v63 = vld [vmem:[%s18932_s2 + $0xc0] sm:$0xff]  ;;  %v14560_v7 = vld [vmem:[%s18932_s2 + $0xa8] sm:$0xff] }
  0x14   :  { %19706 = vst [vmem:[#allocation25_spill] sm:$0xff] %v14453_v35  ;;  %19707 = vst [vmem:[#allocation26_spill] sm:$0xff] %v14456_v36  ;;  %v14516_v55 = vand.u32 4294901760, %v227_v45  ;;  %217 = vmatprep.subr.mxu1 %v14498_v49  ;;  %v14530_v59 = vand.u32 4294901760, %v233_v50  ;;  %v14538_v62 = vand.u32 4294901760, %v14495_v48  ;;  %123 = vmatpush1.msra.mxu0 %v14412_v24  ;;  %v14555_v3 = vand.u32 4294901760, %v14511_v53 }
  0x15   :  { %19708 = vst [vmem:[#allocation27_spill] sm:$0xff] %v14459_v37  ;;  %19709 = vst [vmem:[#allocation28_spill] sm:$0xff] %v14462_v38  ;;  %223 = vmatpush1.msra.mxu1 %v14514_v54  ;;  %v14547_v0 = vand.u32 4294901760, %v239_v56  ;;  %v251_v1 = vsub.f32 %v14490_v47, %v14521_v57  ;;  %125 = vmatprep.subr.mxu0 %v14418_v26  ;;  %v14564_v8 = vand.u32 4294901760, %v245_v60  ;;  %v14567_v9 = vand.u32 4294901760, %v14535_v61  ;;  %v14579_v16 = vld [vmem:[%s18932_s2 + $0xa0] sm:$0xff] }
  0x16   :  { %19710 = vst [vmem:[#allocation29_spill] sm:$0xff] %v14473_v41  ;;  %19711 = vst [vmem:[#allocation30_spill] sm:$0xff] %v14476_v42  ;;  %229 = vmatprep.subr.mxu1 %v14516_v55  ;;  %v14571_v14 = vsub.f32 %v14398_v21, %v14412_v24  ;;  %v14574_v15 = vand.u32 4294901760, %v14526_v58  ;;  %127 = vmatpush1.msra.mxu0 %v14443_v32  ;;  %v14586_v44 = vand.u32 4294901760, %v14552_v2  ;;  %v14593_v45 = vand.u32 4294901760, %v14543_v63  ;;  %v14713_v41 = vld [vmem:[%s18932_s2 + $0x40] sm:$0xff] }
  0x17   :  { %19712 = vst [vmem:[#allocation31_spill] sm:$0xff] %v14479_v43  ;;  %19713 = vst [vmem:[#allocation32_spill] sm:$0xff] %v14487_v46  ;;  %235 = vmatpush1.msra.mxu1 %v14530_v59  ;;  %v14583_v40 = vand.u32 4294901760, %v251_v1  ;;  %v14590_v21 = vsub.f32 %v14403_v22, %v14418_v26  ;;  %129 = vmatprep.subr.mxu0 %v14449_v34  ;;  %v257_v50 = vsub.f32 %v14535_v61, %v14567_v9  ;;  %v14612_v1 = vld [vmem:[%s18932_s2 + $0x88] sm:$0xff] }
  0x18   :  { %19714 = vst [vmem:[#allocation33_spill] sm:$0xff] %v14490_v47  ;;  %19715 = vst [vmem:[#allocation34_spill] sm:$0xff] %v14498_v49  ;;  %241 = vmatprep.subr.mxu1 %v14547_v0  ;;  %v14600_v56 = vand.u32 4294901760, %v14571_v14  ;;  %v14604_v60 = vsub.f32 %v14408_v23, %v14443_v32  ;;  %v14607_v22 = vand.u32 4294901760, %v14560_v7  ;;  %131 = vmatpush1.msra.mxu0 %v14462_v38  ;;  %v14696_v46 = vld [vmem:[%s18932_s2 + $0x48] sm:$0xff] }
  0x19   :  { %19716 = vst [vmem:[#allocation35_spill] sm:$0xff] %v14503_v51  ;;  %19717 = vst [vmem:[#allocation36_spill] sm:$0xff] %v14506_v52  ;;  %247 = vmatpush1.msra.mxu1 %v14564_v8  ;;  %v263_v10 = vsub.f32 %v14552_v2, %v14586_v44  ;;  %v14623_v23 = vsub.f32 %v14426_v28, %v14449_v34  ;;  %133 = vmatprep.subr.mxu0 %v14479_v43  ;;  %v14644_v28 = vld [vmem:[%s18932_s2 + $0x80] sm:$0xff]  ;;  %v14732_v35 = vld [vmem:[%s18932_s2 + $0x28] sm:$0xff]  ;;  %v14745_v31 = vand.u32 4294901760, %v14696_v46 }
  0x1a   :  { %19718 = vst [vmem:[#allocation37_spill] sm:$0xff] %v14514_v54  ;;  %19719 = vst [vmem:[#allocation38_spill] sm:$0xff] %v14516_v55  ;;  %253 = vmatprep.subr.mxu1 %v14583_v40  ;;  %v14630_v55 = vand.u32 4294901760, %v257_v50  ;;  %v14635_v54 = vand.u32 4294901760, %v14604_v60  ;;  %v14639_v49 = vsub.f32 %v14431_v29, %v14462_v38  ;;  %135 = vmatpush1.msra.mxu0 %v14506_v52  ;;  %v14660_v29 = vld [vmem:[%s18932_s2 + $0x68] sm:$0xff]  ;;  %v14678_v51 = vld [vmem:[%s18932_s2 + $0x60] sm:$0xff] }
  0x1b   :  { %19720 = vst [vmem:[#allocation39_spill] sm:$0xff] %v14521_v57  ;;  %19721 = vst [vmem:[#allocation40_spill] sm:$0xff] %v14530_v59  ;;  %v14626_v59 = vand.u32 4294901760, %v14579_v16  ;;  %137 = vmatprep.subr.mxu0 %v14538_v62  ;;  %v14673_v57 = vsub.f32 %v14436_v30, %v14479_v43  ;;  %v14691_v30 = vsub.f32 %v14467_v39, %v14506_v52  ;;  %v14708_v39 = vand.u32 4294901760, %v14660_v29 }
  0x1c   :  { %19722 = vst [vmem:[#allocation41_spill] sm:$0xff] %v14535_v61  ;;  %19723 = vst [vmem:[#allocation42_spill] sm:$0xff] %v14538_v62  ;;  %259 = vmatpush1.msra.mxu1 %v14630_v55  ;;  %139 = vmatpush1.msra.mxu0 %v14555_v3  ;;  %v14727_v36 = vand.u32 4294901760, %v14678_v51 }
  0x1d   :  { %19724 = vst [vmem:[#allocation43_spill] sm:$0xff] %v14547_v0  ;;  %19725 = vst [vmem:[#allocation44_spill] sm:$0xff] %v14552_v2  ;;  %v14619_v0 = vand.u32 4294901760, %v14590_v21  ;;  %141 = vmatprep.subr.mxu0 %v14574_v15 }
  0x1e   :  { %19726 = vst [vmem:[#allocation45_spill] sm:$0xff] %v14555_v3  ;;  %19727 = vst [vmem:[#allocation46_spill] sm:$0xff] %v14564_v8  ;;  %v269_v8 = vsub.f32 %v14571_v14, %v14600_v56  ;;  %143 = vmatpush1.msra.mxu0 %v14593_v45 }
  0x1f   :  { %19728 = vst [vmem:[#allocation47_spill] sm:$0xff] %v14567_v9  ;;  %19729 = vst [vmem:[#allocation48_spill] sm:$0xff] %v14571_v14  ;;  %v275_v50 = vsub.f32 %v14590_v21, %v14619_v0  ;;  %v14669_v9 = vand.u32 4294901760, %v14639_v49  ;;  %145 = vmatprep.subr.mxu0 %v14607_v22 }
  0x20   :  { %19730 = vst [vmem:[#allocation49_spill] sm:$0xff] %v14574_v15  ;;  %19731 = vst [vmem:[#allocation50_spill] sm:$0xff] %v14583_v40  ;;  %v14647_v40 = vand.u32 4294901760, %v263_v10  ;;  %v14664_v10 = vand.u32 4294901760, %v269_v8  ;;  %147 = vmatpush1.msra.mxu0 %v14626_v59 }
  0x21   :  { %19732 = vst [vmem:[#allocation51_spill] sm:$0xff] %v14586_v44  ;;  %19733 = vst [vmem:[#allocation52_spill] sm:$0xff] %v14590_v21  ;;  %v14655_v44 = vand.u32 4294901760, %v14612_v1  ;;  %v14682_v8 = vand.u32 4294901760, %v275_v50 }
  0x22   :  { %19734 = vst [vmem:[#allocation53_spill] sm:$0xff] %v14593_v45  ;;  %19735 = vst [vmem:[#allocation54_spill] sm:$0xff] %v14600_v56  ;;  %v14652_v56 = vand.u32 4294901760, %v14623_v23  ;;  %265 = vmatprep.subr.mxu1 %v14647_v40 }
  0x23   :  { %19736 = vst [vmem:[#allocation55_spill] sm:$0xff] %v14604_v60  ;;  %19737 = vst [vmem:[#allocation56_spill] sm:$0xff] %v14607_v22  ;;  %271 = vmatpush1.msra.mxu1 %v14664_v10  ;;  %149 = vmatprep.subr.mxu0 %v14655_v44  ;;  %v14838_v38 = vsub.f32 %v14612_v1, %v14655_v44 }
  0x24   :  { %19738 = vst [vmem:[#allocation57_spill] sm:$0xff] %v14619_v0  ;;  %19739 = vst [vmem:[#allocation58_spill] sm:$0xff] %v14623_v23  ;;  %v281_v0 = vsub.f32 %v14604_v60, %v14635_v54  ;;  %277 = vmatprep.subr.mxu1 %v14682_v8 }
  0x25   :  { %19740 = vst [vmem:[#allocation59_spill] sm:$0xff] %v14626_v59  ;;  %19741 = vst [vmem:[#allocation60_spill] sm:$0xff] %v14630_v55  ;;  %v287_v55 = vsub.f32 %v14623_v23, %v14652_v56 }
  0x26   :  { %19742 = vst [vmem:[#allocation61_spill] sm:$0xff] %v14635_v54  ;;  %19743 = vst [vmem:[#allocation62_spill] sm:$0xff] %v14639_v49  ;;  %v14687_v54 = vand.u32 4294901760, %v14644_v28  ;;  %v14700_v50 = vand.u32 4294901760, %v281_v0 }
  0x27   :  { %19744 = vst [vmem:[#allocation63_spill] sm:$0xff] %v14647_v40  ;;  %19745 = vst [vmem:[#allocation64_spill] sm:$0xff] %v14652_v56  ;;  %v293_v40 = vsub.f32 %v14639_v49, %v14669_v9  ;;  %v14705_v56 = vand.u32 4294901760, %v14673_v57  ;;  %v14717_v0 = vand.u32 4294901760, %v287_v55 }
  0x28   :  { %19746 = vst [vmem:[#allocation65_spill] sm:$0xff] %v14655_v44  ;;  %19747 = vst [vmem:[#allocation66_spill] sm:$0xff] %v14664_v10  ;;  %v14720_v10 = vand.u32 4294901760, %v14691_v30  ;;  %283 = vmatpush1.msra.mxu1 %v14700_v50  ;;  %151 = vmatpush1.msra.mxu0 %v14687_v54 }
  0x29   :  { %19748 = vst [vmem:[#allocation67_spill] sm:$0xff] %v14669_v9  ;;  %19749 = vst [vmem:[#allocation68_spill] sm:$0xff] %v14673_v57  ;;  %v14724_v9 = vsub.f32 %v14495_v48, %v14538_v62  ;;  %v14736_v55 = vand.u32 4294901760, %v293_v40  ;;  %v14742_v48 = vsub.f32 %v14511_v53, %v14555_v3  ;;  %289 = vmatprep.subr.mxu1 %v14717_v0  ;;  %v14759_v53 = vand.u32 4294901760, %v14713_v41  ;;  %v14764_v3 = vld [vmem:[%s18932_s2 + $0x20] sm:$0xff]  ;;  %v14783_v62 = vld [vmem:[%s18932_s2 + $0x8] sm:$0xff] }
  0x2a   :  { %19750 = vst [vmem:[#allocation69_spill] sm:$0xff] %v14682_v8  ;;  %19751 = vst [vmem:[#allocation70_spill] sm:$0xff] %v14687_v54  ;;  %v299_v8 = vsub.f32 %v14673_v57, %v14705_v56  ;;  %153 = vmatprep.subr.mxu0 %v14708_v39  ;;  %v14805_v43 = vand.u32 4294901760, %v14764_v3 }
  0x2b   :  { %19752 = vst [vmem:[#allocation71_spill] sm:$0xff] %v14691_v30  ;;  %19753 = vst [vmem:[#allocation72_spill] sm:$0xff] %v14700_v50  ;;  %v305_v50 = vsub.f32 %v14691_v30, %v14720_v10  ;;  %v14752_v40 = vand.u32 4294901760, %v14724_v9  ;;  %295 = vmatpush1.msra.mxu1 %v14736_v55  ;;  %155 = vmatpush1.msra.mxu0 %v14727_v36 }
  0x2c   :  { %19754 = vst [vmem:[#allocation73_spill] sm:$0xff] %v14705_v56  ;;  %19755 = vst [vmem:[#allocation74_spill] sm:$0xff] %v14708_v39  ;;  %v14756_v56 = vsub.f32 %v14526_v58, %v14574_v15  ;;  %v14775_v58 = vsub.f32 %v14543_v63, %v14593_v45  ;;  %v14778_v15 = vand.u32 4294901760, %v14732_v35  ;;  %v14795_v63 = vsub.f32 %v14560_v7, %v14607_v22  ;;  %v14814_v7 = vld [vmem:[%s18932_s2] sm:$0xff] }
  0x2d   :  { %19756 = vst [vmem:[#allocation75_spill] sm:$0xff] %v14717_v0  ;;  %19757 = vst [vmem:[#allocation76_spill] sm:$0xff] %v14720_v10  ;;  %v14768_v0 = vand.u32 4294901760, %v299_v8  ;;  %v14771_v10 = vand.u32 4294901760, %v14742_v48  ;;  %v311_v8 = vsub.f32 %v14724_v9, %v14752_v40  ;;  %157 = vmatprep.subr.mxu0 %v14745_v31  ;;  %v14847_v32 = vand.u32 4294901760, %v14814_v7 }
  0x2e   :  { %19758 = vst [vmem:[#allocation77_spill] sm:$0xff] %v14724_v9  ;;  %19759 = vst [vmem:[#allocation78_spill] sm:$0xff] %v14727_v36  ;;  %v14791_v52 = vand.u32 4294901760, %v14756_v56  ;;  %v14823_v22 = vand.u32 4294901760, %v14795_v63  ;;  %159 = vmatpush1.msra.mxu0 %v14759_v53 }
  0x2f   :  { %19760 = vst [vmem:[#allocation79_spill] sm:$0xff] %v14736_v55  ;;  %19761 = vst [vmem:[#allocation80_spill] sm:$0xff] %v14742_v48  ;;  %v14786_v55 = vand.u32 4294901760, %v305_v50  ;;  %301 = vmatprep.subr.mxu1 %v14768_v0  ;;  %v317_v45 = vsub.f32 %v14742_v48, %v14771_v10  ;;  %v14802_v50 = vand.u32 4294901760, %v14775_v58  ;;  %161 = vmatprep.subr.mxu0 %v14778_v15 }
  0x30   :  { %19762 = vst [vmem:[#allocation81_spill] sm:$0xff] %v14745_v31  ;;  %19763 = vst [vmem:[#allocation82_spill] sm:$0xff] %v14752_v40  ;;  %v14809_v40 = vsub.f32 %v14579_v16, %v14626_v59  ;;  %v14826_v16 = vand.u32 4294901760, %v14783_v62  ;;  %163 = vmatpush1.msra.mxu0 %v14805_v43 }
  0x31   :  { %19764 = vst [vmem:[#allocation83_spill] sm:$0xff] %v14756_v56  ;;  %19765 = vst [vmem:[#allocation84_spill] sm:$0xff] %v14759_v53  ;;  %307 = vmatpush1.msra.mxu1 %v14786_v55  ;;  %v14828_v59 = vand.u32 4294901760, %v317_v45  ;;  %v335_v45 = vsub.f32 %v14795_v63, %v14823_v22 }
  0x32   :  { %19766 = vst [vmem:[#allocation85_spill] sm:$0xff] %v14768_v0  ;;  %19767 = vst [vmem:[#allocation86_spill] sm:$0xff] %v14771_v10  ;;  %v14817_v0 = vand.u32 4294901760, %v311_v8  ;;  %v323_v10 = vsub.f32 %v14756_v56, %v14791_v52  ;;  %v14834_v8 = vand.u32 4294901760, %v14809_v40  ;;  %165 = vmatprep.subr.mxu0 %v14826_v16 }
  0x33   :  { %19768 = vst [vmem:[#allocation87_spill] sm:$0xff] %v14775_v58  ;;  %19769 = vst [vmem:[#allocation88_spill] sm:$0xff] %v14778_v15  ;;  %167 = vmatpush1.msra.mxu0 %v14847_v32 }
  0x34   :  { %19770 = vst [vmem:[#allocation89_spill] sm:$0xff] %v14786_v55  ;;  %19771 = vst [vmem:[#allocation90_spill] sm:$0xff] %v14791_v52  ;;  %v329_v55 = vsub.f32 %v14775_v58, %v14802_v50  ;;  %v97_v52 = vld [vmem:[#allocation2] sm:$0xff]  ;;  %313 = vmatprep.subr.mxu1 %v14817_v0  ;;  %v14841_v34 = vand.u32 4294901760, %v323_v10  ;;  %v341_v10 = vsub.f32 %v14809_v40, %v14834_v8  ;;  %446 = vmatprep.subr.mxu0 %v14393_v20 }
  0x35   :  { %19772 = vst [vmem:[#allocation91_spill] sm:$0xff] %v14795_v63  ;;  %19773 = vst [vmem:[#allocation92_spill] sm:$0xff] %v14802_v50  ;;  %v14851_v50 = vsub.f32 %v14644_v28, %v14687_v54  ;;  %319 = vmatpush1.msra.mxu1 %v14828_v59  ;;  %v14867_v28 = vand.u32 4294901760, %v335_v45 }
  0x36   :  { %19774 = vst [vmem:[#allocation93_spill] sm:$0xff] %v14805_v43  ;;  %19775 = vst [vmem:[#allocation94_spill] sm:$0xff] %v14809_v40  ;;  %v14854_v1 = vand.u32 4294901760, %v329_v55  ;;  %325 = vmatprep.subr.mxu1 %v14841_v34  ;;  %v14880_v54 = vand.u32 4294901760, %v341_v10 }
  0x37   :  { %19776 = vst [vmem:[#allocation95_spill] sm:$0xff] %v14817_v0  ;;  %19777 = vst [vmem:[#allocation96_spill] sm:$0xff] %v14823_v22  ;;  %v14860_v0 = vand.u32 4294901760, %v14838_v38  ;;  %v14864_v22 = vsub.f32 %v14660_v29, %v14708_v39  ;;  %v14871_v55 = vand.u32 4294901760, %v14851_v50 }
  0x38   :  { %19778 = vst [vmem:[#allocation97_spill] sm:$0xff] %v14826_v16  ;;  %19779 = vst [vmem:[#allocation98_spill] sm:$0xff] %v14828_v59  ;;  %v14873_v59 = vand.u32 4294901760, %v97_v52  ;;  %331 = vmatpush1.msra.mxu1 %v14854_v1 }
  0x39   :  { %19780 = vst [vmem:[#allocation99_spill] sm:$0xff] %v14834_v8  ;;  %19781 = vst [vmem:[#allocation100_spill] sm:$0xff] %v14838_v38  ;;  %v14877_v8 = vsub.f32 %v14678_v51, %v14727_v36  ;;  %v347_v29 = vsub.f32 %v14838_v38, %v14860_v0  ;;  %v14886_v45 = vand.u32 4294901760, %v14864_v22  ;;  %337 = vmatprep.subr.mxu1 %v14867_v28 }
  0x3a   :  { %19782 = vst [vmem:[#allocation101_spill] sm:$0xff] %v14841_v34  ;;  %19783 = vst [vmem:[#allocation102_spill] sm:$0xff] %v14847_v32  ;;  %v14890_v34 = vsub.f32 %v14696_v46, %v14745_v31  ;;  %v353_v51 = vsub.f32 %v14851_v50, %v14871_v55  ;;  %v14897_v10 = vsub.f32 %v97_v52, %v14873_v59  ;;  %343 = vmatpush1.msra.mxu1 %v14880_v54 }
  0x3b   :  { %19784 = vst [vmem:[#allocation103_spill] sm:$0xff] %v14851_v50  ;;  %19785 = vst [vmem:[#allocation104_spill] sm:$0xff] %v14854_v1  ;;  %v14900_v1 = vand.u32 4294901760, %v14877_v8  ;;  %v14907_v46 = vand.u32 4294901760, %v347_v29  ;;  %v14917_v52 = vsub.f32 %v14732_v35, %v14778_v15 }
  0x3c   :  { %19786 = vst [vmem:[#allocation105_spill] sm:$0xff] %v14860_v0  ;;  %19787 = vst [vmem:[#allocation106_spill] sm:$0xff] %v14864_v22  ;;  %v14904_v0 = vsub.f32 %v14713_v41, %v14759_v53  ;;  %v14919_v31 = vand.u32 4294901760, %v353_v51  ;;  %v14922_v41 = vand.u32 4294901760, %v14897_v10  ;;  %v14939_v51 = vsub.f32 %v14764_v3, %v14805_v43 }
  0x3d   :  { %19788 = vst [vmem:[#allocation107_spill] sm:$0xff] %v14867_v28  ;;  %19789 = vst [vmem:[#allocation108_spill] sm:$0xff] %v14871_v55  ;;  %v359_v28 = vsub.f32 %v14864_v22, %v14886_v45  ;;  %v14913_v55 = vand.u32 4294901760, %v14890_v34  ;;  %v365_v29 = vsub.f32 %v14877_v8, %v14900_v1  ;;  %349 = vmatprep.subr.mxu1 %v14907_v46  ;;  %v14935_v35 = vand.u32 4294901760, %v14917_v52 }
  0x3e   :  { %19790 = vst [vmem:[#allocation109_spill] sm:$0xff] %v14877_v8  ;;  %19791 = vst [vmem:[#allocation110_spill] sm:$0xff] %v14880_v54  ;;  %v14927_v54 = vand.u32 4294901760, %v14904_v0  ;;  %355 = vmatpush1.msra.mxu1 %v14919_v31 }
  0x3f   :  { %19792 = vst [vmem:[#allocation111_spill] sm:$0xff] %v14886_v45  ;;  %19793 = vst [vmem:[#allocation112_spill] sm:$0xff] %v14890_v34  ;;  %v14930_v20 = vand.u32 4294901760, %v359_v28  ;;  %v371_v45 = vsub.f32 %v14890_v34, %v14913_v55  ;;  %v14944_v15 = vand.u32 4294901760, %v365_v29  ;;  %v383_v3 = vsub.f32 %v14917_v52, %v14935_v35 }
  0x40   :  { %19794 = vst [vmem:[#allocation113_spill] sm:$0xff] %v14897_v10  ;;  %19795 = vst [vmem:[#allocation114_spill] sm:$0xff] %v14900_v1  ;;  %v204_v1 = vsub.f32 %v14897_v10, %v14922_v41  ;;  %v377_v28 = vsub.f32 %v14904_v0, %v14927_v54  ;;  %v14962_v29 = vsub.f32 %v14814_v7, %v14847_v32 }
  0x41   :  { %19796 = vst [vmem:[#allocation115_spill] sm:$0xff] %v14904_v0  ;;  %19797 = vst [vmem:[#allocation116_spill] sm:$0xff] %v14907_v46  ;;  %v14950_v46 = vsub.f32 %v14783_v62, %v14826_v16  ;;  %361 = vmatprep.subr.mxu1 %v14930_v20 }
  0x42   :  { %19798 = vst [vmem:[#allocation117_spill] sm:$0xff] %v14913_v55  ;;  %19799 = vst [vmem:[#allocation118_spill] sm:$0xff] %v14917_v52  ;;  %v14953_v55 = vand.u32 4294901760, %v371_v45  ;;  %367 = vmatpush1.msra.mxu1 %v14944_v15  ;;  %v14967_v62 = vand.u32 4294901760, %v377_v28  ;;  %v14973_v45 = vand.u32 4294901760, %v383_v3 }
  0x43   :  { %19800 = vst [vmem:[#allocation119_spill] sm:$0xff] %v14919_v31  ;;  %19801 = vst [vmem:[#allocation120_spill] sm:$0xff] %v14922_v41  ;;  %v14958_v31 = vand.u32 4294901760, %v14939_v51  ;;  %v14964_v41 = vand.u32 4294901760, %v204_v1 }
  0x44   :  { %19802 = vst [vmem:[#allocation121_spill] sm:$0xff] %v14927_v54  ;;  %19803 = vst [vmem:[#allocation122_spill] sm:$0xff] %v14930_v20  ;;  %v14970_v20 = vand.u32 4294901760, %v14950_v46  ;;  %373 = vmatprep.subr.mxu1 %v14953_v55  ;;  %v14978_v54 = vand.u32 4294901760, %v14962_v29 }
  0x45   :  { %19804 = vst [vmem:[#allocation123_spill] sm:$0xff] %v14935_v35  ;;  %19805 = vst [vmem:[#allocation124_spill] sm:$0xff] %v14939_v51  ;;  %v389_v35 = vsub.f32 %v14939_v51, %v14958_v31  ;;  %206 = vmatmul.mubr.f32.vlgmr.msra.gmra.mxu0 %v14964_v41  ;;  %379 = vmatpush1.msra.mxu1 %v14967_v62 }
  0x46   :  { %19806 = vst [vmem:[#allocation125_spill] sm:$0xff] %v14944_v15  ;;  %19807 = vst [vmem:[#allocation126_spill] sm:$0xff] %v14950_v46  ;;  %v395_v7 = vsub.f32 %v14950_v46, %v14970_v20  ;;  %449 = vmatpush1.msra.mxu0 %v14415_v25  ;;  %385 = vmatprep.subr.mxu1 %v14973_v45  ;;  %v401_v28 = vsub.f32 %v14962_v29, %v14978_v54  ;;  %v19862_v25 = vld [vmem:[#allocation111_spill] sm:$0xff]  ;;  %v71_v15 = vld [vmem:[%s18932_s2 + $0x150] sm:$0xff] }
  0x47   :  { %19808 = vst [vmem:[#allocation127_spill] sm:$0xff] %v14953_v55  ;;  %19809 = vst [vmem:[#allocation128_spill] sm:$0xff] %v14958_v31  ;;  %v14986_v1 = vand.u32 4294901760, %v389_v35  ;;  %452 = vmatprep.subr.mxu0 %v14421_v27  ;;  %v19817_v55 = vmov 0.0   ;;  %v19819_v35 = vld [vmem:[#allocation22_spill] sm:$0xff] }
  0x48   :  { %19810 = vst [vmem:[#allocation129_spill] sm:$0xff] %v14962_v29  ;;  %19811 = vst [vmem:[#allocation130_spill] sm:$0xff] %v14967_v62  ;;  %v14991_v3 = vand.u32 4294901760, %v395_v7  ;;  %572 = vmatprep.mubr.f32.mxu0 %v19817_v55  ;;  %455 = vmatpush1.msra.mxu0 %v14446_v33  ;;  %v14996_v62 = vand.u32 4294901760, %v401_v28  ;;  %v19820_v7 = vld [vmem:[#allocation24_spill] sm:$0xff]  ;;  %v79_v33 = vld [vmem:[%s18932_s2 + $0x190] sm:$0xff] }
  0x49   :  { %19812 = vst [vmem:[#allocation131_spill] sm:$0xff] %v14970_v20  ;;  %19813 = vst [vmem:[#allocation132_spill] sm:$0xff] %v14973_v45  ;;  %391 = vmatpush1.msra.mxu1 %v14986_v1  ;;  %458 = vmatprep.subr.mxu0 %v14459_v37  ;;  %v19821_v28 = vld [vmem:[#allocation28_spill] sm:$0xff]  ;;  %v19868_v45 = vld [vmem:[#allocation117_spill] sm:$0xff] }
  0x4a   :  { %19814 = vst [vmem:[#allocation133_spill] sm:$0xff] %v14978_v54  ;;  %19815 = vst [vmem:[#allocation134_spill] sm:$0xff] %v14986_v1  ;;  %397 = vmatprep.subr.mxu1 %v14991_v3  ;;  %461 = vmatpush1.msra.mxu0 %v14476_v42  ;;  %v19857_v42 = vld [vmem:[#allocation105_spill] sm:$0xff] }
  0x4b   :  { %19816 = vst [vmem:[#allocation135_spill] sm:$0xff] %v14991_v3  ;;  %19818 = vst [vmem:[#allocation136_spill] sm:$0xff] %v14996_v62  ;;  %403 = vmatpush1.msra.mxu1 %v14996_v62  ;;  %464 = vmatprep.subr.mxu0 %v14490_v47  ;;  %v80_v47 = vld [vmem:[%s18932_s2 + $0x198] sm:$0xff]  ;;  %v19865_v3 = vld [vmem:[#allocation114_spill] sm:$0xff] }
  0x4c   :  { %438 = vmatmul.mubr.f32.vlgmr.msra.gmra.mxu1 %v14873_v59  ;;  %467 = vmatpush1.msra.mxu0 %v14535_v61 }
  0x4d   :  { %582 = vmatprep.subr.mxu1 %v14353_v4  ;;  %470 = vmatprep.subr.mxu0 %v14552_v2  ;;  %v19855_v2 = vld [vmem:[#allocation99_spill] sm:$0xff] }
  0x4e   :  { %584 = vmatpush1.msra.mxu1 %v14355_v5  ;;  %473 = vmatpush1.msra.mxu0 %v14571_v14 }
  0x4f   :  { %586 = vmatprep.subr.mxu1 %v14357_v6  ;;  %476 = vmatprep.subr.mxu0 %v14590_v21  ;;  %v19854_v21 = vld [vmem:[#allocation96_spill] sm:$0xff] }
  0x50   :  { %588 = vmatpush1.msra.mxu1 %v14370_v11  ;;  %479 = vmatpush1.msra.mxu0 %v14604_v60 }
  0x51   :  { %590 = vmatprep.subr.mxu1 %v14372_v12  ;;  %482 = vmatprep.subr.mxu0 %v14623_v23  ;;  %v19853_v23 = vld [vmem:[#allocation92_spill] sm:$0xff] }
  0x52   :  { %592 = vmatpush1.msra.mxu1 %v14374_v13  ;;  %485 = vmatpush1.msra.mxu0 %v14639_v49 }
  0x53   :  { %594 = vmatprep.subr.mxu1 %v14386_v17  ;;  %488 = vmatprep.subr.mxu0 %v14673_v57  ;;  %v19846_v57 = vld [vmem:[#allocation64_spill] sm:$0xff] }
  0x54   :  { %596 = vmatpush1.msra.mxu1 %v14388_v18  ;;  %491 = vmatpush1.msra.mxu0 %v14691_v30  ;;  %v19838_v30 = vld [vmem:[#allocation35_spill] sm:$0xff] }
  0x55   :  { %598 = vmatprep.subr.mxu1 %v14390_v19  ;;  %494 = vmatprep.subr.mxu0 %v14724_v9  ;;  %v19822_v9 = vld [vmem:[#allocation31_spill] sm:$0xff] }
  0x56   :  { %600 = vmatpush1.msra.mxu1 %v14412_v24  ;;  %497 = vmatpush1.msra.mxu0 %v14742_v48  ;;  %v19823_v48 = vld [vmem:[#allocation36_spill] sm:$0xff] }
  0x57   :  { %602 = vmatprep.subr.mxu1 %v14418_v26  ;;  %500 = vmatprep.subr.mxu0 %v14756_v56  ;;  %v19824_v56 = vld [vmem:[#allocation42_spill] sm:$0xff] }
  0x58   :  { %604 = vmatpush1.msra.mxu1 %v19819_v35  ;;  %503 = vmatpush1.msra.mxu0 %v14775_v58  ;;  %v19825_v58 = vld [vmem:[#allocation45_spill] sm:$0xff] }
  0x59   :  { %606 = vmatprep.subr.mxu1 %v19820_v7  ;;  %506 = vmatprep.subr.mxu0 %v14795_v63  ;;  %v19826_v63 = vld [vmem:[#allocation49_spill] sm:$0xff] }
  0x5a   :  { %608 = vmatpush1.msra.mxu1 %v19821_v28  ;;  %509 = vmatpush1.msra.mxu0 %v14809_v40  ;;  %v19827_v40 = vld [vmem:[#allocation53_spill] sm:$0xff] }
  0x5b   :  { %610 = vmatprep.subr.mxu1 %v19822_v9  ;;  %512 = vmatprep.subr.mxu0 %v14838_v38  ;;  %v19828_v38 = vld [vmem:[#allocation56_spill] sm:$0xff] }
  0x5c   :  { %612 = vmatpush1.msra.mxu1 %v19823_v48  ;;  %515 = vmatpush1.msra.mxu0 %v14851_v50  ;;  %v19829_v50 = vld [vmem:[#allocation59_spill] sm:$0xff] }
  0x5d   :  { %614 = vmatprep.subr.mxu1 %v19824_v56  ;;  %518 = vmatprep.subr.mxu0 %v14864_v22  ;;  %v19836_v22 = vld [vmem:[#allocation88_spill] sm:$0xff] }
  0x5e   :  { %616 = vmatpush1.msra.mxu1 %v19825_v58  ;;  %521 = vmatpush1.msra.mxu0 %v14877_v8  ;;  %v19830_v8 = vld [vmem:[#allocation70_spill] sm:$0xff] }
  0x5f   :  { %618 = vmatprep.subr.mxu1 %v19826_v63  ;;  %524 = vmatprep.subr.mxu0 %v14890_v34  ;;  %v19833_v34 = vld [vmem:[#allocation81_spill] sm:$0xff] }
  0x60   :  { %620 = vmatpush1.msra.mxu1 %v19827_v40  ;;  %527 = vmatpush1.msra.mxu0 %v14904_v0  ;;  %v19831_v0 = vld [vmem:[#allocation21_spill] sm:$0xff] }
  0x61   :  { %622 = vmatprep.subr.mxu1 %v19828_v38  ;;  %530 = vmatprep.subr.mxu0 %v14917_v52  ;;  %v19832_v52 = vld [vmem:[#allocation25_spill] sm:$0xff] }
  0x62   :  { %624 = vmatpush1.msra.mxu1 %v19829_v50  ;;  %533 = vmatpush1.msra.mxu0 %v14939_v51  ;;  %v19834_v51 = vld [vmem:[#allocation26_spill] sm:$0xff] }
  0x63   :  { %626 = vmatprep.subr.mxu1 %v14655_v44  ;;  %536 = vmatprep.subr.mxu0 %v14950_v46  ;;  %v19835_v46 = vld [vmem:[#allocation29_spill] sm:$0xff] }
  0x64   :  { %628 = vmatpush1.msra.mxu1 %v19830_v8  ;;  %539 = vmatpush1.msra.mxu0 %v14962_v29  ;;  %v19837_v29 = vld [vmem:[#allocation32_spill] sm:$0xff] }
  0x65   :  { %630 = vmatprep.subr.mxu1 %v14708_v39  ;;  %575 = vmatmul.mubr.f32.vlgmr.msra.gmra.mxu0 %v14897_v10 }
  0x66   :  { %690 = vmatprep.subr.mxu0 %v19831_v0  ;;  %632 = vmatpush1.msra.mxu1 %v14727_v36  ;;  %v19839_v0 = vld [vmem:[#allocation39_spill] sm:$0xff] }
  0x67   :  { %694 = vmatpush1.msra.mxu0 %v19832_v52  ;;  %634 = vmatprep.subr.mxu1 %v19833_v34  ;;  %v19841_v52 = vld [vmem:[#allocation120_spill] sm:$0xff] }
  0x68   :  { %698 = vmatprep.subr.mxu0 %v19834_v51  ;;  %636 = vmatpush1.msra.mxu1 %v14759_v53  ;;  %v19840_v51 = vld [vmem:[#allocation47_spill] sm:$0xff] }
  0x69   :  { %702 = vmatpush1.msra.mxu0 %v19835_v46  ;;  %638 = vmatprep.subr.mxu1 %v19836_v22  ;;  %v19842_v46 = vld [vmem:[#allocation51_spill] sm:$0xff] }
  0x6a   :  { %706 = vmatprep.subr.mxu0 %v19837_v29  ;;  %640 = vmatpush1.msra.mxu1 %v14805_v43  ;;  %v19843_v29 = vld [vmem:[#allocation54_spill] sm:$0xff] }
  0x6b   :  { %710 = vmatpush1.msra.mxu0 %v19838_v30  ;;  %642 = vmatprep.subr.mxu1 %v14826_v16  ;;  %v19844_v30 = vld [vmem:[#allocation57_spill] sm:$0xff] }
  0x6c   :  { %714 = vmatprep.subr.mxu0 %v19839_v0  ;;  %644 = vmatpush1.msra.mxu1 %v14847_v32  ;;  %v19845_v0 = vld [vmem:[#allocation61_spill] sm:$0xff] }
  0x6d   :  { %677 = vmatprep.mubr.f32.mxu1 %v19817_v55  ;;  %718 = vmatpush1.msra.mxu0 %v19840_v51  ;;  %v19847_v51 = vld [vmem:[#allocation67_spill] sm:$0xff] }
  0x6e   :  { %681 = vmatmul.mubr.f32.vlgmr.msra.gmra.mxu1 %v19841_v52  ;;  %722 = vmatprep.subr.mxu0 %v19842_v46  ;;  %v19848_v46 = vld [vmem:[#allocation73_spill] sm:$0xff]  ;;  %v56_v52 = vld [vmem:[%s18932_s2 + $0xd8] sm:$0xff] }
  0x6f   :  { %856 = vmatprep.subr.mxu1 %v14353_v4  ;;  %726 = vmatpush1.msra.mxu0 %v19843_v29  ;;  %v19849_v29 = vld [vmem:[#allocation76_spill] sm:$0xff] }
  0x70   :  { %858 = vmatpush1.msra.mxu1 %v14355_v5  ;;  %730 = vmatprep.subr.mxu0 %v19844_v30  ;;  %v19850_v30 = vld [vmem:[#allocation82_spill] sm:$0xff] }
  0x71   :  { %860 = vmatprep.subr.mxu1 %v14357_v6  ;;  %734 = vmatpush1.msra.mxu0 %v19845_v0  ;;  %v92_v0 = vld [vmem:[%s18932_s2 + $0x1f8] sm:$0xff] }
  0x72   :  { %862 = vmatpush1.msra.mxu1 %v14370_v11  ;;  %738 = vmatprep.subr.mxu0 %v19846_v57  ;;  %v19851_v57 = vld [vmem:[#allocation86_spill] sm:$0xff]  ;;  %v15103_v49 = vand.u32 4294901760, %v92_v0 }
  0x73   :  { %864 = vmatprep.subr.mxu1 %v14372_v12  ;;  %742 = vmatpush1.msra.mxu0 %v19847_v51  ;;  %v91_v51 = vld [vmem:[%s18932_s2 + $0x1f0] sm:$0xff] }
  0x74   :  { %866 = vmatpush1.msra.mxu1 %v14374_v13  ;;  %746 = vmatprep.subr.mxu0 %v19848_v46  ;;  %v19852_v46 = vld [vmem:[#allocation90_spill] sm:$0xff]  ;;  %v15113_v60 = vand.u32 4294901760, %v91_v51  ;;  %v15136_v37 = vsub.f32 %v92_v0, %v15103_v49  ;;  %v76_v0 = vld [vmem:[%s18932_s2 + $0x178] sm:$0xff] }
  0x75   :  { %868 = vmatprep.subr.mxu1 %v14386_v17  ;;  %750 = vmatpush1.msra.mxu0 %v19849_v29  ;;  %v88_v29 = vld [vmem:[%s18932_s2 + $0x1d8] sm:$0xff] }
  0x76   :  { %870 = vmatpush1.msra.mxu1 %v14388_v18  ;;  %754 = vmatprep.subr.mxu0 %v19850_v30  ;;  %v87_v30 = vld [vmem:[%s18932_s2 + $0x1d0] sm:$0xff]  ;;  %v15120_v14 = vand.u32 4294901760, %v88_v29  ;;  %19859 = vst [vmem:[#allocation139_spill] sm:$0xff] %v15136_v37  ;;  %v15144_v27 = vsub.f32 %v91_v51, %v15113_v60  ;;  %v72_v51 = vld [vmem:[%s18932_s2 + $0x158] sm:$0xff] }
  0x77   :  { %872 = vmatprep.subr.mxu1 %v14390_v19  ;;  %758 = vmatpush1.msra.mxu0 %v19851_v57  ;;  %v84_v57 = vld [vmem:[%s18932_s2 + $0x1b8] sm:$0xff]  ;;  %v15124_v61 = vand.u32 4294901760, %v87_v30 }
  0x78   :  { %874 = vmatpush1.msra.mxu1 %v14412_v24  ;;  %762 = vmatprep.subr.mxu0 %v19852_v46  ;;  %v83_v46 = vld [vmem:[%s18932_s2 + $0x1b0] sm:$0xff]  ;;  %19861 = vst [vmem:[#allocation140_spill] sm:$0xff] %v15144_v27  ;;  %v15157_v62 = vsub.f32 %v88_v29, %v15120_v14  ;;  %v15172_v29 = vand.u32 4294901760, %v79_v33  ;;  %v60_v17 = vld [vmem:[%s18932_s2 + $0xf8] sm:$0xff] }
  0x79   :  { %876 = vmatprep.subr.mxu1 %v14418_v26  ;;  %766 = vmatpush1.msra.mxu0 %v19853_v23  ;;  %v15126_v23 = vand.u32 4294901760, %v84_v57  ;;  %v15302_v5 = vand.u32 4294901760, %v60_v17 }
  0x7a   :  { %878 = vmatpush1.msra.mxu1 %v19819_v35  ;;  %770 = vmatprep.subr.mxu0 %v19854_v21  ;;  %v15133_v21 = vand.u32 4294901760, %v83_v46  ;;  %19864 = vst [vmem:[#allocation142_spill] sm:$0xff] %v15157_v62  ;;  %19869 = vst [vmem:[#allocation145_spill] sm:$0xff] %v15172_v29  ;;  %v15231_v35 = vsub.f32 %v79_v33, %v15172_v29 }
  0x7b   :  { %880 = vmatprep.subr.mxu1 %v19820_v7  ;;  %774 = vmatpush1.msra.mxu0 %v19855_v2  ;;  %19856 = vst [vmem:[#allocation137_spill] sm:$0xff] %v15126_v23  ;;  %v19860_v2 = vld [vmem:[#allocation108_spill] sm:$0xff]  ;;  %v15168_v1 = vsub.f32 %v84_v57, %v15126_v23  ;;  %v15185_v57 = vand.u32 4294901760, %v76_v0  ;;  %v64_v7 = vld [vmem:[%s18932_s2 + $0x118] sm:$0xff]  ;;  %19901 = vst [vmem:[#allocation175_spill] sm:$0xff] %v15302_v5 }
  0x7c   :  { %882 = vmatpush1.msra.mxu1 %v19821_v28  ;;  %778 = vmatprep.subr.mxu0 %v19857_v42  ;;  %19858 = vst [vmem:[#allocation138_spill] sm:$0xff] %v15133_v21  ;;  %v15148_v42 = vand.u32 4294901760, %v80_v47  ;;  %19885 = vst [vmem:[#allocation159_spill] sm:$0xff] %v15231_v35  ;;  %v15264_v18 = vand.u32 4294901760, %v64_v7  ;;  %v15279_v12 = vand.u32 4294901760, %v15231_v35 }
  0x7d   :  { %884 = vmatprep.subr.mxu1 %v19822_v9  ;;  %782 = vmatpush1.msra.mxu0 %v19860_v2  ;;  %v75_v2 = vld [vmem:[%s18932_s2 + $0x170] sm:$0xff]  ;;  %19867 = vst [vmem:[#allocation144_spill] sm:$0xff] %v15168_v1  ;;  %19873 = vst [vmem:[#allocation148_spill] sm:$0xff] %v15185_v57  ;;  %v15207_v9 = vand.u32 4294901760, %v71_v15 }
  0x7e   :  { %886 = vmatpush1.msra.mxu1 %v19823_v48  ;;  %786 = vmatprep.subr.mxu0 %v19862_v25  ;;  %19863 = vst [vmem:[#allocation141_spill] sm:$0xff] %v15148_v42  ;;  %v15165_v25 = vsub.f32 %v87_v30, %v15124_v61  ;;  %v19872_v30 = vld [vmem:[#allocation121_spill] sm:$0xff]  ;;  %v19876_v48 = vld [vmem:[#allocation123_spill] sm:$0xff]  ;;  %19891 = vst [vmem:[#allocation165_spill] sm:$0xff] %v15264_v18 }
  0x7f   :  { %888 = vmatprep.subr.mxu1 %v19824_v56  ;;  %790 = vmatpush1.msra.mxu0 %v19865_v3  ;;  %v15175_v3 = vand.u32 4294901760, %v15136_v37  ;;  %v68_v56 = vld [vmem:[%s18932_s2 + $0x138] sm:$0xff]  ;;  %19880 = vst [vmem:[#allocation154_spill] sm:$0xff] %v15207_v9  ;;  %v15270_v13 = vsub.f32 %v71_v15, %v15207_v9  ;;  %19894 = vst [vmem:[#allocation168_spill] sm:$0xff] %v15279_v12 }
  0x80   :  { %890 = vmatpush1.msra.mxu1 %v19825_v58  ;;  %19866 = vst [vmem:[#allocation143_spill] sm:$0xff] %v15165_v25  ;;  %794 = vmatprep.subr.mxu0 %v19868_v45  ;;  %v15181_v58 = vsub.f32 %v83_v46, %v15133_v21  ;;  %v15187_v45 = vand.u32 4294901760, %v75_v2  ;;  %v15197_v46 = vand.u32 4294901760, %v72_v51  ;;  %v15210_v28 = vand.u32 4294901760, %v15165_v25 }
  0x81   :  { %892 = vmatprep.subr.mxu1 %v19826_v63  ;;  %19870 = vst [vmem:[#allocation146_spill] sm:$0xff] %v15175_v3  ;;  %798 = vmatpush1.msra.mxu0 %v19872_v30  ;;  %v15190_v63 = vand.u32 4294901760, %v15144_v27  ;;  %v15200_v30 = vand.u32 4294901760, %v15157_v62  ;;  %19892 = vst [vmem:[#allocation166_spill] sm:$0xff] %v15270_v13 }
  0x82   :  { %19871 = vst [vmem:[#allocation147_spill] sm:$0xff] %v15181_v58  ;;  %894 = vmatpush1.msra.mxu1 %v19827_v40  ;;  %19874 = vst [vmem:[#allocation149_spill] sm:$0xff] %v15187_v45  ;;  %802 = vmatprep.subr.mxu0 %v19876_v48  ;;  %v15203_v40 = vsub.f32 %v80_v47, %v15148_v42  ;;  %v15213_v48 = vand.u32 4294901760, %v15168_v1  ;;  %v1070_v47 = vsub.f32 %v15136_v37, %v15175_v3 }
  0x83   :  { %19875 = vst [vmem:[#allocation150_spill] sm:$0xff] %v15190_v63  ;;  %896 = vmatprep.subr.mxu1 %v19828_v38  ;;  %19877 = vst [vmem:[#allocation151_spill] sm:$0xff] %v15197_v46  ;;  %806 = vmatpush1.msra.mxu0 %v14958_v31  ;;  %v67_v38 = vld [vmem:[%s18932_s2 + $0x130] sm:$0xff]  ;;  %v15222_v31 = vand.u32 4294901760, %v68_v56  ;;  %v15241_v26 = vsub.f32 %v75_v2, %v15187_v45  ;;  %v1082_v33 = vsub.f32 %v15157_v62, %v15200_v30 }
  0x84   :  { %19878 = vst [vmem:[#allocation152_spill] sm:$0xff] %v15200_v30  ;;  %19879 = vst [vmem:[#allocation153_spill] sm:$0xff] %v15203_v40  ;;  %898 = vmatpush1.msra.mxu1 %v19829_v50  ;;  %810 = vmatprep.subr.mxu0 %v14970_v20  ;;  %v15225_v50 = vand.u32 4294901760, %v15181_v58  ;;  %v1076_v20 = vsub.f32 %v15144_v27, %v15190_v63  ;;  %v15247_v24 = vand.u32 4294901760, %v67_v38  ;;  %v51_v30 = vld [vmem:[%s18932_s2 + $0xb0] sm:$0xff] }
  0x85   :  { %19881 = vst [vmem:[#allocation155_spill] sm:$0xff] %v15210_v28  ;;  %19882 = vst [vmem:[#allocation156_spill] sm:$0xff] %v15213_v48  ;;  %900 = vmatprep.subr.mxu1 %v14655_v44  ;;  %814 = vmatpush1.msra.mxu0 %v14978_v54  ;;  %v15238_v44 = vsub.f32 %v76_v0, %v15185_v57  ;;  %v15250_v54 = vand.u32 4294901760, %v15203_v40  ;;  %v63_v0 = vld [vmem:[%s18932_s2 + $0x110] sm:$0xff]  ;;  %v15256_v19 = vsub.f32 %v72_v51, %v15197_v46 }
  0x86   :  { %19883 = vst [vmem:[#allocation157_spill] sm:$0xff] %v15222_v31  ;;  %19884 = vst [vmem:[#allocation158_spill] sm:$0xff] %v15225_v50  ;;  %847 = vmatprep.mubr.f32.mxu0 %v19817_v55  ;;  %902 = vmatpush1.msra.mxu1 %v19830_v8  ;;  %v1088_v2 = vsub.f32 %v15165_v25, %v15210_v28  ;;  %v1094_v8 = vsub.f32 %v15168_v1, %v15213_v48  ;;  %v15274_v51 = vand.u32 4294901760, %v1070_v47  ;;  %v52_v48 = vld [vmem:[%s18932_s2 + $0xb8] sm:$0xff] }
  0x87   :  { %19886 = vst [vmem:[#allocation160_spill] sm:$0xff] %v15238_v44  ;;  %19887 = vst [vmem:[#allocation161_spill] sm:$0xff] %v15241_v26  ;;  %849 = vmatmul.mubr.f32.vlgmr.msra.gmra.mxu0 %v14873_v59  ;;  %904 = vmatprep.subr.mxu1 %v14708_v39  ;;  %v1100_v39 = vsub.f32 %v15181_v58, %v15225_v50  ;;  %v15282_v11 = vsub.f32 %v68_v56, %v15222_v31  ;;  %v15286_v15 = vand.u32 4294901760, %v1076_v20  ;;  %v59_v20 = vld [vmem:[%s18932_s2 + $0xf0] sm:$0xff] }
  0x88   :  { %19888 = vst [vmem:[#allocation162_spill] sm:$0xff] %v15247_v24  ;;  %19889 = vst [vmem:[#allocation163_spill] sm:$0xff] %v15250_v54  ;;  %960 = vmatprep.subr.mxu0 %v15103_v49  ;;  %906 = vmatpush1.msra.mxu1 %v14727_v36  ;;  %v15288_v36 = vand.u32 4294901760, %v63_v0  ;;  %v15291_v47 = vand.u32 4294901760, %v15238_v44  ;;  %v15294_v6 = vand.u32 4294901760, %v15241_v26  ;;  %v15298_v56 = vand.u32 4294901760, %v1082_v33 }
  0x89   :  { %19890 = vst [vmem:[#allocation164_spill] sm:$0xff] %v15256_v19  ;;  %962 = vmatpush1.msra.mxu0 %v15113_v60  ;;  %19893 = vst [vmem:[#allocation167_spill] sm:$0xff] %v15274_v51  ;;  %908 = vmatprep.subr.mxu1 %v19833_v34  ;;  %v1106_v34 = vsub.f32 %v15203_v40, %v15250_v54  ;;  %v15308_v4 = vand.u32 4294901760, %v15256_v19  ;;  %v15314_v33 = vand.u32 4294901760, %v1094_v8  ;;  %v15320_v54 = vand.u32 4294901760, %v15270_v13 }
  0x8a   :  { %19895 = vst [vmem:[#allocation169_spill] sm:$0xff] %v15282_v11  ;;  %964 = vmatprep.subr.mxu0 %v15120_v14  ;;  %19896 = vst [vmem:[#allocation170_spill] sm:$0xff] %v15286_v15  ;;  %910 = vmatpush1.msra.mxu1 %v14759_v53  ;;  %v15312_v53 = vand.u32 4294901760, %v1088_v2  ;;  %v15323_v50 = vsub.f32 %v67_v38, %v15247_v24  ;;  %v1112_v8 = vsub.f32 %v15231_v35, %v15279_v12  ;;  %v55_v2 = vld [vmem:[%s18932_s2 + $0xd0] sm:$0xff] }
  0x8b   :  { %19897 = vst [vmem:[#allocation171_spill] sm:$0xff] %v15288_v36  ;;  %19898 = vst [vmem:[#allocation172_spill] sm:$0xff] %v15291_v47  ;;  %966 = vmatpush1.msra.mxu0 %v15124_v61  ;;  %912 = vmatprep.subr.mxu1 %v19836_v22  ;;  %v15327_v22 = vand.u32 4294901760, %v1100_v39  ;;  %v15338_v38 = vand.u32 4294901760, %v15282_v11  ;;  %v1118_v39 = vsub.f32 %v15238_v44, %v15291_v47  ;;  %v15347_v12 = vand.u32 4294901760, %v59_v20 }
  0x8c   :  { %19899 = vst [vmem:[#allocation173_spill] sm:$0xff] %v15294_v6  ;;  %19900 = vst [vmem:[#allocation174_spill] sm:$0xff] %v15298_v56  ;;  %968 = vmatprep.subr.mxu0 %v15126_v23  ;;  %914 = vmatpush1.msra.mxu1 %v14805_v43  ;;  %v15341_v43 = vsub.f32 %v64_v7, %v15264_v18  ;;  %v1124_v28 = vsub.f32 %v15241_v26, %v15294_v6  ;;  %v15359_v7 = vand.u32 4294901760, %v1106_v34 }
  0x8d   :  { %19902 = vst [vmem:[#allocation176_spill] sm:$0xff] %v15308_v4  ;;  %19903 = vst [vmem:[#allocation177_spill] sm:$0xff] %v15312_v53  ;;  %970 = vmatpush1.msra.mxu0 %v15133_v21  ;;  %916 = vmatprep.subr.mxu1 %v14826_v16  ;;  %v15355_v63 = vsub.f32 %v63_v0, %v15288_v36  ;;  %v15361_v16 = vand.u32 4294901760, %v56_v52  ;;  %v1130_v47 = vsub.f32 %v15256_v19, %v15308_v4  ;;  %v48_v4 = vld [vmem:[%s18932_s2 + $0x98] sm:$0xff] }
  0x8e   :  { %19904 = vst [vmem:[#allocation178_spill] sm:$0xff] %v15314_v33  ;;  %19905 = vst [vmem:[#allocation179_spill] sm:$0xff] %v15320_v54  ;;  %972 = vmatprep.subr.mxu0 %v15148_v42  ;;  %918 = vmatpush1.msra.mxu1 %v14847_v32  ;;  %v15366_v6 = vsub.f32 %v60_v17, %v15302_v5  ;;  %v15370_v0 = vand.u32 4294901760, %v55_v2  ;;  %v1136_v32 = vsub.f32 %v15270_v13, %v15320_v54  ;;  %v47_v42 = vld [vmem:[%s18932_s2 + $0x90] sm:$0xff] }
  0x8f   :  { %19906 = vst [vmem:[#allocation180_spill] sm:$0xff] %v15323_v50  ;;  %19907 = vst [vmem:[#allocation181_spill] sm:$0xff] %v15327_v22  ;;  %951 = vmatprep.mubr.f32.mxu1 %v19817_v55  ;;  %974 = vmatpush1.msra.mxu0 %v15172_v29  ;;  %v15374_v3 = vand.u32 4294901760, %v52_v48  ;;  %v15377_v34 = vand.u32 4294901760, %v15323_v50  ;;  %v15384_v17 = vand.u32 4294901760, %v1112_v8  ;;  %v1142_v10 = vsub.f32 %v15282_v11, %v15338_v38 }
  0x90   :  { %19908 = vst [vmem:[#allocation182_spill] sm:$0xff] %v15338_v38  ;;  %19909 = vst [vmem:[#allocation183_spill] sm:$0xff] %v15341_v43  ;;  %953 = vmatmul.mubr.f32.vlgmr.msra.gmra.mxu1 %v14873_v59  ;;  %976 = vmatprep.subr.mxu0 %v15185_v57  ;;  %v15388_v29 = vand.u32 4294901760, %v51_v30  ;;  %v15391_v54 = vand.u32 4294901760, %v15341_v43  ;;  %v15398_v57 = vand.u32 4294901760, %v1118_v39  ;;  %v15400_v8 = vand.u32 4294901760, %v1124_v28 }
  0x91   :  { %19910 = vst [vmem:[#allocation184_spill] sm:$0xff] %v15347_v12  ;;  %19911 = vst [vmem:[#allocation185_spill] sm:$0xff] %v15355_v63  ;;  %1072 = vmatprep.subr.mxu1 %v15274_v51  ;;  %978 = vmatpush1.msra.mxu0 %v15187_v45  ;;  %v15403_v51 = vand.u32 4294901760, %v15355_v63  ;;  %v44_v38 = vld [vmem:[%s18932_s2 + $0x78] sm:$0xff]  ;;  %v15409_v21 = vsub.f32 %v59_v20, %v15347_v12  ;;  %v15413_v45 = vand.u32 4294901760, %v1130_v47  ;;  %v15415_v39 = vand.u32 4294901760, %v48_v4 }
  0x92   :  { %19912 = vst [vmem:[#allocation186_spill] sm:$0xff] %v15359_v7  ;;  %19913 = vst [vmem:[#allocation187_spill] sm:$0xff] %v15361_v16  ;;  %1078 = vmatpush1.msra.mxu1 %v15286_v15  ;;  %980 = vmatprep.subr.mxu0 %v15197_v46  ;;  %v15418_v28 = vand.u32 4294901760, %v15366_v6  ;;  %v43_v15 = vld [vmem:[%s18932_s2 + $0x70] sm:$0xff]  ;;  %v15424_v23 = vsub.f32 %v56_v52, %v15361_v16  ;;  %v15428_v20 = vand.u32 4294901760, %v1136_v32  ;;  %v40_v46 = vld [vmem:[%s18932_s2 + $0x58] sm:$0xff] }
  0x93   :  { %19914 = vst [vmem:[#allocation188_spill] sm:$0xff] %v15366_v6  ;;  %19915 = vst [vmem:[#allocation189_spill] sm:$0xff] %v15370_v0  ;;  %1084 = vmatprep.subr.mxu1 %v15298_v56  ;;  %982 = vmatpush1.msra.mxu0 %v15207_v9  ;;  %v1148_v47 = vsub.f32 %v15323_v50, %v15377_v34  ;;  %v15432_v56 = vand.u32 4294901760, %v47_v42  ;;  %v15438_v11 = vsub.f32 %v55_v2, %v15370_v0 }
  0x94   :  { %19916 = vst [vmem:[#allocation190_spill] sm:$0xff] %v15374_v3  ;;  %19917 = vst [vmem:[#allocation191_spill] sm:$0xff] %v15377_v34  ;;  %1090 = vmatpush1.msra.mxu1 %v15312_v53  ;;  %984 = vmatprep.subr.mxu0 %v15222_v31  ;;  %v15442_v52 = vand.u32 4294901760, %v1142_v10  ;;  %v1154_v32 = vsub.f32 %v15341_v43, %v15391_v54  ;;  %v15446_v53 = vand.u32 4294901760, %v44_v38  ;;  %v39_v34 = vld [vmem:[%s18932_s2 + $0x50] sm:$0xff]  ;;  %v15458_v2 = vand.u32 4294901760, %v43_v15 }
  0x95   :  { %19918 = vst [vmem:[#allocation192_spill] sm:$0xff] %v15384_v17  ;;  %19919 = vst [vmem:[#allocation193_spill] sm:$0xff] %v15388_v29  ;;  %1096 = vmatprep.subr.mxu1 %v15314_v33  ;;  %v15452_v9 = vsub.f32 %v52_v48, %v15374_v3  ;;  %986 = vmatpush1.msra.mxu0 %v15247_v24  ;;  %v1160_v10 = vsub.f32 %v15355_v63, %v15403_v51  ;;  %v15461_v33 = vand.u32 4294901760, %v15409_v21  ;;  %v35_v24 = vld [vmem:[%s18932_s2 + $0x30] sm:$0xff] }
  0x96   :  { %19920 = vst [vmem:[#allocation194_spill] sm:$0xff] %v15391_v54  ;;  %19921 = vst [vmem:[#allocation195_spill] sm:$0xff] %v15398_v57  ;;  %1102 = vmatpush1.msra.mxu1 %v15327_v22  ;;  %v36_v54 = vld [vmem:[%s18932_s2 + $0x38] sm:$0xff]  ;;  %v15467_v31 = vsub.f32 %v51_v30, %v15388_v29  ;;  %988 = vmatprep.subr.mxu0 %v15264_v18  ;;  %v1166_v48 = vsub.f32 %v15366_v6, %v15418_v28  ;;  %v15473_v22 = vand.u32 4294901760, %v40_v46  ;;  %v31_v43 = vld [vmem:[%s18932_s2 + $0x10] sm:$0xff] }
  0x97   :  { %19922 = vst [vmem:[#allocation196_spill] sm:$0xff] %v15400_v8  ;;  %19923 = vst [vmem:[#allocation197_spill] sm:$0xff] %v15403_v51  ;;  %1108 = vmatprep.subr.mxu1 %v15359_v7  ;;  %v15476_v51 = vand.u32 4294901760, %v15424_v23  ;;  %v15482_v63 = vsub.f32 %v48_v4, %v15415_v39  ;;  %990 = vmatpush1.msra.mxu0 %v15288_v36  ;;  %v15486_v30 = vand.u32 4294901760, %v1148_v47  ;;  %v15488_v7 = vand.u32 4294901760, %v39_v34  ;;  %v32_v47 = vld [vmem:[%s18932_s2 + $0x18] sm:$0xff] }
  0x98   :  { %19924 = vst [vmem:[#allocation198_spill] sm:$0xff] %v15409_v21  ;;  %19925 = vst [vmem:[#allocation199_spill] sm:$0xff] %v15413_v45  ;;  %1114 = vmatpush1.msra.mxu1 %v15384_v17  ;;  %v15494_v18 = vsub.f32 %v47_v42, %v15432_v56  ;;  %992 = vmatprep.subr.mxu0 %v15302_v5  ;;  %v15498_v4 = vand.u32 4294901760, %v1154_v32  ;;  %v15500_v6 = vand.u32 4294901760, %v36_v54  ;;  %v15503_v17 = vand.u32 4294901760, %v15452_v9 }
  0x99   :  { %19926 = vst [vmem:[#allocation200_spill] sm:$0xff] %v15415_v39  ;;  %19927 = vst [vmem:[#allocation201_spill] sm:$0xff] %v15418_v28  ;;  %v15491_v28 = vand.u32 4294901760, %v15438_v11  ;;  %1120 = vmatprep.subr.mxu1 %v15398_v57  ;;  %v15509_v36 = vsub.f32 %v44_v38, %v15446_v53  ;;  %994 = vmatpush1.msra.mxu0 %v15347_v12  ;;  %v15513_v42 = vand.u32 4294901760, %v1160_v10  ;;  %v15517_v57 = vand.u32 4294901760, %v35_v24 }
  0x9a   :  { %19928 = vst [vmem:[#allocation202_spill] sm:$0xff] %v15424_v23  ;;  %19929 = vst [vmem:[#allocation203_spill] sm:$0xff] %v15428_v20  ;;  %1126 = vmatpush1.msra.mxu1 %v15400_v8  ;;  %v1172_v32 = vsub.f32 %v15409_v21, %v15461_v33  ;;  %v15520_v5 = vand.u32 4294901760, %v15467_v31  ;;  %996 = vmatprep.subr.mxu0 %v15361_v16  ;;  %v15527_v38 = vand.u32 4294901760, %v1166_v48  ;;  %v15532_v8 = vand.u32 4294901760, %v15482_v63 }
  0x9b   :  { %19930 = vst [vmem:[#allocation204_spill] sm:$0xff] %v15432_v56  ;;  %19931 = vst [vmem:[#allocation205_spill] sm:$0xff] %v15438_v11  ;;  %1132 = vmatprep.subr.mxu1 %v15413_v45  ;;  %v1178_v10 = vsub.f32 %v15424_v23, %v15476_v51  ;;  %998 = vmatpush1.msra.mxu0 %v15370_v0  ;;  %v1184_v16 = vsub.f32 %v15438_v11, %v15491_v28  ;;  %v15541_v12 = vand.u32 4294901760, %v32_v47 }
  0x9c   :  { %19932 = vst [vmem:[#allocation206_spill] sm:$0xff] %v15442_v52  ;;  %19933 = vst [vmem:[#allocation207_spill] sm:$0xff] %v15446_v53  ;;  %1138 = vmatpush1.msra.mxu1 %v15428_v20  ;;  %v15544_v48 = vand.u32 4294901760, %v15494_v18  ;;  %v15547_v45 = vsub.f32 %v40_v46, %v15473_v22  ;;  %1000 = vmatprep.subr.mxu0 %v15374_v3  ;;  %v15556_v20 = vand.u32 4294901760, %v15509_v36  ;;  %v15563_v46 = vand.u32 4294901760, %v1172_v32 }
  0x9d   :  { %19934 = vst [vmem:[#allocation208_spill] sm:$0xff] %v15452_v9  ;;  %19935 = vst [vmem:[#allocation209_spill] sm:$0xff] %v15458_v2  ;;  %1144 = vmatprep.subr.mxu1 %v15442_v52  ;;  %1002 = vmatpush1.msra.mxu0 %v15388_v29  ;;  %v1196_v52 = vsub.f32 %v15467_v31, %v15520_v5  ;;  %v15568_v3 = vsub.f32 %v36_v54, %v15500_v6  ;;  %v15584_v54 = vand.u32 4294901760, %v1184_v16 }
  0x9e   :  { %19936 = vst [vmem:[#allocation210_spill] sm:$0xff] %v15461_v33  ;;  %19937 = vst [vmem:[#allocation211_spill] sm:$0xff] %v15467_v31  ;;  %v15535_v33 = vsub.f32 %v43_v15, %v15458_v2  ;;  %v1190_v15 = vsub.f32 %v15452_v9, %v15503_v17  ;;  %1150 = vmatpush1.msra.mxu1 %v15486_v30  ;;  %1004 = vmatprep.subr.mxu0 %v15415_v39 }
  0x9f   :  { %19938 = vst [vmem:[#allocation212_spill] sm:$0xff] %v15473_v22  ;;  %19939 = vst [vmem:[#allocation213_spill] sm:$0xff] %v15476_v51  ;;  %v15553_v51 = vand.u32 4294901760, %v31_v43  ;;  %1156 = vmatprep.subr.mxu1 %v15498_v4  ;;  %v15580_v32 = vsub.f32 %v35_v24, %v15517_v57  ;;  %1006 = vmatpush1.msra.mxu0 %v15432_v56 }
  0xa0   :  { %19940 = vst [vmem:[#allocation214_spill] sm:$0xff] %v15482_v63  ;;  %19941 = vst [vmem:[#allocation215_spill] sm:$0xff] %v15486_v30  ;;  %v15577_v29 = vand.u32 4294901760, %v15535_v33  ;;  %1162 = vmatpush1.msra.mxu1 %v15513_v42  ;;  %v15592_v30 = vsub.f32 %v32_v47, %v15541_v12  ;;  %1008 = vmatprep.subr.mxu0 %v15446_v53  ;;  %v15596_v24 = vand.u32 4294901760, %v1190_v15  ;;  %v15608_v47 = vand.u32 4294901760, %v1196_v52 }
  0xa1   :  { %19942 = vst [vmem:[#allocation216_spill] sm:$0xff] %v15488_v7  ;;  %19943 = vst [vmem:[#allocation217_spill] sm:$0xff] %v15491_v28  ;;  %v15559_v28 = vsub.f32 %v39_v34, %v15488_v7  ;;  %v1202_v34 = vsub.f32 %v15482_v63, %v15532_v8  ;;  %1168 = vmatprep.subr.mxu1 %v15527_v38  ;;  %1010 = vmatpush1.msra.mxu0 %v15458_v2 }
  0xa2   :  { %19944 = vst [vmem:[#allocation218_spill] sm:$0xff] %v15494_v18  ;;  %19945 = vst [vmem:[#allocation219_spill] sm:$0xff] %v15498_v4  ;;  %v1208_v4 = vsub.f32 %v15494_v18, %v15544_v48  ;;  %1174 = vmatpush1.msra.mxu1 %v15563_v46  ;;  %1012 = vmatprep.subr.mxu0 %v15473_v22 }
  0xa3   :  { %19946 = vst [vmem:[#allocation220_spill] sm:$0xff] %v15500_v6  ;;  %19947 = vst [vmem:[#allocation221_spill] sm:$0xff] %v15503_v17  ;;  %v15572_v17 = vand.u32 4294901760, %v1178_v10  ;;  %v15589_v10 = vand.u32 4294901760, %v15547_v45  ;;  %v15601_v16 = vand.u32 4294901760, %v15559_v28  ;;  %v15615_v15 = vand.u32 4294901760, %v1202_v34  ;;  %1014 = vmatpush1.msra.mxu0 %v15488_v7  ;;  %1055 = vmatprep.mubr.f32.mxu0 %v19817_v55 }
  0xa4   :  { %19948 = vst [vmem:[#allocation222_spill] sm:$0xff] %v15509_v36  ;;  %19949 = vst [vmem:[#allocation223_spill] sm:$0xff] %v15513_v42  ;;  %v1214_v42 = vsub.f32 %v15509_v36, %v15556_v20  ;;  %v15624_v52 = vand.u32 4294901760, %v1208_v4  ;;  %1016 = vmatprep.subr.mxu0 %v15500_v6  ;;  %1291 = vmatprep.mubr.f32.mxu1 %v19817_v55 }
  0xa5   :  { %19950 = vst [vmem:[#allocation224_spill] sm:$0xff] %v15517_v57  ;;  %19951 = vst [vmem:[#allocation225_spill] sm:$0xff] %v15520_v5  ;;  %1180 = vmatprep.subr.mxu1 %v15572_v17  ;;  %1018 = vmatpush1.msra.mxu0 %v15517_v57 }
  0xa6   :  { %19952 = vst [vmem:[#allocation226_spill] sm:$0xff] %v15527_v38  ;;  %19953 = vst [vmem:[#allocation227_spill] sm:$0xff] %v15532_v8  ;;  %v15611_v8 = vand.u32 4294901760, %v15568_v3  ;;  %v1220_v38 = vsub.f32 %v15535_v33, %v15577_v29  ;;  %1186 = vmatpush1.msra.mxu1 %v15584_v54  ;;  %v15633_v34 = vand.u32 4294901760, %v1214_v42  ;;  %1020 = vmatprep.subr.mxu0 %v15541_v12 }
  0xa7   :  { %19954 = vst [vmem:[#allocation228_spill] sm:$0xff] %v15535_v33  ;;  %19955 = vst [vmem:[#allocation229_spill] sm:$0xff] %v15541_v12  ;;  %1192 = vmatprep.subr.mxu1 %v15596_v24  ;;  %1022 = vmatpush1.msra.mxu0 %v15553_v51 }
  0xa8   :  { %19956 = vst [vmem:[#allocation230_spill] sm:$0xff] %v15544_v48  ;;  %19957 = vst [vmem:[#allocation231_spill] sm:$0xff] %v15547_v45  ;;  %v15604_v48 = vsub.f32 %v31_v43, %v15553_v51  ;;  %v15620_v43 = vand.u32 4294901760, %v15580_v32  ;;  %1198 = vmatpush1.msra.mxu1 %v15608_v47  ;;  %v1238_v4 = vsub.f32 %v15568_v3, %v15611_v8  ;;  %1301 = vmatprep.subr.mxu0 %v15136_v37 }
  0xa9   :  { %19958 = vst [vmem:[#allocation232_spill] sm:$0xff] %v15553_v51  ;;  %19959 = vst [vmem:[#allocation233_spill] sm:$0xff] %v15556_v20  ;;  %v15629_v20 = vand.u32 4294901760, %v15592_v30  ;;  %1204 = vmatprep.subr.mxu1 %v15615_v15  ;;  %1061 = vmatmul.mubr.f32.vlgmr.msra.gmra.mxu0 %v14964_v41  ;;  %v19987_v41 = vld [vmem:[#allocation169_spill] sm:$0xff] }
  0xaa   :  { %19960 = vst [vmem:[#allocation234_spill] sm:$0xff] %v15559_v28  ;;  %19961 = vst [vmem:[#allocation235_spill] sm:$0xff] %v15563_v46  ;;  %v1226_v46 = vsub.f32 %v15547_v45, %v15589_v10  ;;  %v1244_v42 = vsub.f32 %v15580_v32, %v15620_v43  ;;  %1210 = vmatpush1.msra.mxu1 %v15624_v52  ;;  %1304 = vmatpush1.msra.mxu0 %v15144_v27  ;;  %v20064_v27 = vld [vmem:[#allocation72_spill] sm:$0xff] }
  0xab   :  { %19962 = vst [vmem:[#allocation236_spill] sm:$0xff] %v15568_v3  ;;  %19963 = vst [vmem:[#allocation237_spill] sm:$0xff] %v15572_v17  ;;  %v1232_v17 = vsub.f32 %v15559_v28, %v15601_v16  ;;  %1216 = vmatprep.subr.mxu1 %v15633_v34  ;;  %1307 = vmatprep.subr.mxu0 %v15157_v62  ;;  %v20062_v62 = vld [vmem:[#allocation69_spill] sm:$0xff] }
  0xac   :  { %19964 = vst [vmem:[#allocation238_spill] sm:$0xff] %v15577_v29  ;;  %19965 = vst [vmem:[#allocation239_spill] sm:$0xff] %v15580_v32  ;;  %v15638_v29 = vand.u32 4294901760, %v15604_v48  ;;  %1310 = vmatpush1.msra.mxu0 %v15165_v25  ;;  %1427 = vmatprep.mubr.f32.mxu0 %v19817_v55  ;;  %v20060_v25 = vld [vmem:[#allocation66_spill] sm:$0xff] }
  0xad   :  { %19966 = vst [vmem:[#allocation240_spill] sm:$0xff] %v15584_v54  ;;  %19967 = vst [vmem:[#allocation241_spill] sm:$0xff] %v15589_v10  ;;  %v15652_v54 = vand.u32 4294901760, %v1226_v46  ;;  %v15668_v46 = vand.u32 4294901760, %v1244_v42  ;;  %1313 = vmatprep.subr.mxu0 %v15168_v1  ;;  %v19990_v42 = vld [vmem:[#allocation183_spill] sm:$0xff] }
  0xae   :  { %19968 = vst [vmem:[#allocation242_spill] sm:$0xff] %v15592_v30  ;;  %19969 = vst [vmem:[#allocation243_spill] sm:$0xff] %v15596_v24  ;;  %v15646_v24 = vand.u32 4294901760, %v1220_v38  ;;  %v1256_v38 = vsub.f32 %v15604_v48, %v15638_v29  ;;  %1316 = vmatpush1.msra.mxu0 %v15181_v58  ;;  %v20056_v58 = vld [vmem:[#allocation60_spill] sm:$0xff]  ;;  %v20058_v1 = vld [vmem:[#allocation63_spill] sm:$0xff] }
  0xaf   :  { %19970 = vst [vmem:[#allocation244_spill] sm:$0xff] %v15601_v16  ;;  %19971 = vst [vmem:[#allocation245_spill] sm:$0xff] %v15604_v48  ;;  %1319 = vmatprep.subr.mxu0 %v15203_v40  ;;  %v20052_v40 = vld [vmem:[#allocation46_spill] sm:$0xff] }
  0xb0   :  { %19972 = vst [vmem:[#allocation246_spill] sm:$0xff] %v15608_v47  ;;  %19973 = vst [vmem:[#allocation247_spill] sm:$0xff] %v15611_v8  ;;  %v1250_v47 = vsub.f32 %v15592_v30, %v15629_v20  ;;  %v15658_v8 = vand.u32 4294901760, %v1232_v17  ;;  %1222 = vmatpush1.msra.mxu1 %v15646_v24  ;;  %v15676_v37 = vand.u32 4294901760, %v1256_v38  ;;  %1322 = vmatpush1.msra.mxu0 %v15231_v35  ;;  %v19991_v38 = vld [vmem:[#allocation141_spill] sm:$0xff]  ;;  %v20051_v35 = vld [vmem:[#allocation15_spill] sm:$0xff] }
  0xb1   :  { %19974 = vst [vmem:[#allocation248_spill] sm:$0xff] %v15615_v15  ;;  %19975 = vst [vmem:[#allocation249_spill] sm:$0xff] %v15620_v43  ;;  %v15664_v15 = vand.u32 4294901760, %v1238_v4  ;;  %1228 = vmatprep.subr.mxu1 %v15652_v54  ;;  %1325 = vmatprep.subr.mxu0 %v15238_v44  ;;  %v19989_v4 = vld [vmem:[#allocation138_spill] sm:$0xff]  ;;  %v19994_v44 = vld [vmem:[#allocation188_spill] sm:$0xff] }
  0xb2   :  { %19976 = vst [vmem:[#allocation250_spill] sm:$0xff] %v15624_v52  ;;  %19977 = vst [vmem:[#allocation251_spill] sm:$0xff] %v15629_v20  ;;  %v15672_v17 = vand.u32 4294901760, %v1250_v47  ;;  %1234 = vmatpush1.msra.mxu1 %v15658_v8  ;;  %1328 = vmatpush1.msra.mxu0 %v15241_v26  ;;  %v19988_v47 = vld [vmem:[#allocation137_spill] sm:$0xff] }
  0xb3   :  { %19978 = vst [vmem:[#allocation252_spill] sm:$0xff] %v15633_v34  ;;  %19979 = vst [vmem:[#allocation253_spill] sm:$0xff] %v15638_v29  ;;  %1240 = vmatprep.subr.mxu1 %v15664_v15  ;;  %1331 = vmatprep.subr.mxu0 %v15256_v19  ;;  %v19992_v26 = vld [vmem:[#allocation185_spill] sm:$0xff] }
  0xb4   :  { %19980 = vst [vmem:[#allocation254_spill] sm:$0xff] %v15646_v24  ;;  %19981 = vst [vmem:[#allocation255_spill] sm:$0xff] %v15652_v54  ;;  %1246 = vmatpush1.msra.mxu1 %v15668_v46  ;;  %1334 = vmatpush1.msra.mxu0 %v15270_v13  ;;  %v19993_v19 = vld [vmem:[#allocation145_spill] sm:$0xff]  ;;  %v19995_v13 = vld [vmem:[#allocation148_spill] sm:$0xff] }
  0xb5   :  { %19982 = vst [vmem:[#allocation256_spill] sm:$0xff] %v15658_v8  ;;  %19983 = vst [vmem:[#allocation257_spill] sm:$0xff] %v15664_v15  ;;  %1252 = vmatprep.subr.mxu1 %v15672_v17  ;;  %1337 = vmatprep.subr.mxu0 %v19987_v41  ;;  %v19996_v41 = vld [vmem:[#allocation149_spill] sm:$0xff]  ;;  %v20095_v15 = vld [vmem:[#allocation130_spill] sm:$0xff] }
  0xb6   :  { %19984 = vst [vmem:[#allocation258_spill] sm:$0xff] %v15668_v46  ;;  %19985 = vst [vmem:[#allocation259_spill] sm:$0xff] %v15672_v17  ;;  %1258 = vmatpush1.msra.mxu1 %v15676_v37  ;;  %1340 = vmatpush1.msra.mxu0 %v15323_v50  ;;  %v19997_v50 = vld [vmem:[#allocation151_spill] sm:$0xff]  ;;  %v20091_v46 = vld [vmem:[#allocation125_spill] sm:$0xff] }
  0xb7   :  { %19986 = vst [vmem:[#allocation260_spill] sm:$0xff] %v15676_v37  ;;  %1293 = vmatmul.mubr.f32.vlgmr.msra.gmra.mxu1 %v14873_v59  ;;  %1437 = vmatprep.subr.mxu1 %v15103_v49  ;;  %v20082_v37 = vld [vmem:[#allocation107_spill] sm:$0xff]  ;;  %v20099_v8 = vld [vmem:[#allocation134_spill] sm:$0xff] }
  0xb8   :  { %1439 = vmatpush1.msra.mxu1 %v15113_v60  ;;  %1343 = vmatprep.subr.mxu0 %v19990_v42  ;;  %v19998_v42 = vld [vmem:[#allocation154_spill] sm:$0xff]  ;;  %v20087_v17 = vld [vmem:[#allocation119_spill] sm:$0xff] }
  0xb9   :  { %1441 = vmatprep.subr.mxu1 %v15120_v14  ;;  %1346 = vmatpush1.msra.mxu0 %v19992_v26  ;;  %v19999_v26 = vld [vmem:[#allocation157_spill] sm:$0xff] }
  0xba   :  { %1443 = vmatpush1.msra.mxu1 %v15124_v61  ;;  %1349 = vmatprep.subr.mxu0 %v19994_v44  ;;  %v20000_v44 = vld [vmem:[#allocation162_spill] sm:$0xff] }
  0xbb   :  { %1445 = vmatprep.subr.mxu1 %v19988_v47  ;;  %1352 = vmatpush1.msra.mxu0 %v15409_v21  ;;  %v20001_v21 = vld [vmem:[#allocation165_spill] sm:$0xff] }
  0xbc   :  { %1447 = vmatpush1.msra.mxu1 %v19989_v4  ;;  %1355 = vmatprep.subr.mxu0 %v15424_v23  ;;  %v20002_v23 = vld [vmem:[#allocation171_spill] sm:$0xff] }
  0xbd   :  { %1449 = vmatprep.subr.mxu1 %v19991_v38  ;;  %1358 = vmatpush1.msra.mxu0 %v15438_v11  ;;  %v20003_v11 = vld [vmem:[#allocation175_spill] sm:$0xff] }
  0xbe   :  { %1451 = vmatpush1.msra.mxu1 %v19993_v19  ;;  %1361 = vmatprep.subr.mxu0 %v15452_v9  ;;  %v20004_v9 = vld [vmem:[#allocation184_spill] sm:$0xff] }
  0xbf   :  { %1453 = vmatprep.subr.mxu1 %v19995_v13  ;;  %1364 = vmatpush1.msra.mxu0 %v15467_v31  ;;  %v20005_v31 = vld [vmem:[#allocation187_spill] sm:$0xff] }
  0xc0   :  { %1455 = vmatpush1.msra.mxu1 %v19996_v41  ;;  %1367 = vmatprep.subr.mxu0 %v15482_v63  ;;  %v20050_v63 = vld [vmem:[#allocation43_spill] sm:$0xff] }
  0xc1   :  { %1457 = vmatprep.subr.mxu1 %v19997_v50  ;;  %1370 = vmatpush1.msra.mxu0 %v15494_v18  ;;  %v20006_v18 = vld [vmem:[#allocation190_spill] sm:$0xff] }
  0xc2   :  { %1459 = vmatpush1.msra.mxu1 %v19998_v42  ;;  %1373 = vmatprep.subr.mxu0 %v15509_v36  ;;  %v20007_v36 = vld [vmem:[#allocation193_spill] sm:$0xff] }
  0xc3   :  { %1461 = vmatprep.subr.mxu1 %v19999_v26  ;;  %1376 = vmatpush1.msra.mxu0 %v15535_v33  ;;  %v20022_v33 = vld [vmem:[#allocation182_spill] sm:$0xff] }
  0xc4   :  { %1463 = vmatpush1.msra.mxu1 %v20000_v44  ;;  %1379 = vmatprep.subr.mxu0 %v15547_v45  ;;  %v20013_v45 = vld [vmem:[#allocation156_spill] sm:$0xff] }
  0xc5   :  { %1465 = vmatprep.subr.mxu1 %v20001_v21  ;;  %1382 = vmatpush1.msra.mxu0 %v15559_v28  ;;  %v20008_v28 = vld [vmem:[#allocation113_spill] sm:$0xff] }
  0xc6   :  { %1467 = vmatpush1.msra.mxu1 %v20002_v23  ;;  %1385 = vmatprep.subr.mxu0 %v15568_v3  ;;  %v20009_v3 = vld [vmem:[#allocation146_spill] sm:$0xff] }
  0xc7   :  { %1469 = vmatprep.subr.mxu1 %v20003_v11  ;;  %1388 = vmatpush1.msra.mxu0 %v15580_v32  ;;  %v20010_v32 = vld [vmem:[#allocation150_spill] sm:$0xff] }
  0xc8   :  { %1471 = vmatpush1.msra.mxu1 %v20004_v9  ;;  %1391 = vmatprep.subr.mxu0 %v15592_v30  ;;  %v20011_v30 = vld [vmem:[#allocation152_spill] sm:$0xff] }
  0xc9   :  { %1473 = vmatprep.subr.mxu1 %v20005_v31  ;;  %1394 = vmatpush1.msra.mxu0 %v15604_v48  ;;  %v20012_v48 = vld [vmem:[#allocation155_spill] sm:$0xff] }
  0xca   :  { %1475 = vmatpush1.msra.mxu1 %v15370_v0  ;;  %1430 = vmatmul.mubr.f32.vlgmr.msra.gmra.mxu0 %v20008_v28  ;;  %v20014_v28 = vld [vmem:[#allocation158_spill] sm:$0xff] }
  0xcb   :  { %1477 = vmatprep.subr.mxu1 %v20006_v18  ;;  %1545 = vmatprep.subr.mxu0 %v20009_v3  ;;  %v20015_v3 = vld [vmem:[#allocation163_spill] sm:$0xff] }
  0xcc   :  { %1479 = vmatpush1.msra.mxu1 %v20007_v36  ;;  %1549 = vmatpush1.msra.mxu0 %v20010_v32  ;;  %v20017_v32 = vld [vmem:[#allocation120_spill] sm:$0xff] }
  0xcd   :  { %1481 = vmatprep.subr.mxu1 %v15415_v39  ;;  %1553 = vmatprep.subr.mxu0 %v20011_v30  ;;  %v20016_v30 = vld [vmem:[#allocation168_spill] sm:$0xff] }
  0xce   :  { %1483 = vmatpush1.msra.mxu1 %v15432_v56  ;;  %1557 = vmatpush1.msra.mxu0 %v20012_v48  ;;  %v20018_v48 = vld [vmem:[#allocation172_spill] sm:$0xff] }
  0xcf   :  { %1485 = vmatprep.subr.mxu1 %v15446_v53  ;;  %1561 = vmatprep.subr.mxu0 %v20013_v45  ;;  %v20019_v45 = vld [vmem:[#allocation173_spill] sm:$0xff] }
  0xd0   :  { %1487 = vmatpush1.msra.mxu1 %v15458_v2  ;;  %1565 = vmatpush1.msra.mxu0 %v20014_v28  ;;  %v20020_v28 = vld [vmem:[#allocation176_spill] sm:$0xff] }
  0xd1   :  { %1489 = vmatprep.subr.mxu1 %v15473_v22  ;;  %1569 = vmatprep.subr.mxu0 %v20015_v3  ;;  %v20021_v3 = vld [vmem:[#allocation179_spill] sm:$0xff] }
  0xd2   :  { %1491 = vmatpush1.msra.mxu1 %v15488_v7  ;;  %1532 = vmatprep.mubr.f32.mxu1 %v19817_v55 }
  0xd3   :  { %1493 = vmatprep.subr.mxu1 %v15500_v6  ;;  %1573 = vmatpush1.msra.mxu0 %v20016_v30  ;;  %v20032_v30 = vld [vmem:[#allocation230_spill] sm:$0xff] }
  0xd4   :  { %1495 = vmatpush1.msra.mxu1 %v15517_v57  ;;  %1577 = vmatprep.subr.mxu0 %v20018_v48  ;;  %v20024_v48 = vld [vmem:[#allocation194_spill] sm:$0xff] }
  0xd5   :  { %1497 = vmatprep.subr.mxu1 %v15541_v12  ;;  %1581 = vmatpush1.msra.mxu0 %v20019_v45  ;;  %v20025_v45 = vld [vmem:[#allocation197_spill] sm:$0xff] }
  0xd6   :  { %1499 = vmatpush1.msra.mxu1 %v15553_v51  ;;  %1585 = vmatprep.subr.mxu0 %v20020_v28  ;;  %v20026_v28 = vld [vmem:[#allocation201_spill] sm:$0xff] }
  0xd7   :  { %1536 = vmatmul.mubr.f32.vlgmr.msra.gmra.mxu1 %v20017_v32  ;;  %1711 = vmatprep.subr.mxu1 %v15103_v49  ;;  %v20023_v32 = vld [vmem:[#allocation191_spill] sm:$0xff] }
  0xd8   :  { %1713 = vmatpush1.msra.mxu1 %v15113_v60  ;;  %1589 = vmatpush1.msra.mxu0 %v20021_v3  ;;  %v20027_v3 = vld [vmem:[#allocation210_spill] sm:$0xff] }
  0xd9   :  { %1715 = vmatprep.subr.mxu1 %v15120_v14  ;;  %1593 = vmatprep.subr.mxu0 %v20022_v33  ;;  %v93_v33 = vld [vmem:[%s18933_s3] sm:$0xff] }
  0xda   :  { %1717 = vmatpush1.msra.mxu1 %v15124_v61  ;;  %1597 = vmatpush1.msra.mxu0 %v20023_v32  ;;  %v20028_v32 = vld [vmem:[#allocation213_spill] sm:$0xff]  ;;  %vm94_vm0 = vcmp.gt.s32.totalorder %v93_v33, 0 }
  0xdb   :  { %1719 = vmatprep.subr.mxu1 %v19988_v47  ;;  %1601 = vmatprep.subr.mxu0 %v20024_v48  ;;  %v20029_v48 = vld [vmem:[#allocation217_spill] sm:$0xff] }
  0xdc   :  { %1721 = vmatpush1.msra.mxu1 %v19989_v4  ;;  %1605 = vmatpush1.msra.mxu0 %v20025_v45 }
  0xdd   :  { %1723 = vmatprep.subr.mxu1 %v19991_v38  ;;  %1609 = vmatprep.subr.mxu0 %v20026_v28  ;;  %v20030_v28 = vld [vmem:[#allocation221_spill] sm:$0xff] }
  0xde   :  { %1725 = vmatpush1.msra.mxu1 %v19993_v19  ;;  %1613 = vmatpush1.msra.mxu0 %v20027_v3  ;;  %v20031_v3 = vld [vmem:[#allocation227_spill] sm:$0xff] }
  0xdf   :  { %1727 = vmatprep.subr.mxu1 %v19995_v13  ;;  %1617 = vmatprep.subr.mxu0 %v20028_v32  ;;  %v19392_v32 = vmov 0   ;;  %v101_v13 = vld [vmem:[%s18931_s1 + $0x8] sm:$0xff] }
  0xe0   :  { %1729 = vmatpush1.msra.mxu1 %v19996_v41  ;;  %1621 = vmatpush1.msra.mxu0 %v20029_v48  ;;  %v95_v45 = vsel %vm94_vm0, 1, %v19392_v32  ;;  %v20033_v48 = vld [vmem:[#allocation233_spill] sm:$0xff]  ;;  %v20036_v32 = vld [vmem:[#allocation247_spill] sm:$0xff] }
  0xe1   :  { %1731 = vmatprep.subr.mxu1 %v19997_v50  ;;  %1625 = vmatprep.subr.mxu0 %v20030_v28  ;;  %v20034_v28 = vld [vmem:[#allocation238_spill] sm:$0xff] }
  0xe2   :  { %1733 = vmatpush1.msra.mxu1 %v19998_v42  ;;  %1629 = vmatpush1.msra.mxu0 %v15520_v5  ;;  %v15796_v5 = vsub.s32 %v93_v33, %v95_v45  ;;  %v20037_v45 = vmov 0  }
  0xe3   :  { %1735 = vmatprep.subr.mxu1 %v19999_v26  ;;  %1633 = vmatprep.subr.mxu0 %v20031_v3  ;;  %v20048_v3 = vld [vmem:[#allocation40_spill] sm:$0xff] }
  0xe4   :  { %1737 = vmatpush1.msra.mxu1 %v20000_v44  ;;  %1637 = vmatpush1.msra.mxu0 %v20032_v30  ;;  %20035 = vst [vmem:[#allocation137_spill] sm:$0xff] %v15796_v5  ;;  %vm1843_vm1 = vcmp.eq.s32.totalorder %v15796_v5, 0  ;;  %v20047_v30 = vld [vmem:[#allocation13_spill] sm:$0xff]  ;;  %v20049_v5 = vld [vmem:[#allocation14_spill] sm:$0xff] }
  0xe5   :  { %1739 = vmatprep.subr.mxu1 %v20001_v21  ;;  %1641 = vmatprep.subr.mxu0 %v20033_v48  ;;  %v1844_v33 = vsel %vm1843_vm1, 1, %v20037_v45  ;;  %v20046_v48 = vld [vmem:[#allocation38_spill] sm:$0xff] }
  0xe6   :  { %1741 = vmatpush1.msra.mxu1 %v20002_v23  ;;  %1645 = vmatpush1.msra.mxu0 %v20034_v28  ;;  %v20045_v28 = vld [vmem:[#allocation12_spill] sm:$0xff] }
  0xe7   :  { %1743 = vmatprep.subr.mxu1 %v20003_v11  ;;  %1649 = vmatprep.subr.mxu0 %v15589_v10  ;;  %v20044_v10 = vld [vmem:[#allocation37_spill] sm:$0xff] }
  0xe8   :  { %1745 = vmatpush1.msra.mxu1 %v20004_v9  ;;  %1653 = vmatpush1.msra.mxu0 %v15601_v16  ;;  %v20042_v16 = vld [vmem:[#allocation11_spill] sm:$0xff] }
  0xe9   :  { %1747 = vmatprep.subr.mxu1 %v20005_v31  ;;  %1657 = vmatprep.subr.mxu0 %v20036_v32  ;;  %v20041_v32 = vld [vmem:[#allocation10_spill] sm:$0xff] }
  0xea   :  { %1749 = vmatpush1.msra.mxu1 %v15370_v0  ;;  %1661 = vmatpush1.msra.mxu0 %v15620_v43  ;;  %v20040_v43 = vld [vmem:[#allocation9_spill] sm:$0xff]  ;;  %v20102_v0 = vld [vmem:[#allocation136_spill] sm:$0xff] }
  0xeb   :  { %1751 = vmatprep.subr.mxu1 %v20006_v18  ;;  %1665 = vmatprep.subr.mxu0 %v15629_v20  ;;  %v20039_v20 = vld [vmem:[#allocation8_spill] sm:$0xff] }
  0xec   :  { %1753 = vmatpush1.msra.mxu1 %v20007_v36  ;;  %1669 = vmatpush1.msra.mxu0 %v15638_v29  ;;  %v20038_v29 = vld [vmem:[#allocation7_spill] sm:$0xff]  ;;  %v20097_v18 = vld [vmem:[#allocation132_spill] sm:$0xff] }
  0xed   :  { %1755 = vmatprep.subr.mxu1 %v15415_v39  ;;  %1702 = vmatprep.mubr.f32.mxu0 %v19817_v55  ;;  %v20089_v39 = vld [vmem:[#allocation122_spill] sm:$0xff]  ;;  %v20093_v36 = vld [vmem:[#allocation127_spill] sm:$0xff] }
  0xee   :  { %1757 = vmatpush1.msra.mxu1 %v15432_v56  ;;  %1704 = vmatmul.mubr.f32.vlgmr.msra.gmra.mxu0 %v14873_v59  ;;  %v20084_v56 = vld [vmem:[#allocation110_spill] sm:$0xff] }
  0xef   :  { %1759 = vmatprep.subr.mxu1 %v15446_v53  ;;  %1806 = vmatprep.mubr.f32.mxu1 %v19817_v55  ;;  %v20080_v53 = vld [vmem:[#allocation104_spill] sm:$0xff] }
  0xf0   :  { %1761 = vmatpush1.msra.mxu1 %v15458_v2  ;;  %14183 = vset.pattern.permute.xlu0 %v20037_v45  ;;  %v20078_v2 = vld [vmem:[#allocation101_spill] sm:$0xff] }
  0xf1   :  { %1763 = vmatprep.subr.mxu1 %v15473_v22  ;;  %1846 = vperm.xlu0 %14183, %v1844_v33   ;;  %v20043_v33 = vld [vmem:[#allocation34_spill] sm:$0xff] }
  0xf2   :  { %1765 = vmatpush1.msra.mxu1 %v15488_v7  ;;  %1856 = vmatprep.subr.mxu0 %v20038_v29  ;;  %v20074_v7 = vld [vmem:[#allocation95_spill] sm:$0xff]  ;;  %v20076_v22 = vld [vmem:[#allocation98_spill] sm:$0xff] }
  0xf3   :  { %1767 = vmatprep.subr.mxu1 %v15500_v6  ;;  %1858 = vmatpush1.msra.mxu0 %v20039_v20  ;;  %v20072_v6 = vld [vmem:[#allocation89_spill] sm:$0xff] }
  0xf4   :  { %1769 = vmatpush1.msra.mxu1 %v15517_v57  ;;  %1860 = vmatprep.subr.mxu0 %v20040_v43  ;;  %v20070_v57 = vld [vmem:[#allocation85_spill] sm:$0xff] }
  0xf5   :  { %1771 = vmatprep.subr.mxu1 %v15541_v12  ;;  %1862 = vmatpush1.msra.mxu0 %v20041_v32  ;;  %v20068_v12 = vld [vmem:[#allocation79_spill] sm:$0xff] }
  0xf6   :  { %1773 = vmatpush1.msra.mxu1 %v15553_v51  ;;  %1864 = vmatprep.subr.mxu0 %v20042_v16  ;;  %v20066_v51 = vld [vmem:[#allocation75_spill] sm:$0xff] }
  0xf7   :  { %1808 = vmatmul.mubr.f32.vlgmr.msra.gmra.mxu1 %v14873_v59  ;;  %1968 = vmatprep.subr.mxu1 %v20043_v33  ;;  %v20053_v59 = vld [vmem:[#allocation17_spill] sm:$0xff]  ;;  %v20054_v33 = vld [vmem:[#allocation50_spill] sm:$0xff] }
  0xf8   :  { %1974 = vmatpush1.msra.mxu1 %v20044_v10  ;;  %1866 = vmatpush1.msra.mxu0 %v20045_v28  ;;  %v20055_v10 = vld [vmem:[#allocation19_spill] sm:$0xff] }
  0xf9   :  { %1980 = vmatprep.subr.mxu1 %v20046_v48  ;;  %1868 = vmatprep.subr.mxu0 %v20047_v30  ;;  %v20057_v48 = vld [vmem:[#allocation22_spill] sm:$0xff] }
  0xfa   :  { %1986 = vmatpush1.msra.mxu1 %v20048_v3  ;;  %1870 = vmatpush1.msra.mxu0 %v20049_v5  ;;  %v20059_v3 = vld [vmem:[#allocation24_spill] sm:$0xff] }
  0xfb   :  { %1992 = vmatprep.subr.mxu1 %v20050_v63  ;;  %1872 = vmatprep.subr.mxu0 %v20051_v35  ;;  %v20061_v63 = vld [vmem:[#allocation28_spill] sm:$0xff] }
  0xfc   :  { %1998 = vmatpush1.msra.mxu1 %v20052_v40  ;;  %1874 = vmatpush1.msra.mxu0 %v20053_v59  ;;  %v20063_v40 = vld [vmem:[#allocation31_spill] sm:$0xff] }
  0xfd   :  { %2004 = vmatprep.subr.mxu1 %v20054_v33  ;;  %1876 = vmatprep.subr.mxu0 %v20055_v10  ;;  %v20065_v33 = vld [vmem:[#allocation36_spill] sm:$0xff] }
  0xfe   :  { %2010 = vmatpush1.msra.mxu1 %v20056_v58  ;;  %1878 = vmatpush1.msra.mxu0 %v20057_v48  ;;  %v20067_v58 = vld [vmem:[#allocation42_spill] sm:$0xff] }
  0xff   :  { %2016 = vmatprep.subr.mxu1 %v20058_v1  ;;  %1880 = vmatprep.subr.mxu0 %v20059_v3  ;;  %v20069_v1 = vld [vmem:[#allocation45_spill] sm:$0xff] }
 0x100   :  { %2022 = vmatpush1.msra.mxu1 %v20060_v25  ;;  %1882 = vmatpush1.msra.mxu0 %v20061_v63  ;;  %v20071_v25 = vld [vmem:[#allocation49_spill] sm:$0xff] }
 0x101   :  { %2028 = vmatprep.subr.mxu1 %v20062_v62  ;;  %1884 = vmatprep.subr.mxu0 %v20063_v40  ;;  %v20073_v62 = vld [vmem:[#allocation53_spill] sm:$0xff] }
 0x102   :  { %2034 = vmatpush1.msra.mxu1 %v20064_v27  ;;  %1886 = vmatpush1.msra.mxu0 %v20065_v33  ;;  %v20075_v27 = vld [vmem:[#allocation56_spill] sm:$0xff] }
 0x103   :  { %2040 = vmatprep.subr.mxu1 %v20066_v51  ;;  %1888 = vmatprep.subr.mxu0 %v20067_v58  ;;  %v20077_v51 = vld [vmem:[#allocation59_spill] sm:$0xff] }
 0x104   :  { %2046 = vmatpush1.msra.mxu1 %v20068_v12  ;;  %1890 = vmatpush1.msra.mxu0 %v20069_v1  ;;  %v20079_v12 = vld [vmem:[#allocation65_spill] sm:$0xff] }
 0x105   :  { %2052 = vmatprep.subr.mxu1 %v20070_v57  ;;  %1892 = vmatprep.subr.mxu0 %v20071_v25  ;;  %v20081_v57 = vld [vmem:[#allocation70_spill] sm:$0xff] }
 0x106   :  { %2058 = vmatpush1.msra.mxu1 %v20072_v6  ;;  %1894 = vmatpush1.msra.mxu0 %v20073_v62  ;;  %v20083_v6 = vld [vmem:[#allocation74_spill] sm:$0xff] }
 0x107   :  { %2064 = vmatprep.subr.mxu1 %v20074_v7  ;;  %1896 = vmatprep.subr.mxu0 %v20075_v27  ;;  %v20085_v7 = vld [vmem:[#allocation116_spill] sm:$0xff] }
 0x108   :  { %2070 = vmatpush1.msra.mxu1 %v20076_v22  ;;  %1898 = vmatpush1.msra.mxu0 %v20077_v51  ;;  %v20086_v22 = vld [vmem:[#allocation78_spill] sm:$0xff] }
 0x109   :  { %2076 = vmatprep.subr.mxu1 %v20078_v2  ;;  %1900 = vmatprep.subr.mxu0 %v20079_v12  ;;  %v20088_v2 = vld [vmem:[#allocation81_spill] sm:$0xff] }
 0x10a   :  { %2082 = vmatpush1.msra.mxu1 %v20080_v53  ;;  %1902 = vmatpush1.msra.mxu0 %v20081_v57  ;;  %v20090_v53 = vld [vmem:[#allocation84_spill] sm:$0xff] }
 0x10b   :  { %2088 = vmatprep.subr.mxu1 %v20082_v37  ;;  %1904 = vmatprep.subr.mxu0 %v20083_v6  ;;  %v20092_v37 = vld [vmem:[#allocation88_spill] sm:$0xff] }
 0x10c   :  { %2094 = vmatpush1.msra.mxu1 %v20084_v56  ;;  %2187 = vmatprep.mubr.f32.mxu1 %v19817_v55  ;;  %v20094_v56 = vld [vmem:[#allocation93_spill] sm:$0xff] }
 0x10d   :  { %2100 = vmatprep.subr.mxu1 %v20085_v7  ;;  %1906 = vmatpush1.msra.mxu0 %v20086_v22  ;;  %v20096_v7 = vld [vmem:[#allocation97_spill] sm:$0xff] }
 0x10e   :  { %2106 = vmatpush1.msra.mxu1 %v20087_v17  ;;  %1908 = vmatprep.subr.mxu0 %v20088_v2  ;;  %v20098_v17 = vld [vmem:[#allocation102_spill] sm:$0xff] }
 0x10f   :  { %2112 = vmatprep.subr.mxu1 %v20089_v39  ;;  %1910 = vmatpush1.msra.mxu0 %v20090_v53  ;;  %v20100_v39 = vld [vmem:[#allocation135_spill] sm:$0xff] }
 0x110   :  { %2118 = vmatpush1.msra.mxu1 %v20091_v46  ;;  %1912 = vmatprep.subr.mxu0 %v20092_v37  ;;  %v20101_v46 = vld [vmem:[#allocation16_spill] sm:$0xff] }
 0x111   :  { %2124 = vmatprep.subr.mxu1 %v20093_v36  ;;  %1914 = vmatpush1.msra.mxu0 %v20094_v56  ;;  %v439_v36 = vpop.f32.mrf.mxu1 }
 0x112   :  { %2130 = vmatpush1.msra.mxu1 %v20095_v15  ;;  %1916 = vmatprep.subr.mxu0 %v20096_v7  ;;  %v207_v15 = vpop.f32.mrf.mxu0 }
 0x113   :  { %2136 = vmatprep.subr.mxu1 %v20097_v18  ;;  %1918 = vmatpush1.msra.mxu0 %v20098_v17  ;;  %v441_v18 = vpop.f32.mrf.mxu1  ;;  %v440_v52 = vadd.f32 %v439_v36, %v207_v15 }
 0x114   :  { %2142 = vmatpush1.msra.mxu1 %v20099_v8  ;;  %1951 = vmatprep.mubr.f32.mxu0 %v19817_v55  ;;  %v209_v54 = vpop.f32.mrf.mxu0 }
 0x115   :  { %2148 = vmatprep.subr.mxu1 %v20100_v39  ;;  %2197 = vmatprep.subr.mxu0 %v20101_v46  ;;  %v442_v11 = vadd.f32 %v441_v18, %v209_v54  ;;  %v100_v18 = vld [vmem:[%s18931_s1] sm:$0xff] }
 0x116   :  { %2154 = vmatpush1.msra.mxu1 %v20102_v0  ;;  %14184 = vset.pattern.permute.xlu1 %v20037_v45 }
 0x117   :  { %2333 = vmatprep.subr.mxu1 %v20038_v29 }
 0x125   :  { %v576_v31 = vpop.f32.mrf.mxu0 }
 0x126   :  { %v577_v46 = vadd.f32 %v576_v31, %v440_v52 }
 0x127   :  { %v578_v9 = vpop.f32.mrf.mxu0 }
 0x128   :  { %v579_v23 = vadd.f32 %v578_v9, %v442_v11 }
 0x12e   :  { %v682_v24 = vpop.f32.mrf.mxu1 }
 0x12f   :  { %v683_v44 = vadd.f32 %v682_v24, %v577_v46 }
 0x130   :  { %v684_v8 = vpop.f32.mrf.mxu1 }
 0x131   :  { %v685_v0 = vadd.f32 %v684_v8, %v579_v23 }
 0x147   :  { %v850_v34 = vpop.f32.mrf.mxu0 }
 0x148   :  { %v851_v42 = vadd.f32 %v850_v34, %v683_v44 }
 0x149   :  { %v852_v21 = vpop.f32.mrf.mxu0 }
 0x14a   :  { %v853_v26 = vadd.f32 %v852_v21, %v685_v0 }
 0x150   :  { %v954_v39 = vpop.f32.mrf.mxu1 }
 0x151   :  { %v955_v41 = vadd.f32 %v954_v39, %v851_v42 }
 0x152   :  { %v956_v45 = vpop.f32.mrf.mxu1 }
 0x153   :  { %v957_v50 = vadd.f32 %v956_v45, %v853_v26  ;;  %v1814_v54 = vadd.f32 %v955_v41, %v100_v18 }
 0x155   :  { %v1815_v36 = vadd.f32 %v957_v50, %v101_v13  ;;  %v14128_v31 = vmul.f32 -1.442695, %v1814_v54 }
 0x157   :  { %v14129_v11 = vmul.f32 -1.442695, %v1815_v36 }
 0x159   :  { %14185 = vpow2.f32 %v14129_v11  ;;  %v102_v11 = vld [vmem:[%s18931_s1 + $0x10] sm:$0xff] }
 0x15a   :  { %14187 = vpow2.f32 %v14128_v31 }
 0x166   :  { %v14186_v34 = vpop.eup %14185 }
 0x167   :  { %v14188_v42 = vpop.eup %14187  ;;  %v1827_v45 = vadd.f32 1.0, %v14186_v34 }
 0x168   :  { %v1821_v54 = vadd.f32 1.0, %v14188_v42 }
 0x169   :  { %v1062_v9 = vpop.f32.mrf.mxu0  ;;  %14189 = vrcp.f32 %v1827_v45 }
 0x16a   :  { %14191 = vrcp.f32 %v1821_v54 }
 0x16b   :  { %v1064_v23 = vpop.f32.mrf.mxu0 }
 0x177   :  { %v1294_v21 = vpop.f32.mrf.mxu1 }
 0x178   :  { %v1295_v39 = vadd.f32 %v1294_v21, %v1062_v9 }
 0x179   :  { %v1296_v26 = vpop.f32.mrf.mxu1 }
 0x17a   :  { %v1297_v15 = vadd.f32 %v1296_v26, %v1064_v23  ;;  %v103_v23 = vld [vmem:[%s18931_s1 + $0x18] sm:$0xff] }
 0x18a   :  { %v1431_v44 = vpop.f32.mrf.mxu0 }
 0x18b   :  { %v1432_v52 = vadd.f32 %v1431_v44, %v1295_v39  ;;  %v14190_v39 = vpop.eup %14189 }
 0x18c   :  { %v1433_v0 = vpop.f32.mrf.mxu0 }
 0x18d   :  { %v1434_v13 = vadd.f32 %v1433_v0, %v1297_v15  ;;  %v14192_v15 = vpop.eup %14191 }
 0x197   :  { %v1537_v8 = vpop.f32.mrf.mxu1 }
 0x198   :  { %v1538_v50 = vadd.f32 %v1537_v8, %v1432_v52 }
 0x199   :  { %v1539_v46 = vpop.f32.mrf.mxu1 }
 0x19a   :  { %v1540_v18 = vadd.f32 %v1539_v46, %v1434_v13 }
 0x1ae   :  { %v1705_v24 = vpop.f32.mrf.mxu0 }
 0x1af   :  { %v1706_v36 = vadd.f32 %v1705_v24, %v1538_v50  ;;  %v98_v24 = vld [vmem:[#allocation3] sm:$0xff] }
 0x1b0   :  { %v1707_v41 = vpop.f32.mrf.mxu0  ;;  %v1837_v34 = vmul.f32 %v14190_v39, %v98_v24  ;;  %v20112_v39 = vld [vmem:[#allocation44_spill] sm:$0xff] }
 0x1b1   :  { %v1708_v19 = vadd.f32 %v1707_v41, %v1540_v18  ;;  %v20113_v24 = vld [vmem:[#allocation48_spill] sm:$0xff] }
 0x1b7   :  { %v1809_v31 = vpop.f32.mrf.mxu1 }
 0x1b8   :  { %v1810_v9 = vadd.f32 %v1809_v31, %v1706_v36 }
 0x1b9   :  { %v1811_v21 = vpop.f32.mrf.mxu1 }
 0x1ba   :  { %v1816_v44 = vadd.f32 %v1810_v9, %v102_v11  ;;  %v1812_v26 = vadd.f32 %v1811_v21, %v1708_v19  ;;  %v20105_v9 = vld [vmem:[#allocation18_spill] sm:$0xff]  ;;  %v20107_v21 = vld [vmem:[#allocation23_spill] sm:$0xff] }
 0x1bc   :  { %14193 = vtanh.f32 %v1816_v44  ;;  %v1817_v0 = vadd.f32 %v1812_v26, %v103_v23  ;;  %v20106_v23 = vld [vmem:[#allocation20_spill] sm:$0xff]  ;;  %v20108_v44 = vld [vmem:[#allocation27_spill] sm:$0xff]  ;;  %v20109_v26 = vld [vmem:[#allocation30_spill] sm:$0xff] }
 0x1be   :  { %v14130_v8 = vmul.f32 -1.442695, %v1817_v0  ;;  %v20110_v0 = vld [vmem:[#allocation33_spill] sm:$0xff] }
 0x1c0   :  { %14195 = vpow2.f32 %v14130_v8  ;;  %v20111_v8 = vld [vmem:[#allocation41_spill] sm:$0xff] }
 0x1c9   :  { %v14194_v52 = vpop.eup %14193 }
 0x1ca   :  { %v1838_v46 = vmul.f32 %v14194_v52, %v14192_v15  ;;  %v20114_v15 = vld [vmem:[#allocation52_spill] sm:$0xff]  ;;  %v20115_v52 = vld [vmem:[#allocation55_spill] sm:$0xff] }
 0x1cc   :  { %v15906_v42 = vadd.f32 %v1838_v46, %v1837_v34  ;;  %v20116_v34 = vld [vmem:[#allocation58_spill] sm:$0xff] }
 0x1cd   :  { %v14196_v13 = vpop.eup %14195  ;;  %v20117_v46 = vld [vmem:[#allocation62_spill] sm:$0xff] }
 0x1ce   :  { %20103 = vst [vmem:[#allocation138_spill] sm:$0xff] %v15906_v42  ;;  %v1834_v50 = vadd.f32 1.0, %v14196_v13  ;;  %14197 = vtanh.f32 %v15906_v42  ;;  %v20118_v13 = vld [vmem:[#allocation68_spill] sm:$0xff]  ;;  %v20210_v42 = vld [vmem:[#allocation257_spill] sm:$0xff] }
 0x1d0   :  { %14199 = vrcp.f32 %v1834_v50  ;;  %v20119_v50 = vld [vmem:[#allocation71_spill] sm:$0xff] }
 0x1db   :  { %v14198_v41 = vpop.eup %14197 }
 0x1dd   :  { %v14200_v19 = vpop.eup %14199 }
 0x1de   :  { %v15909_v45 = vmul.f32 %v14200_v19, %v14198_v41  ;;  %v20120_v41 = vld [vmem:[#allocation77_spill] sm:$0xff]  ;;  %v20121_v19 = vld [vmem:[#allocation80_spill] sm:$0xff] }
 0x1e0   :  { %20104 = vst [vmem:[#allocation141_spill] sm:$0xff] %v15909_v45  ;;  %v15912_v18 = vand.u32 4294901760, %v15909_v45 }
 0x1e2   :  { %v15916_v36 = vsub.f32 %v15909_v45, %v15912_v18  ;;  %2189 = vmatmul.mubr.f32.vlgmr.msra.gmra.mxu1 %v15912_v18  ;;  %v20208_v45 = vld [vmem:[#allocation256_spill] sm:$0xff] }
 0x1e3   :  { %2335 = vmatpush1.msra.mxu1 %v20039_v20  ;;  %2428 = vmatprep.mubr.f32.mxu1 %v19817_v55 }
 0x1e4   :  { %2337 = vmatprep.subr.mxu1 %v20040_v43  ;;  %v15923_v54 = vand.u32 4294901760, %v15916_v36 }
 0x1e5   :  { %2339 = vmatpush1.msra.mxu1 %v20041_v32 }
 0x1e6   :  { %2341 = vmatprep.subr.mxu1 %v20042_v16  ;;  %v1955_v11 = vsub.f32 %v15916_v36, %v15923_v54 }
 0x1e7   :  { %2343 = vmatpush1.msra.mxu1 %v20045_v28 }
 0x1e8   :  { %2345 = vmatprep.subr.mxu1 %v20047_v30  ;;  %v15931_v31 = vand.u32 4294901760, %v1955_v11  ;;  %v20122_v11 = vld [vmem:[#allocation83_spill] sm:$0xff] }
 0x1e9   :  { %2347 = vmatpush1.msra.mxu1 %v20049_v5 }
 0x1ea   :  { %2349 = vmatprep.subr.mxu1 %v20051_v35  ;;  %1957 = vmatmul.mubr.f32.vlgmr.msra.gmra.mxu0 %v15931_v31 }
 0x1eb   :  { %2200 = vmatpush1.msra.mxu0 %v20105_v9  ;;  %2351 = vmatpush1.msra.mxu1 %v20053_v59  ;;  %v20206_v9 = vld [vmem:[#allocation255_spill] sm:$0xff] }
 0x1ec   :  { %2203 = vmatprep.subr.mxu0 %v20106_v23  ;;  %2353 = vmatprep.subr.mxu1 %v20055_v10  ;;  %v20204_v23 = vld [vmem:[#allocation254_spill] sm:$0xff] }
 0x1ed   :  { %2206 = vmatpush1.msra.mxu0 %v20107_v21  ;;  %2355 = vmatpush1.msra.mxu1 %v20057_v48  ;;  %v20202_v21 = vld [vmem:[#allocation252_spill] sm:$0xff] }
 0x1ee   :  { %2209 = vmatprep.subr.mxu0 %v20108_v44  ;;  %2357 = vmatprep.subr.mxu1 %v20059_v3  ;;  %v20200_v44 = vld [vmem:[#allocation250_spill] sm:$0xff] }
 0x1ef   :  { %2212 = vmatpush1.msra.mxu0 %v20109_v26  ;;  %2359 = vmatpush1.msra.mxu1 %v20061_v63  ;;  %v20198_v26 = vld [vmem:[#allocation248_spill] sm:$0xff] }
 0x1f0   :  { %2215 = vmatprep.subr.mxu0 %v20110_v0  ;;  %2361 = vmatprep.subr.mxu1 %v20063_v40  ;;  %v20196_v0 = vld [vmem:[#allocation246_spill] sm:$0xff] }
 0x1f1   :  { %2218 = vmatpush1.msra.mxu0 %v20111_v8  ;;  %2363 = vmatpush1.msra.mxu1 %v20065_v33  ;;  %v20194_v8 = vld [vmem:[#allocation243_spill] sm:$0xff] }
 0x1f2   :  { %2221 = vmatprep.subr.mxu0 %v20112_v39  ;;  %2365 = vmatprep.subr.mxu1 %v20067_v58  ;;  %v20171_v39 = vld [vmem:[#allocation181_spill] sm:$0xff] }
 0x1f3   :  { %2224 = vmatpush1.msra.mxu0 %v20113_v24  ;;  %2367 = vmatpush1.msra.mxu1 %v20069_v1  ;;  %v20169_v24 = vld [vmem:[#allocation178_spill] sm:$0xff] }
 0x1f4   :  { %2227 = vmatprep.subr.mxu0 %v20114_v15  ;;  %2369 = vmatprep.subr.mxu1 %v20071_v25  ;;  %v20168_v15 = vld [vmem:[#allocation123_spill] sm:$0xff] }
 0x1f5   :  { %2230 = vmatpush1.msra.mxu0 %v20115_v52  ;;  %2371 = vmatpush1.msra.mxu1 %v20073_v62  ;;  %v20166_v52 = vld [vmem:[#allocation121_spill] sm:$0xff] }
 0x1f6   :  { %2233 = vmatprep.subr.mxu0 %v20116_v34  ;;  %2373 = vmatprep.subr.mxu1 %v20075_v27  ;;  %v20164_v34 = vld [vmem:[#allocation117_spill] sm:$0xff] }
 0x1f7   :  { %2236 = vmatpush1.msra.mxu0 %v20117_v46  ;;  %2375 = vmatpush1.msra.mxu1 %v20077_v51  ;;  %v20123_v46 = vld [vmem:[#allocation87_spill] sm:$0xff] }
 0x1f8   :  { %2239 = vmatprep.subr.mxu0 %v20118_v13  ;;  %2377 = vmatprep.subr.mxu1 %v20079_v12  ;;  %v20124_v13 = vld [vmem:[#allocation91_spill] sm:$0xff] }
 0x1f9   :  { %2242 = vmatpush1.msra.mxu0 %v20119_v50  ;;  %2379 = vmatpush1.msra.mxu1 %v20081_v57  ;;  %v20125_v50 = vld [vmem:[#allocation94_spill] sm:$0xff] }
 0x1fa   :  { %2245 = vmatprep.subr.mxu0 %v20120_v41  ;;  %2381 = vmatprep.subr.mxu1 %v20083_v6  ;;  %v20126_v41 = vld [vmem:[#allocation100_spill] sm:$0xff] }
 0x1fb   :  { %2248 = vmatpush1.msra.mxu0 %v20121_v19  ;;  %2383 = vmatpush1.msra.mxu1 %v20086_v22  ;;  %v20127_v19 = vld [vmem:[#allocation103_spill] sm:$0xff] }
 0x1fc   :  { %2251 = vmatprep.subr.mxu0 %v20122_v11  ;;  %2385 = vmatprep.subr.mxu1 %v20088_v2  ;;  %v20128_v11 = vld [vmem:[#allocation106_spill] sm:$0xff] }
 0x1fd   :  { %2254 = vmatpush1.msra.mxu0 %v20123_v46  ;;  %2387 = vmatpush1.msra.mxu1 %v20090_v53  ;;  %v20134_v46 = vld [vmem:[#allocation126_spill] sm:$0xff] }
 0x1fe   :  { %2257 = vmatprep.subr.mxu0 %v20124_v13  ;;  %2389 = vmatprep.subr.mxu1 %v20092_v37  ;;  %v20129_v13 = vld [vmem:[#allocation109_spill] sm:$0xff] }
 0x1ff   :  { %2260 = vmatpush1.msra.mxu0 %v20125_v50  ;;  %2391 = vmatpush1.msra.mxu1 %v20094_v56  ;;  %v20130_v50 = vld [vmem:[#allocation112_spill] sm:$0xff] }
 0x200   :  { %2263 = vmatprep.subr.mxu0 %v20126_v41  ;;  %2393 = vmatprep.subr.mxu1 %v20096_v7  ;;  %v20131_v41 = vld [vmem:[#allocation115_spill] sm:$0xff] }
 0x201   :  { %2266 = vmatpush1.msra.mxu0 %v20127_v19  ;;  %2395 = vmatpush1.msra.mxu1 %v20098_v17  ;;  %v20132_v19 = vld [vmem:[#allocation118_spill] sm:$0xff] }
 0x202   :  { %2269 = vmatprep.subr.mxu0 %v20128_v11  ;;  %2432 = vmatmul.mubr.f32.vlgmr.msra.gmra.mxu1 %v15923_v54  ;;  %v20133_v11 = vld [vmem:[#allocation124_spill] sm:$0xff] }
 0x203   :  { %2607 = vmatprep.subr.mxu1 %v20038_v29  ;;  %2272 = vmatpush1.msra.mxu0 %v20129_v13  ;;  %v20135_v13 = vld [vmem:[#allocation129_spill] sm:$0xff] }
 0x204   :  { %2609 = vmatpush1.msra.mxu1 %v20039_v20  ;;  %2275 = vmatprep.subr.mxu0 %v20130_v50  ;;  %v20141_v50 = vld [vmem:[#allocation35_spill] sm:$0xff] }
 0x205   :  { %2611 = vmatprep.subr.mxu1 %v20040_v43  ;;  %2278 = vmatpush1.msra.mxu0 %v20131_v41  ;;  %v20136_v41 = vld [vmem:[#allocation21_spill] sm:$0xff] }
 0x206   :  { %2613 = vmatpush1.msra.mxu1 %v20041_v32  ;;  %2281 = vmatprep.subr.mxu0 %v20132_v19  ;;  %v20137_v19 = vld [vmem:[#allocation25_spill] sm:$0xff] }
 0x207   :  { %2615 = vmatprep.subr.mxu1 %v20042_v16  ;;  %2284 = vmatpush1.msra.mxu0 %v20133_v11  ;;  %v20138_v11 = vld [vmem:[#allocation26_spill] sm:$0xff] }
 0x208   :  { %2617 = vmatpush1.msra.mxu1 %v20045_v28  ;;  %2287 = vmatprep.subr.mxu0 %v20134_v46  ;;  %v20139_v46 = vld [vmem:[#allocation29_spill] sm:$0xff] }
 0x209   :  { %2619 = vmatprep.subr.mxu1 %v20047_v30  ;;  %2290 = vmatpush1.msra.mxu0 %v20135_v13  ;;  %v20140_v13 = vld [vmem:[#allocation32_spill] sm:$0xff] }
 0x20a   :  { %2323 = vmatprep.mubr.f32.mxu0 %v19817_v55  ;;  %2621 = vmatpush1.msra.mxu1 %v20049_v5 }
 0x20b   :  { %2326 = vmatmul.mubr.f32.vlgmr.msra.gmra.mxu0 %v15916_v36  ;;  %2441 = vmatprep.subr.mxu0 %v20136_v41  ;;  %v20142_v41 = vld [vmem:[#allocation39_spill] sm:$0xff] }
 0x20c   :  { %2623 = vmatprep.subr.mxu1 %v20051_v35  ;;  %2445 = vmatpush1.msra.mxu0 %v20137_v19  ;;  %v20143_v19 = vld [vmem:[#allocation47_spill] sm:$0xff] }
 0x20d   :  { %2625 = vmatpush1.msra.mxu1 %v20053_v59  ;;  %2449 = vmatprep.subr.mxu0 %v20138_v11  ;;  %v20144_v11 = vld [vmem:[#allocation51_spill] sm:$0xff] }
 0x20e   :  { %2627 = vmatprep.subr.mxu1 %v20055_v10  ;;  %2453 = vmatpush1.msra.mxu0 %v20139_v46  ;;  %v20145_v46 = vld [vmem:[#allocation54_spill] sm:$0xff] }
 0x20f   :  { %2629 = vmatpush1.msra.mxu1 %v20057_v48  ;;  %2457 = vmatprep.subr.mxu0 %v20140_v13  ;;  %v20146_v13 = vld [vmem:[#allocation57_spill] sm:$0xff] }
 0x210   :  { %2631 = vmatprep.subr.mxu1 %v20059_v3  ;;  %2461 = vmatpush1.msra.mxu0 %v20141_v50  ;;  %v20147_v50 = vld [vmem:[#allocation61_spill] sm:$0xff] }
 0x211   :  { %2633 = vmatpush1.msra.mxu1 %v20061_v63  ;;  %2465 = vmatprep.subr.mxu0 %v20142_v41  ;;  %v20148_v41 = vld [vmem:[#allocation64_spill] sm:$0xff] }
 0x212   :  { %2635 = vmatprep.subr.mxu1 %v20063_v40  ;;  %2469 = vmatpush1.msra.mxu0 %v20143_v19  ;;  %v20149_v19 = vld [vmem:[#allocation67_spill] sm:$0xff] }
 0x213   :  { %2637 = vmatpush1.msra.mxu1 %v20065_v33  ;;  %2473 = vmatprep.subr.mxu0 %v20144_v11  ;;  %v20150_v11 = vld [vmem:[#allocation73_spill] sm:$0xff] }
 0x214   :  { %2639 = vmatprep.subr.mxu1 %v20067_v58  ;;  %2477 = vmatpush1.msra.mxu0 %v20145_v46  ;;  %v20151_v46 = vld [vmem:[#allocation76_spill] sm:$0xff] }
 0x215   :  { %2641 = vmatpush1.msra.mxu1 %v20069_v1  ;;  %2481 = vmatprep.subr.mxu0 %v20146_v13  ;;  %v20152_v13 = vld [vmem:[#allocation82_spill] sm:$0xff] }
 0x216   :  { %2643 = vmatprep.subr.mxu1 %v20071_v25  ;;  %2485 = vmatpush1.msra.mxu0 %v20147_v50  ;;  %v20153_v50 = vld [vmem:[#allocation86_spill] sm:$0xff] }
 0x217   :  { %2645 = vmatpush1.msra.mxu1 %v20073_v62  ;;  %2489 = vmatprep.subr.mxu0 %v20148_v41  ;;  %v20154_v41 = vld [vmem:[#allocation90_spill] sm:$0xff] }
 0x218   :  { %2647 = vmatprep.subr.mxu1 %v20075_v27  ;;  %2493 = vmatpush1.msra.mxu0 %v20149_v19  ;;  %v20155_v19 = vld [vmem:[#allocation92_spill] sm:$0xff] }
 0x219   :  { %2649 = vmatpush1.msra.mxu1 %v20077_v51  ;;  %2497 = vmatprep.subr.mxu0 %v20150_v11  ;;  %v20156_v11 = vld [vmem:[#allocation96_spill] sm:$0xff] }
 0x21a   :  { %2651 = vmatprep.subr.mxu1 %v20079_v12  ;;  %2501 = vmatpush1.msra.mxu0 %v20151_v46  ;;  %v20157_v46 = vld [vmem:[#allocation99_spill] sm:$0xff]  ;;  %v20229_v12 = vld [vmem:[#allocation144_spill] sm:$0xff] }
 0x21b   :  { %2653 = vmatpush1.msra.mxu1 %v20081_v57  ;;  %2505 = vmatprep.subr.mxu0 %v20152_v13  ;;  %v20158_v13 = vld [vmem:[#allocation105_spill] sm:$0xff]  ;;  %v20228_v57 = vld [vmem:[#allocation143_spill] sm:$0xff] }
 0x21c   :  { %2655 = vmatprep.subr.mxu1 %v20083_v6  ;;  %2509 = vmatpush1.msra.mxu0 %v20153_v50  ;;  %v20159_v50 = vld [vmem:[#allocation108_spill] sm:$0xff]  ;;  %v20227_v6 = vld [vmem:[#allocation142_spill] sm:$0xff] }
 0x21d   :  { %2657 = vmatpush1.msra.mxu1 %v20086_v22  ;;  %2513 = vmatprep.subr.mxu0 %v20154_v41  ;;  %v20162_v41 = vld [vmem:[#allocation114_spill] sm:$0xff]  ;;  %v20226_v22 = vld [vmem:[#allocation140_spill] sm:$0xff] }
 0x21e   :  { %2659 = vmatprep.subr.mxu1 %v20088_v2  ;;  %2517 = vmatpush1.msra.mxu0 %v20155_v19  ;;  %v20160_v19 = vld [vmem:[#allocation111_spill] sm:$0xff] }
 0x21f   :  { %2661 = vmatpush1.msra.mxu1 %v20090_v53  ;;  %2521 = vmatprep.subr.mxu0 %v20156_v11  ;;  %v20161_v11 = vld [vmem:[#allocation167_spill] sm:$0xff]  ;;  %v20224_v53 = vld [vmem:[#allocation232_spill] sm:$0xff] }
 0x220   :  { %2663 = vmatprep.subr.mxu1 %v20092_v37  ;;  %2525 = vmatpush1.msra.mxu0 %v20157_v46  ;;  %v20163_v46 = vld [vmem:[#allocation170_spill] sm:$0xff]  ;;  %v20223_v37 = vld [vmem:[#allocation229_spill] sm:$0xff]  ;;  %v20225_v2 = vld [vmem:[#allocation139_spill] sm:$0xff] }
 0x221   :  { %2665 = vmatpush1.msra.mxu1 %v20094_v56  ;;  %2529 = vmatprep.subr.mxu0 %v20158_v13  ;;  %v20165_v13 = vld [vmem:[#allocation174_spill] sm:$0xff]  ;;  %v20216_v56 = vld [vmem:[#allocation260_spill] sm:$0xff] }
 0x222   :  { %2667 = vmatprep.subr.mxu1 %v20096_v7  ;;  %2533 = vmatpush1.msra.mxu0 %v20159_v50  ;;  %v20167_v50 = vld [vmem:[#allocation177_spill] sm:$0xff]  ;;  %v20214_v7 = vld [vmem:[#allocation259_spill] sm:$0xff] }
 0x223   :  { %2669 = vmatpush1.msra.mxu1 %v20098_v17  ;;  %2702 = vmatprep.mubr.f32.mxu1 %v19817_v55  ;;  %v20212_v17 = vld [vmem:[#allocation258_spill] sm:$0xff] }
 0x224   :  { %2537 = vmatprep.subr.mxu0 %v20160_v19  ;;  %2704 = vmatmul.mubr.f32.vlgmr.msra.gmra.mxu1 %v15912_v18  ;;  %v20170_v19 = vld [vmem:[#allocation128_spill] sm:$0xff] }
 0x225   :  { %2823 = vmatprep.subr.mxu1 %v20161_v11  ;;  %2541 = vmatpush1.msra.mxu0 %v20162_v41  ;;  %v20172_v11 = vld [vmem:[#allocation131_spill] sm:$0xff]  ;;  %v20173_v41 = vld [vmem:[#allocation186_spill] sm:$0xff] }
 0x226   :  { %2829 = vmatpush1.msra.mxu1 %v20163_v46  ;;  %2545 = vmatprep.subr.mxu0 %v20164_v34  ;;  %v20174_v46 = vld [vmem:[#allocation133_spill] sm:$0xff]  ;;  %v20192_v34 = vld [vmem:[#allocation240_spill] sm:$0xff] }
 0x227   :  { %2835 = vmatprep.subr.mxu1 %v20165_v13  ;;  %2549 = vmatpush1.msra.mxu0 %v20166_v52  ;;  %v20175_v13 = vld [vmem:[#allocation192_spill] sm:$0xff]  ;;  %v20190_v52 = vld [vmem:[#allocation237_spill] sm:$0xff] }
 0x228   :  { %2841 = vmatpush1.msra.mxu1 %v20167_v50  ;;  %2553 = vmatprep.subr.mxu0 %v20168_v15  ;;  %v20176_v15 = vld [vmem:[#allocation195_spill] sm:$0xff] }
 0x229   :  { %2847 = vmatprep.subr.mxu1 %v20169_v24  ;;  %2557 = vmatpush1.msra.mxu0 %v20170_v19  ;;  %v20177_v19 = vld [vmem:[#allocation196_spill] sm:$0xff]  ;;  %v20186_v24 = vld [vmem:[#allocation226_spill] sm:$0xff]  ;;  %v20188_v50 = vld [vmem:[#allocation235_spill] sm:$0xff] }
 0x22a   :  { %2853 = vmatpush1.msra.mxu1 %v20171_v39  ;;  %2561 = vmatprep.subr.mxu0 %v20172_v11  ;;  %v20178_v11 = vld [vmem:[#allocation199_spill] sm:$0xff] }
 0x22b   :  { %2859 = vmatprep.subr.mxu1 %v20173_v41  ;;  %2565 = vmatpush1.msra.mxu0 %v20174_v46  ;;  %v20179_v46 = vld [vmem:[#allocation203_spill] sm:$0xff] }
 0x22c   :  { %2598 = vmatprep.mubr.f32.mxu0 %v19817_v55  ;;  %2865 = vmatpush1.msra.mxu1 %v20175_v13  ;;  %v20180_v13 = vld [vmem:[#allocation206_spill] sm:$0xff]  ;;  %v20181_v41 = vld [vmem:[#allocation215_spill] sm:$0xff] }
 0x22d   :  { %2600 = vmatmul.mubr.f32.vlgmr.msra.gmra.mxu0 %v15912_v18  ;;  %2711 = vmatprep.subr.mxu0 %v15103_v49  ;;  %v20184_v39 = vld [vmem:[#allocation223_spill] sm:$0xff] }
 0x22e   :  { %2871 = vmatprep.subr.mxu1 %v20176_v15  ;;  %2713 = vmatpush1.msra.mxu0 %v15113_v60  ;;  %v20182_v15 = vld [vmem:[#allocation219_spill] sm:$0xff] }
 0x22f   :  { %2877 = vmatpush1.msra.mxu1 %v20177_v19  ;;  %2715 = vmatprep.subr.mxu0 %v15120_v14  ;;  %v20183_v19 = vld [vmem:[#allocation145_spill] sm:$0xff] }
 0x230   :  { %2883 = vmatprep.subr.mxu1 %v20178_v11  ;;  %2717 = vmatpush1.msra.mxu0 %v15124_v61  ;;  %v20185_v11 = vld [vmem:[#allocation148_spill] sm:$0xff] }
 0x231   :  { %2889 = vmatpush1.msra.mxu1 %v20179_v46  ;;  %2719 = vmatprep.subr.mxu0 %v19988_v47  ;;  %v20187_v46 = vld [vmem:[#allocation149_spill] sm:$0xff] }
 0x232   :  { %2895 = vmatprep.subr.mxu1 %v20180_v13  ;;  %2721 = vmatpush1.msra.mxu0 %v19989_v4  ;;  %v20189_v13 = vld [vmem:[#allocation151_spill] sm:$0xff] }
 0x233   :  { %2901 = vmatpush1.msra.mxu1 %v20181_v41  ;;  %2723 = vmatprep.subr.mxu0 %v19991_v38  ;;  %v20191_v41 = vld [vmem:[#allocation154_spill] sm:$0xff] }
 0x234   :  { %2907 = vmatprep.subr.mxu1 %v20182_v15  ;;  %2725 = vmatpush1.msra.mxu0 %v20183_v19  ;;  %v20193_v15 = vld [vmem:[#allocation157_spill] sm:$0xff] }
 0x235   :  { %2913 = vmatpush1.msra.mxu1 %v20184_v39  ;;  %2727 = vmatprep.subr.mxu0 %v20185_v11  ;;  %v20195_v39 = vld [vmem:[#allocation162_spill] sm:$0xff] }
 0x236   :  { %2919 = vmatprep.subr.mxu1 %v20186_v24  ;;  %2729 = vmatpush1.msra.mxu0 %v20187_v46  ;;  %v20197_v24 = vld [vmem:[#allocation165_spill] sm:$0xff] }
 0x237   :  { %2925 = vmatpush1.msra.mxu1 %v20188_v50  ;;  %2731 = vmatprep.subr.mxu0 %v20189_v13  ;;  %v20199_v50 = vld [vmem:[#allocation171_spill] sm:$0xff] }
 0x238   :  { %2931 = vmatprep.subr.mxu1 %v20190_v52  ;;  %2733 = vmatpush1.msra.mxu0 %v20191_v41  ;;  %v20201_v52 = vld [vmem:[#allocation175_spill] sm:$0xff] }
 0x239   :  { %2937 = vmatpush1.msra.mxu1 %v20192_v34  ;;  %2735 = vmatprep.subr.mxu0 %v20193_v15  ;;  %v20203_v34 = vld [vmem:[#allocation184_spill] sm:$0xff] }
 0x23a   :  { %2943 = vmatprep.subr.mxu1 %v20194_v8  ;;  %2737 = vmatpush1.msra.mxu0 %v20195_v39  ;;  %v20205_v8 = vld [vmem:[#allocation187_spill] sm:$0xff] }
 0x23b   :  { %2949 = vmatpush1.msra.mxu1 %v20196_v0  ;;  %2739 = vmatprep.subr.mxu0 %v20197_v24  ;;  %v20207_v0 = vld [vmem:[#allocation189_spill] sm:$0xff] }
 0x23c   :  { %2955 = vmatprep.subr.mxu1 %v20198_v26  ;;  %2741 = vmatpush1.msra.mxu0 %v20199_v50  ;;  %v20209_v26 = vld [vmem:[#allocation190_spill] sm:$0xff] }
 0x23d   :  { %2961 = vmatpush1.msra.mxu1 %v20200_v44  ;;  %2743 = vmatprep.subr.mxu0 %v20201_v52  ;;  %v20211_v44 = vld [vmem:[#allocation193_spill] sm:$0xff] }
 0x23e   :  { %2967 = vmatprep.subr.mxu1 %v20202_v21  ;;  %2745 = vmatpush1.msra.mxu0 %v20203_v34  ;;  %v20213_v21 = vld [vmem:[#allocation200_spill] sm:$0xff] }
 0x23f   :  { %2973 = vmatpush1.msra.mxu1 %v20204_v23  ;;  %2747 = vmatprep.subr.mxu0 %v20205_v8  ;;  %v20215_v23 = vld [vmem:[#allocation204_spill] sm:$0xff] }
 0x240   :  { %2979 = vmatprep.subr.mxu1 %v20206_v9  ;;  %2749 = vmatpush1.msra.mxu0 %v20207_v0  ;;  %v20217_v9 = vld [vmem:[#allocation207_spill] sm:$0xff] }
 0x241   :  { %2985 = vmatpush1.msra.mxu1 %v20208_v45  ;;  %2751 = vmatprep.subr.mxu0 %v20209_v26  ;;  %v20222_v45 = vld [vmem:[#allocation224_spill] sm:$0xff] }
 0x242   :  { %2991 = vmatprep.subr.mxu1 %v20210_v42  ;;  %2753 = vmatpush1.msra.mxu0 %v20211_v44  ;;  %v20218_v42 = vld [vmem:[#allocation209_spill] sm:$0xff] }
 0x243   :  { %2997 = vmatpush1.msra.mxu1 %v20212_v17  ;;  %2755 = vmatprep.subr.mxu0 %v20213_v21  ;;  %v20219_v17 = vld [vmem:[#allocation212_spill] sm:$0xff] }
 0x244   :  { %3003 = vmatprep.subr.mxu1 %v20214_v7  ;;  %2757 = vmatpush1.msra.mxu0 %v20215_v23  ;;  %v20220_v7 = vld [vmem:[#allocation216_spill] sm:$0xff] }
 0x245   :  { %3009 = vmatpush1.msra.mxu1 %v20216_v56  ;;  %3042 = vmatprep.mubr.f32.mxu1 %v19817_v55  ;;  %v20221_v56 = vld [vmem:[#allocation220_spill] sm:$0xff] }
 0x246   :  { %2759 = vmatprep.subr.mxu0 %v20217_v9  ;;  %3044 = vmatmul.mubr.f32.vlgmr.msra.gmra.mxu1 %v15912_v18 }
 0x247   :  { %3188 = vmatprep.subr.mxu1 %v15103_v49  ;;  %2761 = vmatpush1.msra.mxu0 %v20218_v42 }
 0x248   :  { %3190 = vmatpush1.msra.mxu1 %v15113_v60  ;;  %2763 = vmatprep.subr.mxu0 %v20219_v17 }
 0x249   :  { %3192 = vmatprep.subr.mxu1 %v15120_v14  ;;  %2765 = vmatpush1.msra.mxu0 %v20220_v7 }
 0x24a   :  { %3194 = vmatpush1.msra.mxu1 %v15124_v61  ;;  %2767 = vmatprep.subr.mxu0 %v20221_v56 }
 0x24b   :  { %3196 = vmatprep.subr.mxu1 %v19988_v47  ;;  %2769 = vmatpush1.msra.mxu0 %v20222_v45 }
 0x24c   :  { %3198 = vmatpush1.msra.mxu1 %v19989_v4  ;;  %2771 = vmatprep.subr.mxu0 %v20223_v37 }
 0x24d   :  { %3200 = vmatprep.subr.mxu1 %v19991_v38  ;;  %2773 = vmatpush1.msra.mxu0 %v20224_v53 }
 0x24e   :  { %2806 = vmatprep.mubr.f32.mxu0 %v19817_v55  ;;  %3202 = vmatpush1.msra.mxu1 %v20183_v19 }
 0x24f   :  { %2812 = vmatmul.mubr.f32.vlgmr.msra.gmra.mxu0 %v15931_v31  ;;  %3052 = vmatprep.subr.mxu0 %v20225_v2  ;;  %v20230_v31 = vld [vmem:[#allocation147_spill] sm:$0xff]  ;;  %v20231_v2 = vld [vmem:[#allocation153_spill] sm:$0xff] }
 0x250   :  { %3204 = vmatprep.subr.mxu1 %v20185_v11  ;;  %3055 = vmatpush1.msra.mxu0 %v20226_v22  ;;  %v20232_v22 = vld [vmem:[#allocation159_spill] sm:$0xff] }
 0x251   :  { %3206 = vmatpush1.msra.mxu1 %v20187_v46  ;;  %3058 = vmatprep.subr.mxu0 %v20227_v6  ;;  %v20233_v6 = vld [vmem:[#allocation160_spill] sm:$0xff] }
 0x252   :  { %3208 = vmatprep.subr.mxu1 %v20189_v13  ;;  %3061 = vmatpush1.msra.mxu0 %v20228_v57  ;;  %v20234_v57 = vld [vmem:[#allocation161_spill] sm:$0xff] }
 0x253   :  { %3210 = vmatpush1.msra.mxu1 %v20191_v41  ;;  %3064 = vmatprep.subr.mxu0 %v20229_v12  ;;  %v20235_v12 = vld [vmem:[#allocation164_spill] sm:$0xff] }
 0x254   :  { %3212 = vmatprep.subr.mxu1 %v20193_v15  ;;  %3067 = vmatpush1.msra.mxu0 %v20230_v31  ;;  %v20236_v31 = vld [vmem:[#allocation166_spill] sm:$0xff] }
 0x255   :  { %3214 = vmatpush1.msra.mxu1 %v20195_v39  ;;  %3070 = vmatprep.subr.mxu0 %v20231_v2  ;;  %v20237_v2 = vld [vmem:[#allocation169_spill] sm:$0xff] }
 0x256   :  { %3216 = vmatprep.subr.mxu1 %v20197_v24  ;;  %3073 = vmatpush1.msra.mxu0 %v20232_v22  ;;  %v20238_v22 = vld [vmem:[#allocation180_spill] sm:$0xff] }
 0x257   :  { %3218 = vmatpush1.msra.mxu1 %v20199_v50  ;;  %3076 = vmatprep.subr.mxu0 %v20233_v6  ;;  %v20239_v6 = vld [vmem:[#allocation183_spill] sm:$0xff] }
 0x258   :  { %3220 = vmatprep.subr.mxu1 %v20201_v52  ;;  %3079 = vmatpush1.msra.mxu0 %v20234_v57  ;;  %v20240_v57 = vld [vmem:[#allocation185_spill] sm:$0xff] }
 0x259   :  { %3222 = vmatpush1.msra.mxu1 %v20203_v34  ;;  %3082 = vmatprep.subr.mxu0 %v20235_v12  ;;  %v20241_v12 = vld [vmem:[#allocation188_spill] sm:$0xff] }
 0x25a   :  { %3224 = vmatprep.subr.mxu1 %v20205_v8  ;;  %3085 = vmatpush1.msra.mxu0 %v20236_v31  ;;  %v20242_v31 = vld [vmem:[#allocation198_spill] sm:$0xff] }
 0x25b   :  { %3226 = vmatpush1.msra.mxu1 %v20207_v0  ;;  %3088 = vmatprep.subr.mxu0 %v20237_v2  ;;  %v20243_v2 = vld [vmem:[#allocation202_spill] sm:$0xff] }
 0x25c   :  { %3228 = vmatprep.subr.mxu1 %v20209_v26  ;;  %3091 = vmatpush1.msra.mxu0 %v20238_v22  ;;  %v20244_v22 = vld [vmem:[#allocation205_spill] sm:$0xff] }
 0x25d   :  { %3230 = vmatpush1.msra.mxu1 %v20211_v44  ;;  %3094 = vmatprep.subr.mxu0 %v20239_v6  ;;  %v20245_v6 = vld [vmem:[#allocation208_spill] sm:$0xff] }
 0x25e   :  { %3232 = vmatprep.subr.mxu1 %v20213_v21  ;;  %3097 = vmatpush1.msra.mxu0 %v20240_v57  ;;  %v20246_v57 = vld [vmem:[#allocation211_spill] sm:$0xff] }
 0x25f   :  { %3234 = vmatpush1.msra.mxu1 %v20215_v23  ;;  %3100 = vmatprep.subr.mxu0 %v20241_v12  ;;  %v20247_v12 = vld [vmem:[#allocation214_spill] sm:$0xff] }
 0x260   :  { %3236 = vmatprep.subr.mxu1 %v20217_v9  ;;  %3103 = vmatpush1.msra.mxu0 %v20242_v31  ;;  %v20248_v31 = vld [vmem:[#allocation218_spill] sm:$0xff] }
 0x261   :  { %3238 = vmatpush1.msra.mxu1 %v20218_v42  ;;  %3106 = vmatprep.subr.mxu0 %v20243_v2  ;;  %v20288_v2 = vld [vmem:[#allocation247_spill] sm:$0xff] }
 0x262   :  { %3240 = vmatprep.subr.mxu1 %v20219_v17  ;;  %3109 = vmatpush1.msra.mxu0 %v20244_v22  ;;  %v20249_v22 = vld [vmem:[#allocation222_spill] sm:$0xff] }
 0x263   :  { %3242 = vmatpush1.msra.mxu1 %v20220_v7  ;;  %3112 = vmatprep.subr.mxu0 %v20245_v6  ;;  %v20250_v6 = vld [vmem:[#allocation228_spill] sm:$0xff] }
 0x264   :  { %3244 = vmatprep.subr.mxu1 %v20221_v56  ;;  %3115 = vmatpush1.msra.mxu0 %v20246_v57  ;;  %v20251_v57 = vld [vmem:[#allocation231_spill] sm:$0xff] }
 0x265   :  { %3246 = vmatpush1.msra.mxu1 %v20222_v45  ;;  %3118 = vmatprep.subr.mxu0 %v20247_v12  ;;  %v20252_v12 = vld [vmem:[#allocation234_spill] sm:$0xff] }
 0x266   :  { %3248 = vmatprep.subr.mxu1 %v20223_v37  ;;  %3121 = vmatpush1.msra.mxu0 %v20248_v31  ;;  %v20253_v31 = vld [vmem:[#allocation236_spill] sm:$0xff] }
 0x267   :  { %3250 = vmatpush1.msra.mxu1 %v20224_v53  ;;  %3283 = vmatprep.mubr.f32.mxu1 %v19817_v55 }
 0x268   :  { %3124 = vmatprep.subr.mxu0 %v20249_v22  ;;  %3287 = vmatmul.mubr.f32.vlgmr.msra.gmra.mxu1 %v15923_v54  ;;  %v20254_v22 = vld [vmem:[#allocation239_spill] sm:$0xff]  ;;  %v20255_v54 = vld [vmem:[#allocation242_spill] sm:$0xff] }
 0x269   :  { %3462 = vmatprep.subr.mxu1 %v15103_v49  ;;  %3127 = vmatpush1.msra.mxu0 %v20250_v6  ;;  %v20256_v6 = vld [vmem:[#allocation245_spill] sm:$0xff] }
 0x26a   :  { %3464 = vmatpush1.msra.mxu1 %v15113_v60  ;;  %3130 = vmatprep.subr.mxu0 %v20251_v57  ;;  %v20283_v57 = vld [vmem:[#allocation233_spill] sm:$0xff] }
 0x26b   :  { %3466 = vmatprep.subr.mxu1 %v15120_v14  ;;  %3133 = vmatpush1.msra.mxu0 %v20252_v12  ;;  %v20257_v12 = vld [vmem:[#allocation146_spill] sm:$0xff] }
 0x26c   :  { %3468 = vmatpush1.msra.mxu1 %v15124_v61  ;;  %3136 = vmatprep.subr.mxu0 %v20253_v31  ;;  %v20258_v31 = vld [vmem:[#allocation150_spill] sm:$0xff] }
 0x26d   :  { %3470 = vmatprep.subr.mxu1 %v19988_v47  ;;  %3139 = vmatpush1.msra.mxu0 %v20254_v22  ;;  %v20259_v22 = vld [vmem:[#allocation152_spill] sm:$0xff] }
 0x26e   :  { %3472 = vmatpush1.msra.mxu1 %v19989_v4  ;;  %3142 = vmatprep.subr.mxu0 %v20255_v54  ;;  %v20260_v54 = vld [vmem:[#allocation155_spill] sm:$0xff] }
 0x26f   :  { %3474 = vmatprep.subr.mxu1 %v19991_v38  ;;  %3145 = vmatpush1.msra.mxu0 %v20256_v6  ;;  %v20261_v6 = vld [vmem:[#allocation156_spill] sm:$0xff] }
 0x270   :  { %3178 = vmatprep.mubr.f32.mxu0 %v19817_v55  ;;  %3476 = vmatpush1.msra.mxu1 %v20183_v19 }
 0x271   :  { %3181 = vmatmul.mubr.f32.vlgmr.msra.gmra.mxu0 %v15916_v36  ;;  %3296 = vmatprep.subr.mxu0 %v20257_v12  ;;  %v20262_v36 = vld [vmem:[#allocation158_spill] sm:$0xff]  ;;  %v20263_v12 = vld [vmem:[#allocation163_spill] sm:$0xff] }
 0x272   :  { %3478 = vmatprep.subr.mxu1 %v20185_v11  ;;  %3300 = vmatpush1.msra.mxu0 %v20258_v31  ;;  %v20264_v31 = vld [vmem:[#allocation168_spill] sm:$0xff]  ;;  %v14132_v11 = vld [vmem:[%s18931_s1 + $0x28] sm:$0xff] }
 0x273   :  { %3480 = vmatpush1.msra.mxu1 %v20187_v46  ;;  %3304 = vmatprep.subr.mxu0 %v20259_v22  ;;  %v20265_v22 = vld [vmem:[#allocation172_spill] sm:$0xff] }
 0x274   :  { %3482 = vmatprep.subr.mxu1 %v20189_v13  ;;  %3308 = vmatpush1.msra.mxu0 %v20260_v54  ;;  %v20266_v54 = vld [vmem:[#allocation173_spill] sm:$0xff] }
 0x275   :  { %3484 = vmatpush1.msra.mxu1 %v20191_v41  ;;  %3312 = vmatprep.subr.mxu0 %v20261_v6  ;;  %v20267_v6 = vld [vmem:[#allocation176_spill] sm:$0xff] }
 0x276   :  { %3486 = vmatprep.subr.mxu1 %v20193_v15  ;;  %3316 = vmatpush1.msra.mxu0 %v20262_v36  ;;  %v20268_v36 = vld [vmem:[#allocation179_spill] sm:$0xff] }
 0x277   :  { %3488 = vmatpush1.msra.mxu1 %v20195_v39  ;;  %3320 = vmatprep.subr.mxu0 %v20263_v12  ;;  %v20269_v12 = vld [vmem:[#allocation182_spill] sm:$0xff] }
 0x278   :  { %3490 = vmatprep.subr.mxu1 %v20197_v24  ;;  %3324 = vmatpush1.msra.mxu0 %v20264_v31  ;;  %v20270_v31 = vld [vmem:[#allocation191_spill] sm:$0xff] }
 0x279   :  { %3492 = vmatpush1.msra.mxu1 %v20199_v50  ;;  %3328 = vmatprep.subr.mxu0 %v20265_v22  ;;  %v20271_v22 = vld [vmem:[#allocation194_spill] sm:$0xff] }
 0x27a   :  { %3494 = vmatprep.subr.mxu1 %v20201_v52  ;;  %3332 = vmatpush1.msra.mxu0 %v20266_v54  ;;  %v20272_v54 = vld [vmem:[#allocation197_spill] sm:$0xff] }
 0x27b   :  { %3496 = vmatpush1.msra.mxu1 %v20203_v34  ;;  %3336 = vmatprep.subr.mxu0 %v20267_v6  ;;  %v20273_v6 = vld [vmem:[#allocation201_spill] sm:$0xff] }
 0x27c   :  { %3498 = vmatprep.subr.mxu1 %v20205_v8  ;;  %3340 = vmatpush1.msra.mxu0 %v20268_v36  ;;  %v20274_v36 = vld [vmem:[#allocation210_spill] sm:$0xff] }
 0x27d   :  { %3500 = vmatpush1.msra.mxu1 %v20207_v0  ;;  %3344 = vmatprep.subr.mxu0 %v20269_v12  ;;  %v20275_v12 = vld [vmem:[#allocation213_spill] sm:$0xff] }
 0x27e   :  { %3502 = vmatprep.subr.mxu1 %v20209_v26  ;;  %3348 = vmatpush1.msra.mxu0 %v20270_v31  ;;  %v20276_v31 = vld [vmem:[#allocation217_spill] sm:$0xff] }
 0x27f   :  { %3504 = vmatpush1.msra.mxu1 %v20211_v44  ;;  %3352 = vmatprep.subr.mxu0 %v20271_v22  ;;  %v20277_v22 = vld [vmem:[#allocation221_spill] sm:$0xff] }
 0x280   :  { %3506 = vmatprep.subr.mxu1 %v20213_v21  ;;  %3356 = vmatpush1.msra.mxu0 %v20272_v54  ;;  %v20278_v54 = vld [vmem:[#allocation225_spill] sm:$0xff] }
 0x281   :  { %3508 = vmatpush1.msra.mxu1 %v20215_v23  ;;  %3360 = vmatprep.subr.mxu0 %v20273_v6  ;;  %v20279_v6 = vld [vmem:[#allocation137_spill] sm:$0xff] }
 0x282   :  { %3510 = vmatprep.subr.mxu1 %v20217_v9  ;;  %3364 = vmatpush1.msra.mxu0 %v20274_v36  ;;  %vm3595_vm2 = vcmp.eq.s32.totalorder %v20279_v6, 1  ;;  %v20280_v36 = vld [vmem:[#allocation227_spill] sm:$0xff]  ;;  %v20285_v6 = vld [vmem:[#allocation241_spill] sm:$0xff] }
 0x283   :  { %3512 = vmatpush1.msra.mxu1 %v20218_v42  ;;  %3368 = vmatprep.subr.mxu0 %v20275_v12  ;;  %v20281_v12 = vld [vmem:[#allocation230_spill] sm:$0xff] }
 0x284   :  { %3514 = vmatprep.subr.mxu1 %v20219_v17  ;;  %3372 = vmatpush1.msra.mxu0 %v20276_v31  ;;  %v20282_v31 = vmov 0  }
 0x285   :  { %3516 = vmatpush1.msra.mxu1 %v20220_v7  ;;  %3376 = vmatprep.subr.mxu0 %v20277_v22  ;;  %v3596_v22 = vsel %vm3595_vm2, 1, %v20282_v31  ;;  %v20290_v31 = vld [vmem:[#allocation249_spill] sm:$0xff] }
 0x286   :  { %3518 = vmatprep.subr.mxu1 %v20221_v56  ;;  %3380 = vmatpush1.msra.mxu0 %v20278_v54  ;;  %v20284_v54 = vld [vmem:[#allocation238_spill] sm:$0xff] }
 0x287   :  { %3520 = vmatpush1.msra.mxu1 %v20222_v45  ;;  %3384 = vmatprep.subr.mxu0 %v20280_v36  ;;  %v20286_v36 = vld [vmem:[#allocation244_spill] sm:$0xff]  ;;  %v20294_v45 = vld [vmem:[#allocation253_spill] sm:$0xff] }
 0x288   :  { %3522 = vmatprep.subr.mxu1 %v20223_v37  ;;  %3388 = vmatpush1.msra.mxu0 %v20281_v12  ;;  %v20287_v12 = vld [vmem:[#allocation34_spill] sm:$0xff]  ;;  %v20292_v37 = vld [vmem:[#allocation251_spill] sm:$0xff] }
 0x289   :  { %3524 = vmatpush1.msra.mxu1 %v20224_v53  ;;  %3557 = vmatprep.mubr.f32.mxu1 %v19817_v55  ;;  %v20289_v53 = vld [vmem:[#allocation37_spill] sm:$0xff] }
 0x28a   :  { %3392 = vmatprep.subr.mxu0 %v20283_v57  ;;  %3559 = vmatmul.mubr.f32.vlgmr.msra.gmra.mxu1 %v15912_v18  ;;  %v20291_v57 = vld [vmem:[#allocation38_spill] sm:$0xff] }
 0x28b   :  { %3396 = vmatpush1.msra.mxu0 %v20284_v54  ;;  %3453 = vmatprep.mubr.f32.mxu0 %v19817_v55  ;;  %v20293_v54 = vld [vmem:[#allocation40_spill] sm:$0xff] }
 0x28c   :  { %3400 = vmatprep.subr.mxu0 %v20285_v6  ;;  %3598 = vperm.xlu0 %14183, %v3596_v22   ;;  %v20295_v6 = vld [vmem:[#allocation43_spill] sm:$0xff]  ;;  %v20296_v22 = vld [vmem:[#allocation46_spill] sm:$0xff] }
 0x28d   :  { %3404 = vmatpush1.msra.mxu0 %v20286_v36  ;;  %3720 = vmatprep.subr.mxu1 %v20287_v12  ;;  %v20297_v12 = vld [vmem:[#allocation50_spill] sm:$0xff] }
 0x28e   :  { %3408 = vmatprep.subr.mxu0 %v20288_v2  ;;  %3726 = vmatpush1.msra.mxu1 %v20289_v53  ;;  %v20298_v53 = vld [vmem:[#allocation60_spill] sm:$0xff]  ;;  %v20332_v2 = vld [vmem:[#allocation102_spill] sm:$0xff] }
 0x28f   :  { %3412 = vmatpush1.msra.mxu0 %v20290_v31  ;;  %3732 = vmatprep.subr.mxu1 %v20291_v57  ;;  %v20299_v57 = vld [vmem:[#allocation63_spill] sm:$0xff]  ;;  %v20330_v31 = vld [vmem:[#allocation93_spill] sm:$0xff] }
 0x290   :  { %3416 = vmatprep.subr.mxu0 %v20292_v37  ;;  %3738 = vmatpush1.msra.mxu1 %v20293_v54  ;;  %v20300_v54 = vld [vmem:[#allocation66_spill] sm:$0xff]  ;;  %v20325_v37 = vld [vmem:[#allocation136_spill] sm:$0xff] }
 0x291   :  { %3420 = vmatpush1.msra.mxu0 %v20294_v45  ;;  %3744 = vmatprep.subr.mxu1 %v20295_v6  ;;  %v20301_v6 = vld [vmem:[#allocation69_spill] sm:$0xff]  ;;  %v20323_v45 = vld [vmem:[#allocation135_spill] sm:$0xff] }
 0x292   :  { %3455 = vmatmul.mubr.f32.vlgmr.msra.gmra.mxu0 %v15912_v18  ;;  %3750 = vmatpush1.msra.mxu1 %v20296_v22  ;;  %v20302_v18 = vld [vmem:[#allocation72_spill] sm:$0xff]  ;;  %v20321_v22 = vld [vmem:[#allocation134_spill] sm:$0xff] }
 0x293   :  { %3756 = vmatprep.subr.mxu1 %v20297_v12  ;;  %3608 = vmatprep.subr.mxu0 %v20038_v29  ;;  %v20303_v12 = vld [vmem:[#allocation75_spill] sm:$0xff] }
 0x294   :  { %3762 = vmatpush1.msra.mxu1 %v20298_v53  ;;  %3610 = vmatpush1.msra.mxu0 %v20039_v20  ;;  %v20304_v53 = vld [vmem:[#allocation79_spill] sm:$0xff] }
 0x295   :  { %3768 = vmatprep.subr.mxu1 %v20299_v57  ;;  %3612 = vmatprep.subr.mxu0 %v20040_v43  ;;  %v20305_v57 = vld [vmem:[#allocation85_spill] sm:$0xff] }
 0x296   :  { %3774 = vmatpush1.msra.mxu1 %v20300_v54  ;;  %3614 = vmatpush1.msra.mxu0 %v20041_v32  ;;  %v20306_v54 = vld [vmem:[#allocation89_spill] sm:$0xff] }
 0x297   :  { %3780 = vmatprep.subr.mxu1 %v20301_v6  ;;  %3616 = vmatprep.subr.mxu0 %v20042_v16  ;;  %v20307_v6 = vld [vmem:[#allocation95_spill] sm:$0xff] }
 0x298   :  { %3786 = vmatpush1.msra.mxu1 %v20302_v18  ;;  %3618 = vmatpush1.msra.mxu0 %v20045_v28  ;;  %v20308_v18 = vld [vmem:[#allocation98_spill] sm:$0xff] }
 0x299   :  { %3792 = vmatprep.subr.mxu1 %v20303_v12  ;;  %3620 = vmatprep.subr.mxu0 %v20047_v30  ;;  %v20309_v12 = vld [vmem:[#allocation101_spill] sm:$0xff] }
 0x29a   :  { %3798 = vmatpush1.msra.mxu1 %v20304_v53  ;;  %3622 = vmatpush1.msra.mxu0 %v20049_v5  ;;  %v20310_v53 = vld [vmem:[#allocation104_spill] sm:$0xff] }
 0x29b   :  { %3804 = vmatprep.subr.mxu1 %v20305_v57  ;;  %3624 = vmatprep.subr.mxu0 %v20051_v35  ;;  %v20311_v57 = vld [vmem:[#allocation107_spill] sm:$0xff] }
 0x29c   :  { %3810 = vmatpush1.msra.mxu1 %v20306_v54  ;;  %3626 = vmatpush1.msra.mxu0 %v20053_v59  ;;  %v20312_v54 = vld [vmem:[#allocation110_spill] sm:$0xff] }
 0x29d   :  { %3816 = vmatprep.subr.mxu1 %v20307_v6  ;;  %3628 = vmatprep.subr.mxu0 %v20055_v10  ;;  %v20313_v6 = vld [vmem:[#allocation116_spill] sm:$0xff] }
 0x29e   :  { %3822 = vmatpush1.msra.mxu1 %v20308_v18  ;;  %3630 = vmatpush1.msra.mxu0 %v20057_v48  ;;  %v20314_v18 = vld [vmem:[#allocation119_spill] sm:$0xff] }
 0x29f   :  { %3828 = vmatprep.subr.mxu1 %v20309_v12  ;;  %3632 = vmatprep.subr.mxu0 %v20059_v3  ;;  %v20315_v12 = vld [vmem:[#allocation122_spill] sm:$0xff] }
 0x2a0   :  { %3834 = vmatpush1.msra.mxu1 %v20310_v53  ;;  %3634 = vmatpush1.msra.mxu0 %v20061_v63  ;;  %v20316_v53 = vld [vmem:[#allocation125_spill] sm:$0xff] }
 0x2a1   :  { %3840 = vmatprep.subr.mxu1 %v20311_v57  ;;  %3636 = vmatprep.subr.mxu0 %v20063_v40  ;;  %v20317_v57 = vld [vmem:[#allocation127_spill] sm:$0xff] }
 0x2a2   :  { %3846 = vmatpush1.msra.mxu1 %v20312_v54  ;;  %3638 = vmatpush1.msra.mxu0 %v20065_v33  ;;  %v20318_v54 = vld [vmem:[#allocation130_spill] sm:$0xff]  ;;  %v2190_v7 = vpop.f32.mrf.mxu1 }
 0x2a3   :  { %3852 = vmatprep.subr.mxu1 %v20313_v6  ;;  %3640 = vmatprep.subr.mxu0 %v20067_v58  ;;  %v20319_v6 = vld [vmem:[#allocation132_spill] sm:$0xff] }
 0x2a4   :  { %3858 = vmatpush1.msra.mxu1 %v20314_v18  ;;  %3642 = vmatpush1.msra.mxu0 %v20069_v1  ;;  %v20320_v18 = vld [vmem:[#allocation65_spill] sm:$0xff]  ;;  %v2192_v42 = vpop.f32.mrf.mxu1 }
 0x2a5   :  { %3864 = vmatprep.subr.mxu1 %v20315_v12  ;;  %3644 = vmatprep.subr.mxu0 %v20071_v25  ;;  %v20322_v12 = vld [vmem:[#allocation70_spill] sm:$0xff] }
 0x2a6   :  { %3870 = vmatpush1.msra.mxu1 %v20316_v53  ;;  %3646 = vmatpush1.msra.mxu0 %v20073_v62  ;;  %v20324_v53 = vld [vmem:[#allocation74_spill] sm:$0xff] }
 0x2a7   :  { %3876 = vmatprep.subr.mxu1 %v20317_v57  ;;  %3648 = vmatprep.subr.mxu0 %v20075_v27  ;;  %v20327_v57 = vld [vmem:[#allocation81_spill] sm:$0xff] }
 0x2a8   :  { %3882 = vmatpush1.msra.mxu1 %v20318_v54  ;;  %3650 = vmatpush1.msra.mxu0 %v20077_v51  ;;  %v20326_v54 = vld [vmem:[#allocation78_spill] sm:$0xff] }
 0x2a9   :  { %3888 = vmatprep.subr.mxu1 %v20319_v6  ;;  %3652 = vmatprep.subr.mxu0 %v20320_v18  ;;  %v20328_v6 = vld [vmem:[#allocation84_spill] sm:$0xff] }
 0x2aa   :  { %3894 = vmatpush1.msra.mxu1 %v20321_v22  ;;  %3654 = vmatpush1.msra.mxu0 %v20322_v12  ;;  %v20329_v22 = vld [vmem:[#allocation88_spill] sm:$0xff]  ;;  %v1958_v36 = vpop.f32.mrf.mxu0 }
 0x2ab   :  { %3900 = vmatprep.subr.mxu1 %v20323_v45  ;;  %3656 = vmatprep.subr.mxu0 %v20324_v53  ;;  %v20331_v45 = vld [vmem:[#allocation97_spill] sm:$0xff]  ;;  %v2191_v21 = vadd.f32 %v2190_v7, %v1958_v36 }
 0x2ac   :  { %3906 = vmatpush1.msra.mxu1 %v20325_v37  ;;  %3939 = vmatprep.mubr.f32.mxu1 %v19817_v55  ;;  %v20333_v37 = vld [vmem:[#allocation16_spill] sm:$0xff]  ;;  %v1960_v56 = vpop.f32.mrf.mxu0 }
 0x2ad   :  { %4085 = vmatprep.subr.mxu1 %v20038_v29  ;;  %3658 = vmatpush1.msra.mxu0 %v20326_v54  ;;  %v2193_v23 = vadd.f32 %v2192_v42, %v1960_v56  ;;  %v14131_v56 = vld [vmem:[%s18931_s1 + $0x20] sm:$0xff] }
 0x2ae   :  { %3660 = vmatprep.subr.mxu0 %v20327_v57  ;;  %3703 = vmatprep.mubr.f32.mxu0 %v19817_v55 }
 0x2af   :  { %3662 = vmatpush1.msra.mxu0 %v20328_v6 }
 0x2b0   :  { %3664 = vmatprep.subr.mxu0 %v20329_v22 }
 0x2b1   :  { %3666 = vmatpush1.msra.mxu0 %v20330_v31 }
 0x2b2   :  { %3668 = vmatprep.subr.mxu0 %v20331_v45 }
 0x2b3   :  { %3670 = vmatpush1.msra.mxu0 %v20332_v2 }
 0x2b4   :  { %3949 = vmatprep.subr.mxu0 %v20333_v37 }
 0x2c2   :  { %v2433_v44 = vpop.f32.mrf.mxu1 }
 0x2c4   :  { %v2435_v34 = vpop.f32.mrf.mxu1 }
 0x2cb   :  { %v2327_v17 = vpop.f32.mrf.mxu0 }
 0x2cc   :  { %v2328_v8 = vadd.f32 %v2327_v17, %v2191_v21 }
 0x2cd   :  { %v2329_v9 = vpop.f32.mrf.mxu0 }
 0x2ce   :  { %v2330_v0 = vadd.f32 %v2329_v9, %v2193_v23  ;;  %v2434_v39 = vadd.f32 %v2433_v44, %v2328_v8 }
 0x2d0   :  { %v2436_v50 = vadd.f32 %v2435_v34, %v2330_v0 }
 0x2e4   :  { %v2705_v24 = vpop.f32.mrf.mxu1 }
 0x2e6   :  { %v2707_v37 = vpop.f32.mrf.mxu1 }
 0x2ed   :  { %v2601_v26 = vpop.f32.mrf.mxu0 }
 0x2ee   :  { %v2602_v41 = vadd.f32 %v2601_v26, %v2434_v39 }
 0x2ef   :  { %v2603_v52 = vpop.f32.mrf.mxu0 }
 0x2f0   :  { %v2604_v15 = vadd.f32 %v2603_v52, %v2436_v50  ;;  %v2706_v46 = vadd.f32 %v2705_v24, %v2602_v41 }
 0x2f2   :  { %v2708_v13 = vadd.f32 %v2707_v37, %v2604_v15  ;;  %v3565_v17 = vadd.f32 %v14131_v56, %v2706_v46 }
 0x2f4   :  { %v3566_v7 = vadd.f32 %v14132_v11, %v2708_v13  ;;  %v14135_v9 = vmul.f32 -1.442695, %v3565_v17 }
 0x2f6   :  { %v14136_v42 = vmul.f32 -1.442695, %v3566_v7 }
 0x2f8   :  { %14201 = vpow2.f32 %v14136_v42  ;;  %v14133_v42 = vld [vmem:[%s18931_s1 + $0x30] sm:$0xff] }
 0x2f9   :  { %14203 = vpow2.f32 %v14135_v9 }
 0x305   :  { %v14202_v34 = vpop.eup %14201 }
 0x306   :  { %v3045_v21 = vpop.f32.mrf.mxu1  ;;  %v14204_v41 = vpop.eup %14203  ;;  %v3578_v36 = vadd.f32 1.0, %v14202_v34  ;;  %v20334_v34 = vld [vmem:[#allocation138_spill] sm:$0xff] }
 0x307   :  { %v3572_v17 = vadd.f32 1.0, %v14204_v41 }
 0x308   :  { %v3047_v37 = vpop.f32.mrf.mxu1  ;;  %14205 = vrcp.f32 %v3578_v36  ;;  %v1847_v36 = vpop.permute.xlu0 %1846 }
 0x309   :  { %14207 = vrcp.f32 %v3572_v17  ;;  %v99_v17 = vld [vmem:[#allocation4] sm:$0xff]  ;;  %vm1848_vm3 = vcmp.eq.s32.totalorder %v1847_v36, 1  ;;  %v20346_v36 = vld [vmem:[#allocation48_spill] sm:$0xff] }
 0x30f   :  { %v2813_v23 = vpop.f32.mrf.mxu0 }
 0x310   :  { %v3046_v0 = vadd.f32 %v3045_v21, %v2813_v23 }
 0x311   :  { %v2815_v44 = vpop.f32.mrf.mxu0 }
 0x312   :  { %v3048_v24 = vadd.f32 %v3047_v37, %v2815_v44 }
 0x328   :  { %v3288_v8 = vpop.f32.mrf.mxu1 }
 0x32a   :  { %v3290_v50 = vpop.f32.mrf.mxu1 }
 0x331   :  { %v3182_v26 = vpop.f32.mrf.mxu0 }
 0x332   :  { %v3183_v15 = vadd.f32 %v3182_v26, %v3046_v0  ;;  %v14134_v26 = vld [vmem:[%s18931_s1 + $0x38] sm:$0xff] }
 0x333   :  { %v3184_v39 = vpop.f32.mrf.mxu0 }
 0x334   :  { %v3185_v52 = vadd.f32 %v3184_v39, %v3048_v24  ;;  %v3289_v13 = vadd.f32 %v3288_v8, %v3183_v15  ;;  %v14206_v24 = vpop.eup %14205 }
 0x335   :  { %v14208_v15 = vpop.eup %14207 }
 0x336   :  { %v3291_v7 = vadd.f32 %v3290_v50, %v3185_v52  ;;  %v3588_v50 = vmul.f32 %v14206_v24, %v20334_v34  ;;  %v20338_v24 = vld [vmem:[#allocation18_spill] sm:$0xff]  ;;  %v20341_v34 = vld [vmem:[#allocation27_spill] sm:$0xff] }
 0x34a   :  { %v3560_v46 = vpop.f32.mrf.mxu1 }
 0x34c   :  { %v3562_v44 = vpop.f32.mrf.mxu1 }
 0x352   :  { %v3456_v11 = vpop.f32.mrf.mxu0 }
 0x353   :  { %v3457_v56 = vadd.f32 %v3456_v11, %v3289_v13 }
 0x354   :  { %v3458_v9 = vpop.f32.mrf.mxu0 }
 0x355   :  { %v3561_v23 = vadd.f32 %v3560_v46, %v3457_v56  ;;  %v3459_v21 = vadd.f32 %v3458_v9, %v3291_v7  ;;  %v3599_v56 = vpop.permute.xlu0 %3598 }
 0x356   :  { %vm3600_vm4 = vcmp.eq.s32.totalorder %v3599_v56, 1  ;;  %v20347_v56 = vld [vmem:[#allocation52_spill] sm:$0xff] }
 0x357   :  { %v3567_v37 = vadd.f32 %v14133_v42, %v3561_v23  ;;  %v3563_v0 = vadd.f32 %v3562_v44, %v3459_v21  ;;  %v20336_v23 = vld [vmem:[#allocation141_spill] sm:$0xff] }
 0x358   :  { %v1849_v21 = vsel %vm1848_vm3, %v20336_v23, %v99_v17  ;;  %v20349_v17 = vld [vmem:[#allocation58_spill] sm:$0xff]  ;;  %v20352_v23 = vld [vmem:[#allocation71_spill] sm:$0xff] }
 0x359   :  { %14209 = vtanh.f32 %v3567_v37  ;;  %v3568_v8 = vadd.f32 %v14134_v26, %v3563_v0 }
 0x35b   :  { %v14137_v39 = vmul.f32 -1.442695, %v3568_v8 }
 0x35d   :  { %14211 = vpow2.f32 %v14137_v39 }
 0x366   :  { %v14210_v52 = vpop.eup %14209 }
 0x367   :  { %v3589_v41 = vmul.f32 %v14210_v52, %v14208_v15  ;;  %v20339_v15 = vld [vmem:[#allocation20_spill] sm:$0xff]  ;;  %v20340_v52 = vld [vmem:[#allocation23_spill] sm:$0xff] }
 0x369   :  { %v16348_v13 = vadd.f32 %v3589_v41, %v3588_v50  ;;  %v20342_v50 = vld [vmem:[#allocation30_spill] sm:$0xff]  ;;  %v20343_v41 = vld [vmem:[#allocation33_spill] sm:$0xff] }
 0x36a   :  { %v14212_v46 = vpop.eup %14211 }
 0x36b   :  { %20335 = vst [vmem:[#allocation113_spill] sm:$0xff] %v16348_v13  ;;  %v3585_v11 = vadd.f32 1.0, %v14212_v46  ;;  %14213 = vtanh.f32 %v16348_v13  ;;  %v20344_v46 = vld [vmem:[#allocation41_spill] sm:$0xff] }
 0x36c   :  { %v20442_v13 = vld [vmem:[#allocation257_spill] sm:$0xff] }
 0x36d   :  { %14215 = vrcp.f32 %v3585_v11  ;;  %v20345_v11 = vld [vmem:[#allocation44_spill] sm:$0xff] }
 0x378   :  { %v14214_v7 = vpop.eup %14213 }
 0x37a   :  { %v14216_v42 = vpop.eup %14215 }
 0x37b   :  { %v3592_v9 = vmul.f32 %v14216_v42, %v14214_v7  ;;  %v20348_v7 = vld [vmem:[#allocation55_spill] sm:$0xff]  ;;  %v20350_v42 = vld [vmem:[#allocation62_spill] sm:$0xff] }
 0x37d   :  { %v16352_v44 = vsel %vm3600_vm4, %v3592_v9, %v1849_v21  ;;  %v16354_v26 = vand.u32 4294901760, %v3592_v9  ;;  %v20353_v21 = vld [vmem:[#allocation77_spill] sm:$0xff] }
 0x37e   :  { %20337 = vst [vmem:[#allocation120_spill] sm:$0xff] %v16352_v44  ;;  %v20440_v44 = vld [vmem:[#allocation256_spill] sm:$0xff] }
 0x37f   :  { %v16357_v37 = vsub.f32 %v3592_v9, %v16354_v26  ;;  %3941 = vmatmul.mubr.f32.vlgmr.msra.gmra.mxu1 %v16354_v26  ;;  %v20351_v9 = vld [vmem:[#allocation68_spill] sm:$0xff] }
 0x380   :  { %4087 = vmatpush1.msra.mxu1 %v20039_v20  ;;  %4180 = vmatprep.mubr.f32.mxu1 %v19817_v55 }
 0x381   :  { %4089 = vmatprep.subr.mxu1 %v20040_v43  ;;  %v16364_v0 = vand.u32 4294901760, %v16357_v37 }
 0x382   :  { %4091 = vmatpush1.msra.mxu1 %v20041_v32 }
 0x383   :  { %4093 = vmatprep.subr.mxu1 %v20042_v16  ;;  %v3707_v8 = vsub.f32 %v16357_v37, %v16364_v0 }
 0x384   :  { %4095 = vmatpush1.msra.mxu1 %v20045_v28 }
 0x385   :  { %4097 = vmatprep.subr.mxu1 %v20047_v30  ;;  %v16372_v39 = vand.u32 4294901760, %v3707_v8  ;;  %v20354_v8 = vld [vmem:[#allocation80_spill] sm:$0xff] }
 0x386   :  { %4099 = vmatpush1.msra.mxu1 %v20049_v5 }
 0x387   :  { %4101 = vmatprep.subr.mxu1 %v20051_v35  ;;  %3709 = vmatmul.mubr.f32.vlgmr.msra.gmra.mxu0 %v16372_v39 }
 0x388   :  { %3952 = vmatpush1.msra.mxu0 %v20338_v24  ;;  %4103 = vmatpush1.msra.mxu1 %v20053_v59  ;;  %v20438_v24 = vld [vmem:[#allocation255_spill] sm:$0xff] }
 0x389   :  { %3955 = vmatprep.subr.mxu0 %v20339_v15  ;;  %4105 = vmatprep.subr.mxu1 %v20055_v10  ;;  %v20436_v15 = vld [vmem:[#allocation254_spill] sm:$0xff] }
 0x38a   :  { %3958 = vmatpush1.msra.mxu0 %v20340_v52  ;;  %4107 = vmatpush1.msra.mxu1 %v20057_v48  ;;  %v20434_v52 = vld [vmem:[#allocation252_spill] sm:$0xff] }
 0x38b   :  { %3961 = vmatprep.subr.mxu0 %v20341_v34  ;;  %4109 = vmatprep.subr.mxu1 %v20059_v3  ;;  %v20432_v34 = vld [vmem:[#allocation250_spill] sm:$0xff] }
 0x38c   :  { %3964 = vmatpush1.msra.mxu0 %v20342_v50  ;;  %4111 = vmatpush1.msra.mxu1 %v20061_v63  ;;  %v20430_v50 = vld [vmem:[#allocation248_spill] sm:$0xff] }
 0x38d   :  { %3967 = vmatprep.subr.mxu0 %v20343_v41  ;;  %4113 = vmatprep.subr.mxu1 %v20063_v40  ;;  %v20428_v41 = vld [vmem:[#allocation246_spill] sm:$0xff] }
 0x38e   :  { %3970 = vmatpush1.msra.mxu0 %v20344_v46  ;;  %4115 = vmatpush1.msra.mxu1 %v20065_v33  ;;  %v20404_v46 = vld [vmem:[#allocation181_spill] sm:$0xff] }
 0x38f   :  { %3973 = vmatprep.subr.mxu0 %v20345_v11  ;;  %4117 = vmatprep.subr.mxu1 %v20067_v58  ;;  %v20402_v11 = vld [vmem:[#allocation178_spill] sm:$0xff] }
 0x390   :  { %3976 = vmatpush1.msra.mxu0 %v20346_v36  ;;  %4119 = vmatpush1.msra.mxu1 %v20069_v1  ;;  %v20401_v36 = vld [vmem:[#allocation123_spill] sm:$0xff] }
 0x391   :  { %3979 = vmatprep.subr.mxu0 %v20347_v56  ;;  %4121 = vmatprep.subr.mxu1 %v20071_v25  ;;  %v20399_v56 = vld [vmem:[#allocation121_spill] sm:$0xff] }
 0x392   :  { %3982 = vmatpush1.msra.mxu0 %v20348_v7  ;;  %4123 = vmatpush1.msra.mxu1 %v20073_v62  ;;  %v20397_v7 = vld [vmem:[#allocation117_spill] sm:$0xff] }
 0x393   :  { %3985 = vmatprep.subr.mxu0 %v20349_v17  ;;  %4125 = vmatprep.subr.mxu1 %v20075_v27  ;;  %v20355_v17 = vld [vmem:[#allocation83_spill] sm:$0xff] }
 0x394   :  { %3988 = vmatpush1.msra.mxu0 %v20350_v42  ;;  %4127 = vmatpush1.msra.mxu1 %v20077_v51  ;;  %v20356_v42 = vld [vmem:[#allocation87_spill] sm:$0xff] }
 0x395   :  { %3991 = vmatprep.subr.mxu0 %v20351_v9  ;;  %4129 = vmatprep.subr.mxu1 %v20320_v18  ;;  %v20357_v9 = vld [vmem:[#allocation91_spill] sm:$0xff] }
 0x396   :  { %3994 = vmatpush1.msra.mxu0 %v20352_v23  ;;  %4131 = vmatpush1.msra.mxu1 %v20322_v12  ;;  %v20358_v23 = vld [vmem:[#allocation94_spill] sm:$0xff] }
 0x397   :  { %3997 = vmatprep.subr.mxu0 %v20353_v21  ;;  %4133 = vmatprep.subr.mxu1 %v20324_v53  ;;  %v20359_v21 = vld [vmem:[#allocation100_spill] sm:$0xff] }
 0x398   :  { %4000 = vmatpush1.msra.mxu0 %v20354_v8  ;;  %4135 = vmatpush1.msra.mxu1 %v20326_v54  ;;  %v20360_v8 = vld [vmem:[#allocation103_spill] sm:$0xff] }
 0x399   :  { %4003 = vmatprep.subr.mxu0 %v20355_v17  ;;  %4137 = vmatprep.subr.mxu1 %v20327_v57  ;;  %v20361_v17 = vld [vmem:[#allocation106_spill] sm:$0xff] }
 0x39a   :  { %4006 = vmatpush1.msra.mxu0 %v20356_v42  ;;  %4139 = vmatpush1.msra.mxu1 %v20328_v6  ;;  %v20367_v42 = vld [vmem:[#allocation126_spill] sm:$0xff] }
 0x39b   :  { %4009 = vmatprep.subr.mxu0 %v20357_v9  ;;  %4141 = vmatprep.subr.mxu1 %v20329_v22  ;;  %v20362_v9 = vld [vmem:[#allocation109_spill] sm:$0xff] }
 0x39c   :  { %4012 = vmatpush1.msra.mxu0 %v20358_v23  ;;  %4143 = vmatpush1.msra.mxu1 %v20330_v31  ;;  %v20363_v23 = vld [vmem:[#allocation112_spill] sm:$0xff] }
 0x39d   :  { %4015 = vmatprep.subr.mxu0 %v20359_v21  ;;  %4145 = vmatprep.subr.mxu1 %v20331_v45  ;;  %v20364_v21 = vld [vmem:[#allocation115_spill] sm:$0xff] }
 0x39e   :  { %4018 = vmatpush1.msra.mxu0 %v20360_v8  ;;  %4147 = vmatpush1.msra.mxu1 %v20332_v2  ;;  %v20365_v8 = vld [vmem:[#allocation118_spill] sm:$0xff] }
 0x39f   :  { %4021 = vmatprep.subr.mxu0 %v20361_v17  ;;  %4184 = vmatmul.mubr.f32.vlgmr.msra.gmra.mxu1 %v16364_v0  ;;  %v20366_v17 = vld [vmem:[#allocation124_spill] sm:$0xff] }
 0x3a0   :  { %4359 = vmatprep.subr.mxu1 %v20038_v29  ;;  %4024 = vmatpush1.msra.mxu0 %v20362_v9  ;;  %v20368_v9 = vld [vmem:[#allocation129_spill] sm:$0xff] }
 0x3a1   :  { %4361 = vmatpush1.msra.mxu1 %v20039_v20  ;;  %4027 = vmatprep.subr.mxu0 %v20363_v23  ;;  %v20374_v23 = vld [vmem:[#allocation35_spill] sm:$0xff] }
 0x3a2   :  { %4363 = vmatprep.subr.mxu1 %v20040_v43  ;;  %4030 = vmatpush1.msra.mxu0 %v20364_v21  ;;  %v20369_v21 = vld [vmem:[#allocation21_spill] sm:$0xff] }
 0x3a3   :  { %4365 = vmatpush1.msra.mxu1 %v20041_v32  ;;  %4033 = vmatprep.subr.mxu0 %v20365_v8  ;;  %v20370_v8 = vld [vmem:[#allocation25_spill] sm:$0xff] }
 0x3a4   :  { %4367 = vmatprep.subr.mxu1 %v20042_v16  ;;  %4036 = vmatpush1.msra.mxu0 %v20366_v17  ;;  %v20371_v17 = vld [vmem:[#allocation26_spill] sm:$0xff] }
 0x3a5   :  { %4369 = vmatpush1.msra.mxu1 %v20045_v28  ;;  %4039 = vmatprep.subr.mxu0 %v20367_v42  ;;  %v20372_v42 = vld [vmem:[#allocation29_spill] sm:$0xff] }
 0x3a6   :  { %4371 = vmatprep.subr.mxu1 %v20047_v30  ;;  %4042 = vmatpush1.msra.mxu0 %v20368_v9  ;;  %v20373_v9 = vld [vmem:[#allocation32_spill] sm:$0xff] }
 0x3a7   :  { %4075 = vmatprep.mubr.f32.mxu0 %v19817_v55  ;;  %4373 = vmatpush1.msra.mxu1 %v20049_v5 }
 0x3a8   :  { %4078 = vmatmul.mubr.f32.vlgmr.msra.gmra.mxu0 %v16357_v37  ;;  %4193 = vmatprep.subr.mxu0 %v20369_v21  ;;  %v20375_v21 = vld [vmem:[#allocation39_spill] sm:$0xff] }
 0x3a9   :  { %4375 = vmatprep.subr.mxu1 %v20051_v35  ;;  %4197 = vmatpush1.msra.mxu0 %v20370_v8  ;;  %v20376_v8 = vld [vmem:[#allocation47_spill] sm:$0xff] }
 0x3aa   :  { %4377 = vmatpush1.msra.mxu1 %v20053_v59  ;;  %4201 = vmatprep.subr.mxu0 %v20371_v17  ;;  %v20377_v17 = vld [vmem:[#allocation51_spill] sm:$0xff] }
 0x3ab   :  { %4379 = vmatprep.subr.mxu1 %v20055_v10  ;;  %4205 = vmatpush1.msra.mxu0 %v20372_v42  ;;  %v20378_v42 = vld [vmem:[#allocation54_spill] sm:$0xff] }
 0x3ac   :  { %4381 = vmatpush1.msra.mxu1 %v20057_v48  ;;  %4209 = vmatprep.subr.mxu0 %v20373_v9  ;;  %v20379_v9 = vld [vmem:[#allocation57_spill] sm:$0xff] }
 0x3ad   :  { %4383 = vmatprep.subr.mxu1 %v20059_v3  ;;  %4213 = vmatpush1.msra.mxu0 %v20374_v23  ;;  %v20380_v23 = vld [vmem:[#allocation61_spill] sm:$0xff] }
 0x3ae   :  { %4385 = vmatpush1.msra.mxu1 %v20061_v63  ;;  %4217 = vmatprep.subr.mxu0 %v20375_v21  ;;  %v20381_v21 = vld [vmem:[#allocation64_spill] sm:$0xff] }
 0x3af   :  { %4387 = vmatprep.subr.mxu1 %v20063_v40  ;;  %4221 = vmatpush1.msra.mxu0 %v20376_v8  ;;  %v20382_v8 = vld [vmem:[#allocation67_spill] sm:$0xff] }
 0x3b0   :  { %4389 = vmatpush1.msra.mxu1 %v20065_v33  ;;  %4225 = vmatprep.subr.mxu0 %v20377_v17  ;;  %v20383_v17 = vld [vmem:[#allocation73_spill] sm:$0xff] }
 0x3b1   :  { %4391 = vmatprep.subr.mxu1 %v20067_v58  ;;  %4229 = vmatpush1.msra.mxu0 %v20378_v42  ;;  %v20384_v42 = vld [vmem:[#allocation76_spill] sm:$0xff] }
 0x3b2   :  { %4393 = vmatpush1.msra.mxu1 %v20069_v1  ;;  %4233 = vmatprep.subr.mxu0 %v20379_v9  ;;  %v20385_v9 = vld [vmem:[#allocation82_spill] sm:$0xff] }
 0x3b3   :  { %4395 = vmatprep.subr.mxu1 %v20071_v25  ;;  %4237 = vmatpush1.msra.mxu0 %v20380_v23  ;;  %v20386_v23 = vld [vmem:[#allocation86_spill] sm:$0xff] }
 0x3b4   :  { %4397 = vmatpush1.msra.mxu1 %v20073_v62  ;;  %4241 = vmatprep.subr.mxu0 %v20381_v21  ;;  %v20387_v21 = vld [vmem:[#allocation90_spill] sm:$0xff] }
 0x3b5   :  { %4399 = vmatprep.subr.mxu1 %v20075_v27  ;;  %4245 = vmatpush1.msra.mxu0 %v20382_v8  ;;  %v20388_v8 = vld [vmem:[#allocation92_spill] sm:$0xff] }
 0x3b6   :  { %4401 = vmatpush1.msra.mxu1 %v20077_v51  ;;  %4249 = vmatprep.subr.mxu0 %v20383_v17  ;;  %v20389_v17 = vld [vmem:[#allocation96_spill] sm:$0xff] }
 0x3b7   :  { %4403 = vmatprep.subr.mxu1 %v20320_v18  ;;  %4253 = vmatpush1.msra.mxu0 %v20384_v42  ;;  %v20390_v42 = vld [vmem:[#allocation99_spill] sm:$0xff]  ;;  %v20461_v18 = vld [vmem:[#allocation144_spill] sm:$0xff] }
 0x3b8   :  { %4405 = vmatpush1.msra.mxu1 %v20322_v12  ;;  %4257 = vmatprep.subr.mxu0 %v20385_v9  ;;  %v20391_v9 = vld [vmem:[#allocation105_spill] sm:$0xff]  ;;  %v20460_v12 = vld [vmem:[#allocation143_spill] sm:$0xff] }
 0x3b9   :  { %4407 = vmatprep.subr.mxu1 %v20324_v53  ;;  %4261 = vmatpush1.msra.mxu0 %v20386_v23  ;;  %v20392_v23 = vld [vmem:[#allocation108_spill] sm:$0xff]  ;;  %v20459_v53 = vld [vmem:[#allocation142_spill] sm:$0xff] }
 0x3ba   :  { %4409 = vmatpush1.msra.mxu1 %v20326_v54  ;;  %4265 = vmatprep.subr.mxu0 %v20387_v21  ;;  %v20395_v21 = vld [vmem:[#allocation114_spill] sm:$0xff]  ;;  %v20458_v54 = vld [vmem:[#allocation140_spill] sm:$0xff] }
 0x3bb   :  { %4411 = vmatprep.subr.mxu1 %v20327_v57  ;;  %4269 = vmatpush1.msra.mxu0 %v20388_v8  ;;  %v20393_v8 = vld [vmem:[#allocation111_spill] sm:$0xff] }
 0x3bc   :  { %4413 = vmatpush1.msra.mxu1 %v20328_v6  ;;  %4273 = vmatprep.subr.mxu0 %v20389_v17  ;;  %v20394_v17 = vld [vmem:[#allocation167_spill] sm:$0xff]  ;;  %v20456_v6 = vld [vmem:[#allocation232_spill] sm:$0xff] }
 0x3bd   :  { %4415 = vmatprep.subr.mxu1 %v20329_v22  ;;  %4277 = vmatpush1.msra.mxu0 %v20390_v42  ;;  %v20396_v42 = vld [vmem:[#allocation170_spill] sm:$0xff]  ;;  %v20455_v22 = vld [vmem:[#allocation229_spill] sm:$0xff]  ;;  %v20457_v57 = vld [vmem:[#allocation139_spill] sm:$0xff] }
 0x3be   :  { %4417 = vmatpush1.msra.mxu1 %v20330_v31  ;;  %4281 = vmatprep.subr.mxu0 %v20391_v9  ;;  %v20398_v9 = vld [vmem:[#allocation174_spill] sm:$0xff]  ;;  %v20448_v31 = vld [vmem:[#allocation260_spill] sm:$0xff] }
 0x3bf   :  { %4419 = vmatprep.subr.mxu1 %v20331_v45  ;;  %4285 = vmatpush1.msra.mxu0 %v20392_v23  ;;  %v20400_v23 = vld [vmem:[#allocation177_spill] sm:$0xff]  ;;  %v20446_v45 = vld [vmem:[#allocation259_spill] sm:$0xff] }
 0x3c0   :  { %4421 = vmatpush1.msra.mxu1 %v20332_v2  ;;  %4454 = vmatprep.mubr.f32.mxu1 %v19817_v55  ;;  %v20444_v2 = vld [vmem:[#allocation258_spill] sm:$0xff] }
 0x3c1   :  { %4289 = vmatprep.subr.mxu0 %v20393_v8  ;;  %4456 = vmatmul.mubr.f32.vlgmr.msra.gmra.mxu1 %v16354_v26  ;;  %v20403_v8 = vld [vmem:[#allocation128_spill] sm:$0xff] }
 0x3c2   :  { %4575 = vmatprep.subr.mxu1 %v20394_v17  ;;  %4293 = vmatpush1.msra.mxu0 %v20395_v21  ;;  %v20405_v17 = vld [vmem:[#allocation131_spill] sm:$0xff]  ;;  %v20406_v21 = vld [vmem:[#allocation186_spill] sm:$0xff] }
 0x3c3   :  { %4581 = vmatpush1.msra.mxu1 %v20396_v42  ;;  %4297 = vmatprep.subr.mxu0 %v20397_v7  ;;  %v20407_v42 = vld [vmem:[#allocation133_spill] sm:$0xff]  ;;  %v20426_v7 = vld [vmem:[#allocation243_spill] sm:$0xff] }
 0x3c4   :  { %4587 = vmatprep.subr.mxu1 %v20398_v9  ;;  %4301 = vmatpush1.msra.mxu0 %v20399_v56  ;;  %v20408_v9 = vld [vmem:[#allocation192_spill] sm:$0xff] }
 0x3c5   :  { %4593 = vmatpush1.msra.mxu1 %v20400_v23  ;;  %4305 = vmatprep.subr.mxu0 %v20401_v36  ;;  %v20409_v36 = vld [vmem:[#allocation195_spill] sm:$0xff]  ;;  %v20422_v23 = vld [vmem:[#allocation237_spill] sm:$0xff]  ;;  %v20424_v56 = vld [vmem:[#allocation240_spill] sm:$0xff] }
 0x3c6   :  { %4599 = vmatprep.subr.mxu1 %v20402_v11  ;;  %4309 = vmatpush1.msra.mxu0 %v20403_v8  ;;  %v20410_v8 = vld [vmem:[#allocation196_spill] sm:$0xff]  ;;  %v20420_v11 = vld [vmem:[#allocation235_spill] sm:$0xff] }
 0x3c7   :  { %4605 = vmatpush1.msra.mxu1 %v20404_v46  ;;  %4313 = vmatprep.subr.mxu0 %v20405_v17  ;;  %v20411_v17 = vld [vmem:[#allocation199_spill] sm:$0xff]  ;;  %v20418_v46 = vld [vmem:[#allocation226_spill] sm:$0xff] }
 0x3c8   :  { %4611 = vmatprep.subr.mxu1 %v20406_v21  ;;  %4317 = vmatpush1.msra.mxu0 %v20407_v42  ;;  %v20412_v42 = vld [vmem:[#allocation203_spill] sm:$0xff] }
 0x3c9   :  { %4350 = vmatprep.mubr.f32.mxu0 %v19817_v55  ;;  %4617 = vmatpush1.msra.mxu1 %v20408_v9  ;;  %v20413_v9 = vld [vmem:[#allocation206_spill] sm:$0xff]  ;;  %v20414_v21 = vld [vmem:[#allocation215_spill] sm:$0xff] }
 0x3ca   :  { %4352 = vmatmul.mubr.f32.vlgmr.msra.gmra.mxu0 %v16354_v26  ;;  %4463 = vmatprep.subr.mxu0 %v15103_v49 }
 0x3cb   :  { %4623 = vmatprep.subr.mxu1 %v20409_v36  ;;  %4465 = vmatpush1.msra.mxu0 %v15113_v60  ;;  %v20415_v36 = vld [vmem:[#allocation219_spill] sm:$0xff] }
 0x3cc   :  { %4629 = vmatpush1.msra.mxu1 %v20410_v8  ;;  %4467 = vmatprep.subr.mxu0 %v15120_v14  ;;  %v20416_v8 = vld [vmem:[#allocation223_spill] sm:$0xff] }
 0x3cd   :  { %4635 = vmatprep.subr.mxu1 %v20411_v17  ;;  %4469 = vmatpush1.msra.mxu0 %v15124_v61  ;;  %v20417_v17 = vld [vmem:[#allocation148_spill] sm:$0xff] }
 0x3ce   :  { %4641 = vmatpush1.msra.mxu1 %v20412_v42  ;;  %4471 = vmatprep.subr.mxu0 %v19988_v47  ;;  %v20419_v42 = vld [vmem:[#allocation149_spill] sm:$0xff] }
 0x3cf   :  { %4647 = vmatprep.subr.mxu1 %v20413_v9  ;;  %4473 = vmatpush1.msra.mxu0 %v19989_v4  ;;  %v20421_v9 = vld [vmem:[#allocation151_spill] sm:$0xff] }
 0x3d0   :  { %4653 = vmatpush1.msra.mxu1 %v20414_v21  ;;  %4475 = vmatprep.subr.mxu0 %v19991_v38  ;;  %v20423_v21 = vld [vmem:[#allocation154_spill] sm:$0xff] }
 0x3d1   :  { %4659 = vmatprep.subr.mxu1 %v20415_v36  ;;  %4477 = vmatpush1.msra.mxu0 %v20183_v19  ;;  %v20425_v36 = vld [vmem:[#allocation157_spill] sm:$0xff] }
 0x3d2   :  { %4665 = vmatpush1.msra.mxu1 %v20416_v8  ;;  %4479 = vmatprep.subr.mxu0 %v20417_v17  ;;  %v20427_v8 = vld [vmem:[#allocation162_spill] sm:$0xff] }
 0x3d3   :  { %4671 = vmatprep.subr.mxu1 %v20418_v46  ;;  %4481 = vmatpush1.msra.mxu0 %v20419_v42  ;;  %v20429_v46 = vld [vmem:[#allocation165_spill] sm:$0xff] }
 0x3d4   :  { %4677 = vmatpush1.msra.mxu1 %v20420_v11  ;;  %4483 = vmatprep.subr.mxu0 %v20421_v9  ;;  %v20431_v11 = vld [vmem:[#allocation171_spill] sm:$0xff] }
 0x3d5   :  { %4683 = vmatprep.subr.mxu1 %v20422_v23  ;;  %4485 = vmatpush1.msra.mxu0 %v20423_v21  ;;  %v20433_v23 = vld [vmem:[#allocation175_spill] sm:$0xff] }
 0x3d6   :  { %4689 = vmatpush1.msra.mxu1 %v20424_v56  ;;  %4487 = vmatprep.subr.mxu0 %v20425_v36  ;;  %v20435_v56 = vld [vmem:[#allocation184_spill] sm:$0xff] }
 0x3d7   :  { %4695 = vmatprep.subr.mxu1 %v20426_v7  ;;  %4489 = vmatpush1.msra.mxu0 %v20427_v8  ;;  %v20437_v7 = vld [vmem:[#allocation187_spill] sm:$0xff] }
 0x3d8   :  { %4701 = vmatpush1.msra.mxu1 %v20428_v41  ;;  %4491 = vmatprep.subr.mxu0 %v20429_v46  ;;  %v20439_v41 = vld [vmem:[#allocation189_spill] sm:$0xff] }
 0x3d9   :  { %4707 = vmatprep.subr.mxu1 %v20430_v50  ;;  %4493 = vmatpush1.msra.mxu0 %v20431_v11  ;;  %v20441_v50 = vld [vmem:[#allocation190_spill] sm:$0xff] }
 0x3da   :  { %4713 = vmatpush1.msra.mxu1 %v20432_v34  ;;  %4495 = vmatprep.subr.mxu0 %v20433_v23  ;;  %v20443_v34 = vld [vmem:[#allocation193_spill] sm:$0xff] }
 0x3db   :  { %4719 = vmatprep.subr.mxu1 %v20434_v52  ;;  %4497 = vmatpush1.msra.mxu0 %v20435_v56  ;;  %v20445_v52 = vld [vmem:[#allocation200_spill] sm:$0xff] }
 0x3dc   :  { %4725 = vmatpush1.msra.mxu1 %v20436_v15  ;;  %4499 = vmatprep.subr.mxu0 %v20437_v7  ;;  %v20447_v15 = vld [vmem:[#allocation204_spill] sm:$0xff] }
 0x3dd   :  { %4731 = vmatprep.subr.mxu1 %v20438_v24  ;;  %4501 = vmatpush1.msra.mxu0 %v20439_v41  ;;  %v20449_v24 = vld [vmem:[#allocation207_spill] sm:$0xff] }
 0x3de   :  { %4737 = vmatpush1.msra.mxu1 %v20440_v44  ;;  %4503 = vmatprep.subr.mxu0 %v20441_v50  ;;  %v20454_v44 = vld [vmem:[#allocation224_spill] sm:$0xff] }
 0x3df   :  { %4743 = vmatprep.subr.mxu1 %v20442_v13  ;;  %4505 = vmatpush1.msra.mxu0 %v20443_v34  ;;  %v20450_v13 = vld [vmem:[#allocation209_spill] sm:$0xff] }
 0x3e0   :  { %4749 = vmatpush1.msra.mxu1 %v20444_v2  ;;  %4507 = vmatprep.subr.mxu0 %v20445_v52  ;;  %v20451_v2 = vld [vmem:[#allocation212_spill] sm:$0xff] }
 0x3e1   :  { %4755 = vmatprep.subr.mxu1 %v20446_v45  ;;  %4509 = vmatpush1.msra.mxu0 %v20447_v15  ;;  %v20452_v45 = vld [vmem:[#allocation216_spill] sm:$0xff] }
 0x3e2   :  { %4761 = vmatpush1.msra.mxu1 %v20448_v31  ;;  %4794 = vmatprep.mubr.f32.mxu1 %v19817_v55  ;;  %v20453_v31 = vld [vmem:[#allocation220_spill] sm:$0xff] }
 0x3e3   :  { %4511 = vmatprep.subr.mxu0 %v20449_v24  ;;  %4796 = vmatmul.mubr.f32.vlgmr.msra.gmra.mxu1 %v16354_v26 }
 0x3e4   :  { %4940 = vmatprep.subr.mxu1 %v15103_v49  ;;  %4513 = vmatpush1.msra.mxu0 %v20450_v13 }
 0x3e5   :  { %4942 = vmatpush1.msra.mxu1 %v15113_v60  ;;  %4515 = vmatprep.subr.mxu0 %v20451_v2 }
 0x3e6   :  { %4944 = vmatprep.subr.mxu1 %v15120_v14  ;;  %4517 = vmatpush1.msra.mxu0 %v20452_v45 }
 0x3e7   :  { %4946 = vmatpush1.msra.mxu1 %v15124_v61  ;;  %4519 = vmatprep.subr.mxu0 %v20453_v31 }
 0x3e8   :  { %4948 = vmatprep.subr.mxu1 %v19988_v47  ;;  %4521 = vmatpush1.msra.mxu0 %v20454_v44 }
 0x3e9   :  { %4950 = vmatpush1.msra.mxu1 %v19989_v4  ;;  %4523 = vmatprep.subr.mxu0 %v20455_v22 }
 0x3ea   :  { %4952 = vmatprep.subr.mxu1 %v19991_v38  ;;  %4525 = vmatpush1.msra.mxu0 %v20456_v6 }
 0x3eb   :  { %4558 = vmatprep.mubr.f32.mxu0 %v19817_v55  ;;  %4954 = vmatpush1.msra.mxu1 %v20183_v19 }
 0x3ec   :  { %4564 = vmatmul.mubr.f32.vlgmr.msra.gmra.mxu0 %v16372_v39  ;;  %4804 = vmatprep.subr.mxu0 %v20457_v57  ;;  %v20462_v39 = vld [vmem:[#allocation147_spill] sm:$0xff]  ;;  %v20463_v57 = vld [vmem:[#allocation153_spill] sm:$0xff] }
 0x3ed   :  { %4956 = vmatprep.subr.mxu1 %v20417_v17  ;;  %4807 = vmatpush1.msra.mxu0 %v20458_v54  ;;  %v20464_v54 = vld [vmem:[#allocation159_spill] sm:$0xff] }
 0x3ee   :  { %4958 = vmatpush1.msra.mxu1 %v20419_v42  ;;  %4810 = vmatprep.subr.mxu0 %v20459_v53  ;;  %v20465_v53 = vld [vmem:[#allocation160_spill] sm:$0xff] }
 0x3ef   :  { %4960 = vmatprep.subr.mxu1 %v20421_v9  ;;  %4813 = vmatpush1.msra.mxu0 %v20460_v12  ;;  %v20466_v12 = vld [vmem:[#allocation161_spill] sm:$0xff] }
 0x3f0   :  { %4962 = vmatpush1.msra.mxu1 %v20423_v21  ;;  %4816 = vmatprep.subr.mxu0 %v20461_v18  ;;  %v20467_v18 = vld [vmem:[#allocation164_spill] sm:$0xff] }
 0x3f1   :  { %4964 = vmatprep.subr.mxu1 %v20425_v36  ;;  %4819 = vmatpush1.msra.mxu0 %v20462_v39  ;;  %v20468_v39 = vld [vmem:[#allocation166_spill] sm:$0xff] }
 0x3f2   :  { %4966 = vmatpush1.msra.mxu1 %v20427_v8  ;;  %4822 = vmatprep.subr.mxu0 %v20463_v57  ;;  %v20469_v57 = vld [vmem:[#allocation169_spill] sm:$0xff] }
 0x3f3   :  { %4968 = vmatprep.subr.mxu1 %v20429_v46  ;;  %4825 = vmatpush1.msra.mxu0 %v20464_v54  ;;  %v20470_v54 = vld [vmem:[#allocation180_spill] sm:$0xff] }
 0x3f4   :  { %4970 = vmatpush1.msra.mxu1 %v20431_v11  ;;  %4828 = vmatprep.subr.mxu0 %v20465_v53  ;;  %v20471_v53 = vld [vmem:[#allocation183_spill] sm:$0xff] }
 0x3f5   :  { %4972 = vmatprep.subr.mxu1 %v20433_v23  ;;  %4831 = vmatpush1.msra.mxu0 %v20466_v12  ;;  %v20472_v12 = vld [vmem:[#allocation185_spill] sm:$0xff] }
 0x3f6   :  { %4974 = vmatpush1.msra.mxu1 %v20435_v56  ;;  %4834 = vmatprep.subr.mxu0 %v20467_v18  ;;  %v20473_v18 = vld [vmem:[#allocation188_spill] sm:$0xff] }
 0x3f7   :  { %4976 = vmatprep.subr.mxu1 %v20437_v7  ;;  %4837 = vmatpush1.msra.mxu0 %v20468_v39  ;;  %v20474_v39 = vld [vmem:[#allocation198_spill] sm:$0xff] }
 0x3f8   :  { %4978 = vmatpush1.msra.mxu1 %v20439_v41  ;;  %4840 = vmatprep.subr.mxu0 %v20469_v57  ;;  %v20475_v57 = vld [vmem:[#allocation202_spill] sm:$0xff] }
 0x3f9   :  { %4980 = vmatprep.subr.mxu1 %v20441_v50  ;;  %4843 = vmatpush1.msra.mxu0 %v20470_v54  ;;  %v20476_v54 = vld [vmem:[#allocation205_spill] sm:$0xff] }
 0x3fa   :  { %4982 = vmatpush1.msra.mxu1 %v20443_v34  ;;  %4846 = vmatprep.subr.mxu0 %v20471_v53  ;;  %v20477_v53 = vld [vmem:[#allocation208_spill] sm:$0xff] }
 0x3fb   :  { %4984 = vmatprep.subr.mxu1 %v20445_v52  ;;  %4849 = vmatpush1.msra.mxu0 %v20472_v12  ;;  %v20478_v12 = vld [vmem:[#allocation211_spill] sm:$0xff] }
 0x3fc   :  { %4986 = vmatpush1.msra.mxu1 %v20447_v15  ;;  %4852 = vmatprep.subr.mxu0 %v20473_v18  ;;  %v20479_v18 = vld [vmem:[#allocation214_spill] sm:$0xff] }
 0x3fd   :  { %4988 = vmatprep.subr.mxu1 %v20449_v24  ;;  %4855 = vmatpush1.msra.mxu0 %v20474_v39  ;;  %v20480_v39 = vld [vmem:[#allocation218_spill] sm:$0xff] }
 0x3fe   :  { %4990 = vmatpush1.msra.mxu1 %v20450_v13  ;;  %4858 = vmatprep.subr.mxu0 %v20475_v57  ;;  %v20520_v57 = vld [vmem:[#allocation247_spill] sm:$0xff] }
 0x3ff   :  { %4992 = vmatprep.subr.mxu1 %v20451_v2  ;;  %4861 = vmatpush1.msra.mxu0 %v20476_v54  ;;  %v20481_v54 = vld [vmem:[#allocation222_spill] sm:$0xff] }
 0x400   :  { %4994 = vmatpush1.msra.mxu1 %v20452_v45  ;;  %4864 = vmatprep.subr.mxu0 %v20477_v53  ;;  %v20482_v53 = vld [vmem:[#allocation228_spill] sm:$0xff] }
 0x401   :  { %4996 = vmatprep.subr.mxu1 %v20453_v31  ;;  %4867 = vmatpush1.msra.mxu0 %v20478_v12  ;;  %v20483_v12 = vld [vmem:[#allocation231_spill] sm:$0xff] }
 0x402   :  { %4998 = vmatpush1.msra.mxu1 %v20454_v44  ;;  %4870 = vmatprep.subr.mxu0 %v20479_v18  ;;  %v20484_v18 = vld [vmem:[#allocation234_spill] sm:$0xff] }
 0x403   :  { %5000 = vmatprep.subr.mxu1 %v20455_v22  ;;  %4873 = vmatpush1.msra.mxu0 %v20480_v39  ;;  %v20485_v39 = vld [vmem:[#allocation236_spill] sm:$0xff] }
 0x404   :  { %5002 = vmatpush1.msra.mxu1 %v20456_v6  ;;  %5035 = vmatprep.mubr.f32.mxu1 %v19817_v55 }
 0x405   :  { %4876 = vmatprep.subr.mxu0 %v20481_v54  ;;  %5039 = vmatmul.mubr.f32.vlgmr.msra.gmra.mxu1 %v16364_v0  ;;  %v20486_v54 = vld [vmem:[#allocation239_spill] sm:$0xff]  ;;  %v20487_v0 = vld [vmem:[#allocation242_spill] sm:$0xff] }
 0x406   :  { %5214 = vmatprep.subr.mxu1 %v15103_v49  ;;  %4879 = vmatpush1.msra.mxu0 %v20482_v53  ;;  %v20488_v53 = vld [vmem:[#allocation245_spill] sm:$0xff] }
 0x407   :  { %5216 = vmatpush1.msra.mxu1 %v15113_v60  ;;  %4882 = vmatprep.subr.mxu0 %v20483_v12  ;;  %v20515_v12 = vld [vmem:[#allocation233_spill] sm:$0xff] }
 0x408   :  { %5218 = vmatprep.subr.mxu1 %v15120_v14  ;;  %4885 = vmatpush1.msra.mxu0 %v20484_v18  ;;  %v20489_v18 = vld [vmem:[#allocation146_spill] sm:$0xff] }
 0x409   :  { %5220 = vmatpush1.msra.mxu1 %v15124_v61  ;;  %4888 = vmatprep.subr.mxu0 %v20485_v39  ;;  %v20490_v39 = vld [vmem:[#allocation150_spill] sm:$0xff] }
 0x40a   :  { %5222 = vmatprep.subr.mxu1 %v19988_v47  ;;  %4891 = vmatpush1.msra.mxu0 %v20486_v54  ;;  %v20491_v54 = vld [vmem:[#allocation152_spill] sm:$0xff] }
 0x40b   :  { %5224 = vmatpush1.msra.mxu1 %v19989_v4  ;;  %4894 = vmatprep.subr.mxu0 %v20487_v0  ;;  %v20492_v0 = vld [vmem:[#allocation155_spill] sm:$0xff] }
 0x40c   :  { %5226 = vmatprep.subr.mxu1 %v19991_v38  ;;  %4897 = vmatpush1.msra.mxu0 %v20488_v53  ;;  %v20493_v53 = vld [vmem:[#allocation156_spill] sm:$0xff] }
 0x40d   :  { %4930 = vmatprep.mubr.f32.mxu0 %v19817_v55  ;;  %5228 = vmatpush1.msra.mxu1 %v20183_v19 }
 0x40e   :  { %4933 = vmatmul.mubr.f32.vlgmr.msra.gmra.mxu0 %v16357_v37  ;;  %5048 = vmatprep.subr.mxu0 %v20489_v18  ;;  %v20494_v37 = vld [vmem:[#allocation158_spill] sm:$0xff]  ;;  %v20495_v18 = vld [vmem:[#allocation163_spill] sm:$0xff] }
 0x40f   :  { %5230 = vmatprep.subr.mxu1 %v20417_v17  ;;  %5052 = vmatpush1.msra.mxu0 %v20490_v39  ;;  %v20496_v39 = vld [vmem:[#allocation168_spill] sm:$0xff]  ;;  %v14139_v17 = vld [vmem:[%s18931_s1 + $0x48] sm:$0xff] }
 0x410   :  { %5232 = vmatpush1.msra.mxu1 %v20419_v42  ;;  %5056 = vmatprep.subr.mxu0 %v20491_v54  ;;  %v20497_v54 = vld [vmem:[#allocation172_spill] sm:$0xff] }
 0x411   :  { %5234 = vmatprep.subr.mxu1 %v20421_v9  ;;  %5060 = vmatpush1.msra.mxu0 %v20492_v0  ;;  %v20498_v0 = vld [vmem:[#allocation173_spill] sm:$0xff] }
 0x412   :  { %5236 = vmatpush1.msra.mxu1 %v20423_v21  ;;  %5064 = vmatprep.subr.mxu0 %v20493_v53  ;;  %v20499_v53 = vld [vmem:[#allocation176_spill] sm:$0xff] }
 0x413   :  { %5238 = vmatprep.subr.mxu1 %v20425_v36  ;;  %5068 = vmatpush1.msra.mxu0 %v20494_v37  ;;  %v20500_v37 = vld [vmem:[#allocation179_spill] sm:$0xff] }
 0x414   :  { %5240 = vmatpush1.msra.mxu1 %v20427_v8  ;;  %5072 = vmatprep.subr.mxu0 %v20495_v18  ;;  %v20501_v18 = vld [vmem:[#allocation182_spill] sm:$0xff] }
 0x415   :  { %5242 = vmatprep.subr.mxu1 %v20429_v46  ;;  %5076 = vmatpush1.msra.mxu0 %v20496_v39  ;;  %v20502_v39 = vld [vmem:[#allocation191_spill] sm:$0xff] }
 0x416   :  { %5244 = vmatpush1.msra.mxu1 %v20431_v11  ;;  %5080 = vmatprep.subr.mxu0 %v20497_v54  ;;  %v20503_v54 = vld [vmem:[#allocation194_spill] sm:$0xff] }
 0x417   :  { %5246 = vmatprep.subr.mxu1 %v20433_v23  ;;  %5084 = vmatpush1.msra.mxu0 %v20498_v0  ;;  %v20504_v0 = vld [vmem:[#allocation197_spill] sm:$0xff] }
 0x418   :  { %5248 = vmatpush1.msra.mxu1 %v20435_v56  ;;  %5088 = vmatprep.subr.mxu0 %v20499_v53  ;;  %v20505_v53 = vld [vmem:[#allocation201_spill] sm:$0xff] }
 0x419   :  { %5250 = vmatprep.subr.mxu1 %v20437_v7  ;;  %5092 = vmatpush1.msra.mxu0 %v20500_v37  ;;  %v20506_v37 = vld [vmem:[#allocation210_spill] sm:$0xff] }
 0x41a   :  { %5252 = vmatpush1.msra.mxu1 %v20439_v41  ;;  %5096 = vmatprep.subr.mxu0 %v20501_v18  ;;  %v20507_v18 = vld [vmem:[#allocation213_spill] sm:$0xff] }
 0x41b   :  { %5254 = vmatprep.subr.mxu1 %v20441_v50  ;;  %5100 = vmatpush1.msra.mxu0 %v20502_v39  ;;  %v20508_v39 = vld [vmem:[#allocation217_spill] sm:$0xff] }
 0x41c   :  { %5256 = vmatpush1.msra.mxu1 %v20443_v34  ;;  %5104 = vmatprep.subr.mxu0 %v20503_v54  ;;  %v20509_v54 = vld [vmem:[#allocation221_spill] sm:$0xff] }
 0x41d   :  { %5258 = vmatprep.subr.mxu1 %v20445_v52  ;;  %5108 = vmatpush1.msra.mxu0 %v20504_v0  ;;  %v20510_v0 = vld [vmem:[#allocation225_spill] sm:$0xff] }
 0x41e   :  { %5260 = vmatpush1.msra.mxu1 %v20447_v15  ;;  %5112 = vmatprep.subr.mxu0 %v20505_v53  ;;  %v20511_v53 = vld [vmem:[#allocation137_spill] sm:$0xff] }
 0x41f   :  { %5262 = vmatprep.subr.mxu1 %v20449_v24  ;;  %5116 = vmatpush1.msra.mxu0 %v20506_v37  ;;  %vm5347_vm5 = vcmp.eq.s32.totalorder %v20511_v53, 2  ;;  %v20512_v37 = vld [vmem:[#allocation227_spill] sm:$0xff]  ;;  %v20517_v53 = vld [vmem:[#allocation241_spill] sm:$0xff] }
 0x420   :  { %5264 = vmatpush1.msra.mxu1 %v20450_v13  ;;  %5120 = vmatprep.subr.mxu0 %v20507_v18  ;;  %v20513_v18 = vld [vmem:[#allocation230_spill] sm:$0xff] }
 0x421   :  { %5266 = vmatprep.subr.mxu1 %v20451_v2  ;;  %5124 = vmatpush1.msra.mxu0 %v20508_v39  ;;  %v20514_v39 = vmov 0  }
 0x422   :  { %5268 = vmatpush1.msra.mxu1 %v20452_v45  ;;  %5128 = vmatprep.subr.mxu0 %v20509_v54  ;;  %v5348_v54 = vsel %vm5347_vm5, 1, %v20514_v39  ;;  %v20522_v39 = vld [vmem:[#allocation249_spill] sm:$0xff] }
 0x423   :  { %5270 = vmatprep.subr.mxu1 %v20453_v31  ;;  %5132 = vmatpush1.msra.mxu0 %v20510_v0  ;;  %v20516_v0 = vld [vmem:[#allocation238_spill] sm:$0xff] }
 0x424   :  { %5272 = vmatpush1.msra.mxu1 %v20454_v44  ;;  %5136 = vmatprep.subr.mxu0 %v20512_v37  ;;  %v20518_v37 = vld [vmem:[#allocation244_spill] sm:$0xff]  ;;  %v20526_v44 = vld [vmem:[#allocation253_spill] sm:$0xff] }
 0x425   :  { %5274 = vmatprep.subr.mxu1 %v20455_v22  ;;  %5140 = vmatpush1.msra.mxu0 %v20513_v18  ;;  %v20519_v18 = vld [vmem:[#allocation34_spill] sm:$0xff]  ;;  %v20524_v22 = vld [vmem:[#allocation251_spill] sm:$0xff] }
 0x426   :  { %5276 = vmatpush1.msra.mxu1 %v20456_v6  ;;  %5309 = vmatprep.mubr.f32.mxu1 %v19817_v55  ;;  %v20521_v6 = vld [vmem:[#allocation37_spill] sm:$0xff] }
 0x427   :  { %5144 = vmatprep.subr.mxu0 %v20515_v12  ;;  %5311 = vmatmul.mubr.f32.vlgmr.msra.gmra.mxu1 %v16354_v26  ;;  %v20523_v12 = vld [vmem:[#allocation38_spill] sm:$0xff] }
 0x428   :  { %5148 = vmatpush1.msra.mxu0 %v20516_v0  ;;  %5205 = vmatprep.mubr.f32.mxu0 %v19817_v55  ;;  %v20525_v0 = vld [vmem:[#allocation40_spill] sm:$0xff] }
 0x429   :  { %5152 = vmatprep.subr.mxu0 %v20517_v53  ;;  %5350 = vperm.xlu1 %14184, %v5348_v54   ;;  %v20527_v53 = vld [vmem:[#allocation43_spill] sm:$0xff]  ;;  %v20528_v54 = vld [vmem:[#allocation46_spill] sm:$0xff] }
 0x42a   :  { %5156 = vmatpush1.msra.mxu0 %v20518_v37  ;;  %5472 = vmatprep.subr.mxu1 %v20519_v18  ;;  %v20529_v18 = vld [vmem:[#allocation50_spill] sm:$0xff] }
 0x42b   :  { %5160 = vmatprep.subr.mxu0 %v20520_v57  ;;  %5478 = vmatpush1.msra.mxu1 %v20521_v6  ;;  %v20530_v6 = vld [vmem:[#allocation60_spill] sm:$0xff]  ;;  %v20564_v57 = vld [vmem:[#allocation102_spill] sm:$0xff] }
 0x42c   :  { %5164 = vmatpush1.msra.mxu0 %v20522_v39  ;;  %5484 = vmatprep.subr.mxu1 %v20523_v12  ;;  %v20531_v12 = vld [vmem:[#allocation63_spill] sm:$0xff]  ;;  %v20562_v39 = vld [vmem:[#allocation93_spill] sm:$0xff] }
 0x42d   :  { %5168 = vmatprep.subr.mxu0 %v20524_v22  ;;  %5490 = vmatpush1.msra.mxu1 %v20525_v0  ;;  %v20532_v0 = vld [vmem:[#allocation66_spill] sm:$0xff]  ;;  %v20557_v22 = vld [vmem:[#allocation136_spill] sm:$0xff] }
 0x42e   :  { %5172 = vmatpush1.msra.mxu0 %v20526_v44  ;;  %5496 = vmatprep.subr.mxu1 %v20527_v53  ;;  %v20533_v53 = vld [vmem:[#allocation69_spill] sm:$0xff]  ;;  %v20555_v44 = vld [vmem:[#allocation135_spill] sm:$0xff] }
 0x42f   :  { %5207 = vmatmul.mubr.f32.vlgmr.msra.gmra.mxu0 %v16354_v26  ;;  %5502 = vmatpush1.msra.mxu1 %v20528_v54  ;;  %v20534_v26 = vld [vmem:[#allocation72_spill] sm:$0xff]  ;;  %v20553_v54 = vld [vmem:[#allocation134_spill] sm:$0xff] }
 0x430   :  { %5508 = vmatprep.subr.mxu1 %v20529_v18  ;;  %5360 = vmatprep.subr.mxu0 %v20038_v29  ;;  %v20535_v18 = vld [vmem:[#allocation75_spill] sm:$0xff] }
 0x431   :  { %5514 = vmatpush1.msra.mxu1 %v20530_v6  ;;  %5362 = vmatpush1.msra.mxu0 %v20039_v20  ;;  %v20536_v6 = vld [vmem:[#allocation79_spill] sm:$0xff] }
 0x432   :  { %5520 = vmatprep.subr.mxu1 %v20531_v12  ;;  %5364 = vmatprep.subr.mxu0 %v20040_v43  ;;  %v20537_v12 = vld [vmem:[#allocation85_spill] sm:$0xff] }
 0x433   :  { %5526 = vmatpush1.msra.mxu1 %v20532_v0  ;;  %5366 = vmatpush1.msra.mxu0 %v20041_v32  ;;  %v20538_v0 = vld [vmem:[#allocation89_spill] sm:$0xff] }
 0x434   :  { %5532 = vmatprep.subr.mxu1 %v20533_v53  ;;  %5368 = vmatprep.subr.mxu0 %v20042_v16  ;;  %v20539_v53 = vld [vmem:[#allocation95_spill] sm:$0xff] }
 0x435   :  { %5538 = vmatpush1.msra.mxu1 %v20534_v26  ;;  %5370 = vmatpush1.msra.mxu0 %v20045_v28  ;;  %v20540_v26 = vld [vmem:[#allocation98_spill] sm:$0xff] }
 0x436   :  { %5544 = vmatprep.subr.mxu1 %v20535_v18  ;;  %5372 = vmatprep.subr.mxu0 %v20047_v30  ;;  %v20541_v18 = vld [vmem:[#allocation101_spill] sm:$0xff] }
 0x437   :  { %5550 = vmatpush1.msra.mxu1 %v20536_v6  ;;  %5374 = vmatpush1.msra.mxu0 %v20049_v5  ;;  %v20542_v6 = vld [vmem:[#allocation104_spill] sm:$0xff] }
 0x438   :  { %5556 = vmatprep.subr.mxu1 %v20537_v12  ;;  %5376 = vmatprep.subr.mxu0 %v20051_v35  ;;  %v20543_v12 = vld [vmem:[#allocation107_spill] sm:$0xff] }
 0x439   :  { %5562 = vmatpush1.msra.mxu1 %v20538_v0  ;;  %5378 = vmatpush1.msra.mxu0 %v20053_v59  ;;  %v20544_v0 = vld [vmem:[#allocation110_spill] sm:$0xff] }
 0x43a   :  { %5568 = vmatprep.subr.mxu1 %v20539_v53  ;;  %5380 = vmatprep.subr.mxu0 %v20055_v10  ;;  %v20545_v53 = vld [vmem:[#allocation116_spill] sm:$0xff] }
 0x43b   :  { %5574 = vmatpush1.msra.mxu1 %v20540_v26  ;;  %5382 = vmatpush1.msra.mxu0 %v20057_v48  ;;  %v20546_v26 = vld [vmem:[#allocation119_spill] sm:$0xff] }
 0x43c   :  { %5580 = vmatprep.subr.mxu1 %v20541_v18  ;;  %5384 = vmatprep.subr.mxu0 %v20059_v3  ;;  %v20547_v18 = vld [vmem:[#allocation122_spill] sm:$0xff] }
 0x43d   :  { %5586 = vmatpush1.msra.mxu1 %v20542_v6  ;;  %5386 = vmatpush1.msra.mxu0 %v20061_v63  ;;  %v20548_v6 = vld [vmem:[#allocation125_spill] sm:$0xff] }
 0x43e   :  { %5592 = vmatprep.subr.mxu1 %v20543_v12  ;;  %5388 = vmatprep.subr.mxu0 %v20063_v40  ;;  %v20549_v12 = vld [vmem:[#allocation127_spill] sm:$0xff] }
 0x43f   :  { %5598 = vmatpush1.msra.mxu1 %v20544_v0  ;;  %5390 = vmatpush1.msra.mxu0 %v20065_v33  ;;  %v20550_v0 = vld [vmem:[#allocation130_spill] sm:$0xff]  ;;  %v3942_v45 = vpop.f32.mrf.mxu1 }
 0x440   :  { %5604 = vmatprep.subr.mxu1 %v20545_v53  ;;  %5392 = vmatprep.subr.mxu0 %v20067_v58  ;;  %v20551_v53 = vld [vmem:[#allocation132_spill] sm:$0xff] }
 0x441   :  { %5610 = vmatpush1.msra.mxu1 %v20546_v26  ;;  %5394 = vmatpush1.msra.mxu0 %v20069_v1  ;;  %v20552_v26 = vld [vmem:[#allocation65_spill] sm:$0xff]  ;;  %v3944_v13 = vpop.f32.mrf.mxu1 }
 0x442   :  { %5616 = vmatprep.subr.mxu1 %v20547_v18  ;;  %5396 = vmatprep.subr.mxu0 %v20071_v25  ;;  %v20554_v18 = vld [vmem:[#allocation70_spill] sm:$0xff] }
 0x443   :  { %5622 = vmatpush1.msra.mxu1 %v20548_v6  ;;  %5398 = vmatpush1.msra.mxu0 %v20073_v62  ;;  %v20556_v6 = vld [vmem:[#allocation74_spill] sm:$0xff] }
 0x444   :  { %5628 = vmatprep.subr.mxu1 %v20549_v12  ;;  %5400 = vmatprep.subr.mxu0 %v20075_v27  ;;  %v20559_v12 = vld [vmem:[#allocation81_spill] sm:$0xff] }
 0x445   :  { %5634 = vmatpush1.msra.mxu1 %v20550_v0  ;;  %5402 = vmatpush1.msra.mxu0 %v20077_v51  ;;  %v20558_v0 = vld [vmem:[#allocation78_spill] sm:$0xff] }
 0x446   :  { %5640 = vmatprep.subr.mxu1 %v20551_v53  ;;  %5404 = vmatprep.subr.mxu0 %v20552_v26  ;;  %v20560_v53 = vld [vmem:[#allocation84_spill] sm:$0xff] }
 0x447   :  { %5646 = vmatpush1.msra.mxu1 %v20553_v54  ;;  %5406 = vmatpush1.msra.mxu0 %v20554_v18  ;;  %v20561_v54 = vld [vmem:[#allocation88_spill] sm:$0xff]  ;;  %v3710_v37 = vpop.f32.mrf.mxu0 }
 0x448   :  { %5652 = vmatprep.subr.mxu1 %v20555_v44  ;;  %5408 = vmatprep.subr.mxu0 %v20556_v6  ;;  %v20563_v44 = vld [vmem:[#allocation97_spill] sm:$0xff]  ;;  %v3943_v52 = vadd.f32 %v3942_v45, %v3710_v37  ;;  %v14138_v45 = vld [vmem:[%s18931_s1 + $0x40] sm:$0xff] }
 0x449   :  { %5658 = vmatpush1.msra.mxu1 %v20557_v22  ;;  %5691 = vmatprep.mubr.f32.mxu1 %v19817_v55  ;;  %v20565_v22 = vld [vmem:[#allocation16_spill] sm:$0xff]  ;;  %v3712_v31 = vpop.f32.mrf.mxu0 }
 0x44a   :  { %5837 = vmatprep.subr.mxu1 %v20038_v29  ;;  %5410 = vmatpush1.msra.mxu0 %v20558_v0  ;;  %v3945_v15 = vadd.f32 %v3944_v13, %v3712_v31 }
 0x44b   :  { %5412 = vmatprep.subr.mxu0 %v20559_v12  ;;  %5455 = vmatprep.mubr.f32.mxu0 %v19817_v55 }
 0x44c   :  { %5414 = vmatpush1.msra.mxu0 %v20560_v53 }
 0x44d   :  { %5416 = vmatprep.subr.mxu0 %v20561_v54 }
 0x44e   :  { %5418 = vmatpush1.msra.mxu0 %v20562_v39 }
 0x44f   :  { %5420 = vmatprep.subr.mxu0 %v20563_v44 }
 0x450   :  { %5422 = vmatpush1.msra.mxu0 %v20564_v57 }
 0x451   :  { %5701 = vmatprep.subr.mxu0 %v20565_v22 }
 0x45f   :  { %v4185_v34 = vpop.f32.mrf.mxu1 }
 0x461   :  { %v4187_v56 = vpop.f32.mrf.mxu1 }
 0x468   :  { %v4079_v2 = vpop.f32.mrf.mxu0 }
 0x469   :  { %v4080_v7 = vadd.f32 %v4079_v2, %v3943_v52 }
 0x46a   :  { %v4081_v24 = vpop.f32.mrf.mxu0 }
 0x46b   :  { %v4082_v41 = vadd.f32 %v4081_v24, %v3945_v15  ;;  %v4186_v8 = vadd.f32 %v4185_v34, %v4080_v7 }
 0x46d   :  { %v4188_v11 = vadd.f32 %v4187_v56, %v4082_v41 }
 0x481   :  { %v4457_v46 = vpop.f32.mrf.mxu1 }
 0x483   :  { %v4459_v22 = vpop.f32.mrf.mxu1 }
 0x48a   :  { %v4353_v50 = vpop.f32.mrf.mxu0 }
 0x48b   :  { %v4354_v21 = vadd.f32 %v4353_v50, %v4186_v8 }
 0x48c   :  { %v4355_v23 = vpop.f32.mrf.mxu0 }
 0x48d   :  { %v4356_v36 = vadd.f32 %v4355_v23, %v4188_v11  ;;  %v4458_v42 = vadd.f32 %v4457_v46, %v4354_v21 }
 0x48f   :  { %v4460_v9 = vadd.f32 %v4459_v22, %v4356_v36  ;;  %v5317_v2 = vadd.f32 %v14138_v45, %v4458_v42 }
 0x491   :  { %v5318_v31 = vadd.f32 %v14139_v17, %v4460_v9  ;;  %v14142_v24 = vmul.f32 -1.442695, %v5317_v2 }
 0x493   :  { %v14143_v13 = vmul.f32 -1.442695, %v5318_v31 }
 0x495   :  { %14217 = vpow2.f32 %v14143_v13  ;;  %v14140_v13 = vld [vmem:[%s18931_s1 + $0x50] sm:$0xff] }
 0x496   :  { %14219 = vpow2.f32 %v14142_v24 }
 0x4a2   :  { %v14218_v23 = vpop.eup %14217 }
 0x4a3   :  { %v4797_v52 = vpop.f32.mrf.mxu1  ;;  %v14220_v8 = vpop.eup %14219  ;;  %v5330_v37 = vadd.f32 1.0, %v14218_v23  ;;  %v20566_v23 = vld [vmem:[#allocation113_spill] sm:$0xff] }
 0x4a4   :  { %v5324_v2 = vadd.f32 1.0, %v14220_v8 }
 0x4a5   :  { %v4799_v22 = vpop.f32.mrf.mxu1  ;;  %14221 = vrcp.f32 %v5330_v37  ;;  %v5351_v37 = vpop.permute.xlu1 %5350 }
 0x4a6   :  { %14223 = vrcp.f32 %v5324_v2  ;;  %vm5352_vm6 = vcmp.eq.s32.totalorder %v5351_v37, 1  ;;  %v20581_v37 = vld [vmem:[#allocation58_spill] sm:$0xff] }
 0x4ac   :  { %v4565_v15 = vpop.f32.mrf.mxu0 }
 0x4ad   :  { %v4798_v41 = vadd.f32 %v4797_v52, %v4565_v15 }
 0x4ae   :  { %v4567_v34 = vpop.f32.mrf.mxu0 }
 0x4af   :  { %v4800_v36 = vadd.f32 %v4799_v22, %v4567_v34 }
 0x4c5   :  { %v5040_v46 = vpop.f32.mrf.mxu1 }
 0x4c7   :  { %v5042_v21 = vpop.f32.mrf.mxu1 }
 0x4ce   :  { %v4934_v50 = vpop.f32.mrf.mxu0 }
 0x4cf   :  { %v4935_v56 = vadd.f32 %v4934_v50, %v4798_v41  ;;  %v14141_v50 = vld [vmem:[%s18931_s1 + $0x58] sm:$0xff] }
 0x4d0   :  { %v4936_v11 = vpop.f32.mrf.mxu0 }
 0x4d1   :  { %v4937_v7 = vadd.f32 %v4936_v11, %v4800_v36  ;;  %v5041_v17 = vadd.f32 %v5040_v46, %v4935_v56  ;;  %v14222_v36 = vpop.eup %14221 }
 0x4d2   :  { %v14224_v56 = vpop.eup %14223 }
 0x4d3   :  { %v5043_v31 = vadd.f32 %v5042_v21, %v4937_v7  ;;  %v5340_v21 = vmul.f32 %v14222_v36, %v20566_v23  ;;  %v20573_v36 = vld [vmem:[#allocation27_spill] sm:$0xff]  ;;  %v20576_v23 = vld [vmem:[#allocation41_spill] sm:$0xff] }
 0x4e7   :  { %v5312_v42 = vpop.f32.mrf.mxu1 }
 0x4e9   :  { %v5314_v34 = vpop.f32.mrf.mxu1 }
 0x4ef   :  { %v5208_v9 = vpop.f32.mrf.mxu0 }
 0x4f0   :  { %v5209_v45 = vadd.f32 %v5208_v9, %v5041_v17 }
 0x4f1   :  { %v5210_v24 = vpop.f32.mrf.mxu0 }
 0x4f2   :  { %v5313_v15 = vadd.f32 %v5312_v42, %v5209_v45  ;;  %v5211_v52 = vadd.f32 %v5210_v24, %v5043_v31 }
 0x4f4   :  { %v5319_v22 = vadd.f32 %v14140_v13, %v5313_v15  ;;  %v5315_v41 = vadd.f32 %v5314_v34, %v5211_v52  ;;  %v20568_v13 = vld [vmem:[#allocation120_spill] sm:$0xff] }
 0x4f6   :  { %14225 = vtanh.f32 %v5319_v22  ;;  %v5320_v46 = vadd.f32 %v14141_v50, %v5315_v41  ;;  %v20570_v41 = vld [vmem:[#allocation18_spill] sm:$0xff] }
 0x4f8   :  { %v14144_v11 = vmul.f32 -1.442695, %v5320_v46  ;;  %v20571_v46 = vld [vmem:[#allocation20_spill] sm:$0xff] }
 0x4fa   :  { %14227 = vpow2.f32 %v14144_v11  ;;  %v20572_v11 = vld [vmem:[#allocation23_spill] sm:$0xff] }
 0x503   :  { %v14226_v7 = vpop.eup %14225 }
 0x504   :  { %v5341_v8 = vmul.f32 %v14226_v7, %v14224_v56  ;;  %v20574_v56 = vld [vmem:[#allocation30_spill] sm:$0xff]  ;;  %v20575_v7 = vld [vmem:[#allocation33_spill] sm:$0xff] }
 0x506   :  { %v16789_v17 = vadd.f32 %v5341_v8, %v5340_v21  ;;  %v20577_v21 = vld [vmem:[#allocation44_spill] sm:$0xff] }
 0x507   :  { %v14228_v42 = vpop.eup %14227  ;;  %v20578_v8 = vld [vmem:[#allocation48_spill] sm:$0xff] }
 0x508   :  { %20567 = vst [vmem:[#allocation7_spill] sm:$0xff] %v16789_v17  ;;  %v5337_v9 = vadd.f32 1.0, %v14228_v42  ;;  %14229 = vtanh.f32 %v16789_v17  ;;  %v20579_v42 = vld [vmem:[#allocation52_spill] sm:$0xff]  ;;  %v20674_v17 = vld [vmem:[#allocation257_spill] sm:$0xff] }
 0x50a   :  { %14231 = vrcp.f32 %v5337_v9  ;;  %v20580_v9 = vld [vmem:[#allocation55_spill] sm:$0xff] }
 0x515   :  { %v14230_v45 = vpop.eup %14229 }
 0x517   :  { %v14232_v31 = vpop.eup %14231 }
 0x518   :  { %v5344_v2 = vmul.f32 %v14232_v31, %v14230_v45  ;;  %v20582_v45 = vld [vmem:[#allocation62_spill] sm:$0xff]  ;;  %v20583_v31 = vld [vmem:[#allocation68_spill] sm:$0xff] }
 0x51a   :  { %v16793_v24 = vsel %vm5352_vm6, %v5344_v2, %v20568_v13  ;;  %v16795_v15 = vand.u32 4294901760, %v5344_v2  ;;  %v20585_v13 = vld [vmem:[#allocation77_spill] sm:$0xff] }
 0x51b   :  { %20569 = vst [vmem:[#allocation8_spill] sm:$0xff] %v16793_v24  ;;  %v20672_v24 = vld [vmem:[#allocation256_spill] sm:$0xff] }
 0x51c   :  { %v16798_v52 = vsub.f32 %v5344_v2, %v16795_v15  ;;  %5693 = vmatmul.mubr.f32.vlgmr.msra.gmra.mxu1 %v16795_v15  ;;  %v20584_v2 = vld [vmem:[#allocation71_spill] sm:$0xff] }
 0x51d   :  { %5839 = vmatpush1.msra.mxu1 %v20039_v20  ;;  %5932 = vmatprep.mubr.f32.mxu1 %v19817_v55 }
 0x51e   :  { %5841 = vmatprep.subr.mxu1 %v20040_v43  ;;  %v16805_v34 = vand.u32 4294901760, %v16798_v52 }
 0x51f   :  { %5843 = vmatpush1.msra.mxu1 %v20041_v32 }
 0x520   :  { %5845 = vmatprep.subr.mxu1 %v20042_v16  ;;  %v5459_v50 = vsub.f32 %v16798_v52, %v16805_v34 }
 0x521   :  { %5847 = vmatpush1.msra.mxu1 %v20045_v28 }
 0x522   :  { %5849 = vmatprep.subr.mxu1 %v20047_v30  ;;  %v16813_v22 = vand.u32 4294901760, %v5459_v50  ;;  %v20586_v50 = vld [vmem:[#allocation80_spill] sm:$0xff] }
 0x523   :  { %5851 = vmatpush1.msra.mxu1 %v20049_v5 }
 0x524   :  { %5853 = vmatprep.subr.mxu1 %v20051_v35  ;;  %5461 = vmatmul.mubr.f32.vlgmr.msra.gmra.mxu0 %v16813_v22 }
 0x525   :  { %5704 = vmatpush1.msra.mxu0 %v20570_v41  ;;  %5855 = vmatpush1.msra.mxu1 %v20053_v59  ;;  %v20670_v41 = vld [vmem:[#allocation255_spill] sm:$0xff] }
 0x526   :  { %5707 = vmatprep.subr.mxu0 %v20571_v46  ;;  %5857 = vmatprep.subr.mxu1 %v20055_v10  ;;  %v20668_v46 = vld [vmem:[#allocation254_spill] sm:$0xff] }
 0x527   :  { %5710 = vmatpush1.msra.mxu0 %v20572_v11  ;;  %5859 = vmatpush1.msra.mxu1 %v20057_v48  ;;  %v20666_v11 = vld [vmem:[#allocation252_spill] sm:$0xff] }
 0x528   :  { %5713 = vmatprep.subr.mxu0 %v20573_v36  ;;  %5861 = vmatprep.subr.mxu1 %v20059_v3  ;;  %v20664_v36 = vld [vmem:[#allocation250_spill] sm:$0xff] }
 0x529   :  { %5716 = vmatpush1.msra.mxu0 %v20574_v56  ;;  %5863 = vmatpush1.msra.mxu1 %v20061_v63  ;;  %v20662_v56 = vld [vmem:[#allocation248_spill] sm:$0xff] }
 0x52a   :  { %5719 = vmatprep.subr.mxu0 %v20575_v7  ;;  %5865 = vmatprep.subr.mxu1 %v20063_v40  ;;  %v20660_v7 = vld [vmem:[#allocation246_spill] sm:$0xff] }
 0x52b   :  { %5722 = vmatpush1.msra.mxu0 %v20576_v23  ;;  %5867 = vmatpush1.msra.mxu1 %v20065_v33  ;;  %v20636_v23 = vld [vmem:[#allocation181_spill] sm:$0xff] }
 0x52c   :  { %5725 = vmatprep.subr.mxu0 %v20577_v21  ;;  %5869 = vmatprep.subr.mxu1 %v20067_v58  ;;  %v20634_v21 = vld [vmem:[#allocation178_spill] sm:$0xff] }
 0x52d   :  { %5728 = vmatpush1.msra.mxu0 %v20578_v8  ;;  %5871 = vmatpush1.msra.mxu1 %v20069_v1  ;;  %v20633_v8 = vld [vmem:[#allocation123_spill] sm:$0xff] }
 0x52e   :  { %5731 = vmatprep.subr.mxu0 %v20579_v42  ;;  %5873 = vmatprep.subr.mxu1 %v20071_v25  ;;  %v20631_v42 = vld [vmem:[#allocation121_spill] sm:$0xff] }
 0x52f   :  { %5734 = vmatpush1.msra.mxu0 %v20580_v9  ;;  %5875 = vmatpush1.msra.mxu1 %v20073_v62  ;;  %v20629_v9 = vld [vmem:[#allocation117_spill] sm:$0xff] }
 0x530   :  { %5737 = vmatprep.subr.mxu0 %v20581_v37  ;;  %5877 = vmatprep.subr.mxu1 %v20075_v27  ;;  %v20587_v37 = vld [vmem:[#allocation83_spill] sm:$0xff] }
 0x531   :  { %5740 = vmatpush1.msra.mxu0 %v20582_v45  ;;  %5879 = vmatpush1.msra.mxu1 %v20077_v51  ;;  %v20588_v45 = vld [vmem:[#allocation87_spill] sm:$0xff] }
 0x532   :  { %5743 = vmatprep.subr.mxu0 %v20583_v31  ;;  %5881 = vmatprep.subr.mxu1 %v20552_v26  ;;  %v20589_v31 = vld [vmem:[#allocation91_spill] sm:$0xff] }
 0x533   :  { %5746 = vmatpush1.msra.mxu0 %v20584_v2  ;;  %5883 = vmatpush1.msra.mxu1 %v20554_v18  ;;  %v20590_v2 = vld [vmem:[#allocation94_spill] sm:$0xff] }
 0x534   :  { %5749 = vmatprep.subr.mxu0 %v20585_v13  ;;  %5885 = vmatprep.subr.mxu1 %v20556_v6  ;;  %v20591_v13 = vld [vmem:[#allocation100_spill] sm:$0xff] }
 0x535   :  { %5752 = vmatpush1.msra.mxu0 %v20586_v50  ;;  %5887 = vmatpush1.msra.mxu1 %v20558_v0  ;;  %v20592_v50 = vld [vmem:[#allocation103_spill] sm:$0xff] }
 0x536   :  { %5755 = vmatprep.subr.mxu0 %v20587_v37  ;;  %5889 = vmatprep.subr.mxu1 %v20559_v12  ;;  %v20593_v37 = vld [vmem:[#allocation106_spill] sm:$0xff] }
 0x537   :  { %5758 = vmatpush1.msra.mxu0 %v20588_v45  ;;  %5891 = vmatpush1.msra.mxu1 %v20560_v53  ;;  %v20599_v45 = vld [vmem:[#allocation126_spill] sm:$0xff] }
 0x538   :  { %5761 = vmatprep.subr.mxu0 %v20589_v31  ;;  %5893 = vmatprep.subr.mxu1 %v20561_v54  ;;  %v20594_v31 = vld [vmem:[#allocation109_spill] sm:$0xff] }
 0x539   :  { %5764 = vmatpush1.msra.mxu0 %v20590_v2  ;;  %5895 = vmatpush1.msra.mxu1 %v20562_v39  ;;  %v20595_v2 = vld [vmem:[#allocation112_spill] sm:$0xff] }
 0x53a   :  { %5767 = vmatprep.subr.mxu0 %v20591_v13  ;;  %5897 = vmatprep.subr.mxu1 %v20563_v44  ;;  %v20596_v13 = vld [vmem:[#allocation115_spill] sm:$0xff] }
 0x53b   :  { %5770 = vmatpush1.msra.mxu0 %v20592_v50  ;;  %5899 = vmatpush1.msra.mxu1 %v20564_v57  ;;  %v20597_v50 = vld [vmem:[#allocation118_spill] sm:$0xff] }
 0x53c   :  { %5773 = vmatprep.subr.mxu0 %v20593_v37  ;;  %5936 = vmatmul.mubr.f32.vlgmr.msra.gmra.mxu1 %v16805_v34  ;;  %v20598_v37 = vld [vmem:[#allocation124_spill] sm:$0xff] }
 0x53d   :  { %6111 = vmatprep.subr.mxu1 %v20038_v29  ;;  %5776 = vmatpush1.msra.mxu0 %v20594_v31  ;;  %v20600_v31 = vld [vmem:[#allocation129_spill] sm:$0xff] }
 0x53e   :  { %6113 = vmatpush1.msra.mxu1 %v20039_v20  ;;  %5779 = vmatprep.subr.mxu0 %v20595_v2  ;;  %v20606_v2 = vld [vmem:[#allocation35_spill] sm:$0xff] }
 0x53f   :  { %6115 = vmatprep.subr.mxu1 %v20040_v43  ;;  %5782 = vmatpush1.msra.mxu0 %v20596_v13  ;;  %v20601_v13 = vld [vmem:[#allocation21_spill] sm:$0xff] }
 0x540   :  { %6117 = vmatpush1.msra.mxu1 %v20041_v32  ;;  %5785 = vmatprep.subr.mxu0 %v20597_v50  ;;  %v20602_v50 = vld [vmem:[#allocation25_spill] sm:$0xff] }
 0x541   :  { %6119 = vmatprep.subr.mxu1 %v20042_v16  ;;  %5788 = vmatpush1.msra.mxu0 %v20598_v37  ;;  %v20603_v37 = vld [vmem:[#allocation26_spill] sm:$0xff] }
 0x542   :  { %6121 = vmatpush1.msra.mxu1 %v20045_v28  ;;  %5791 = vmatprep.subr.mxu0 %v20599_v45  ;;  %v20604_v45 = vld [vmem:[#allocation29_spill] sm:$0xff] }
 0x543   :  { %6123 = vmatprep.subr.mxu1 %v20047_v30  ;;  %5794 = vmatpush1.msra.mxu0 %v20600_v31  ;;  %v20605_v31 = vld [vmem:[#allocation32_spill] sm:$0xff] }
 0x544   :  { %5827 = vmatprep.mubr.f32.mxu0 %v19817_v55  ;;  %6125 = vmatpush1.msra.mxu1 %v20049_v5 }
 0x545   :  { %5830 = vmatmul.mubr.f32.vlgmr.msra.gmra.mxu0 %v16798_v52  ;;  %5945 = vmatprep.subr.mxu0 %v20601_v13  ;;  %v20607_v13 = vld [vmem:[#allocation39_spill] sm:$0xff] }
 0x546   :  { %6127 = vmatprep.subr.mxu1 %v20051_v35  ;;  %5949 = vmatpush1.msra.mxu0 %v20602_v50  ;;  %v20608_v50 = vld [vmem:[#allocation47_spill] sm:$0xff] }
 0x547   :  { %6129 = vmatpush1.msra.mxu1 %v20053_v59  ;;  %5953 = vmatprep.subr.mxu0 %v20603_v37  ;;  %v20609_v37 = vld [vmem:[#allocation51_spill] sm:$0xff] }
 0x548   :  { %6131 = vmatprep.subr.mxu1 %v20055_v10  ;;  %5957 = vmatpush1.msra.mxu0 %v20604_v45  ;;  %v20610_v45 = vld [vmem:[#allocation54_spill] sm:$0xff] }
 0x549   :  { %6133 = vmatpush1.msra.mxu1 %v20057_v48  ;;  %5961 = vmatprep.subr.mxu0 %v20605_v31  ;;  %v20611_v31 = vld [vmem:[#allocation57_spill] sm:$0xff] }
 0x54a   :  { %6135 = vmatprep.subr.mxu1 %v20059_v3  ;;  %5965 = vmatpush1.msra.mxu0 %v20606_v2  ;;  %v20612_v2 = vld [vmem:[#allocation61_spill] sm:$0xff] }
 0x54b   :  { %6137 = vmatpush1.msra.mxu1 %v20061_v63  ;;  %5969 = vmatprep.subr.mxu0 %v20607_v13  ;;  %v20613_v13 = vld [vmem:[#allocation64_spill] sm:$0xff] }
 0x54c   :  { %6139 = vmatprep.subr.mxu1 %v20063_v40  ;;  %5973 = vmatpush1.msra.mxu0 %v20608_v50  ;;  %v20614_v50 = vld [vmem:[#allocation67_spill] sm:$0xff] }
 0x54d   :  { %6141 = vmatpush1.msra.mxu1 %v20065_v33  ;;  %5977 = vmatprep.subr.mxu0 %v20609_v37  ;;  %v20615_v37 = vld [vmem:[#allocation73_spill] sm:$0xff] }
 0x54e   :  { %6143 = vmatprep.subr.mxu1 %v20067_v58  ;;  %5981 = vmatpush1.msra.mxu0 %v20610_v45  ;;  %v20616_v45 = vld [vmem:[#allocation76_spill] sm:$0xff] }
 0x54f   :  { %6145 = vmatpush1.msra.mxu1 %v20069_v1  ;;  %5985 = vmatprep.subr.mxu0 %v20611_v31  ;;  %v20617_v31 = vld [vmem:[#allocation82_spill] sm:$0xff] }
 0x550   :  { %6147 = vmatprep.subr.mxu1 %v20071_v25  ;;  %5989 = vmatpush1.msra.mxu0 %v20612_v2  ;;  %v20618_v2 = vld [vmem:[#allocation86_spill] sm:$0xff] }
 0x551   :  { %6149 = vmatpush1.msra.mxu1 %v20073_v62  ;;  %5993 = vmatprep.subr.mxu0 %v20613_v13  ;;  %v20619_v13 = vld [vmem:[#allocation90_spill] sm:$0xff] }
 0x552   :  { %6151 = vmatprep.subr.mxu1 %v20075_v27  ;;  %5997 = vmatpush1.msra.mxu0 %v20614_v50  ;;  %v20620_v50 = vld [vmem:[#allocation92_spill] sm:$0xff] }
 0x553   :  { %6153 = vmatpush1.msra.mxu1 %v20077_v51  ;;  %6001 = vmatprep.subr.mxu0 %v20615_v37  ;;  %v20621_v37 = vld [vmem:[#allocation96_spill] sm:$0xff] }
 0x554   :  { %6155 = vmatprep.subr.mxu1 %v20552_v26  ;;  %6005 = vmatpush1.msra.mxu0 %v20616_v45  ;;  %v20622_v45 = vld [vmem:[#allocation99_spill] sm:$0xff]  ;;  %v20693_v26 = vld [vmem:[#allocation144_spill] sm:$0xff] }
 0x555   :  { %6157 = vmatpush1.msra.mxu1 %v20554_v18  ;;  %6009 = vmatprep.subr.mxu0 %v20617_v31  ;;  %v20623_v31 = vld [vmem:[#allocation105_spill] sm:$0xff]  ;;  %v20692_v18 = vld [vmem:[#allocation143_spill] sm:$0xff] }
 0x556   :  { %6159 = vmatprep.subr.mxu1 %v20556_v6  ;;  %6013 = vmatpush1.msra.mxu0 %v20618_v2  ;;  %v20624_v2 = vld [vmem:[#allocation108_spill] sm:$0xff]  ;;  %v20691_v6 = vld [vmem:[#allocation142_spill] sm:$0xff] }
 0x557   :  { %6161 = vmatpush1.msra.mxu1 %v20558_v0  ;;  %6017 = vmatprep.subr.mxu0 %v20619_v13  ;;  %v20627_v13 = vld [vmem:[#allocation114_spill] sm:$0xff]  ;;  %v20690_v0 = vld [vmem:[#allocation140_spill] sm:$0xff] }
 0x558   :  { %6163 = vmatprep.subr.mxu1 %v20559_v12  ;;  %6021 = vmatpush1.msra.mxu0 %v20620_v50  ;;  %v20625_v50 = vld [vmem:[#allocation111_spill] sm:$0xff] }
 0x559   :  { %6165 = vmatpush1.msra.mxu1 %v20560_v53  ;;  %6025 = vmatprep.subr.mxu0 %v20621_v37  ;;  %v20626_v37 = vld [vmem:[#allocation167_spill] sm:$0xff]  ;;  %v20688_v53 = vld [vmem:[#allocation232_spill] sm:$0xff] }
 0x55a   :  { %6167 = vmatprep.subr.mxu1 %v20561_v54  ;;  %6029 = vmatpush1.msra.mxu0 %v20622_v45  ;;  %v20628_v45 = vld [vmem:[#allocation170_spill] sm:$0xff]  ;;  %v20687_v54 = vld [vmem:[#allocation229_spill] sm:$0xff]  ;;  %v20689_v12 = vld [vmem:[#allocation139_spill] sm:$0xff] }
 0x55b   :  { %6169 = vmatpush1.msra.mxu1 %v20562_v39  ;;  %6033 = vmatprep.subr.mxu0 %v20623_v31  ;;  %v20630_v31 = vld [vmem:[#allocation174_spill] sm:$0xff]  ;;  %v20680_v39 = vld [vmem:[#allocation260_spill] sm:$0xff] }
 0x55c   :  { %6171 = vmatprep.subr.mxu1 %v20563_v44  ;;  %6037 = vmatpush1.msra.mxu0 %v20624_v2  ;;  %v20632_v2 = vld [vmem:[#allocation177_spill] sm:$0xff]  ;;  %v20678_v44 = vld [vmem:[#allocation259_spill] sm:$0xff] }
 0x55d   :  { %6173 = vmatpush1.msra.mxu1 %v20564_v57  ;;  %6206 = vmatprep.mubr.f32.mxu1 %v19817_v55  ;;  %v20676_v57 = vld [vmem:[#allocation258_spill] sm:$0xff] }
 0x55e   :  { %6041 = vmatprep.subr.mxu0 %v20625_v50  ;;  %6208 = vmatmul.mubr.f32.vlgmr.msra.gmra.mxu1 %v16795_v15  ;;  %v20635_v50 = vld [vmem:[#allocation128_spill] sm:$0xff] }
 0x55f   :  { %6327 = vmatprep.subr.mxu1 %v20626_v37  ;;  %6045 = vmatpush1.msra.mxu0 %v20627_v13  ;;  %v20637_v37 = vld [vmem:[#allocation131_spill] sm:$0xff]  ;;  %v20638_v13 = vld [vmem:[#allocation186_spill] sm:$0xff] }
 0x560   :  { %6333 = vmatpush1.msra.mxu1 %v20628_v45  ;;  %6049 = vmatprep.subr.mxu0 %v20629_v9  ;;  %v20639_v45 = vld [vmem:[#allocation133_spill] sm:$0xff]  ;;  %v20658_v9 = vld [vmem:[#allocation243_spill] sm:$0xff] }
 0x561   :  { %6339 = vmatprep.subr.mxu1 %v20630_v31  ;;  %6053 = vmatpush1.msra.mxu0 %v20631_v42  ;;  %v20640_v31 = vld [vmem:[#allocation192_spill] sm:$0xff] }
 0x562   :  { %6345 = vmatpush1.msra.mxu1 %v20632_v2  ;;  %6057 = vmatprep.subr.mxu0 %v20633_v8  ;;  %v20641_v8 = vld [vmem:[#allocation195_spill] sm:$0xff]  ;;  %v20654_v2 = vld [vmem:[#allocation237_spill] sm:$0xff]  ;;  %v20656_v42 = vld [vmem:[#allocation240_spill] sm:$0xff] }
 0x563   :  { %6351 = vmatprep.subr.mxu1 %v20634_v21  ;;  %6061 = vmatpush1.msra.mxu0 %v20635_v50  ;;  %v20642_v50 = vld [vmem:[#allocation196_spill] sm:$0xff]  ;;  %v20652_v21 = vld [vmem:[#allocation235_spill] sm:$0xff] }
 0x564   :  { %6357 = vmatpush1.msra.mxu1 %v20636_v23  ;;  %6065 = vmatprep.subr.mxu0 %v20637_v37  ;;  %v20643_v37 = vld [vmem:[#allocation199_spill] sm:$0xff]  ;;  %v20650_v23 = vld [vmem:[#allocation226_spill] sm:$0xff] }
 0x565   :  { %6363 = vmatprep.subr.mxu1 %v20638_v13  ;;  %6069 = vmatpush1.msra.mxu0 %v20639_v45  ;;  %v20644_v45 = vld [vmem:[#allocation203_spill] sm:$0xff] }
 0x566   :  { %6102 = vmatprep.mubr.f32.mxu0 %v19817_v55  ;;  %6369 = vmatpush1.msra.mxu1 %v20640_v31  ;;  %v20645_v31 = vld [vmem:[#allocation206_spill] sm:$0xff]  ;;  %v20646_v13 = vld [vmem:[#allocation215_spill] sm:$0xff] }
 0x567   :  { %6104 = vmatmul.mubr.f32.vlgmr.msra.gmra.mxu0 %v16795_v15  ;;  %6215 = vmatprep.subr.mxu0 %v15103_v49 }
 0x568   :  { %6375 = vmatprep.subr.mxu1 %v20641_v8  ;;  %6217 = vmatpush1.msra.mxu0 %v15113_v60  ;;  %v20647_v8 = vld [vmem:[#allocation219_spill] sm:$0xff] }
 0x569   :  { %6381 = vmatpush1.msra.mxu1 %v20642_v50  ;;  %6219 = vmatprep.subr.mxu0 %v15120_v14  ;;  %v20648_v50 = vld [vmem:[#allocation223_spill] sm:$0xff] }
 0x56a   :  { %6387 = vmatprep.subr.mxu1 %v20643_v37  ;;  %6221 = vmatpush1.msra.mxu0 %v15124_v61  ;;  %v20649_v37 = vld [vmem:[#allocation148_spill] sm:$0xff] }
 0x56b   :  { %6393 = vmatpush1.msra.mxu1 %v20644_v45  ;;  %6223 = vmatprep.subr.mxu0 %v19988_v47  ;;  %v20651_v45 = vld [vmem:[#allocation149_spill] sm:$0xff] }
 0x56c   :  { %6399 = vmatprep.subr.mxu1 %v20645_v31  ;;  %6225 = vmatpush1.msra.mxu0 %v19989_v4  ;;  %v20653_v31 = vld [vmem:[#allocation151_spill] sm:$0xff] }
 0x56d   :  { %6405 = vmatpush1.msra.mxu1 %v20646_v13  ;;  %6227 = vmatprep.subr.mxu0 %v19991_v38  ;;  %v20655_v13 = vld [vmem:[#allocation154_spill] sm:$0xff] }
 0x56e   :  { %6411 = vmatprep.subr.mxu1 %v20647_v8  ;;  %6229 = vmatpush1.msra.mxu0 %v20183_v19  ;;  %v20657_v8 = vld [vmem:[#allocation157_spill] sm:$0xff] }
 0x56f   :  { %6417 = vmatpush1.msra.mxu1 %v20648_v50  ;;  %6231 = vmatprep.subr.mxu0 %v20649_v37  ;;  %v20659_v50 = vld [vmem:[#allocation162_spill] sm:$0xff] }
 0x570   :  { %6423 = vmatprep.subr.mxu1 %v20650_v23  ;;  %6233 = vmatpush1.msra.mxu0 %v20651_v45  ;;  %v20661_v23 = vld [vmem:[#allocation165_spill] sm:$0xff] }
 0x571   :  { %6429 = vmatpush1.msra.mxu1 %v20652_v21  ;;  %6235 = vmatprep.subr.mxu0 %v20653_v31  ;;  %v20663_v21 = vld [vmem:[#allocation171_spill] sm:$0xff] }
 0x572   :  { %6435 = vmatprep.subr.mxu1 %v20654_v2  ;;  %6237 = vmatpush1.msra.mxu0 %v20655_v13  ;;  %v20665_v2 = vld [vmem:[#allocation175_spill] sm:$0xff] }
 0x573   :  { %6441 = vmatpush1.msra.mxu1 %v20656_v42  ;;  %6239 = vmatprep.subr.mxu0 %v20657_v8  ;;  %v20667_v42 = vld [vmem:[#allocation184_spill] sm:$0xff] }
 0x574   :  { %6447 = vmatprep.subr.mxu1 %v20658_v9  ;;  %6241 = vmatpush1.msra.mxu0 %v20659_v50  ;;  %v20669_v9 = vld [vmem:[#allocation187_spill] sm:$0xff] }
 0x575   :  { %6453 = vmatpush1.msra.mxu1 %v20660_v7  ;;  %6243 = vmatprep.subr.mxu0 %v20661_v23  ;;  %v20671_v7 = vld [vmem:[#allocation189_spill] sm:$0xff] }
 0x576   :  { %6459 = vmatprep.subr.mxu1 %v20662_v56  ;;  %6245 = vmatpush1.msra.mxu0 %v20663_v21  ;;  %v20673_v56 = vld [vmem:[#allocation190_spill] sm:$0xff] }
 0x577   :  { %6465 = vmatpush1.msra.mxu1 %v20664_v36  ;;  %6247 = vmatprep.subr.mxu0 %v20665_v2  ;;  %v20675_v36 = vld [vmem:[#allocation193_spill] sm:$0xff] }
 0x578   :  { %6471 = vmatprep.subr.mxu1 %v20666_v11  ;;  %6249 = vmatpush1.msra.mxu0 %v20667_v42  ;;  %v20677_v11 = vld [vmem:[#allocation200_spill] sm:$0xff] }
 0x579   :  { %6477 = vmatpush1.msra.mxu1 %v20668_v46  ;;  %6251 = vmatprep.subr.mxu0 %v20669_v9  ;;  %v20679_v46 = vld [vmem:[#allocation204_spill] sm:$0xff] }
 0x57a   :  { %6483 = vmatprep.subr.mxu1 %v20670_v41  ;;  %6253 = vmatpush1.msra.mxu0 %v20671_v7  ;;  %v20681_v41 = vld [vmem:[#allocation207_spill] sm:$0xff] }
 0x57b   :  { %6489 = vmatpush1.msra.mxu1 %v20672_v24  ;;  %6255 = vmatprep.subr.mxu0 %v20673_v56  ;;  %v20686_v24 = vld [vmem:[#allocation224_spill] sm:$0xff] }
 0x57c   :  { %6495 = vmatprep.subr.mxu1 %v20674_v17  ;;  %6257 = vmatpush1.msra.mxu0 %v20675_v36  ;;  %v20682_v17 = vld [vmem:[#allocation209_spill] sm:$0xff] }
 0x57d   :  { %6501 = vmatpush1.msra.mxu1 %v20676_v57  ;;  %6259 = vmatprep.subr.mxu0 %v20677_v11  ;;  %v20683_v57 = vld [vmem:[#allocation212_spill] sm:$0xff] }
 0x57e   :  { %6507 = vmatprep.subr.mxu1 %v20678_v44  ;;  %6261 = vmatpush1.msra.mxu0 %v20679_v46  ;;  %v20684_v44 = vld [vmem:[#allocation216_spill] sm:$0xff] }
 0x57f   :  { %6513 = vmatpush1.msra.mxu1 %v20680_v39  ;;  %6546 = vmatprep.mubr.f32.mxu1 %v19817_v55  ;;  %v20685_v39 = vld [vmem:[#allocation220_spill] sm:$0xff] }
 0x580   :  { %6263 = vmatprep.subr.mxu0 %v20681_v41  ;;  %6548 = vmatmul.mubr.f32.vlgmr.msra.gmra.mxu1 %v16795_v15 }
 0x581   :  { %6692 = vmatprep.subr.mxu1 %v15103_v49  ;;  %6265 = vmatpush1.msra.mxu0 %v20682_v17 }
 0x582   :  { %6694 = vmatpush1.msra.mxu1 %v15113_v60  ;;  %6267 = vmatprep.subr.mxu0 %v20683_v57 }
 0x583   :  { %6696 = vmatprep.subr.mxu1 %v15120_v14  ;;  %6269 = vmatpush1.msra.mxu0 %v20684_v44 }
 0x584   :  { %6698 = vmatpush1.msra.mxu1 %v15124_v61  ;;  %6271 = vmatprep.subr.mxu0 %v20685_v39 }
 0x585   :  { %6700 = vmatprep.subr.mxu1 %v19988_v47  ;;  %6273 = vmatpush1.msra.mxu0 %v20686_v24 }
 0x586   :  { %6702 = vmatpush1.msra.mxu1 %v19989_v4  ;;  %6275 = vmatprep.subr.mxu0 %v20687_v54 }
 0x587   :  { %6704 = vmatprep.subr.mxu1 %v19991_v38  ;;  %6277 = vmatpush1.msra.mxu0 %v20688_v53 }
 0x588   :  { %6310 = vmatprep.mubr.f32.mxu0 %v19817_v55  ;;  %6706 = vmatpush1.msra.mxu1 %v20183_v19 }
 0x589   :  { %6316 = vmatmul.mubr.f32.vlgmr.msra.gmra.mxu0 %v16813_v22  ;;  %6556 = vmatprep.subr.mxu0 %v20689_v12  ;;  %v20694_v22 = vld [vmem:[#allocation147_spill] sm:$0xff]  ;;  %v20695_v12 = vld [vmem:[#allocation153_spill] sm:$0xff] }
 0x58a   :  { %6708 = vmatprep.subr.mxu1 %v20649_v37  ;;  %6559 = vmatpush1.msra.mxu0 %v20690_v0  ;;  %v20696_v0 = vld [vmem:[#allocation159_spill] sm:$0xff] }
 0x58b   :  { %6710 = vmatpush1.msra.mxu1 %v20651_v45  ;;  %6562 = vmatprep.subr.mxu0 %v20691_v6  ;;  %v20697_v6 = vld [vmem:[#allocation160_spill] sm:$0xff] }
 0x58c   :  { %6712 = vmatprep.subr.mxu1 %v20653_v31  ;;  %6565 = vmatpush1.msra.mxu0 %v20692_v18  ;;  %v20698_v18 = vld [vmem:[#allocation161_spill] sm:$0xff] }
 0x58d   :  { %6714 = vmatpush1.msra.mxu1 %v20655_v13  ;;  %6568 = vmatprep.subr.mxu0 %v20693_v26  ;;  %v20699_v26 = vld [vmem:[#allocation164_spill] sm:$0xff] }
 0x58e   :  { %6716 = vmatprep.subr.mxu1 %v20657_v8  ;;  %6571 = vmatpush1.msra.mxu0 %v20694_v22  ;;  %v20700_v22 = vld [vmem:[#allocation166_spill] sm:$0xff] }
 0x58f   :  { %6718 = vmatpush1.msra.mxu1 %v20659_v50  ;;  %6574 = vmatprep.subr.mxu0 %v20695_v12  ;;  %v20701_v12 = vld [vmem:[#allocation169_spill] sm:$0xff] }
 0x590   :  { %6720 = vmatprep.subr.mxu1 %v20661_v23  ;;  %6577 = vmatpush1.msra.mxu0 %v20696_v0  ;;  %v20702_v0 = vld [vmem:[#allocation180_spill] sm:$0xff] }
 0x591   :  { %6722 = vmatpush1.msra.mxu1 %v20663_v21  ;;  %6580 = vmatprep.subr.mxu0 %v20697_v6  ;;  %v20703_v6 = vld [vmem:[#allocation183_spill] sm:$0xff] }
 0x592   :  { %6724 = vmatprep.subr.mxu1 %v20665_v2  ;;  %6583 = vmatpush1.msra.mxu0 %v20698_v18  ;;  %v20704_v18 = vld [vmem:[#allocation185_spill] sm:$0xff] }
 0x593   :  { %6726 = vmatpush1.msra.mxu1 %v20667_v42  ;;  %6586 = vmatprep.subr.mxu0 %v20699_v26  ;;  %v20705_v26 = vld [vmem:[#allocation188_spill] sm:$0xff] }
 0x594   :  { %6728 = vmatprep.subr.mxu1 %v20669_v9  ;;  %6589 = vmatpush1.msra.mxu0 %v20700_v22  ;;  %v20706_v22 = vld [vmem:[#allocation198_spill] sm:$0xff] }
 0x595   :  { %6730 = vmatpush1.msra.mxu1 %v20671_v7  ;;  %6592 = vmatprep.subr.mxu0 %v20701_v12  ;;  %v20707_v12 = vld [vmem:[#allocation202_spill] sm:$0xff] }
 0x596   :  { %6732 = vmatprep.subr.mxu1 %v20673_v56  ;;  %6595 = vmatpush1.msra.mxu0 %v20702_v0  ;;  %v20708_v0 = vld [vmem:[#allocation205_spill] sm:$0xff] }
 0x597   :  { %6734 = vmatpush1.msra.mxu1 %v20675_v36  ;;  %6598 = vmatprep.subr.mxu0 %v20703_v6  ;;  %v20709_v6 = vld [vmem:[#allocation208_spill] sm:$0xff] }
 0x598   :  { %6736 = vmatprep.subr.mxu1 %v20677_v11  ;;  %6601 = vmatpush1.msra.mxu0 %v20704_v18  ;;  %v20710_v18 = vld [vmem:[#allocation211_spill] sm:$0xff] }
 0x599   :  { %6738 = vmatpush1.msra.mxu1 %v20679_v46  ;;  %6604 = vmatprep.subr.mxu0 %v20705_v26  ;;  %v20711_v26 = vld [vmem:[#allocation214_spill] sm:$0xff] }
 0x59a   :  { %6740 = vmatprep.subr.mxu1 %v20681_v41  ;;  %6607 = vmatpush1.msra.mxu0 %v20706_v22  ;;  %v20712_v22 = vld [vmem:[#allocation218_spill] sm:$0xff] }
 0x59b   :  { %6742 = vmatpush1.msra.mxu1 %v20682_v17  ;;  %6610 = vmatprep.subr.mxu0 %v20707_v12  ;;  %v20752_v12 = vld [vmem:[#allocation247_spill] sm:$0xff] }
 0x59c   :  { %6744 = vmatprep.subr.mxu1 %v20683_v57  ;;  %6613 = vmatpush1.msra.mxu0 %v20708_v0  ;;  %v20713_v0 = vld [vmem:[#allocation222_spill] sm:$0xff] }
 0x59d   :  { %6746 = vmatpush1.msra.mxu1 %v20684_v44  ;;  %6616 = vmatprep.subr.mxu0 %v20709_v6  ;;  %v20714_v6 = vld [vmem:[#allocation228_spill] sm:$0xff] }
 0x59e   :  { %6748 = vmatprep.subr.mxu1 %v20685_v39  ;;  %6619 = vmatpush1.msra.mxu0 %v20710_v18  ;;  %v20715_v18 = vld [vmem:[#allocation231_spill] sm:$0xff] }
 0x59f   :  { %6750 = vmatpush1.msra.mxu1 %v20686_v24  ;;  %6622 = vmatprep.subr.mxu0 %v20711_v26  ;;  %v20716_v26 = vld [vmem:[#allocation234_spill] sm:$0xff] }
 0x5a0   :  { %6752 = vmatprep.subr.mxu1 %v20687_v54  ;;  %6625 = vmatpush1.msra.mxu0 %v20712_v22  ;;  %v20717_v22 = vld [vmem:[#allocation236_spill] sm:$0xff] }
 0x5a1   :  { %6754 = vmatpush1.msra.mxu1 %v20688_v53  ;;  %6787 = vmatprep.mubr.f32.mxu1 %v19817_v55 }
 0x5a2   :  { %6628 = vmatprep.subr.mxu0 %v20713_v0  ;;  %6791 = vmatmul.mubr.f32.vlgmr.msra.gmra.mxu1 %v16805_v34  ;;  %v20718_v0 = vld [vmem:[#allocation239_spill] sm:$0xff]  ;;  %v20719_v34 = vld [vmem:[#allocation242_spill] sm:$0xff] }
 0x5a3   :  { %6966 = vmatprep.subr.mxu1 %v15103_v49  ;;  %6631 = vmatpush1.msra.mxu0 %v20714_v6  ;;  %v20720_v6 = vld [vmem:[#allocation245_spill] sm:$0xff] }
 0x5a4   :  { %6968 = vmatpush1.msra.mxu1 %v15113_v60  ;;  %6634 = vmatprep.subr.mxu0 %v20715_v18  ;;  %v20747_v18 = vld [vmem:[#allocation233_spill] sm:$0xff] }
 0x5a5   :  { %6970 = vmatprep.subr.mxu1 %v15120_v14  ;;  %6637 = vmatpush1.msra.mxu0 %v20716_v26  ;;  %v20721_v26 = vld [vmem:[#allocation146_spill] sm:$0xff] }
 0x5a6   :  { %6972 = vmatpush1.msra.mxu1 %v15124_v61  ;;  %6640 = vmatprep.subr.mxu0 %v20717_v22  ;;  %v20722_v22 = vld [vmem:[#allocation150_spill] sm:$0xff] }
 0x5a7   :  { %6974 = vmatprep.subr.mxu1 %v19988_v47  ;;  %6643 = vmatpush1.msra.mxu0 %v20718_v0  ;;  %v20723_v0 = vld [vmem:[#allocation152_spill] sm:$0xff] }
 0x5a8   :  { %6976 = vmatpush1.msra.mxu1 %v19989_v4  ;;  %6646 = vmatprep.subr.mxu0 %v20719_v34  ;;  %v20724_v34 = vld [vmem:[#allocation155_spill] sm:$0xff] }
 0x5a9   :  { %6978 = vmatprep.subr.mxu1 %v19991_v38  ;;  %6649 = vmatpush1.msra.mxu0 %v20720_v6  ;;  %v20725_v6 = vld [vmem:[#allocation156_spill] sm:$0xff] }
 0x5aa   :  { %6682 = vmatprep.mubr.f32.mxu0 %v19817_v55  ;;  %6980 = vmatpush1.msra.mxu1 %v20183_v19 }
 0x5ab   :  { %6685 = vmatmul.mubr.f32.vlgmr.msra.gmra.mxu0 %v16798_v52  ;;  %6800 = vmatprep.subr.mxu0 %v20721_v26  ;;  %v20726_v52 = vld [vmem:[#allocation158_spill] sm:$0xff]  ;;  %v20727_v26 = vld [vmem:[#allocation163_spill] sm:$0xff] }
 0x5ac   :  { %6982 = vmatprep.subr.mxu1 %v20649_v37  ;;  %6804 = vmatpush1.msra.mxu0 %v20722_v22  ;;  %v20728_v22 = vld [vmem:[#allocation168_spill] sm:$0xff]  ;;  %v14146_v37 = vld [vmem:[%s18931_s1 + $0x68] sm:$0xff] }
 0x5ad   :  { %6984 = vmatpush1.msra.mxu1 %v20651_v45  ;;  %6808 = vmatprep.subr.mxu0 %v20723_v0  ;;  %v20729_v0 = vld [vmem:[#allocation172_spill] sm:$0xff] }
 0x5ae   :  { %6986 = vmatprep.subr.mxu1 %v20653_v31  ;;  %6812 = vmatpush1.msra.mxu0 %v20724_v34  ;;  %v20730_v34 = vld [vmem:[#allocation173_spill] sm:$0xff] }
 0x5af   :  { %6988 = vmatpush1.msra.mxu1 %v20655_v13  ;;  %6816 = vmatprep.subr.mxu0 %v20725_v6  ;;  %v20731_v6 = vld [vmem:[#allocation176_spill] sm:$0xff] }
 0x5b0   :  { %6990 = vmatprep.subr.mxu1 %v20657_v8  ;;  %6820 = vmatpush1.msra.mxu0 %v20726_v52  ;;  %v20732_v52 = vld [vmem:[#allocation179_spill] sm:$0xff] }
 0x5b1   :  { %6992 = vmatpush1.msra.mxu1 %v20659_v50  ;;  %6824 = vmatprep.subr.mxu0 %v20727_v26  ;;  %v20733_v26 = vld [vmem:[#allocation182_spill] sm:$0xff] }
 0x5b2   :  { %6994 = vmatprep.subr.mxu1 %v20661_v23  ;;  %6828 = vmatpush1.msra.mxu0 %v20728_v22  ;;  %v20734_v22 = vld [vmem:[#allocation191_spill] sm:$0xff] }
 0x5b3   :  { %6996 = vmatpush1.msra.mxu1 %v20663_v21  ;;  %6832 = vmatprep.subr.mxu0 %v20729_v0  ;;  %v20735_v0 = vld [vmem:[#allocation194_spill] sm:$0xff] }
 0x5b4   :  { %6998 = vmatprep.subr.mxu1 %v20665_v2  ;;  %6836 = vmatpush1.msra.mxu0 %v20730_v34  ;;  %v20736_v34 = vld [vmem:[#allocation197_spill] sm:$0xff] }
 0x5b5   :  { %7000 = vmatpush1.msra.mxu1 %v20667_v42  ;;  %6840 = vmatprep.subr.mxu0 %v20731_v6  ;;  %v20737_v6 = vld [vmem:[#allocation201_spill] sm:$0xff] }
 0x5b6   :  { %7002 = vmatprep.subr.mxu1 %v20669_v9  ;;  %6844 = vmatpush1.msra.mxu0 %v20732_v52  ;;  %v20738_v52 = vld [vmem:[#allocation210_spill] sm:$0xff] }
 0x5b7   :  { %7004 = vmatpush1.msra.mxu1 %v20671_v7  ;;  %6848 = vmatprep.subr.mxu0 %v20733_v26  ;;  %v20739_v26 = vld [vmem:[#allocation213_spill] sm:$0xff] }
 0x5b8   :  { %7006 = vmatprep.subr.mxu1 %v20673_v56  ;;  %6852 = vmatpush1.msra.mxu0 %v20734_v22  ;;  %v20740_v22 = vld [vmem:[#allocation217_spill] sm:$0xff] }
 0x5b9   :  { %7008 = vmatpush1.msra.mxu1 %v20675_v36  ;;  %6856 = vmatprep.subr.mxu0 %v20735_v0  ;;  %v20741_v0 = vld [vmem:[#allocation221_spill] sm:$0xff] }
 0x5ba   :  { %7010 = vmatprep.subr.mxu1 %v20677_v11  ;;  %6860 = vmatpush1.msra.mxu0 %v20736_v34  ;;  %v20742_v34 = vld [vmem:[#allocation225_spill] sm:$0xff] }
 0x5bb   :  { %7012 = vmatpush1.msra.mxu1 %v20679_v46  ;;  %6864 = vmatprep.subr.mxu0 %v20737_v6  ;;  %v20743_v6 = vld [vmem:[#allocation137_spill] sm:$0xff] }
 0x5bc   :  { %7014 = vmatprep.subr.mxu1 %v20681_v41  ;;  %6868 = vmatpush1.msra.mxu0 %v20738_v52  ;;  %vm7099_vm7 = vcmp.eq.s32.totalorder %v20743_v6, 3  ;;  %v20744_v52 = vld [vmem:[#allocation227_spill] sm:$0xff]  ;;  %v20749_v6 = vld [vmem:[#allocation241_spill] sm:$0xff] }
 0x5bd   :  { %7016 = vmatpush1.msra.mxu1 %v20682_v17  ;;  %6872 = vmatprep.subr.mxu0 %v20739_v26  ;;  %v20745_v26 = vld [vmem:[#allocation230_spill] sm:$0xff] }
 0x5be   :  { %7018 = vmatprep.subr.mxu1 %v20683_v57  ;;  %6876 = vmatpush1.msra.mxu0 %v20740_v22  ;;  %v20746_v22 = vmov 0  }
 0x5bf   :  { %7020 = vmatpush1.msra.mxu1 %v20684_v44  ;;  %6880 = vmatprep.subr.mxu0 %v20741_v0  ;;  %v7100_v0 = vsel %vm7099_vm7, 1, %v20746_v22  ;;  %v20754_v22 = vld [vmem:[#allocation249_spill] sm:$0xff] }
 0x5c0   :  { %7022 = vmatprep.subr.mxu1 %v20685_v39  ;;  %6884 = vmatpush1.msra.mxu0 %v20742_v34  ;;  %v20748_v34 = vld [vmem:[#allocation238_spill] sm:$0xff] }
 0x5c1   :  { %7024 = vmatpush1.msra.mxu1 %v20686_v24  ;;  %6888 = vmatprep.subr.mxu0 %v20744_v52  ;;  %v20750_v52 = vld [vmem:[#allocation244_spill] sm:$0xff]  ;;  %v20758_v24 = vld [vmem:[#allocation253_spill] sm:$0xff] }
 0x5c2   :  { %7026 = vmatprep.subr.mxu1 %v20687_v54  ;;  %6892 = vmatpush1.msra.mxu0 %v20745_v26  ;;  %v20751_v26 = vld [vmem:[#allocation34_spill] sm:$0xff]  ;;  %v20756_v54 = vld [vmem:[#allocation251_spill] sm:$0xff] }
 0x5c3   :  { %7028 = vmatpush1.msra.mxu1 %v20688_v53  ;;  %7061 = vmatprep.mubr.f32.mxu1 %v19817_v55  ;;  %v20753_v53 = vld [vmem:[#allocation37_spill] sm:$0xff] }
 0x5c4   :  { %6896 = vmatprep.subr.mxu0 %v20747_v18  ;;  %7063 = vmatmul.mubr.f32.vlgmr.msra.gmra.mxu1 %v16795_v15  ;;  %v20755_v18 = vld [vmem:[#allocation38_spill] sm:$0xff] }
 0x5c5   :  { %6900 = vmatpush1.msra.mxu0 %v20748_v34  ;;  %6957 = vmatprep.mubr.f32.mxu0 %v19817_v55  ;;  %v20757_v34 = vld [vmem:[#allocation40_spill] sm:$0xff] }
 0x5c6   :  { %6904 = vmatprep.subr.mxu0 %v20749_v6  ;;  %7102 = vperm.xlu1 %14184, %v7100_v0   ;;  %v20759_v6 = vld [vmem:[#allocation43_spill] sm:$0xff]  ;;  %v20760_v0 = vld [vmem:[#allocation46_spill] sm:$0xff] }
 0x5c7   :  { %6908 = vmatpush1.msra.mxu0 %v20750_v52  ;;  %7224 = vmatprep.subr.mxu1 %v20751_v26  ;;  %v20761_v26 = vld [vmem:[#allocation50_spill] sm:$0xff] }
 0x5c8   :  { %6912 = vmatprep.subr.mxu0 %v20752_v12  ;;  %7230 = vmatpush1.msra.mxu1 %v20753_v53  ;;  %v20762_v53 = vld [vmem:[#allocation60_spill] sm:$0xff]  ;;  %v20796_v12 = vld [vmem:[#allocation102_spill] sm:$0xff] }
 0x5c9   :  { %6916 = vmatpush1.msra.mxu0 %v20754_v22  ;;  %7236 = vmatprep.subr.mxu1 %v20755_v18  ;;  %v20763_v18 = vld [vmem:[#allocation63_spill] sm:$0xff]  ;;  %v20794_v22 = vld [vmem:[#allocation93_spill] sm:$0xff] }
 0x5ca   :  { %6920 = vmatprep.subr.mxu0 %v20756_v54  ;;  %7242 = vmatpush1.msra.mxu1 %v20757_v34  ;;  %v20764_v34 = vld [vmem:[#allocation66_spill] sm:$0xff]  ;;  %v20789_v54 = vld [vmem:[#allocation136_spill] sm:$0xff] }
 0x5cb   :  { %6924 = vmatpush1.msra.mxu0 %v20758_v24  ;;  %7248 = vmatprep.subr.mxu1 %v20759_v6  ;;  %v20765_v6 = vld [vmem:[#allocation69_spill] sm:$0xff]  ;;  %v20787_v24 = vld [vmem:[#allocation135_spill] sm:$0xff] }
 0x5cc   :  { %6959 = vmatmul.mubr.f32.vlgmr.msra.gmra.mxu0 %v16795_v15  ;;  %7254 = vmatpush1.msra.mxu1 %v20760_v0  ;;  %v20766_v15 = vld [vmem:[#allocation72_spill] sm:$0xff]  ;;  %v20785_v0 = vld [vmem:[#allocation134_spill] sm:$0xff] }
 0x5cd   :  { %7260 = vmatprep.subr.mxu1 %v20761_v26  ;;  %7112 = vmatprep.subr.mxu0 %v20038_v29  ;;  %v20767_v26 = vld [vmem:[#allocation75_spill] sm:$0xff] }
 0x5ce   :  { %7266 = vmatpush1.msra.mxu1 %v20762_v53  ;;  %7114 = vmatpush1.msra.mxu0 %v20039_v20  ;;  %v20768_v53 = vld [vmem:[#allocation79_spill] sm:$0xff] }
 0x5cf   :  { %7272 = vmatprep.subr.mxu1 %v20763_v18  ;;  %7116 = vmatprep.subr.mxu0 %v20040_v43  ;;  %v20769_v18 = vld [vmem:[#allocation85_spill] sm:$0xff] }
 0x5d0   :  { %7278 = vmatpush1.msra.mxu1 %v20764_v34  ;;  %7118 = vmatpush1.msra.mxu0 %v20041_v32  ;;  %v20770_v34 = vld [vmem:[#allocation89_spill] sm:$0xff] }
 0x5d1   :  { %7284 = vmatprep.subr.mxu1 %v20765_v6  ;;  %7120 = vmatprep.subr.mxu0 %v20042_v16  ;;  %v20771_v6 = vld [vmem:[#allocation95_spill] sm:$0xff] }
 0x5d2   :  { %7290 = vmatpush1.msra.mxu1 %v20766_v15  ;;  %7122 = vmatpush1.msra.mxu0 %v20045_v28  ;;  %v20772_v15 = vld [vmem:[#allocation98_spill] sm:$0xff] }
 0x5d3   :  { %7296 = vmatprep.subr.mxu1 %v20767_v26  ;;  %7124 = vmatprep.subr.mxu0 %v20047_v30  ;;  %v20773_v26 = vld [vmem:[#allocation101_spill] sm:$0xff] }
 0x5d4   :  { %7302 = vmatpush1.msra.mxu1 %v20768_v53  ;;  %7126 = vmatpush1.msra.mxu0 %v20049_v5  ;;  %v20774_v53 = vld [vmem:[#allocation104_spill] sm:$0xff] }
 0x5d5   :  { %7308 = vmatprep.subr.mxu1 %v20769_v18  ;;  %7128 = vmatprep.subr.mxu0 %v20051_v35  ;;  %v20775_v18 = vld [vmem:[#allocation107_spill] sm:$0xff] }
 0x5d6   :  { %7314 = vmatpush1.msra.mxu1 %v20770_v34  ;;  %7130 = vmatpush1.msra.mxu0 %v20053_v59  ;;  %v20776_v34 = vld [vmem:[#allocation110_spill] sm:$0xff] }
 0x5d7   :  { %7320 = vmatprep.subr.mxu1 %v20771_v6  ;;  %7132 = vmatprep.subr.mxu0 %v20055_v10  ;;  %v20777_v6 = vld [vmem:[#allocation116_spill] sm:$0xff] }
 0x5d8   :  { %7326 = vmatpush1.msra.mxu1 %v20772_v15  ;;  %7134 = vmatpush1.msra.mxu0 %v20057_v48  ;;  %v20778_v15 = vld [vmem:[#allocation119_spill] sm:$0xff] }
 0x5d9   :  { %7332 = vmatprep.subr.mxu1 %v20773_v26  ;;  %7136 = vmatprep.subr.mxu0 %v20059_v3  ;;  %v20779_v26 = vld [vmem:[#allocation122_spill] sm:$0xff] }
 0x5da   :  { %7338 = vmatpush1.msra.mxu1 %v20774_v53  ;;  %7138 = vmatpush1.msra.mxu0 %v20061_v63  ;;  %v20780_v53 = vld [vmem:[#allocation125_spill] sm:$0xff] }
 0x5db   :  { %7344 = vmatprep.subr.mxu1 %v20775_v18  ;;  %7140 = vmatprep.subr.mxu0 %v20063_v40  ;;  %v20781_v18 = vld [vmem:[#allocation127_spill] sm:$0xff] }
 0x5dc   :  { %7350 = vmatpush1.msra.mxu1 %v20776_v34  ;;  %7142 = vmatpush1.msra.mxu0 %v20065_v33  ;;  %v20782_v34 = vld [vmem:[#allocation130_spill] sm:$0xff]  ;;  %v5694_v44 = vpop.f32.mrf.mxu1 }
 0x5dd   :  { %7356 = vmatprep.subr.mxu1 %v20777_v6  ;;  %7144 = vmatprep.subr.mxu0 %v20067_v58  ;;  %v20783_v6 = vld [vmem:[#allocation132_spill] sm:$0xff] }
 0x5de   :  { %7362 = vmatpush1.msra.mxu1 %v20778_v15  ;;  %7146 = vmatpush1.msra.mxu0 %v20069_v1  ;;  %v20784_v15 = vld [vmem:[#allocation65_spill] sm:$0xff]  ;;  %v5696_v17 = vpop.f32.mrf.mxu1 }
 0x5df   :  { %7368 = vmatprep.subr.mxu1 %v20779_v26  ;;  %7148 = vmatprep.subr.mxu0 %v20071_v25  ;;  %v20786_v26 = vld [vmem:[#allocation70_spill] sm:$0xff] }
 0x5e0   :  { %7374 = vmatpush1.msra.mxu1 %v20780_v53  ;;  %7150 = vmatpush1.msra.mxu0 %v20073_v62  ;;  %v20788_v53 = vld [vmem:[#allocation74_spill] sm:$0xff] }
 0x5e1   :  { %7380 = vmatprep.subr.mxu1 %v20781_v18  ;;  %7152 = vmatprep.subr.mxu0 %v20075_v27  ;;  %v20791_v18 = vld [vmem:[#allocation81_spill] sm:$0xff] }
 0x5e2   :  { %7386 = vmatpush1.msra.mxu1 %v20782_v34  ;;  %7154 = vmatpush1.msra.mxu0 %v20077_v51  ;;  %v20790_v34 = vld [vmem:[#allocation78_spill] sm:$0xff] }
 0x5e3   :  { %7392 = vmatprep.subr.mxu1 %v20783_v6  ;;  %7156 = vmatprep.subr.mxu0 %v20784_v15  ;;  %v20792_v6 = vld [vmem:[#allocation84_spill] sm:$0xff] }
 0x5e4   :  { %7398 = vmatpush1.msra.mxu1 %v20785_v0  ;;  %7158 = vmatpush1.msra.mxu0 %v20786_v26  ;;  %v20793_v0 = vld [vmem:[#allocation88_spill] sm:$0xff]  ;;  %v5462_v52 = vpop.f32.mrf.mxu0 }
 0x5e5   :  { %7404 = vmatprep.subr.mxu1 %v20787_v24  ;;  %7160 = vmatprep.subr.mxu0 %v20788_v53  ;;  %v20795_v24 = vld [vmem:[#allocation97_spill] sm:$0xff]  ;;  %v5695_v11 = vadd.f32 %v5694_v44, %v5462_v52  ;;  %v14145_v44 = vld [vmem:[%s18931_s1 + $0x60] sm:$0xff] }
 0x5e6   :  { %7410 = vmatpush1.msra.mxu1 %v20789_v54  ;;  %7443 = vmatprep.mubr.f32.mxu1 %v19817_v55  ;;  %v20797_v54 = vld [vmem:[#allocation16_spill] sm:$0xff]  ;;  %v5464_v39 = vpop.f32.mrf.mxu0 }
 0x5e7   :  { %7589 = vmatprep.subr.mxu1 %v20038_v29  ;;  %7162 = vmatpush1.msra.mxu0 %v20790_v34  ;;  %v5697_v46 = vadd.f32 %v5696_v17, %v5464_v39 }
 0x5e8   :  { %7164 = vmatprep.subr.mxu0 %v20791_v18  ;;  %7207 = vmatprep.mubr.f32.mxu0 %v19817_v55 }
 0x5e9   :  { %7166 = vmatpush1.msra.mxu0 %v20792_v6 }
 0x5ea   :  { %7168 = vmatprep.subr.mxu0 %v20793_v0 }
 0x5eb   :  { %7170 = vmatpush1.msra.mxu0 %v20794_v22 }
 0x5ec   :  { %7172 = vmatprep.subr.mxu0 %v20795_v24 }
 0x5ed   :  { %7174 = vmatpush1.msra.mxu0 %v20796_v12 }
 0x5ee   :  { %7453 = vmatprep.subr.mxu0 %v20797_v54 }
 0x5fc   :  { %v5937_v36 = vpop.f32.mrf.mxu1 }
 0x5fe   :  { %v5939_v42 = vpop.f32.mrf.mxu1 }
 0x605   :  { %v5831_v57 = vpop.f32.mrf.mxu0 }
 0x606   :  { %v5832_v9 = vadd.f32 %v5831_v57, %v5695_v11 }
 0x607   :  { %v5833_v41 = vpop.f32.mrf.mxu0 }
 0x608   :  { %v5834_v7 = vadd.f32 %v5833_v41, %v5697_v46  ;;  %v5938_v50 = vadd.f32 %v5937_v36, %v5832_v9 }
 0x60a   :  { %v5940_v21 = vadd.f32 %v5939_v42, %v5834_v7 }
 0x61e   :  { %v6209_v23 = vpop.f32.mrf.mxu1 }
 0x620   :  { %v6211_v54 = vpop.f32.mrf.mxu1 }
 0x627   :  { %v6105_v56 = vpop.f32.mrf.mxu0 }
 0x628   :  { %v6106_v13 = vadd.f32 %v6105_v56, %v5938_v50 }
 0x629   :  { %v6107_v2 = vpop.f32.mrf.mxu0 }
 0x62a   :  { %v6108_v8 = vadd.f32 %v6107_v2, %v5940_v21  ;;  %v6210_v45 = vadd.f32 %v6209_v23, %v6106_v13 }
 0x62c   :  { %v6212_v31 = vadd.f32 %v6211_v54, %v6108_v8  ;;  %v7069_v57 = vadd.f32 %v14145_v44, %v6210_v45 }
 0x62e   :  { %v7070_v39 = vadd.f32 %v14146_v37, %v6212_v31  ;;  %v14149_v41 = vmul.f32 -1.442695, %v7069_v57 }
 0x630   :  { %v14150_v17 = vmul.f32 -1.442695, %v7070_v39 }
 0x632   :  { %14233 = vpow2.f32 %v14150_v17  ;;  %v14147_v17 = vld [vmem:[%s18931_s1 + $0x70] sm:$0xff] }
 0x633   :  { %14235 = vpow2.f32 %v14149_v41 }
 0x63f   :  { %v14234_v2 = vpop.eup %14233 }
 0x640   :  { %v6549_v11 = vpop.f32.mrf.mxu1  ;;  %v14236_v50 = vpop.eup %14235  ;;  %v7082_v52 = vadd.f32 1.0, %v14234_v2  ;;  %v20798_v2 = vld [vmem:[#allocation7_spill] sm:$0xff] }
 0x641   :  { %v7076_v57 = vadd.f32 1.0, %v14236_v50 }
 0x642   :  { %v6551_v54 = vpop.f32.mrf.mxu1  ;;  %14237 = vrcp.f32 %v7082_v52  ;;  %v7103_v52 = vpop.permute.xlu1 %7102 }
 0x643   :  { %14239 = vrcp.f32 %v7076_v57  ;;  %vm7104_vm8 = vcmp.eq.s32.totalorder %v7103_v52, 1  ;;  %v20813_v52 = vld [vmem:[#allocation58_spill] sm:$0xff] }
 0x649   :  { %v6317_v46 = vpop.f32.mrf.mxu0 }
 0x64a   :  { %v6550_v7 = vadd.f32 %v6549_v11, %v6317_v46 }
 0x64b   :  { %v6319_v36 = vpop.f32.mrf.mxu0 }
 0x64c   :  { %v6552_v8 = vadd.f32 %v6551_v54, %v6319_v36 }
 0x662   :  { %v6792_v23 = vpop.f32.mrf.mxu1 }
 0x664   :  { %v6794_v13 = vpop.f32.mrf.mxu1 }
 0x66b   :  { %v6686_v56 = vpop.f32.mrf.mxu0 }
 0x66c   :  { %v6687_v42 = vadd.f32 %v6686_v56, %v6550_v7  ;;  %v14148_v56 = vld [vmem:[%s18931_s1 + $0x78] sm:$0xff] }
 0x66d   :  { %v6688_v21 = vpop.f32.mrf.mxu0 }
 0x66e   :  { %v6689_v9 = vadd.f32 %v6688_v21, %v6552_v8  ;;  %v6793_v37 = vadd.f32 %v6792_v23, %v6687_v42  ;;  %v14238_v8 = vpop.eup %14237 }
 0x66f   :  { %v14240_v42 = vpop.eup %14239 }
 0x670   :  { %v6795_v39 = vadd.f32 %v6794_v13, %v6689_v9  ;;  %v7092_v13 = vmul.f32 %v14238_v8, %v20798_v2  ;;  %v20805_v8 = vld [vmem:[#allocation27_spill] sm:$0xff]  ;;  %v20808_v2 = vld [vmem:[#allocation41_spill] sm:$0xff] }
 0x684   :  { %v7064_v45 = vpop.f32.mrf.mxu1 }
 0x686   :  { %v7066_v36 = vpop.f32.mrf.mxu1 }
 0x68c   :  { %v6960_v31 = vpop.f32.mrf.mxu0 }
 0x68d   :  { %v6961_v44 = vadd.f32 %v6960_v31, %v6793_v37 }
 0x68e   :  { %v6962_v41 = vpop.f32.mrf.mxu0 }
 0x68f   :  { %v7065_v46 = vadd.f32 %v7064_v45, %v6961_v44  ;;  %v6963_v11 = vadd.f32 %v6962_v41, %v6795_v39 }
 0x691   :  { %v7071_v54 = vadd.f32 %v14147_v17, %v7065_v46  ;;  %v7067_v7 = vadd.f32 %v7066_v36, %v6963_v11  ;;  %v20800_v17 = vld [vmem:[#allocation8_spill] sm:$0xff] }
 0x693   :  { %14241 = vtanh.f32 %v7071_v54  ;;  %v7072_v23 = vadd.f32 %v14148_v56, %v7067_v7  ;;  %v20802_v7 = vld [vmem:[#allocation18_spill] sm:$0xff] }
 0x695   :  { %v14151_v21 = vmul.f32 -1.442695, %v7072_v23  ;;  %v20803_v23 = vld [vmem:[#allocation20_spill] sm:$0xff] }
 0x697   :  { %14243 = vpow2.f32 %v14151_v21  ;;  %v20804_v21 = vld [vmem:[#allocation23_spill] sm:$0xff] }
 0x6a0   :  { %v14242_v9 = vpop.eup %14241 }
 0x6a1   :  { %v7093_v50 = vmul.f32 %v14242_v9, %v14240_v42  ;;  %v20806_v42 = vld [vmem:[#allocation30_spill] sm:$0xff]  ;;  %v20807_v9 = vld [vmem:[#allocation33_spill] sm:$0xff] }
 0x6a3   :  { %v17230_v37 = vadd.f32 %v7093_v50, %v7092_v13  ;;  %v20809_v13 = vld [vmem:[#allocation44_spill] sm:$0xff] }
 0x6a4   :  { %v14244_v45 = vpop.eup %14243  ;;  %v20810_v50 = vld [vmem:[#allocation48_spill] sm:$0xff] }
 0x6a5   :  { %20799 = vst [vmem:[#allocation9_spill] sm:$0xff] %v17230_v37  ;;  %v7089_v31 = vadd.f32 1.0, %v14244_v45  ;;  %14245 = vtanh.f32 %v17230_v37  ;;  %v20811_v45 = vld [vmem:[#allocation52_spill] sm:$0xff]  ;;  %v20906_v37 = vld [vmem:[#allocation257_spill] sm:$0xff] }
 0x6a7   :  { %14247 = vrcp.f32 %v7089_v31  ;;  %v20812_v31 = vld [vmem:[#allocation55_spill] sm:$0xff] }
 0x6b2   :  { %v14246_v44 = vpop.eup %14245 }
 0x6b4   :  { %v14248_v39 = vpop.eup %14247 }
 0x6b5   :  { %v7096_v57 = vmul.f32 %v14248_v39, %v14246_v44  ;;  %v20814_v44 = vld [vmem:[#allocation62_spill] sm:$0xff]  ;;  %v20815_v39 = vld [vmem:[#allocation68_spill] sm:$0xff] }
 0x6b7   :  { %v17234_v41 = vsel %vm7104_vm8, %v7096_v57, %v20800_v17  ;;  %v17236_v46 = vand.u32 4294901760, %v7096_v57  ;;  %v20817_v17 = vld [vmem:[#allocation77_spill] sm:$0xff] }
 0x6b8   :  { %20801 = vst [vmem:[#allocation10_spill] sm:$0xff] %v17234_v41  ;;  %v20904_v41 = vld [vmem:[#allocation256_spill] sm:$0xff] }
 0x6b9   :  { %v17239_v11 = vsub.f32 %v7096_v57, %v17236_v46  ;;  %7445 = vmatmul.mubr.f32.vlgmr.msra.gmra.mxu1 %v17236_v46  ;;  %v20816_v57 = vld [vmem:[#allocation71_spill] sm:$0xff] }
 0x6ba   :  { %7591 = vmatpush1.msra.mxu1 %v20039_v20  ;;  %7684 = vmatprep.mubr.f32.mxu1 %v19817_v55 }
 0x6bb   :  { %7593 = vmatprep.subr.mxu1 %v20040_v43  ;;  %v17246_v36 = vand.u32 4294901760, %v17239_v11 }
 0x6bc   :  { %7595 = vmatpush1.msra.mxu1 %v20041_v32 }
 0x6bd   :  { %7597 = vmatprep.subr.mxu1 %v20042_v16  ;;  %v7211_v56 = vsub.f32 %v17239_v11, %v17246_v36 }
 0x6be   :  { %7599 = vmatpush1.msra.mxu1 %v20045_v28 }
 0x6bf   :  { %7601 = vmatprep.subr.mxu1 %v20047_v30  ;;  %v17254_v54 = vand.u32 4294901760, %v7211_v56  ;;  %v20818_v56 = vld [vmem:[#allocation80_spill] sm:$0xff] }
 0x6c0   :  { %7603 = vmatpush1.msra.mxu1 %v20049_v5 }
 0x6c1   :  { %7605 = vmatprep.subr.mxu1 %v20051_v35  ;;  %7213 = vmatmul.mubr.f32.vlgmr.msra.gmra.mxu0 %v17254_v54 }
 0x6c2   :  { %7456 = vmatpush1.msra.mxu0 %v20802_v7  ;;  %7607 = vmatpush1.msra.mxu1 %v20053_v59  ;;  %v20902_v7 = vld [vmem:[#allocation255_spill] sm:$0xff] }
 0x6c3   :  { %7459 = vmatprep.subr.mxu0 %v20803_v23  ;;  %7609 = vmatprep.subr.mxu1 %v20055_v10  ;;  %v20900_v23 = vld [vmem:[#allocation254_spill] sm:$0xff] }
 0x6c4   :  { %7462 = vmatpush1.msra.mxu0 %v20804_v21  ;;  %7611 = vmatpush1.msra.mxu1 %v20057_v48  ;;  %v20898_v21 = vld [vmem:[#allocation252_spill] sm:$0xff] }
 0x6c5   :  { %7465 = vmatprep.subr.mxu0 %v20805_v8  ;;  %7613 = vmatprep.subr.mxu1 %v20059_v3  ;;  %v20896_v8 = vld [vmem:[#allocation250_spill] sm:$0xff] }
 0x6c6   :  { %7468 = vmatpush1.msra.mxu0 %v20806_v42  ;;  %7615 = vmatpush1.msra.mxu1 %v20061_v63  ;;  %v20894_v42 = vld [vmem:[#allocation248_spill] sm:$0xff] }
 0x6c7   :  { %7471 = vmatprep.subr.mxu0 %v20807_v9  ;;  %7617 = vmatprep.subr.mxu1 %v20063_v40  ;;  %v20892_v9 = vld [vmem:[#allocation246_spill] sm:$0xff] }
 0x6c8   :  { %7474 = vmatpush1.msra.mxu0 %v20808_v2  ;;  %7619 = vmatpush1.msra.mxu1 %v20065_v33  ;;  %v20868_v2 = vld [vmem:[#allocation181_spill] sm:$0xff] }
 0x6c9   :  { %7477 = vmatprep.subr.mxu0 %v20809_v13  ;;  %7621 = vmatprep.subr.mxu1 %v20067_v58  ;;  %v20866_v13 = vld [vmem:[#allocation178_spill] sm:$0xff] }
 0x6ca   :  { %7480 = vmatpush1.msra.mxu0 %v20810_v50  ;;  %7623 = vmatpush1.msra.mxu1 %v20069_v1  ;;  %v20865_v50 = vld [vmem:[#allocation123_spill] sm:$0xff] }
 0x6cb   :  { %7483 = vmatprep.subr.mxu0 %v20811_v45  ;;  %7625 = vmatprep.subr.mxu1 %v20071_v25  ;;  %v20863_v45 = vld [vmem:[#allocation121_spill] sm:$0xff] }
 0x6cc   :  { %7486 = vmatpush1.msra.mxu0 %v20812_v31  ;;  %7627 = vmatpush1.msra.mxu1 %v20073_v62  ;;  %v20861_v31 = vld [vmem:[#allocation117_spill] sm:$0xff] }
 0x6cd   :  { %7489 = vmatprep.subr.mxu0 %v20813_v52  ;;  %7629 = vmatprep.subr.mxu1 %v20075_v27  ;;  %v20819_v52 = vld [vmem:[#allocation83_spill] sm:$0xff] }
 0x6ce   :  { %7492 = vmatpush1.msra.mxu0 %v20814_v44  ;;  %7631 = vmatpush1.msra.mxu1 %v20077_v51  ;;  %v20820_v44 = vld [vmem:[#allocation87_spill] sm:$0xff] }
 0x6cf   :  { %7495 = vmatprep.subr.mxu0 %v20815_v39  ;;  %7633 = vmatprep.subr.mxu1 %v20784_v15  ;;  %v20821_v39 = vld [vmem:[#allocation91_spill] sm:$0xff] }
 0x6d0   :  { %7498 = vmatpush1.msra.mxu0 %v20816_v57  ;;  %7635 = vmatpush1.msra.mxu1 %v20786_v26  ;;  %v20822_v57 = vld [vmem:[#allocation94_spill] sm:$0xff] }
 0x6d1   :  { %7501 = vmatprep.subr.mxu0 %v20817_v17  ;;  %7637 = vmatprep.subr.mxu1 %v20788_v53  ;;  %v20823_v17 = vld [vmem:[#allocation100_spill] sm:$0xff] }
 0x6d2   :  { %7504 = vmatpush1.msra.mxu0 %v20818_v56  ;;  %7639 = vmatpush1.msra.mxu1 %v20790_v34  ;;  %v20824_v56 = vld [vmem:[#allocation103_spill] sm:$0xff] }
 0x6d3   :  { %7507 = vmatprep.subr.mxu0 %v20819_v52  ;;  %7641 = vmatprep.subr.mxu1 %v20791_v18  ;;  %v20825_v52 = vld [vmem:[#allocation106_spill] sm:$0xff] }
 0x6d4   :  { %7510 = vmatpush1.msra.mxu0 %v20820_v44  ;;  %7643 = vmatpush1.msra.mxu1 %v20792_v6  ;;  %v20831_v44 = vld [vmem:[#allocation126_spill] sm:$0xff] }
 0x6d5   :  { %7513 = vmatprep.subr.mxu0 %v20821_v39  ;;  %7645 = vmatprep.subr.mxu1 %v20793_v0  ;;  %v20826_v39 = vld [vmem:[#allocation109_spill] sm:$0xff] }
 0x6d6   :  { %7516 = vmatpush1.msra.mxu0 %v20822_v57  ;;  %7647 = vmatpush1.msra.mxu1 %v20794_v22  ;;  %v20827_v57 = vld [vmem:[#allocation112_spill] sm:$0xff] }
 0x6d7   :  { %7519 = vmatprep.subr.mxu0 %v20823_v17  ;;  %7649 = vmatprep.subr.mxu1 %v20795_v24  ;;  %v20828_v17 = vld [vmem:[#allocation115_spill] sm:$0xff] }
 0x6d8   :  { %7522 = vmatpush1.msra.mxu0 %v20824_v56  ;;  %7651 = vmatpush1.msra.mxu1 %v20796_v12  ;;  %v20829_v56 = vld [vmem:[#allocation118_spill] sm:$0xff] }
 0x6d9   :  { %7525 = vmatprep.subr.mxu0 %v20825_v52  ;;  %7688 = vmatmul.mubr.f32.vlgmr.msra.gmra.mxu1 %v17246_v36  ;;  %v20830_v52 = vld [vmem:[#allocation124_spill] sm:$0xff] }
 0x6da   :  { %7863 = vmatprep.subr.mxu1 %v20038_v29  ;;  %7528 = vmatpush1.msra.mxu0 %v20826_v39  ;;  %v20832_v39 = vld [vmem:[#allocation129_spill] sm:$0xff] }
 0x6db   :  { %7865 = vmatpush1.msra.mxu1 %v20039_v20  ;;  %7531 = vmatprep.subr.mxu0 %v20827_v57  ;;  %v20838_v57 = vld [vmem:[#allocation35_spill] sm:$0xff] }
 0x6dc   :  { %7867 = vmatprep.subr.mxu1 %v20040_v43  ;;  %7534 = vmatpush1.msra.mxu0 %v20828_v17  ;;  %v20833_v17 = vld [vmem:[#allocation21_spill] sm:$0xff] }
 0x6dd   :  { %7869 = vmatpush1.msra.mxu1 %v20041_v32  ;;  %7537 = vmatprep.subr.mxu0 %v20829_v56  ;;  %v20834_v56 = vld [vmem:[#allocation25_spill] sm:$0xff] }
 0x6de   :  { %7871 = vmatprep.subr.mxu1 %v20042_v16  ;;  %7540 = vmatpush1.msra.mxu0 %v20830_v52  ;;  %v20835_v52 = vld [vmem:[#allocation26_spill] sm:$0xff] }
 0x6df   :  { %7873 = vmatpush1.msra.mxu1 %v20045_v28  ;;  %7543 = vmatprep.subr.mxu0 %v20831_v44  ;;  %v20836_v44 = vld [vmem:[#allocation29_spill] sm:$0xff] }
 0x6e0   :  { %7875 = vmatprep.subr.mxu1 %v20047_v30  ;;  %7546 = vmatpush1.msra.mxu0 %v20832_v39  ;;  %v20837_v39 = vld [vmem:[#allocation32_spill] sm:$0xff] }
 0x6e1   :  { %7579 = vmatprep.mubr.f32.mxu0 %v19817_v55  ;;  %7877 = vmatpush1.msra.mxu1 %v20049_v5 }
 0x6e2   :  { %7582 = vmatmul.mubr.f32.vlgmr.msra.gmra.mxu0 %v17239_v11  ;;  %7697 = vmatprep.subr.mxu0 %v20833_v17  ;;  %v20839_v17 = vld [vmem:[#allocation39_spill] sm:$0xff] }
 0x6e3   :  { %7879 = vmatprep.subr.mxu1 %v20051_v35  ;;  %7701 = vmatpush1.msra.mxu0 %v20834_v56  ;;  %v20840_v56 = vld [vmem:[#allocation47_spill] sm:$0xff] }
 0x6e4   :  { %7881 = vmatpush1.msra.mxu1 %v20053_v59  ;;  %7705 = vmatprep.subr.mxu0 %v20835_v52  ;;  %v20841_v52 = vld [vmem:[#allocation51_spill] sm:$0xff] }
 0x6e5   :  { %7883 = vmatprep.subr.mxu1 %v20055_v10  ;;  %7709 = vmatpush1.msra.mxu0 %v20836_v44  ;;  %v20842_v44 = vld [vmem:[#allocation54_spill] sm:$0xff] }
 0x6e6   :  { %7885 = vmatpush1.msra.mxu1 %v20057_v48  ;;  %7713 = vmatprep.subr.mxu0 %v20837_v39  ;;  %v20843_v39 = vld [vmem:[#allocation57_spill] sm:$0xff] }
 0x6e7   :  { %7887 = vmatprep.subr.mxu1 %v20059_v3  ;;  %7717 = vmatpush1.msra.mxu0 %v20838_v57  ;;  %v20844_v57 = vld [vmem:[#allocation61_spill] sm:$0xff] }
 0x6e8   :  { %7889 = vmatpush1.msra.mxu1 %v20061_v63  ;;  %7721 = vmatprep.subr.mxu0 %v20839_v17  ;;  %v20845_v17 = vld [vmem:[#allocation64_spill] sm:$0xff] }
 0x6e9   :  { %7891 = vmatprep.subr.mxu1 %v20063_v40  ;;  %7725 = vmatpush1.msra.mxu0 %v20840_v56  ;;  %v20846_v56 = vld [vmem:[#allocation67_spill] sm:$0xff] }
 0x6ea   :  { %7893 = vmatpush1.msra.mxu1 %v20065_v33  ;;  %7729 = vmatprep.subr.mxu0 %v20841_v52  ;;  %v20847_v52 = vld [vmem:[#allocation73_spill] sm:$0xff] }
 0x6eb   :  { %7895 = vmatprep.subr.mxu1 %v20067_v58  ;;  %7733 = vmatpush1.msra.mxu0 %v20842_v44  ;;  %v20848_v44 = vld [vmem:[#allocation76_spill] sm:$0xff] }
 0x6ec   :  { %7897 = vmatpush1.msra.mxu1 %v20069_v1  ;;  %7737 = vmatprep.subr.mxu0 %v20843_v39  ;;  %v20849_v39 = vld [vmem:[#allocation82_spill] sm:$0xff] }
 0x6ed   :  { %7899 = vmatprep.subr.mxu1 %v20071_v25  ;;  %7741 = vmatpush1.msra.mxu0 %v20844_v57  ;;  %v20850_v57 = vld [vmem:[#allocation86_spill] sm:$0xff] }
 0x6ee   :  { %7901 = vmatpush1.msra.mxu1 %v20073_v62  ;;  %7745 = vmatprep.subr.mxu0 %v20845_v17  ;;  %v20851_v17 = vld [vmem:[#allocation90_spill] sm:$0xff] }
 0x6ef   :  { %7903 = vmatprep.subr.mxu1 %v20075_v27  ;;  %7749 = vmatpush1.msra.mxu0 %v20846_v56  ;;  %v20852_v56 = vld [vmem:[#allocation92_spill] sm:$0xff] }
 0x6f0   :  { %7905 = vmatpush1.msra.mxu1 %v20077_v51  ;;  %7753 = vmatprep.subr.mxu0 %v20847_v52  ;;  %v20853_v52 = vld [vmem:[#allocation96_spill] sm:$0xff] }
 0x6f1   :  { %7907 = vmatprep.subr.mxu1 %v20784_v15  ;;  %7757 = vmatpush1.msra.mxu0 %v20848_v44  ;;  %v20854_v44 = vld [vmem:[#allocation99_spill] sm:$0xff]  ;;  %v20925_v15 = vld [vmem:[#allocation144_spill] sm:$0xff] }
 0x6f2   :  { %7909 = vmatpush1.msra.mxu1 %v20786_v26  ;;  %7761 = vmatprep.subr.mxu0 %v20849_v39  ;;  %v20855_v39 = vld [vmem:[#allocation105_spill] sm:$0xff]  ;;  %v20924_v26 = vld [vmem:[#allocation143_spill] sm:$0xff] }
 0x6f3   :  { %7911 = vmatprep.subr.mxu1 %v20788_v53  ;;  %7765 = vmatpush1.msra.mxu0 %v20850_v57  ;;  %v20856_v57 = vld [vmem:[#allocation108_spill] sm:$0xff]  ;;  %v20923_v53 = vld [vmem:[#allocation142_spill] sm:$0xff] }
 0x6f4   :  { %7913 = vmatpush1.msra.mxu1 %v20790_v34  ;;  %7769 = vmatprep.subr.mxu0 %v20851_v17  ;;  %v20859_v17 = vld [vmem:[#allocation114_spill] sm:$0xff]  ;;  %v20922_v34 = vld [vmem:[#allocation140_spill] sm:$0xff] }
 0x6f5   :  { %7915 = vmatprep.subr.mxu1 %v20791_v18  ;;  %7773 = vmatpush1.msra.mxu0 %v20852_v56  ;;  %v20857_v56 = vld [vmem:[#allocation111_spill] sm:$0xff] }
 0x6f6   :  { %7917 = vmatpush1.msra.mxu1 %v20792_v6  ;;  %7777 = vmatprep.subr.mxu0 %v20853_v52  ;;  %v20858_v52 = vld [vmem:[#allocation167_spill] sm:$0xff]  ;;  %v20920_v6 = vld [vmem:[#allocation232_spill] sm:$0xff] }
 0x6f7   :  { %7919 = vmatprep.subr.mxu1 %v20793_v0  ;;  %7781 = vmatpush1.msra.mxu0 %v20854_v44  ;;  %v20860_v44 = vld [vmem:[#allocation170_spill] sm:$0xff]  ;;  %v20919_v0 = vld [vmem:[#allocation229_spill] sm:$0xff]  ;;  %v20921_v18 = vld [vmem:[#allocation139_spill] sm:$0xff] }
 0x6f8   :  { %7921 = vmatpush1.msra.mxu1 %v20794_v22  ;;  %7785 = vmatprep.subr.mxu0 %v20855_v39  ;;  %v20862_v39 = vld [vmem:[#allocation174_spill] sm:$0xff]  ;;  %v20912_v22 = vld [vmem:[#allocation260_spill] sm:$0xff] }
 0x6f9   :  { %7923 = vmatprep.subr.mxu1 %v20795_v24  ;;  %7789 = vmatpush1.msra.mxu0 %v20856_v57  ;;  %v20864_v57 = vld [vmem:[#allocation177_spill] sm:$0xff]  ;;  %v20910_v24 = vld [vmem:[#allocation259_spill] sm:$0xff] }
 0x6fa   :  { %7925 = vmatpush1.msra.mxu1 %v20796_v12  ;;  %7958 = vmatprep.mubr.f32.mxu1 %v19817_v55  ;;  %v20908_v12 = vld [vmem:[#allocation258_spill] sm:$0xff] }
 0x6fb   :  { %7793 = vmatprep.subr.mxu0 %v20857_v56  ;;  %7960 = vmatmul.mubr.f32.vlgmr.msra.gmra.mxu1 %v17236_v46  ;;  %v20867_v56 = vld [vmem:[#allocation128_spill] sm:$0xff] }
 0x6fc   :  { %8079 = vmatprep.subr.mxu1 %v20858_v52  ;;  %7797 = vmatpush1.msra.mxu0 %v20859_v17  ;;  %v20869_v52 = vld [vmem:[#allocation131_spill] sm:$0xff]  ;;  %v20870_v17 = vld [vmem:[#allocation186_spill] sm:$0xff] }
 0x6fd   :  { %8085 = vmatpush1.msra.mxu1 %v20860_v44  ;;  %7801 = vmatprep.subr.mxu0 %v20861_v31  ;;  %v20871_v44 = vld [vmem:[#allocation133_spill] sm:$0xff]  ;;  %v20890_v31 = vld [vmem:[#allocation243_spill] sm:$0xff] }
 0x6fe   :  { %8091 = vmatprep.subr.mxu1 %v20862_v39  ;;  %7805 = vmatpush1.msra.mxu0 %v20863_v45  ;;  %v20872_v39 = vld [vmem:[#allocation192_spill] sm:$0xff] }
 0x6ff   :  { %8097 = vmatpush1.msra.mxu1 %v20864_v57  ;;  %7809 = vmatprep.subr.mxu0 %v20865_v50  ;;  %v20873_v50 = vld [vmem:[#allocation195_spill] sm:$0xff]  ;;  %v20886_v57 = vld [vmem:[#allocation237_spill] sm:$0xff]  ;;  %v20888_v45 = vld [vmem:[#allocation240_spill] sm:$0xff] }
 0x700   :  { %8103 = vmatprep.subr.mxu1 %v20866_v13  ;;  %7813 = vmatpush1.msra.mxu0 %v20867_v56  ;;  %v20874_v56 = vld [vmem:[#allocation196_spill] sm:$0xff]  ;;  %v20884_v13 = vld [vmem:[#allocation235_spill] sm:$0xff] }
 0x701   :  { %8109 = vmatpush1.msra.mxu1 %v20868_v2  ;;  %7817 = vmatprep.subr.mxu0 %v20869_v52  ;;  %v20875_v52 = vld [vmem:[#allocation199_spill] sm:$0xff]  ;;  %v20882_v2 = vld [vmem:[#allocation226_spill] sm:$0xff] }
 0x702   :  { %8115 = vmatprep.subr.mxu1 %v20870_v17  ;;  %7821 = vmatpush1.msra.mxu0 %v20871_v44  ;;  %v20876_v44 = vld [vmem:[#allocation203_spill] sm:$0xff] }
 0x703   :  { %7854 = vmatprep.mubr.f32.mxu0 %v19817_v55  ;;  %8121 = vmatpush1.msra.mxu1 %v20872_v39  ;;  %v20877_v39 = vld [vmem:[#allocation206_spill] sm:$0xff]  ;;  %v20878_v17 = vld [vmem:[#allocation215_spill] sm:$0xff] }
 0x704   :  { %7856 = vmatmul.mubr.f32.vlgmr.msra.gmra.mxu0 %v17236_v46  ;;  %7967 = vmatprep.subr.mxu0 %v15103_v49 }
 0x705   :  { %8127 = vmatprep.subr.mxu1 %v20873_v50  ;;  %7969 = vmatpush1.msra.mxu0 %v15113_v60  ;;  %v20879_v50 = vld [vmem:[#allocation219_spill] sm:$0xff] }
 0x706   :  { %8133 = vmatpush1.msra.mxu1 %v20874_v56  ;;  %7971 = vmatprep.subr.mxu0 %v15120_v14  ;;  %v20880_v56 = vld [vmem:[#allocation223_spill] sm:$0xff] }
 0x707   :  { %8139 = vmatprep.subr.mxu1 %v20875_v52  ;;  %7973 = vmatpush1.msra.mxu0 %v15124_v61  ;;  %v20881_v52 = vld [vmem:[#allocation148_spill] sm:$0xff] }
 0x708   :  { %8145 = vmatpush1.msra.mxu1 %v20876_v44  ;;  %7975 = vmatprep.subr.mxu0 %v19988_v47  ;;  %v20883_v44 = vld [vmem:[#allocation149_spill] sm:$0xff] }
 0x709   :  { %8151 = vmatprep.subr.mxu1 %v20877_v39  ;;  %7977 = vmatpush1.msra.mxu0 %v19989_v4  ;;  %v20885_v39 = vld [vmem:[#allocation151_spill] sm:$0xff] }
 0x70a   :  { %8157 = vmatpush1.msra.mxu1 %v20878_v17  ;;  %7979 = vmatprep.subr.mxu0 %v19991_v38  ;;  %v20887_v17 = vld [vmem:[#allocation154_spill] sm:$0xff] }
 0x70b   :  { %8163 = vmatprep.subr.mxu1 %v20879_v50  ;;  %7981 = vmatpush1.msra.mxu0 %v20183_v19  ;;  %v20889_v50 = vld [vmem:[#allocation157_spill] sm:$0xff] }
 0x70c   :  { %8169 = vmatpush1.msra.mxu1 %v20880_v56  ;;  %7983 = vmatprep.subr.mxu0 %v20881_v52  ;;  %v20891_v56 = vld [vmem:[#allocation162_spill] sm:$0xff] }
 0x70d   :  { %8175 = vmatprep.subr.mxu1 %v20882_v2  ;;  %7985 = vmatpush1.msra.mxu0 %v20883_v44  ;;  %v20893_v2 = vld [vmem:[#allocation165_spill] sm:$0xff] }
 0x70e   :  { %8181 = vmatpush1.msra.mxu1 %v20884_v13  ;;  %7987 = vmatprep.subr.mxu0 %v20885_v39  ;;  %v20895_v13 = vld [vmem:[#allocation171_spill] sm:$0xff] }
 0x70f   :  { %8187 = vmatprep.subr.mxu1 %v20886_v57  ;;  %7989 = vmatpush1.msra.mxu0 %v20887_v17  ;;  %v20897_v57 = vld [vmem:[#allocation175_spill] sm:$0xff] }
 0x710   :  { %8193 = vmatpush1.msra.mxu1 %v20888_v45  ;;  %7991 = vmatprep.subr.mxu0 %v20889_v50  ;;  %v20899_v45 = vld [vmem:[#allocation184_spill] sm:$0xff] }
 0x711   :  { %8199 = vmatprep.subr.mxu1 %v20890_v31  ;;  %7993 = vmatpush1.msra.mxu0 %v20891_v56  ;;  %v20901_v31 = vld [vmem:[#allocation187_spill] sm:$0xff] }
 0x712   :  { %8205 = vmatpush1.msra.mxu1 %v20892_v9  ;;  %7995 = vmatprep.subr.mxu0 %v20893_v2  ;;  %v20903_v9 = vld [vmem:[#allocation189_spill] sm:$0xff] }
 0x713   :  { %8211 = vmatprep.subr.mxu1 %v20894_v42  ;;  %7997 = vmatpush1.msra.mxu0 %v20895_v13  ;;  %v20905_v42 = vld [vmem:[#allocation190_spill] sm:$0xff] }
 0x714   :  { %8217 = vmatpush1.msra.mxu1 %v20896_v8  ;;  %7999 = vmatprep.subr.mxu0 %v20897_v57  ;;  %v20907_v8 = vld [vmem:[#allocation193_spill] sm:$0xff] }
 0x715   :  { %8223 = vmatprep.subr.mxu1 %v20898_v21  ;;  %8001 = vmatpush1.msra.mxu0 %v20899_v45  ;;  %v20909_v21 = vld [vmem:[#allocation200_spill] sm:$0xff] }
 0x716   :  { %8229 = vmatpush1.msra.mxu1 %v20900_v23  ;;  %8003 = vmatprep.subr.mxu0 %v20901_v31  ;;  %v20911_v23 = vld [vmem:[#allocation204_spill] sm:$0xff] }
 0x717   :  { %8235 = vmatprep.subr.mxu1 %v20902_v7  ;;  %8005 = vmatpush1.msra.mxu0 %v20903_v9  ;;  %v20913_v7 = vld [vmem:[#allocation207_spill] sm:$0xff] }
 0x718   :  { %8241 = vmatpush1.msra.mxu1 %v20904_v41  ;;  %8007 = vmatprep.subr.mxu0 %v20905_v42  ;;  %v20918_v41 = vld [vmem:[#allocation224_spill] sm:$0xff] }
 0x719   :  { %8247 = vmatprep.subr.mxu1 %v20906_v37  ;;  %8009 = vmatpush1.msra.mxu0 %v20907_v8  ;;  %v20914_v37 = vld [vmem:[#allocation209_spill] sm:$0xff] }
 0x71a   :  { %8253 = vmatpush1.msra.mxu1 %v20908_v12  ;;  %8011 = vmatprep.subr.mxu0 %v20909_v21  ;;  %v20915_v12 = vld [vmem:[#allocation212_spill] sm:$0xff] }
 0x71b   :  { %8259 = vmatprep.subr.mxu1 %v20910_v24  ;;  %8013 = vmatpush1.msra.mxu0 %v20911_v23  ;;  %v20916_v24 = vld [vmem:[#allocation216_spill] sm:$0xff] }
 0x71c   :  { %8265 = vmatpush1.msra.mxu1 %v20912_v22  ;;  %8298 = vmatprep.mubr.f32.mxu1 %v19817_v55  ;;  %v20917_v22 = vld [vmem:[#allocation220_spill] sm:$0xff] }
 0x71d   :  { %8015 = vmatprep.subr.mxu0 %v20913_v7  ;;  %8300 = vmatmul.mubr.f32.vlgmr.msra.gmra.mxu1 %v17236_v46 }
 0x71e   :  { %8444 = vmatprep.subr.mxu1 %v15103_v49  ;;  %8017 = vmatpush1.msra.mxu0 %v20914_v37 }
 0x71f   :  { %8446 = vmatpush1.msra.mxu1 %v15113_v60  ;;  %8019 = vmatprep.subr.mxu0 %v20915_v12 }
 0x720   :  { %8448 = vmatprep.subr.mxu1 %v15120_v14  ;;  %8021 = vmatpush1.msra.mxu0 %v20916_v24 }
 0x721   :  { %8450 = vmatpush1.msra.mxu1 %v15124_v61  ;;  %8023 = vmatprep.subr.mxu0 %v20917_v22 }
 0x722   :  { %8452 = vmatprep.subr.mxu1 %v19988_v47  ;;  %8025 = vmatpush1.msra.mxu0 %v20918_v41 }
 0x723   :  { %8454 = vmatpush1.msra.mxu1 %v19989_v4  ;;  %8027 = vmatprep.subr.mxu0 %v20919_v0 }
 0x724   :  { %8456 = vmatprep.subr.mxu1 %v19991_v38  ;;  %8029 = vmatpush1.msra.mxu0 %v20920_v6 }
 0x725   :  { %8062 = vmatprep.mubr.f32.mxu0 %v19817_v55  ;;  %8458 = vmatpush1.msra.mxu1 %v20183_v19 }
 0x726   :  { %8068 = vmatmul.mubr.f32.vlgmr.msra.gmra.mxu0 %v17254_v54  ;;  %8308 = vmatprep.subr.mxu0 %v20921_v18  ;;  %v20926_v54 = vld [vmem:[#allocation147_spill] sm:$0xff]  ;;  %v20927_v18 = vld [vmem:[#allocation153_spill] sm:$0xff] }
 0x727   :  { %8460 = vmatprep.subr.mxu1 %v20881_v52  ;;  %8311 = vmatpush1.msra.mxu0 %v20922_v34  ;;  %v20928_v34 = vld [vmem:[#allocation159_spill] sm:$0xff] }
 0x728   :  { %8462 = vmatpush1.msra.mxu1 %v20883_v44  ;;  %8314 = vmatprep.subr.mxu0 %v20923_v53  ;;  %v20929_v53 = vld [vmem:[#allocation160_spill] sm:$0xff] }
 0x729   :  { %8464 = vmatprep.subr.mxu1 %v20885_v39  ;;  %8317 = vmatpush1.msra.mxu0 %v20924_v26  ;;  %v20930_v26 = vld [vmem:[#allocation161_spill] sm:$0xff] }
 0x72a   :  { %8466 = vmatpush1.msra.mxu1 %v20887_v17  ;;  %8320 = vmatprep.subr.mxu0 %v20925_v15  ;;  %v20931_v15 = vld [vmem:[#allocation164_spill] sm:$0xff] }
 0x72b   :  { %8468 = vmatprep.subr.mxu1 %v20889_v50  ;;  %8323 = vmatpush1.msra.mxu0 %v20926_v54  ;;  %v20932_v54 = vld [vmem:[#allocation166_spill] sm:$0xff] }
 0x72c   :  { %8470 = vmatpush1.msra.mxu1 %v20891_v56  ;;  %8326 = vmatprep.subr.mxu0 %v20927_v18  ;;  %v20933_v18 = vld [vmem:[#allocation169_spill] sm:$0xff] }
 0x72d   :  { %8472 = vmatprep.subr.mxu1 %v20893_v2  ;;  %8329 = vmatpush1.msra.mxu0 %v20928_v34  ;;  %v20934_v34 = vld [vmem:[#allocation180_spill] sm:$0xff] }
 0x72e   :  { %8474 = vmatpush1.msra.mxu1 %v20895_v13  ;;  %8332 = vmatprep.subr.mxu0 %v20929_v53  ;;  %v20935_v53 = vld [vmem:[#allocation183_spill] sm:$0xff] }
 0x72f   :  { %8476 = vmatprep.subr.mxu1 %v20897_v57  ;;  %8335 = vmatpush1.msra.mxu0 %v20930_v26  ;;  %v20936_v26 = vld [vmem:[#allocation185_spill] sm:$0xff] }
 0x730   :  { %8478 = vmatpush1.msra.mxu1 %v20899_v45  ;;  %8338 = vmatprep.subr.mxu0 %v20931_v15  ;;  %v20937_v15 = vld [vmem:[#allocation188_spill] sm:$0xff] }
 0x731   :  { %8480 = vmatprep.subr.mxu1 %v20901_v31  ;;  %8341 = vmatpush1.msra.mxu0 %v20932_v54  ;;  %v20938_v54 = vld [vmem:[#allocation198_spill] sm:$0xff] }
 0x732   :  { %8482 = vmatpush1.msra.mxu1 %v20903_v9  ;;  %8344 = vmatprep.subr.mxu0 %v20933_v18  ;;  %v20939_v18 = vld [vmem:[#allocation202_spill] sm:$0xff] }
 0x733   :  { %8484 = vmatprep.subr.mxu1 %v20905_v42  ;;  %8347 = vmatpush1.msra.mxu0 %v20934_v34  ;;  %v20940_v34 = vld [vmem:[#allocation205_spill] sm:$0xff] }
 0x734   :  { %8486 = vmatpush1.msra.mxu1 %v20907_v8  ;;  %8350 = vmatprep.subr.mxu0 %v20935_v53  ;;  %v20941_v53 = vld [vmem:[#allocation208_spill] sm:$0xff] }
 0x735   :  { %8488 = vmatprep.subr.mxu1 %v20909_v21  ;;  %8353 = vmatpush1.msra.mxu0 %v20936_v26  ;;  %v20942_v26 = vld [vmem:[#allocation211_spill] sm:$0xff] }
 0x736   :  { %8490 = vmatpush1.msra.mxu1 %v20911_v23  ;;  %8356 = vmatprep.subr.mxu0 %v20937_v15  ;;  %v20943_v15 = vld [vmem:[#allocation214_spill] sm:$0xff] }
 0x737   :  { %8492 = vmatprep.subr.mxu1 %v20913_v7  ;;  %8359 = vmatpush1.msra.mxu0 %v20938_v54  ;;  %v20944_v54 = vld [vmem:[#allocation218_spill] sm:$0xff] }
 0x738   :  { %8494 = vmatpush1.msra.mxu1 %v20914_v37  ;;  %8362 = vmatprep.subr.mxu0 %v20939_v18  ;;  %v20984_v18 = vld [vmem:[#allocation247_spill] sm:$0xff] }
 0x739   :  { %8496 = vmatprep.subr.mxu1 %v20915_v12  ;;  %8365 = vmatpush1.msra.mxu0 %v20940_v34  ;;  %v20945_v34 = vld [vmem:[#allocation222_spill] sm:$0xff] }
 0x73a   :  { %8498 = vmatpush1.msra.mxu1 %v20916_v24  ;;  %8368 = vmatprep.subr.mxu0 %v20941_v53  ;;  %v20946_v53 = vld [vmem:[#allocation228_spill] sm:$0xff] }
 0x73b   :  { %8500 = vmatprep.subr.mxu1 %v20917_v22  ;;  %8371 = vmatpush1.msra.mxu0 %v20942_v26  ;;  %v20947_v26 = vld [vmem:[#allocation231_spill] sm:$0xff] }
 0x73c   :  { %8502 = vmatpush1.msra.mxu1 %v20918_v41  ;;  %8374 = vmatprep.subr.mxu0 %v20943_v15  ;;  %v20948_v15 = vld [vmem:[#allocation234_spill] sm:$0xff] }
 0x73d   :  { %8504 = vmatprep.subr.mxu1 %v20919_v0  ;;  %8377 = vmatpush1.msra.mxu0 %v20944_v54  ;;  %v20949_v54 = vld [vmem:[#allocation236_spill] sm:$0xff] }
 0x73e   :  { %8506 = vmatpush1.msra.mxu1 %v20920_v6  ;;  %8539 = vmatprep.mubr.f32.mxu1 %v19817_v55 }
 0x73f   :  { %8380 = vmatprep.subr.mxu0 %v20945_v34  ;;  %8543 = vmatmul.mubr.f32.vlgmr.msra.gmra.mxu1 %v17246_v36  ;;  %v20950_v34 = vld [vmem:[#allocation239_spill] sm:$0xff]  ;;  %v20951_v36 = vld [vmem:[#allocation242_spill] sm:$0xff] }
 0x740   :  { %8718 = vmatprep.subr.mxu1 %v15103_v49  ;;  %8383 = vmatpush1.msra.mxu0 %v20946_v53  ;;  %v20952_v53 = vld [vmem:[#allocation245_spill] sm:$0xff] }
 0x741   :  { %8720 = vmatpush1.msra.mxu1 %v15113_v60  ;;  %8386 = vmatprep.subr.mxu0 %v20947_v26  ;;  %v20979_v26 = vld [vmem:[#allocation233_spill] sm:$0xff] }
 0x742   :  { %8722 = vmatprep.subr.mxu1 %v15120_v14  ;;  %8389 = vmatpush1.msra.mxu0 %v20948_v15  ;;  %v20953_v15 = vld [vmem:[#allocation146_spill] sm:$0xff] }
 0x743   :  { %8724 = vmatpush1.msra.mxu1 %v15124_v61  ;;  %8392 = vmatprep.subr.mxu0 %v20949_v54  ;;  %v20954_v54 = vld [vmem:[#allocation150_spill] sm:$0xff] }
 0x744   :  { %8726 = vmatprep.subr.mxu1 %v19988_v47  ;;  %8395 = vmatpush1.msra.mxu0 %v20950_v34  ;;  %v20955_v34 = vld [vmem:[#allocation152_spill] sm:$0xff] }
 0x745   :  { %8728 = vmatpush1.msra.mxu1 %v19989_v4  ;;  %8398 = vmatprep.subr.mxu0 %v20951_v36  ;;  %v20956_v36 = vld [vmem:[#allocation155_spill] sm:$0xff] }
 0x746   :  { %8730 = vmatprep.subr.mxu1 %v19991_v38  ;;  %8401 = vmatpush1.msra.mxu0 %v20952_v53  ;;  %v20957_v53 = vld [vmem:[#allocation156_spill] sm:$0xff] }
 0x747   :  { %8434 = vmatprep.mubr.f32.mxu0 %v19817_v55  ;;  %8732 = vmatpush1.msra.mxu1 %v20183_v19 }
 0x748   :  { %8437 = vmatmul.mubr.f32.vlgmr.msra.gmra.mxu0 %v17239_v11  ;;  %8552 = vmatprep.subr.mxu0 %v20953_v15  ;;  %v20958_v11 = vld [vmem:[#allocation158_spill] sm:$0xff]  ;;  %v20959_v15 = vld [vmem:[#allocation163_spill] sm:$0xff] }
 0x749   :  { %8734 = vmatprep.subr.mxu1 %v20881_v52  ;;  %8556 = vmatpush1.msra.mxu0 %v20954_v54  ;;  %v20960_v54 = vld [vmem:[#allocation168_spill] sm:$0xff]  ;;  %v14153_v52 = vld [vmem:[%s18931_s1 + $0x88] sm:$0xff] }
 0x74a   :  { %8736 = vmatpush1.msra.mxu1 %v20883_v44  ;;  %8560 = vmatprep.subr.mxu0 %v20955_v34  ;;  %v20961_v34 = vld [vmem:[#allocation172_spill] sm:$0xff] }
 0x74b   :  { %8738 = vmatprep.subr.mxu1 %v20885_v39  ;;  %8564 = vmatpush1.msra.mxu0 %v20956_v36  ;;  %v20962_v36 = vld [vmem:[#allocation173_spill] sm:$0xff] }
 0x74c   :  { %8740 = vmatpush1.msra.mxu1 %v20887_v17  ;;  %8568 = vmatprep.subr.mxu0 %v20957_v53  ;;  %v20963_v53 = vld [vmem:[#allocation176_spill] sm:$0xff] }
 0x74d   :  { %8742 = vmatprep.subr.mxu1 %v20889_v50  ;;  %8572 = vmatpush1.msra.mxu0 %v20958_v11  ;;  %v20964_v11 = vld [vmem:[#allocation179_spill] sm:$0xff] }
 0x74e   :  { %8744 = vmatpush1.msra.mxu1 %v20891_v56  ;;  %8576 = vmatprep.subr.mxu0 %v20959_v15  ;;  %v20965_v15 = vld [vmem:[#allocation182_spill] sm:$0xff] }
 0x74f   :  { %8746 = vmatprep.subr.mxu1 %v20893_v2  ;;  %8580 = vmatpush1.msra.mxu0 %v20960_v54  ;;  %v20966_v54 = vld [vmem:[#allocation191_spill] sm:$0xff] }
 0x750   :  { %8748 = vmatpush1.msra.mxu1 %v20895_v13  ;;  %8584 = vmatprep.subr.mxu0 %v20961_v34  ;;  %v20967_v34 = vld [vmem:[#allocation194_spill] sm:$0xff] }
 0x751   :  { %8750 = vmatprep.subr.mxu1 %v20897_v57  ;;  %8588 = vmatpush1.msra.mxu0 %v20962_v36  ;;  %v20968_v36 = vld [vmem:[#allocation197_spill] sm:$0xff] }
 0x752   :  { %8752 = vmatpush1.msra.mxu1 %v20899_v45  ;;  %8592 = vmatprep.subr.mxu0 %v20963_v53  ;;  %v20969_v53 = vld [vmem:[#allocation201_spill] sm:$0xff] }
 0x753   :  { %8754 = vmatprep.subr.mxu1 %v20901_v31  ;;  %8596 = vmatpush1.msra.mxu0 %v20964_v11  ;;  %v20970_v11 = vld [vmem:[#allocation210_spill] sm:$0xff] }
 0x754   :  { %8756 = vmatpush1.msra.mxu1 %v20903_v9  ;;  %8600 = vmatprep.subr.mxu0 %v20965_v15  ;;  %v20971_v15 = vld [vmem:[#allocation213_spill] sm:$0xff] }
 0x755   :  { %8758 = vmatprep.subr.mxu1 %v20905_v42  ;;  %8604 = vmatpush1.msra.mxu0 %v20966_v54  ;;  %v20972_v54 = vld [vmem:[#allocation217_spill] sm:$0xff] }
 0x756   :  { %8760 = vmatpush1.msra.mxu1 %v20907_v8  ;;  %8608 = vmatprep.subr.mxu0 %v20967_v34  ;;  %v20973_v34 = vld [vmem:[#allocation221_spill] sm:$0xff] }
 0x757   :  { %8762 = vmatprep.subr.mxu1 %v20909_v21  ;;  %8612 = vmatpush1.msra.mxu0 %v20968_v36  ;;  %v20974_v36 = vld [vmem:[#allocation225_spill] sm:$0xff] }
 0x758   :  { %8764 = vmatpush1.msra.mxu1 %v20911_v23  ;;  %8616 = vmatprep.subr.mxu0 %v20969_v53  ;;  %v20975_v53 = vld [vmem:[#allocation137_spill] sm:$0xff] }
 0x759   :  { %8766 = vmatprep.subr.mxu1 %v20913_v7  ;;  %8620 = vmatpush1.msra.mxu0 %v20970_v11  ;;  %vm8851_vm9 = vcmp.eq.s32.totalorder %v20975_v53, 4  ;;  %v20976_v11 = vld [vmem:[#allocation227_spill] sm:$0xff]  ;;  %v20981_v53 = vld [vmem:[#allocation241_spill] sm:$0xff] }
 0x75a   :  { %8768 = vmatpush1.msra.mxu1 %v20914_v37  ;;  %8624 = vmatprep.subr.mxu0 %v20971_v15  ;;  %v20977_v15 = vld [vmem:[#allocation230_spill] sm:$0xff] }
 0x75b   :  { %8770 = vmatprep.subr.mxu1 %v20915_v12  ;;  %8628 = vmatpush1.msra.mxu0 %v20972_v54  ;;  %v20978_v54 = vmov 0  }
 0x75c   :  { %8772 = vmatpush1.msra.mxu1 %v20916_v24  ;;  %8632 = vmatprep.subr.mxu0 %v20973_v34  ;;  %v8852_v34 = vsel %vm8851_vm9, 1, %v20978_v54  ;;  %v20986_v54 = vld [vmem:[#allocation249_spill] sm:$0xff] }
 0x75d   :  { %8774 = vmatprep.subr.mxu1 %v20917_v22  ;;  %8636 = vmatpush1.msra.mxu0 %v20974_v36  ;;  %v20980_v36 = vld [vmem:[#allocation238_spill] sm:$0xff] }
 0x75e   :  { %8776 = vmatpush1.msra.mxu1 %v20918_v41  ;;  %8640 = vmatprep.subr.mxu0 %v20976_v11  ;;  %v20982_v11 = vld [vmem:[#allocation244_spill] sm:$0xff]  ;;  %v20990_v41 = vld [vmem:[#allocation253_spill] sm:$0xff] }
 0x75f   :  { %8778 = vmatprep.subr.mxu1 %v20919_v0  ;;  %8644 = vmatpush1.msra.mxu0 %v20977_v15  ;;  %v20983_v15 = vld [vmem:[#allocation34_spill] sm:$0xff]  ;;  %v20988_v0 = vld [vmem:[#allocation251_spill] sm:$0xff] }
 0x760   :  { %8780 = vmatpush1.msra.mxu1 %v20920_v6  ;;  %8813 = vmatprep.mubr.f32.mxu1 %v19817_v55  ;;  %v20985_v6 = vld [vmem:[#allocation37_spill] sm:$0xff] }
 0x761   :  { %8648 = vmatprep.subr.mxu0 %v20979_v26  ;;  %8815 = vmatmul.mubr.f32.vlgmr.msra.gmra.mxu1 %v17236_v46  ;;  %v20987_v26 = vld [vmem:[#allocation38_spill] sm:$0xff] }
 0x762   :  { %8652 = vmatpush1.msra.mxu0 %v20980_v36  ;;  %8709 = vmatprep.mubr.f32.mxu0 %v19817_v55  ;;  %v20989_v36 = vld [vmem:[#allocation40_spill] sm:$0xff] }
 0x763   :  { %8656 = vmatprep.subr.mxu0 %v20981_v53  ;;  %8854 = vperm.xlu0 %14183, %v8852_v34   ;;  %v20991_v53 = vld [vmem:[#allocation43_spill] sm:$0xff]  ;;  %v20992_v34 = vld [vmem:[#allocation46_spill] sm:$0xff] }
 0x764   :  { %8660 = vmatpush1.msra.mxu0 %v20982_v11  ;;  %8976 = vmatprep.subr.mxu1 %v20983_v15  ;;  %v20993_v15 = vld [vmem:[#allocation50_spill] sm:$0xff] }
 0x765   :  { %8664 = vmatprep.subr.mxu0 %v20984_v18  ;;  %8982 = vmatpush1.msra.mxu1 %v20985_v6  ;;  %v20994_v6 = vld [vmem:[#allocation60_spill] sm:$0xff]  ;;  %v21028_v18 = vld [vmem:[#allocation102_spill] sm:$0xff] }
 0x766   :  { %8668 = vmatpush1.msra.mxu0 %v20986_v54  ;;  %8988 = vmatprep.subr.mxu1 %v20987_v26  ;;  %v20995_v26 = vld [vmem:[#allocation63_spill] sm:$0xff]  ;;  %v21026_v54 = vld [vmem:[#allocation93_spill] sm:$0xff] }
 0x767   :  { %8672 = vmatprep.subr.mxu0 %v20988_v0  ;;  %8994 = vmatpush1.msra.mxu1 %v20989_v36  ;;  %v20996_v36 = vld [vmem:[#allocation66_spill] sm:$0xff]  ;;  %v21021_v0 = vld [vmem:[#allocation136_spill] sm:$0xff] }
 0x768   :  { %8676 = vmatpush1.msra.mxu0 %v20990_v41  ;;  %9000 = vmatprep.subr.mxu1 %v20991_v53  ;;  %v20997_v53 = vld [vmem:[#allocation69_spill] sm:$0xff]  ;;  %v21019_v41 = vld [vmem:[#allocation135_spill] sm:$0xff] }
 0x769   :  { %8711 = vmatmul.mubr.f32.vlgmr.msra.gmra.mxu0 %v17236_v46  ;;  %9006 = vmatpush1.msra.mxu1 %v20992_v34  ;;  %v20998_v46 = vld [vmem:[#allocation72_spill] sm:$0xff]  ;;  %v21017_v34 = vld [vmem:[#allocation134_spill] sm:$0xff] }
 0x76a   :  { %9012 = vmatprep.subr.mxu1 %v20993_v15  ;;  %8864 = vmatprep.subr.mxu0 %v20038_v29  ;;  %v20999_v15 = vld [vmem:[#allocation75_spill] sm:$0xff] }
 0x76b   :  { %9018 = vmatpush1.msra.mxu1 %v20994_v6  ;;  %8866 = vmatpush1.msra.mxu0 %v20039_v20  ;;  %v21000_v6 = vld [vmem:[#allocation79_spill] sm:$0xff] }
 0x76c   :  { %9024 = vmatprep.subr.mxu1 %v20995_v26  ;;  %8868 = vmatprep.subr.mxu0 %v20040_v43  ;;  %v21001_v26 = vld [vmem:[#allocation85_spill] sm:$0xff] }
 0x76d   :  { %9030 = vmatpush1.msra.mxu1 %v20996_v36  ;;  %8870 = vmatpush1.msra.mxu0 %v20041_v32  ;;  %v21002_v36 = vld [vmem:[#allocation89_spill] sm:$0xff] }
 0x76e   :  { %9036 = vmatprep.subr.mxu1 %v20997_v53  ;;  %8872 = vmatprep.subr.mxu0 %v20042_v16  ;;  %v21003_v53 = vld [vmem:[#allocation95_spill] sm:$0xff] }
 0x76f   :  { %9042 = vmatpush1.msra.mxu1 %v20998_v46  ;;  %8874 = vmatpush1.msra.mxu0 %v20045_v28  ;;  %v21004_v46 = vld [vmem:[#allocation98_spill] sm:$0xff] }
 0x770   :  { %9048 = vmatprep.subr.mxu1 %v20999_v15  ;;  %8876 = vmatprep.subr.mxu0 %v20047_v30  ;;  %v21005_v15 = vld [vmem:[#allocation101_spill] sm:$0xff] }
 0x771   :  { %9054 = vmatpush1.msra.mxu1 %v21000_v6  ;;  %8878 = vmatpush1.msra.mxu0 %v20049_v5  ;;  %v21006_v6 = vld [vmem:[#allocation104_spill] sm:$0xff] }
 0x772   :  { %9060 = vmatprep.subr.mxu1 %v21001_v26  ;;  %8880 = vmatprep.subr.mxu0 %v20051_v35  ;;  %v21007_v26 = vld [vmem:[#allocation107_spill] sm:$0xff] }
 0x773   :  { %9066 = vmatpush1.msra.mxu1 %v21002_v36  ;;  %8882 = vmatpush1.msra.mxu0 %v20053_v59  ;;  %v21008_v36 = vld [vmem:[#allocation110_spill] sm:$0xff] }
 0x774   :  { %9072 = vmatprep.subr.mxu1 %v21003_v53  ;;  %8884 = vmatprep.subr.mxu0 %v20055_v10  ;;  %v21009_v53 = vld [vmem:[#allocation116_spill] sm:$0xff] }
 0x775   :  { %9078 = vmatpush1.msra.mxu1 %v21004_v46  ;;  %8886 = vmatpush1.msra.mxu0 %v20057_v48  ;;  %v21010_v46 = vld [vmem:[#allocation119_spill] sm:$0xff] }
 0x776   :  { %9084 = vmatprep.subr.mxu1 %v21005_v15  ;;  %8888 = vmatprep.subr.mxu0 %v20059_v3  ;;  %v21011_v15 = vld [vmem:[#allocation122_spill] sm:$0xff] }
 0x777   :  { %9090 = vmatpush1.msra.mxu1 %v21006_v6  ;;  %8890 = vmatpush1.msra.mxu0 %v20061_v63  ;;  %v21012_v6 = vld [vmem:[#allocation125_spill] sm:$0xff] }
 0x778   :  { %9096 = vmatprep.subr.mxu1 %v21007_v26  ;;  %8892 = vmatprep.subr.mxu0 %v20063_v40  ;;  %v21013_v26 = vld [vmem:[#allocation127_spill] sm:$0xff] }
 0x779   :  { %9102 = vmatpush1.msra.mxu1 %v21008_v36  ;;  %8894 = vmatpush1.msra.mxu0 %v20065_v33  ;;  %v21014_v36 = vld [vmem:[#allocation130_spill] sm:$0xff]  ;;  %v7446_v24 = vpop.f32.mrf.mxu1 }
 0x77a   :  { %9108 = vmatprep.subr.mxu1 %v21009_v53  ;;  %8896 = vmatprep.subr.mxu0 %v20067_v58  ;;  %v21015_v53 = vld [vmem:[#allocation132_spill] sm:$0xff] }
 0x77b   :  { %9114 = vmatpush1.msra.mxu1 %v21010_v46  ;;  %8898 = vmatpush1.msra.mxu0 %v20069_v1  ;;  %v21016_v46 = vld [vmem:[#allocation65_spill] sm:$0xff]  ;;  %v7448_v37 = vpop.f32.mrf.mxu1 }
 0x77c   :  { %9120 = vmatprep.subr.mxu1 %v21011_v15  ;;  %8900 = vmatprep.subr.mxu0 %v20071_v25  ;;  %v21018_v15 = vld [vmem:[#allocation70_spill] sm:$0xff] }
 0x77d   :  { %9126 = vmatpush1.msra.mxu1 %v21012_v6  ;;  %8902 = vmatpush1.msra.mxu0 %v20073_v62  ;;  %v21020_v6 = vld [vmem:[#allocation74_spill] sm:$0xff] }
 0x77e   :  { %9132 = vmatprep.subr.mxu1 %v21013_v26  ;;  %8904 = vmatprep.subr.mxu0 %v20075_v27  ;;  %v21023_v26 = vld [vmem:[#allocation81_spill] sm:$0xff] }
 0x77f   :  { %9138 = vmatpush1.msra.mxu1 %v21014_v36  ;;  %8906 = vmatpush1.msra.mxu0 %v20077_v51  ;;  %v21022_v36 = vld [vmem:[#allocation78_spill] sm:$0xff] }
 0x780   :  { %9144 = vmatprep.subr.mxu1 %v21015_v53  ;;  %8908 = vmatprep.subr.mxu0 %v21016_v46  ;;  %v21024_v53 = vld [vmem:[#allocation84_spill] sm:$0xff] }
 0x781   :  { %9150 = vmatpush1.msra.mxu1 %v21017_v34  ;;  %8910 = vmatpush1.msra.mxu0 %v21018_v15  ;;  %v21025_v34 = vld [vmem:[#allocation88_spill] sm:$0xff]  ;;  %v7214_v11 = vpop.f32.mrf.mxu0 }
 0x782   :  { %9156 = vmatprep.subr.mxu1 %v21019_v41  ;;  %8912 = vmatprep.subr.mxu0 %v21020_v6  ;;  %v21027_v41 = vld [vmem:[#allocation97_spill] sm:$0xff]  ;;  %v7447_v21 = vadd.f32 %v7446_v24, %v7214_v11  ;;  %v14152_v24 = vld [vmem:[%s18931_s1 + $0x80] sm:$0xff] }
 0x783   :  { %9162 = vmatpush1.msra.mxu1 %v21021_v0  ;;  %9195 = vmatprep.mubr.f32.mxu1 %v19817_v55  ;;  %v21029_v0 = vld [vmem:[#allocation16_spill] sm:$0xff]  ;;  %v7216_v22 = vpop.f32.mrf.mxu0 }
 0x784   :  { %9341 = vmatprep.subr.mxu1 %v20038_v29  ;;  %8914 = vmatpush1.msra.mxu0 %v21022_v36  ;;  %v7449_v23 = vadd.f32 %v7448_v37, %v7216_v22 }
 0x785   :  { %8916 = vmatprep.subr.mxu0 %v21023_v26  ;;  %8959 = vmatprep.mubr.f32.mxu0 %v19817_v55 }
 0x786   :  { %8918 = vmatpush1.msra.mxu0 %v21024_v53 }
 0x787   :  { %8920 = vmatprep.subr.mxu0 %v21025_v34 }
 0x788   :  { %8922 = vmatpush1.msra.mxu0 %v21026_v54 }
 0x789   :  { %8924 = vmatprep.subr.mxu0 %v21027_v41 }
 0x78a   :  { %8926 = vmatpush1.msra.mxu0 %v21028_v18 }
 0x78b   :  { %9205 = vmatprep.subr.mxu0 %v21029_v0 }
 0x799   :  { %v7689_v8 = vpop.f32.mrf.mxu1 }
 0x79b   :  { %v7691_v45 = vpop.f32.mrf.mxu1 }
 0x7a2   :  { %v7583_v12 = vpop.f32.mrf.mxu0 }
 0x7a3   :  { %v7584_v31 = vadd.f32 %v7583_v12, %v7447_v21 }
 0x7a4   :  { %v7585_v7 = vpop.f32.mrf.mxu0 }
 0x7a5   :  { %v7586_v9 = vadd.f32 %v7585_v7, %v7449_v23  ;;  %v7690_v56 = vadd.f32 %v7689_v8, %v7584_v31 }
 0x7a7   :  { %v7692_v13 = vadd.f32 %v7691_v45, %v7586_v9 }
 0x7bb   :  { %v7961_v2 = vpop.f32.mrf.mxu1 }
 0x7bd   :  { %v7963_v0 = vpop.f32.mrf.mxu1 }
 0x7c4   :  { %v7857_v42 = vpop.f32.mrf.mxu0 }
 0x7c5   :  { %v7858_v17 = vadd.f32 %v7857_v42, %v7690_v56 }
 0x7c6   :  { %v7859_v57 = vpop.f32.mrf.mxu0 }
 0x7c7   :  { %v7860_v50 = vadd.f32 %v7859_v57, %v7692_v13  ;;  %v7962_v44 = vadd.f32 %v7961_v2, %v7858_v17 }
 0x7c9   :  { %v7964_v39 = vadd.f32 %v7963_v0, %v7860_v50  ;;  %v8821_v12 = vadd.f32 %v14152_v24, %v7962_v44 }
 0x7cb   :  { %v8822_v22 = vadd.f32 %v14153_v52, %v7964_v39  ;;  %v14156_v7 = vmul.f32 -1.442695, %v8821_v12 }
 0x7cd   :  { %v14157_v37 = vmul.f32 -1.442695, %v8822_v22 }
 0x7cf   :  { %14249 = vpow2.f32 %v14157_v37  ;;  %v14154_v37 = vld [vmem:[%s18931_s1 + $0x90] sm:$0xff] }
 0x7d0   :  { %14251 = vpow2.f32 %v14156_v7 }
 0x7dc   :  { %v14250_v57 = vpop.eup %14249 }
 0x7dd   :  { %v8301_v21 = vpop.f32.mrf.mxu1  ;;  %v14252_v56 = vpop.eup %14251  ;;  %v8834_v11 = vadd.f32 1.0, %v14250_v57  ;;  %v21030_v57 = vld [vmem:[#allocation9_spill] sm:$0xff] }
 0x7de   :  { %v8828_v12 = vadd.f32 1.0, %v14252_v56 }
 0x7df   :  { %v8303_v0 = vpop.f32.mrf.mxu1  ;;  %14253 = vrcp.f32 %v8834_v11  ;;  %v8855_v11 = vpop.permute.xlu0 %8854 }
 0x7e0   :  { %14255 = vrcp.f32 %v8828_v12  ;;  %vm8856_vm10 = vcmp.eq.s32.totalorder %v8855_v11, 1  ;;  %v21045_v11 = vld [vmem:[#allocation58_spill] sm:$0xff] }
 0x7e6   :  { %v8069_v23 = vpop.f32.mrf.mxu0 }
 0x7e7   :  { %v8302_v9 = vadd.f32 %v8301_v21, %v8069_v23 }
 0x7e8   :  { %v8071_v8 = vpop.f32.mrf.mxu0 }
 0x7e9   :  { %v8304_v50 = vadd.f32 %v8303_v0, %v8071_v8 }
 0x7ff   :  { %v8544_v2 = vpop.f32.mrf.mxu1 }
 0x801   :  { %v8546_v17 = vpop.f32.mrf.mxu1 }
 0x808   :  { %v8438_v42 = vpop.f32.mrf.mxu0 }
 0x809   :  { %v8439_v45 = vadd.f32 %v8438_v42, %v8302_v9  ;;  %v14155_v42 = vld [vmem:[%s18931_s1 + $0x98] sm:$0xff] }
 0x80a   :  { %v8440_v13 = vpop.f32.mrf.mxu0 }
 0x80b   :  { %v8441_v31 = vadd.f32 %v8440_v13, %v8304_v50  ;;  %v8545_v52 = vadd.f32 %v8544_v2, %v8439_v45  ;;  %v14254_v50 = vpop.eup %14253 }
 0x80c   :  { %v14256_v45 = vpop.eup %14255 }
 0x80d   :  { %v8547_v22 = vadd.f32 %v8546_v17, %v8441_v31  ;;  %v8844_v17 = vmul.f32 %v14254_v50, %v21030_v57  ;;  %v21037_v50 = vld [vmem:[#allocation27_spill] sm:$0xff]  ;;  %v21040_v57 = vld [vmem:[#allocation41_spill] sm:$0xff] }
 0x821   :  { %v8816_v44 = vpop.f32.mrf.mxu1 }
 0x823   :  { %v8818_v8 = vpop.f32.mrf.mxu1 }
 0x829   :  { %v8712_v39 = vpop.f32.mrf.mxu0 }
 0x82a   :  { %v8713_v24 = vadd.f32 %v8712_v39, %v8545_v52 }
 0x82b   :  { %v8714_v7 = vpop.f32.mrf.mxu0 }
 0x82c   :  { %v8817_v23 = vadd.f32 %v8816_v44, %v8713_v24  ;;  %v8715_v21 = vadd.f32 %v8714_v7, %v8547_v22 }
 0x82e   :  { %v8823_v0 = vadd.f32 %v14154_v37, %v8817_v23  ;;  %v8819_v9 = vadd.f32 %v8818_v8, %v8715_v21  ;;  %v21032_v37 = vld [vmem:[#allocation10_spill] sm:$0xff] }
 0x830   :  { %14257 = vtanh.f32 %v8823_v0  ;;  %v8824_v2 = vadd.f32 %v14155_v42, %v8819_v9  ;;  %v21034_v9 = vld [vmem:[#allocation18_spill] sm:$0xff] }
 0x832   :  { %v14158_v13 = vmul.f32 -1.442695, %v8824_v2  ;;  %v21035_v2 = vld [vmem:[#allocation20_spill] sm:$0xff] }
 0x834   :  { %14259 = vpow2.f32 %v14158_v13  ;;  %v21036_v13 = vld [vmem:[#allocation23_spill] sm:$0xff] }
 0x83d   :  { %v14258_v31 = vpop.eup %14257 }
 0x83e   :  { %v8845_v56 = vmul.f32 %v14258_v31, %v14256_v45  ;;  %v21038_v45 = vld [vmem:[#allocation30_spill] sm:$0xff]  ;;  %v21039_v31 = vld [vmem:[#allocation33_spill] sm:$0xff] }
 0x840   :  { %v17671_v52 = vadd.f32 %v8845_v56, %v8844_v17  ;;  %v21041_v17 = vld [vmem:[#allocation44_spill] sm:$0xff] }
 0x841   :  { %v14260_v44 = vpop.eup %14259  ;;  %v21042_v56 = vld [vmem:[#allocation48_spill] sm:$0xff] }
 0x842   :  { %21031 = vst [vmem:[#allocation11_spill] sm:$0xff] %v17671_v52  ;;  %v8841_v39 = vadd.f32 1.0, %v14260_v44  ;;  %14261 = vtanh.f32 %v17671_v52  ;;  %v21043_v44 = vld [vmem:[#allocation52_spill] sm:$0xff]  ;;  %v21138_v52 = vld [vmem:[#allocation257_spill] sm:$0xff] }
 0x844   :  { %14263 = vrcp.f32 %v8841_v39  ;;  %v21044_v39 = vld [vmem:[#allocation55_spill] sm:$0xff] }
 0x84f   :  { %v14262_v24 = vpop.eup %14261 }
 0x851   :  { %v14264_v22 = vpop.eup %14263 }
 0x852   :  { %v8848_v12 = vmul.f32 %v14264_v22, %v14262_v24  ;;  %v21046_v24 = vld [vmem:[#allocation62_spill] sm:$0xff]  ;;  %v21047_v22 = vld [vmem:[#allocation68_spill] sm:$0xff] }
 0x854   :  { %v17675_v7 = vsel %vm8856_vm10, %v8848_v12, %v21032_v37  ;;  %v17677_v23 = vand.u32 4294901760, %v8848_v12  ;;  %v21049_v37 = vld [vmem:[#allocation77_spill] sm:$0xff] }
 0x855   :  { %21033 = vst [vmem:[#allocation12_spill] sm:$0xff] %v17675_v7  ;;  %v21136_v7 = vld [vmem:[#allocation256_spill] sm:$0xff] }
 0x856   :  { %v17680_v21 = vsub.f32 %v8848_v12, %v17677_v23  ;;  %9197 = vmatmul.mubr.f32.vlgmr.msra.gmra.mxu1 %v17677_v23  ;;  %v21048_v12 = vld [vmem:[#allocation71_spill] sm:$0xff] }
 0x857   :  { %9343 = vmatpush1.msra.mxu1 %v20039_v20  ;;  %9436 = vmatprep.mubr.f32.mxu1 %v19817_v55 }
 0x858   :  { %9345 = vmatprep.subr.mxu1 %v20040_v43  ;;  %v17687_v8 = vand.u32 4294901760, %v17680_v21 }
 0x859   :  { %9347 = vmatpush1.msra.mxu1 %v20041_v32 }
 0x85a   :  { %9349 = vmatprep.subr.mxu1 %v20042_v16  ;;  %v8963_v42 = vsub.f32 %v17680_v21, %v17687_v8 }
 0x85b   :  { %9351 = vmatpush1.msra.mxu1 %v20045_v28 }
 0x85c   :  { %9353 = vmatprep.subr.mxu1 %v20047_v30  ;;  %v17695_v0 = vand.u32 4294901760, %v8963_v42  ;;  %v21050_v42 = vld [vmem:[#allocation80_spill] sm:$0xff] }
 0x85d   :  { %9355 = vmatpush1.msra.mxu1 %v20049_v5 }
 0x85e   :  { %9357 = vmatprep.subr.mxu1 %v20051_v35  ;;  %8965 = vmatmul.mubr.f32.vlgmr.msra.gmra.mxu0 %v17695_v0 }
 0x85f   :  { %9208 = vmatpush1.msra.mxu0 %v21034_v9  ;;  %9359 = vmatpush1.msra.mxu1 %v20053_v59  ;;  %v21134_v9 = vld [vmem:[#allocation255_spill] sm:$0xff] }
 0x860   :  { %9211 = vmatprep.subr.mxu0 %v21035_v2  ;;  %9361 = vmatprep.subr.mxu1 %v20055_v10  ;;  %v21132_v2 = vld [vmem:[#allocation254_spill] sm:$0xff] }
 0x861   :  { %9214 = vmatpush1.msra.mxu0 %v21036_v13  ;;  %9363 = vmatpush1.msra.mxu1 %v20057_v48  ;;  %v21130_v13 = vld [vmem:[#allocation252_spill] sm:$0xff] }
 0x862   :  { %9217 = vmatprep.subr.mxu0 %v21037_v50  ;;  %9365 = vmatprep.subr.mxu1 %v20059_v3  ;;  %v21128_v50 = vld [vmem:[#allocation250_spill] sm:$0xff] }
 0x863   :  { %9220 = vmatpush1.msra.mxu0 %v21038_v45  ;;  %9367 = vmatpush1.msra.mxu1 %v20061_v63  ;;  %v21126_v45 = vld [vmem:[#allocation248_spill] sm:$0xff] }
 0x864   :  { %9223 = vmatprep.subr.mxu0 %v21039_v31  ;;  %9369 = vmatprep.subr.mxu1 %v20063_v40  ;;  %v21124_v31 = vld [vmem:[#allocation246_spill] sm:$0xff] }
 0x865   :  { %9226 = vmatpush1.msra.mxu0 %v21040_v57  ;;  %9371 = vmatpush1.msra.mxu1 %v20065_v33  ;;  %v21100_v57 = vld [vmem:[#allocation181_spill] sm:$0xff] }
 0x866   :  { %9229 = vmatprep.subr.mxu0 %v21041_v17  ;;  %9373 = vmatprep.subr.mxu1 %v20067_v58  ;;  %v21098_v17 = vld [vmem:[#allocation178_spill] sm:$0xff] }
 0x867   :  { %9232 = vmatpush1.msra.mxu0 %v21042_v56  ;;  %9375 = vmatpush1.msra.mxu1 %v20069_v1  ;;  %v21097_v56 = vld [vmem:[#allocation123_spill] sm:$0xff] }
 0x868   :  { %9235 = vmatprep.subr.mxu0 %v21043_v44  ;;  %9377 = vmatprep.subr.mxu1 %v20071_v25  ;;  %v21095_v44 = vld [vmem:[#allocation121_spill] sm:$0xff] }
 0x869   :  { %9238 = vmatpush1.msra.mxu0 %v21044_v39  ;;  %9379 = vmatpush1.msra.mxu1 %v20073_v62  ;;  %v21093_v39 = vld [vmem:[#allocation117_spill] sm:$0xff] }
 0x86a   :  { %9241 = vmatprep.subr.mxu0 %v21045_v11  ;;  %9381 = vmatprep.subr.mxu1 %v20075_v27  ;;  %v21051_v11 = vld [vmem:[#allocation83_spill] sm:$0xff] }
 0x86b   :  { %9244 = vmatpush1.msra.mxu0 %v21046_v24  ;;  %9383 = vmatpush1.msra.mxu1 %v20077_v51  ;;  %v21052_v24 = vld [vmem:[#allocation87_spill] sm:$0xff] }
 0x86c   :  { %9247 = vmatprep.subr.mxu0 %v21047_v22  ;;  %9385 = vmatprep.subr.mxu1 %v21016_v46  ;;  %v21053_v22 = vld [vmem:[#allocation91_spill] sm:$0xff] }
 0x86d   :  { %9250 = vmatpush1.msra.mxu0 %v21048_v12  ;;  %9387 = vmatpush1.msra.mxu1 %v21018_v15  ;;  %v21054_v12 = vld [vmem:[#allocation94_spill] sm:$0xff] }
 0x86e   :  { %9253 = vmatprep.subr.mxu0 %v21049_v37  ;;  %9389 = vmatprep.subr.mxu1 %v21020_v6  ;;  %v21055_v37 = vld [vmem:[#allocation100_spill] sm:$0xff] }
 0x86f   :  { %9256 = vmatpush1.msra.mxu0 %v21050_v42  ;;  %9391 = vmatpush1.msra.mxu1 %v21022_v36  ;;  %v21056_v42 = vld [vmem:[#allocation103_spill] sm:$0xff] }
 0x870   :  { %9259 = vmatprep.subr.mxu0 %v21051_v11  ;;  %9393 = vmatprep.subr.mxu1 %v21023_v26  ;;  %v21057_v11 = vld [vmem:[#allocation106_spill] sm:$0xff] }
 0x871   :  { %9262 = vmatpush1.msra.mxu0 %v21052_v24  ;;  %9395 = vmatpush1.msra.mxu1 %v21024_v53  ;;  %v21063_v24 = vld [vmem:[#allocation126_spill] sm:$0xff] }
 0x872   :  { %9265 = vmatprep.subr.mxu0 %v21053_v22  ;;  %9397 = vmatprep.subr.mxu1 %v21025_v34  ;;  %v21058_v22 = vld [vmem:[#allocation109_spill] sm:$0xff] }
 0x873   :  { %9268 = vmatpush1.msra.mxu0 %v21054_v12  ;;  %9399 = vmatpush1.msra.mxu1 %v21026_v54  ;;  %v21059_v12 = vld [vmem:[#allocation112_spill] sm:$0xff] }
 0x874   :  { %9271 = vmatprep.subr.mxu0 %v21055_v37  ;;  %9401 = vmatprep.subr.mxu1 %v21027_v41  ;;  %v21060_v37 = vld [vmem:[#allocation115_spill] sm:$0xff] }
 0x875   :  { %9274 = vmatpush1.msra.mxu0 %v21056_v42  ;;  %9403 = vmatpush1.msra.mxu1 %v21028_v18  ;;  %v21061_v42 = vld [vmem:[#allocation118_spill] sm:$0xff] }
 0x876   :  { %9277 = vmatprep.subr.mxu0 %v21057_v11  ;;  %9440 = vmatmul.mubr.f32.vlgmr.msra.gmra.mxu1 %v17687_v8  ;;  %v21062_v11 = vld [vmem:[#allocation124_spill] sm:$0xff] }
 0x877   :  { %9615 = vmatprep.subr.mxu1 %v20038_v29  ;;  %9280 = vmatpush1.msra.mxu0 %v21058_v22  ;;  %v21064_v22 = vld [vmem:[#allocation129_spill] sm:$0xff] }
 0x878   :  { %9617 = vmatpush1.msra.mxu1 %v20039_v20  ;;  %9283 = vmatprep.subr.mxu0 %v21059_v12  ;;  %v21070_v12 = vld [vmem:[#allocation35_spill] sm:$0xff] }
 0x879   :  { %9619 = vmatprep.subr.mxu1 %v20040_v43  ;;  %9286 = vmatpush1.msra.mxu0 %v21060_v37  ;;  %v21065_v37 = vld [vmem:[#allocation21_spill] sm:$0xff] }
 0x87a   :  { %9621 = vmatpush1.msra.mxu1 %v20041_v32  ;;  %9289 = vmatprep.subr.mxu0 %v21061_v42  ;;  %v21066_v42 = vld [vmem:[#allocation25_spill] sm:$0xff] }
 0x87b   :  { %9623 = vmatprep.subr.mxu1 %v20042_v16  ;;  %9292 = vmatpush1.msra.mxu0 %v21062_v11  ;;  %v21067_v11 = vld [vmem:[#allocation26_spill] sm:$0xff] }
 0x87c   :  { %9625 = vmatpush1.msra.mxu1 %v20045_v28  ;;  %9295 = vmatprep.subr.mxu0 %v21063_v24  ;;  %v21068_v24 = vld [vmem:[#allocation29_spill] sm:$0xff] }
 0x87d   :  { %9627 = vmatprep.subr.mxu1 %v20047_v30  ;;  %9298 = vmatpush1.msra.mxu0 %v21064_v22  ;;  %v21069_v22 = vld [vmem:[#allocation32_spill] sm:$0xff] }
 0x87e   :  { %9331 = vmatprep.mubr.f32.mxu0 %v19817_v55  ;;  %9629 = vmatpush1.msra.mxu1 %v20049_v5 }
 0x87f   :  { %9334 = vmatmul.mubr.f32.vlgmr.msra.gmra.mxu0 %v17680_v21  ;;  %9449 = vmatprep.subr.mxu0 %v21065_v37  ;;  %v21071_v37 = vld [vmem:[#allocation39_spill] sm:$0xff] }
 0x880   :  { %9631 = vmatprep.subr.mxu1 %v20051_v35  ;;  %9453 = vmatpush1.msra.mxu0 %v21066_v42  ;;  %v21072_v42 = vld [vmem:[#allocation47_spill] sm:$0xff] }
 0x881   :  { %9633 = vmatpush1.msra.mxu1 %v20053_v59  ;;  %9457 = vmatprep.subr.mxu0 %v21067_v11  ;;  %v21073_v11 = vld [vmem:[#allocation51_spill] sm:$0xff] }
 0x882   :  { %9635 = vmatprep.subr.mxu1 %v20055_v10  ;;  %9461 = vmatpush1.msra.mxu0 %v21068_v24  ;;  %v21074_v24 = vld [vmem:[#allocation54_spill] sm:$0xff] }
 0x883   :  { %9637 = vmatpush1.msra.mxu1 %v20057_v48  ;;  %9465 = vmatprep.subr.mxu0 %v21069_v22  ;;  %v21075_v22 = vld [vmem:[#allocation57_spill] sm:$0xff] }
 0x884   :  { %9639 = vmatprep.subr.mxu1 %v20059_v3  ;;  %9469 = vmatpush1.msra.mxu0 %v21070_v12  ;;  %v21076_v12 = vld [vmem:[#allocation61_spill] sm:$0xff] }
 0x885   :  { %9641 = vmatpush1.msra.mxu1 %v20061_v63  ;;  %9473 = vmatprep.subr.mxu0 %v21071_v37  ;;  %v21077_v37 = vld [vmem:[#allocation64_spill] sm:$0xff] }
 0x886   :  { %9643 = vmatprep.subr.mxu1 %v20063_v40  ;;  %9477 = vmatpush1.msra.mxu0 %v21072_v42  ;;  %v21078_v42 = vld [vmem:[#allocation67_spill] sm:$0xff] }
 0x887   :  { %9645 = vmatpush1.msra.mxu1 %v20065_v33  ;;  %9481 = vmatprep.subr.mxu0 %v21073_v11  ;;  %v21079_v11 = vld [vmem:[#allocation73_spill] sm:$0xff] }
 0x888   :  { %9647 = vmatprep.subr.mxu1 %v20067_v58  ;;  %9485 = vmatpush1.msra.mxu0 %v21074_v24  ;;  %v21080_v24 = vld [vmem:[#allocation76_spill] sm:$0xff] }
 0x889   :  { %9649 = vmatpush1.msra.mxu1 %v20069_v1  ;;  %9489 = vmatprep.subr.mxu0 %v21075_v22  ;;  %v21081_v22 = vld [vmem:[#allocation82_spill] sm:$0xff] }
 0x88a   :  { %9651 = vmatprep.subr.mxu1 %v20071_v25  ;;  %9493 = vmatpush1.msra.mxu0 %v21076_v12  ;;  %v21082_v12 = vld [vmem:[#allocation86_spill] sm:$0xff] }
 0x88b   :  { %9653 = vmatpush1.msra.mxu1 %v20073_v62  ;;  %9497 = vmatprep.subr.mxu0 %v21077_v37  ;;  %v21083_v37 = vld [vmem:[#allocation90_spill] sm:$0xff] }
 0x88c   :  { %9655 = vmatprep.subr.mxu1 %v20075_v27  ;;  %9501 = vmatpush1.msra.mxu0 %v21078_v42  ;;  %v21084_v42 = vld [vmem:[#allocation92_spill] sm:$0xff] }
 0x88d   :  { %9657 = vmatpush1.msra.mxu1 %v20077_v51  ;;  %9505 = vmatprep.subr.mxu0 %v21079_v11  ;;  %v21085_v11 = vld [vmem:[#allocation96_spill] sm:$0xff] }
 0x88e   :  { %9659 = vmatprep.subr.mxu1 %v21016_v46  ;;  %9509 = vmatpush1.msra.mxu0 %v21080_v24  ;;  %v21086_v24 = vld [vmem:[#allocation99_spill] sm:$0xff]  ;;  %v21157_v46 = vld [vmem:[#allocation144_spill] sm:$0xff] }
 0x88f   :  { %9661 = vmatpush1.msra.mxu1 %v21018_v15  ;;  %9513 = vmatprep.subr.mxu0 %v21081_v22  ;;  %v21087_v22 = vld [vmem:[#allocation105_spill] sm:$0xff]  ;;  %v21156_v15 = vld [vmem:[#allocation143_spill] sm:$0xff] }
 0x890   :  { %9663 = vmatprep.subr.mxu1 %v21020_v6  ;;  %9517 = vmatpush1.msra.mxu0 %v21082_v12  ;;  %v21088_v12 = vld [vmem:[#allocation108_spill] sm:$0xff]  ;;  %v21155_v6 = vld [vmem:[#allocation142_spill] sm:$0xff] }
 0x891   :  { %9665 = vmatpush1.msra.mxu1 %v21022_v36  ;;  %9521 = vmatprep.subr.mxu0 %v21083_v37  ;;  %v21091_v37 = vld [vmem:[#allocation114_spill] sm:$0xff]  ;;  %v21154_v36 = vld [vmem:[#allocation140_spill] sm:$0xff] }
 0x892   :  { %9667 = vmatprep.subr.mxu1 %v21023_v26  ;;  %9525 = vmatpush1.msra.mxu0 %v21084_v42  ;;  %v21089_v42 = vld [vmem:[#allocation111_spill] sm:$0xff] }
 0x893   :  { %9669 = vmatpush1.msra.mxu1 %v21024_v53  ;;  %9529 = vmatprep.subr.mxu0 %v21085_v11  ;;  %v21090_v11 = vld [vmem:[#allocation167_spill] sm:$0xff]  ;;  %v21152_v53 = vld [vmem:[#allocation232_spill] sm:$0xff] }
 0x894   :  { %9671 = vmatprep.subr.mxu1 %v21025_v34  ;;  %9533 = vmatpush1.msra.mxu0 %v21086_v24  ;;  %v21092_v24 = vld [vmem:[#allocation170_spill] sm:$0xff]  ;;  %v21151_v34 = vld [vmem:[#allocation229_spill] sm:$0xff]  ;;  %v21153_v26 = vld [vmem:[#allocation139_spill] sm:$0xff] }
 0x895   :  { %9673 = vmatpush1.msra.mxu1 %v21026_v54  ;;  %9537 = vmatprep.subr.mxu0 %v21087_v22  ;;  %v21094_v22 = vld [vmem:[#allocation174_spill] sm:$0xff]  ;;  %v21144_v54 = vld [vmem:[#allocation260_spill] sm:$0xff] }
 0x896   :  { %9675 = vmatprep.subr.mxu1 %v21027_v41  ;;  %9541 = vmatpush1.msra.mxu0 %v21088_v12  ;;  %v21096_v12 = vld [vmem:[#allocation177_spill] sm:$0xff]  ;;  %v21142_v41 = vld [vmem:[#allocation259_spill] sm:$0xff] }
 0x897   :  { %9677 = vmatpush1.msra.mxu1 %v21028_v18  ;;  %9710 = vmatprep.mubr.f32.mxu1 %v19817_v55  ;;  %v21140_v18 = vld [vmem:[#allocation258_spill] sm:$0xff] }
 0x898   :  { %9545 = vmatprep.subr.mxu0 %v21089_v42  ;;  %9712 = vmatmul.mubr.f32.vlgmr.msra.gmra.mxu1 %v17677_v23  ;;  %v21099_v42 = vld [vmem:[#allocation128_spill] sm:$0xff] }
 0x899   :  { %9831 = vmatprep.subr.mxu1 %v21090_v11  ;;  %9549 = vmatpush1.msra.mxu0 %v21091_v37  ;;  %v21101_v11 = vld [vmem:[#allocation131_spill] sm:$0xff]  ;;  %v21102_v37 = vld [vmem:[#allocation186_spill] sm:$0xff] }
 0x89a   :  { %9837 = vmatpush1.msra.mxu1 %v21092_v24  ;;  %9553 = vmatprep.subr.mxu0 %v21093_v39  ;;  %v21103_v24 = vld [vmem:[#allocation133_spill] sm:$0xff]  ;;  %v21122_v39 = vld [vmem:[#allocation243_spill] sm:$0xff] }
 0x89b   :  { %9843 = vmatprep.subr.mxu1 %v21094_v22  ;;  %9557 = vmatpush1.msra.mxu0 %v21095_v44  ;;  %v21104_v22 = vld [vmem:[#allocation192_spill] sm:$0xff] }
 0x89c   :  { %9849 = vmatpush1.msra.mxu1 %v21096_v12  ;;  %9561 = vmatprep.subr.mxu0 %v21097_v56  ;;  %v21105_v56 = vld [vmem:[#allocation195_spill] sm:$0xff]  ;;  %v21118_v12 = vld [vmem:[#allocation237_spill] sm:$0xff]  ;;  %v21120_v44 = vld [vmem:[#allocation240_spill] sm:$0xff] }
 0x89d   :  { %9855 = vmatprep.subr.mxu1 %v21098_v17  ;;  %9565 = vmatpush1.msra.mxu0 %v21099_v42  ;;  %v21106_v42 = vld [vmem:[#allocation196_spill] sm:$0xff]  ;;  %v21116_v17 = vld [vmem:[#allocation235_spill] sm:$0xff] }
 0x89e   :  { %9861 = vmatpush1.msra.mxu1 %v21100_v57  ;;  %9569 = vmatprep.subr.mxu0 %v21101_v11  ;;  %v21107_v11 = vld [vmem:[#allocation199_spill] sm:$0xff]  ;;  %v21114_v57 = vld [vmem:[#allocation226_spill] sm:$0xff] }
 0x89f   :  { %9867 = vmatprep.subr.mxu1 %v21102_v37  ;;  %9573 = vmatpush1.msra.mxu0 %v21103_v24  ;;  %v21108_v24 = vld [vmem:[#allocation203_spill] sm:$0xff] }
 0x8a0   :  { %9606 = vmatprep.mubr.f32.mxu0 %v19817_v55  ;;  %9873 = vmatpush1.msra.mxu1 %v21104_v22  ;;  %v21109_v22 = vld [vmem:[#allocation206_spill] sm:$0xff]  ;;  %v21110_v37 = vld [vmem:[#allocation215_spill] sm:$0xff] }
 0x8a1   :  { %9608 = vmatmul.mubr.f32.vlgmr.msra.gmra.mxu0 %v17677_v23  ;;  %9719 = vmatprep.subr.mxu0 %v15103_v49 }
 0x8a2   :  { %9879 = vmatprep.subr.mxu1 %v21105_v56  ;;  %9721 = vmatpush1.msra.mxu0 %v15113_v60  ;;  %v21111_v56 = vld [vmem:[#allocation219_spill] sm:$0xff] }
 0x8a3   :  { %9885 = vmatpush1.msra.mxu1 %v21106_v42  ;;  %9723 = vmatprep.subr.mxu0 %v15120_v14  ;;  %v21112_v42 = vld [vmem:[#allocation223_spill] sm:$0xff] }
 0x8a4   :  { %9891 = vmatprep.subr.mxu1 %v21107_v11  ;;  %9725 = vmatpush1.msra.mxu0 %v15124_v61  ;;  %v21113_v11 = vld [vmem:[#allocation148_spill] sm:$0xff] }
 0x8a5   :  { %9897 = vmatpush1.msra.mxu1 %v21108_v24  ;;  %9727 = vmatprep.subr.mxu0 %v19988_v47  ;;  %v21115_v24 = vld [vmem:[#allocation149_spill] sm:$0xff] }
 0x8a6   :  { %9903 = vmatprep.subr.mxu1 %v21109_v22  ;;  %9729 = vmatpush1.msra.mxu0 %v19989_v4  ;;  %v21117_v22 = vld [vmem:[#allocation151_spill] sm:$0xff] }
 0x8a7   :  { %9909 = vmatpush1.msra.mxu1 %v21110_v37  ;;  %9731 = vmatprep.subr.mxu0 %v19991_v38  ;;  %v21119_v37 = vld [vmem:[#allocation154_spill] sm:$0xff] }
 0x8a8   :  { %9915 = vmatprep.subr.mxu1 %v21111_v56  ;;  %9733 = vmatpush1.msra.mxu0 %v20183_v19  ;;  %v21121_v56 = vld [vmem:[#allocation157_spill] sm:$0xff] }
 0x8a9   :  { %9921 = vmatpush1.msra.mxu1 %v21112_v42  ;;  %9735 = vmatprep.subr.mxu0 %v21113_v11  ;;  %v21123_v42 = vld [vmem:[#allocation162_spill] sm:$0xff] }
 0x8aa   :  { %9927 = vmatprep.subr.mxu1 %v21114_v57  ;;  %9737 = vmatpush1.msra.mxu0 %v21115_v24  ;;  %v21125_v57 = vld [vmem:[#allocation165_spill] sm:$0xff] }
 0x8ab   :  { %9933 = vmatpush1.msra.mxu1 %v21116_v17  ;;  %9739 = vmatprep.subr.mxu0 %v21117_v22  ;;  %v21127_v17 = vld [vmem:[#allocation171_spill] sm:$0xff] }
 0x8ac   :  { %9939 = vmatprep.subr.mxu1 %v21118_v12  ;;  %9741 = vmatpush1.msra.mxu0 %v21119_v37  ;;  %v21129_v12 = vld [vmem:[#allocation175_spill] sm:$0xff] }
 0x8ad   :  { %9945 = vmatpush1.msra.mxu1 %v21120_v44  ;;  %9743 = vmatprep.subr.mxu0 %v21121_v56  ;;  %v21131_v44 = vld [vmem:[#allocation184_spill] sm:$0xff] }
 0x8ae   :  { %9951 = vmatprep.subr.mxu1 %v21122_v39  ;;  %9745 = vmatpush1.msra.mxu0 %v21123_v42  ;;  %v21133_v39 = vld [vmem:[#allocation187_spill] sm:$0xff] }
 0x8af   :  { %9957 = vmatpush1.msra.mxu1 %v21124_v31  ;;  %9747 = vmatprep.subr.mxu0 %v21125_v57  ;;  %v21135_v31 = vld [vmem:[#allocation189_spill] sm:$0xff] }
 0x8b0   :  { %9963 = vmatprep.subr.mxu1 %v21126_v45  ;;  %9749 = vmatpush1.msra.mxu0 %v21127_v17  ;;  %v21137_v45 = vld [vmem:[#allocation190_spill] sm:$0xff] }
 0x8b1   :  { %9969 = vmatpush1.msra.mxu1 %v21128_v50  ;;  %9751 = vmatprep.subr.mxu0 %v21129_v12  ;;  %v21139_v50 = vld [vmem:[#allocation193_spill] sm:$0xff] }
 0x8b2   :  { %9975 = vmatprep.subr.mxu1 %v21130_v13  ;;  %9753 = vmatpush1.msra.mxu0 %v21131_v44  ;;  %v21141_v13 = vld [vmem:[#allocation200_spill] sm:$0xff] }
 0x8b3   :  { %9981 = vmatpush1.msra.mxu1 %v21132_v2  ;;  %9755 = vmatprep.subr.mxu0 %v21133_v39  ;;  %v21143_v2 = vld [vmem:[#allocation204_spill] sm:$0xff] }
 0x8b4   :  { %9987 = vmatprep.subr.mxu1 %v21134_v9  ;;  %9757 = vmatpush1.msra.mxu0 %v21135_v31  ;;  %v21145_v9 = vld [vmem:[#allocation207_spill] sm:$0xff] }
 0x8b5   :  { %9993 = vmatpush1.msra.mxu1 %v21136_v7  ;;  %9759 = vmatprep.subr.mxu0 %v21137_v45  ;;  %v21150_v7 = vld [vmem:[#allocation224_spill] sm:$0xff] }
 0x8b6   :  { %9999 = vmatprep.subr.mxu1 %v21138_v52  ;;  %9761 = vmatpush1.msra.mxu0 %v21139_v50  ;;  %v21146_v52 = vld [vmem:[#allocation209_spill] sm:$0xff] }
 0x8b7   :  { %10005 = vmatpush1.msra.mxu1 %v21140_v18  ;;  %9763 = vmatprep.subr.mxu0 %v21141_v13  ;;  %v21147_v18 = vld [vmem:[#allocation212_spill] sm:$0xff] }
 0x8b8   :  { %10011 = vmatprep.subr.mxu1 %v21142_v41  ;;  %9765 = vmatpush1.msra.mxu0 %v21143_v2  ;;  %v21148_v41 = vld [vmem:[#allocation216_spill] sm:$0xff] }
 0x8b9   :  { %10017 = vmatpush1.msra.mxu1 %v21144_v54  ;;  %10050 = vmatprep.mubr.f32.mxu1 %v19817_v55  ;;  %v21149_v54 = vld [vmem:[#allocation220_spill] sm:$0xff] }
 0x8ba   :  { %9767 = vmatprep.subr.mxu0 %v21145_v9  ;;  %10052 = vmatmul.mubr.f32.vlgmr.msra.gmra.mxu1 %v17677_v23 }
 0x8bb   :  { %10196 = vmatprep.subr.mxu1 %v15103_v49  ;;  %9769 = vmatpush1.msra.mxu0 %v21146_v52 }
 0x8bc   :  { %10198 = vmatpush1.msra.mxu1 %v15113_v60  ;;  %9771 = vmatprep.subr.mxu0 %v21147_v18 }
 0x8bd   :  { %10200 = vmatprep.subr.mxu1 %v15120_v14  ;;  %9773 = vmatpush1.msra.mxu0 %v21148_v41 }
 0x8be   :  { %10202 = vmatpush1.msra.mxu1 %v15124_v61  ;;  %9775 = vmatprep.subr.mxu0 %v21149_v54 }
 0x8bf   :  { %10204 = vmatprep.subr.mxu1 %v19988_v47  ;;  %9777 = vmatpush1.msra.mxu0 %v21150_v7 }
 0x8c0   :  { %10206 = vmatpush1.msra.mxu1 %v19989_v4  ;;  %9779 = vmatprep.subr.mxu0 %v21151_v34 }
 0x8c1   :  { %10208 = vmatprep.subr.mxu1 %v19991_v38  ;;  %9781 = vmatpush1.msra.mxu0 %v21152_v53 }
 0x8c2   :  { %9814 = vmatprep.mubr.f32.mxu0 %v19817_v55  ;;  %10210 = vmatpush1.msra.mxu1 %v20183_v19 }
 0x8c3   :  { %9820 = vmatmul.mubr.f32.vlgmr.msra.gmra.mxu0 %v17695_v0  ;;  %10060 = vmatprep.subr.mxu0 %v21153_v26  ;;  %v21158_v0 = vld [vmem:[#allocation147_spill] sm:$0xff]  ;;  %v21159_v26 = vld [vmem:[#allocation153_spill] sm:$0xff] }
 0x8c4   :  { %10212 = vmatprep.subr.mxu1 %v21113_v11  ;;  %10063 = vmatpush1.msra.mxu0 %v21154_v36  ;;  %v21160_v36 = vld [vmem:[#allocation159_spill] sm:$0xff] }
 0x8c5   :  { %10214 = vmatpush1.msra.mxu1 %v21115_v24  ;;  %10066 = vmatprep.subr.mxu0 %v21155_v6  ;;  %v21161_v6 = vld [vmem:[#allocation160_spill] sm:$0xff] }
 0x8c6   :  { %10216 = vmatprep.subr.mxu1 %v21117_v22  ;;  %10069 = vmatpush1.msra.mxu0 %v21156_v15  ;;  %v21162_v15 = vld [vmem:[#allocation161_spill] sm:$0xff] }
 0x8c7   :  { %10218 = vmatpush1.msra.mxu1 %v21119_v37  ;;  %10072 = vmatprep.subr.mxu0 %v21157_v46  ;;  %v21163_v46 = vld [vmem:[#allocation164_spill] sm:$0xff] }
 0x8c8   :  { %10220 = vmatprep.subr.mxu1 %v21121_v56  ;;  %10075 = vmatpush1.msra.mxu0 %v21158_v0  ;;  %v21164_v0 = vld [vmem:[#allocation166_spill] sm:$0xff] }
 0x8c9   :  { %10222 = vmatpush1.msra.mxu1 %v21123_v42  ;;  %10078 = vmatprep.subr.mxu0 %v21159_v26  ;;  %v21165_v26 = vld [vmem:[#allocation169_spill] sm:$0xff] }
 0x8ca   :  { %10224 = vmatprep.subr.mxu1 %v21125_v57  ;;  %10081 = vmatpush1.msra.mxu0 %v21160_v36  ;;  %v21166_v36 = vld [vmem:[#allocation180_spill] sm:$0xff] }
 0x8cb   :  { %10226 = vmatpush1.msra.mxu1 %v21127_v17  ;;  %10084 = vmatprep.subr.mxu0 %v21161_v6  ;;  %v21167_v6 = vld [vmem:[#allocation183_spill] sm:$0xff] }
 0x8cc   :  { %10228 = vmatprep.subr.mxu1 %v21129_v12  ;;  %10087 = vmatpush1.msra.mxu0 %v21162_v15  ;;  %v21168_v15 = vld [vmem:[#allocation185_spill] sm:$0xff] }
 0x8cd   :  { %10230 = vmatpush1.msra.mxu1 %v21131_v44  ;;  %10090 = vmatprep.subr.mxu0 %v21163_v46  ;;  %v21169_v46 = vld [vmem:[#allocation188_spill] sm:$0xff] }
 0x8ce   :  { %10232 = vmatprep.subr.mxu1 %v21133_v39  ;;  %10093 = vmatpush1.msra.mxu0 %v21164_v0  ;;  %v21170_v0 = vld [vmem:[#allocation198_spill] sm:$0xff] }
 0x8cf   :  { %10234 = vmatpush1.msra.mxu1 %v21135_v31  ;;  %10096 = vmatprep.subr.mxu0 %v21165_v26  ;;  %v21171_v26 = vld [vmem:[#allocation202_spill] sm:$0xff] }
 0x8d0   :  { %10236 = vmatprep.subr.mxu1 %v21137_v45  ;;  %10099 = vmatpush1.msra.mxu0 %v21166_v36  ;;  %v21172_v36 = vld [vmem:[#allocation205_spill] sm:$0xff] }
 0x8d1   :  { %10238 = vmatpush1.msra.mxu1 %v21139_v50  ;;  %10102 = vmatprep.subr.mxu0 %v21167_v6  ;;  %v21173_v6 = vld [vmem:[#allocation208_spill] sm:$0xff] }
 0x8d2   :  { %10240 = vmatprep.subr.mxu1 %v21141_v13  ;;  %10105 = vmatpush1.msra.mxu0 %v21168_v15  ;;  %v21174_v15 = vld [vmem:[#allocation211_spill] sm:$0xff] }
 0x8d3   :  { %10242 = vmatpush1.msra.mxu1 %v21143_v2  ;;  %10108 = vmatprep.subr.mxu0 %v21169_v46  ;;  %v21175_v46 = vld [vmem:[#allocation214_spill] sm:$0xff] }
 0x8d4   :  { %10244 = vmatprep.subr.mxu1 %v21145_v9  ;;  %10111 = vmatpush1.msra.mxu0 %v21170_v0  ;;  %v21176_v0 = vld [vmem:[#allocation218_spill] sm:$0xff] }
 0x8d5   :  { %10246 = vmatpush1.msra.mxu1 %v21146_v52  ;;  %10114 = vmatprep.subr.mxu0 %v21171_v26  ;;  %v21216_v26 = vld [vmem:[#allocation247_spill] sm:$0xff] }
 0x8d6   :  { %10248 = vmatprep.subr.mxu1 %v21147_v18  ;;  %10117 = vmatpush1.msra.mxu0 %v21172_v36  ;;  %v21177_v36 = vld [vmem:[#allocation222_spill] sm:$0xff] }
 0x8d7   :  { %10250 = vmatpush1.msra.mxu1 %v21148_v41  ;;  %10120 = vmatprep.subr.mxu0 %v21173_v6  ;;  %v21178_v6 = vld [vmem:[#allocation228_spill] sm:$0xff] }
 0x8d8   :  { %10252 = vmatprep.subr.mxu1 %v21149_v54  ;;  %10123 = vmatpush1.msra.mxu0 %v21174_v15  ;;  %v21179_v15 = vld [vmem:[#allocation231_spill] sm:$0xff] }
 0x8d9   :  { %10254 = vmatpush1.msra.mxu1 %v21150_v7  ;;  %10126 = vmatprep.subr.mxu0 %v21175_v46  ;;  %v21180_v46 = vld [vmem:[#allocation234_spill] sm:$0xff] }
 0x8da   :  { %10256 = vmatprep.subr.mxu1 %v21151_v34  ;;  %10129 = vmatpush1.msra.mxu0 %v21176_v0  ;;  %v21181_v0 = vld [vmem:[#allocation236_spill] sm:$0xff] }
 0x8db   :  { %10258 = vmatpush1.msra.mxu1 %v21152_v53  ;;  %10291 = vmatprep.mubr.f32.mxu1 %v19817_v55 }
 0x8dc   :  { %10132 = vmatprep.subr.mxu0 %v21177_v36  ;;  %10295 = vmatmul.mubr.f32.vlgmr.msra.gmra.mxu1 %v17687_v8  ;;  %v21182_v36 = vld [vmem:[#allocation239_spill] sm:$0xff]  ;;  %v21183_v8 = vld [vmem:[#allocation242_spill] sm:$0xff] }
 0x8dd   :  { %10470 = vmatprep.subr.mxu1 %v15103_v49  ;;  %10135 = vmatpush1.msra.mxu0 %v21178_v6  ;;  %v21184_v6 = vld [vmem:[#allocation245_spill] sm:$0xff] }
 0x8de   :  { %10472 = vmatpush1.msra.mxu1 %v15113_v60  ;;  %10138 = vmatprep.subr.mxu0 %v21179_v15  ;;  %v21211_v15 = vld [vmem:[#allocation233_spill] sm:$0xff] }
 0x8df   :  { %10474 = vmatprep.subr.mxu1 %v15120_v14  ;;  %10141 = vmatpush1.msra.mxu0 %v21180_v46  ;;  %v21185_v46 = vld [vmem:[#allocation146_spill] sm:$0xff] }
 0x8e0   :  { %10476 = vmatpush1.msra.mxu1 %v15124_v61  ;;  %10144 = vmatprep.subr.mxu0 %v21181_v0  ;;  %v21186_v0 = vld [vmem:[#allocation150_spill] sm:$0xff] }
 0x8e1   :  { %10478 = vmatprep.subr.mxu1 %v19988_v47  ;;  %10147 = vmatpush1.msra.mxu0 %v21182_v36  ;;  %v21187_v36 = vld [vmem:[#allocation152_spill] sm:$0xff] }
 0x8e2   :  { %10480 = vmatpush1.msra.mxu1 %v19989_v4  ;;  %10150 = vmatprep.subr.mxu0 %v21183_v8  ;;  %v21188_v8 = vld [vmem:[#allocation155_spill] sm:$0xff] }
 0x8e3   :  { %10482 = vmatprep.subr.mxu1 %v19991_v38  ;;  %10153 = vmatpush1.msra.mxu0 %v21184_v6  ;;  %v21189_v6 = vld [vmem:[#allocation156_spill] sm:$0xff] }
 0x8e4   :  { %10186 = vmatprep.mubr.f32.mxu0 %v19817_v55  ;;  %10484 = vmatpush1.msra.mxu1 %v20183_v19 }
 0x8e5   :  { %10189 = vmatmul.mubr.f32.vlgmr.msra.gmra.mxu0 %v17680_v21  ;;  %10304 = vmatprep.subr.mxu0 %v21185_v46  ;;  %v21190_v21 = vld [vmem:[#allocation158_spill] sm:$0xff]  ;;  %v21191_v46 = vld [vmem:[#allocation163_spill] sm:$0xff] }
 0x8e6   :  { %10486 = vmatprep.subr.mxu1 %v21113_v11  ;;  %10308 = vmatpush1.msra.mxu0 %v21186_v0  ;;  %v21192_v0 = vld [vmem:[#allocation168_spill] sm:$0xff]  ;;  %v14160_v11 = vld [vmem:[%s18931_s1 + $0xa8] sm:$0xff] }
 0x8e7   :  { %10488 = vmatpush1.msra.mxu1 %v21115_v24  ;;  %10312 = vmatprep.subr.mxu0 %v21187_v36  ;;  %v21193_v36 = vld [vmem:[#allocation172_spill] sm:$0xff] }
 0x8e8   :  { %10490 = vmatprep.subr.mxu1 %v21117_v22  ;;  %10316 = vmatpush1.msra.mxu0 %v21188_v8  ;;  %v21194_v8 = vld [vmem:[#allocation173_spill] sm:$0xff] }
 0x8e9   :  { %10492 = vmatpush1.msra.mxu1 %v21119_v37  ;;  %10320 = vmatprep.subr.mxu0 %v21189_v6  ;;  %v21195_v6 = vld [vmem:[#allocation176_spill] sm:$0xff] }
 0x8ea   :  { %10494 = vmatprep.subr.mxu1 %v21121_v56  ;;  %10324 = vmatpush1.msra.mxu0 %v21190_v21  ;;  %v21196_v21 = vld [vmem:[#allocation179_spill] sm:$0xff] }
 0x8eb   :  { %10496 = vmatpush1.msra.mxu1 %v21123_v42  ;;  %10328 = vmatprep.subr.mxu0 %v21191_v46  ;;  %v21197_v46 = vld [vmem:[#allocation182_spill] sm:$0xff] }
 0x8ec   :  { %10498 = vmatprep.subr.mxu1 %v21125_v57  ;;  %10332 = vmatpush1.msra.mxu0 %v21192_v0  ;;  %v21198_v0 = vld [vmem:[#allocation191_spill] sm:$0xff] }
 0x8ed   :  { %10500 = vmatpush1.msra.mxu1 %v21127_v17  ;;  %10336 = vmatprep.subr.mxu0 %v21193_v36  ;;  %v21199_v36 = vld [vmem:[#allocation194_spill] sm:$0xff] }
 0x8ee   :  { %10502 = vmatprep.subr.mxu1 %v21129_v12  ;;  %10340 = vmatpush1.msra.mxu0 %v21194_v8  ;;  %v21200_v8 = vld [vmem:[#allocation197_spill] sm:$0xff] }
 0x8ef   :  { %10504 = vmatpush1.msra.mxu1 %v21131_v44  ;;  %10344 = vmatprep.subr.mxu0 %v21195_v6  ;;  %v21201_v6 = vld [vmem:[#allocation201_spill] sm:$0xff] }
 0x8f0   :  { %10506 = vmatprep.subr.mxu1 %v21133_v39  ;;  %10348 = vmatpush1.msra.mxu0 %v21196_v21  ;;  %v21202_v21 = vld [vmem:[#allocation210_spill] sm:$0xff] }
 0x8f1   :  { %10508 = vmatpush1.msra.mxu1 %v21135_v31  ;;  %10352 = vmatprep.subr.mxu0 %v21197_v46  ;;  %v21203_v46 = vld [vmem:[#allocation213_spill] sm:$0xff] }
 0x8f2   :  { %10510 = vmatprep.subr.mxu1 %v21137_v45  ;;  %10356 = vmatpush1.msra.mxu0 %v21198_v0  ;;  %v21204_v0 = vld [vmem:[#allocation217_spill] sm:$0xff] }
 0x8f3   :  { %10512 = vmatpush1.msra.mxu1 %v21139_v50  ;;  %10360 = vmatprep.subr.mxu0 %v21199_v36  ;;  %v21205_v36 = vld [vmem:[#allocation221_spill] sm:$0xff] }
 0x8f4   :  { %10514 = vmatprep.subr.mxu1 %v21141_v13  ;;  %10364 = vmatpush1.msra.mxu0 %v21200_v8  ;;  %v21206_v8 = vld [vmem:[#allocation225_spill] sm:$0xff] }
 0x8f5   :  { %10516 = vmatpush1.msra.mxu1 %v21143_v2  ;;  %10368 = vmatprep.subr.mxu0 %v21201_v6  ;;  %v21207_v6 = vld [vmem:[#allocation137_spill] sm:$0xff] }
 0x8f6   :  { %10518 = vmatprep.subr.mxu1 %v21145_v9  ;;  %10372 = vmatpush1.msra.mxu0 %v21202_v21  ;;  %vm10603_vm11 = vcmp.eq.s32.totalorder %v21207_v6, 5  ;;  %v21208_v21 = vld [vmem:[#allocation227_spill] sm:$0xff]  ;;  %v21213_v6 = vld [vmem:[#allocation241_spill] sm:$0xff] }
 0x8f7   :  { %10520 = vmatpush1.msra.mxu1 %v21146_v52  ;;  %10376 = vmatprep.subr.mxu0 %v21203_v46  ;;  %v21209_v46 = vld [vmem:[#allocation230_spill] sm:$0xff] }
 0x8f8   :  { %10522 = vmatprep.subr.mxu1 %v21147_v18  ;;  %10380 = vmatpush1.msra.mxu0 %v21204_v0  ;;  %v21210_v0 = vmov 0  }
 0x8f9   :  { %10524 = vmatpush1.msra.mxu1 %v21148_v41  ;;  %10384 = vmatprep.subr.mxu0 %v21205_v36  ;;  %v10604_v36 = vsel %vm10603_vm11, 1, %v21210_v0  ;;  %v21218_v0 = vld [vmem:[#allocation249_spill] sm:$0xff] }
 0x8fa   :  { %10526 = vmatprep.subr.mxu1 %v21149_v54  ;;  %10388 = vmatpush1.msra.mxu0 %v21206_v8  ;;  %v21212_v8 = vld [vmem:[#allocation238_spill] sm:$0xff] }
 0x8fb   :  { %10528 = vmatpush1.msra.mxu1 %v21150_v7  ;;  %10392 = vmatprep.subr.mxu0 %v21208_v21  ;;  %v21214_v21 = vld [vmem:[#allocation244_spill] sm:$0xff]  ;;  %v21222_v7 = vld [vmem:[#allocation253_spill] sm:$0xff] }
 0x8fc   :  { %10530 = vmatprep.subr.mxu1 %v21151_v34  ;;  %10396 = vmatpush1.msra.mxu0 %v21209_v46  ;;  %v21215_v46 = vld [vmem:[#allocation34_spill] sm:$0xff]  ;;  %v21220_v34 = vld [vmem:[#allocation251_spill] sm:$0xff] }
 0x8fd   :  { %10532 = vmatpush1.msra.mxu1 %v21152_v53  ;;  %10565 = vmatprep.mubr.f32.mxu1 %v19817_v55  ;;  %v21217_v53 = vld [vmem:[#allocation37_spill] sm:$0xff] }
 0x8fe   :  { %10400 = vmatprep.subr.mxu0 %v21211_v15  ;;  %10567 = vmatmul.mubr.f32.vlgmr.msra.gmra.mxu1 %v17677_v23  ;;  %v21219_v15 = vld [vmem:[#allocation38_spill] sm:$0xff] }
 0x8ff   :  { %10404 = vmatpush1.msra.mxu0 %v21212_v8  ;;  %10461 = vmatprep.mubr.f32.mxu0 %v19817_v55  ;;  %v21221_v8 = vld [vmem:[#allocation40_spill] sm:$0xff] }
 0x900   :  { %10408 = vmatprep.subr.mxu0 %v21213_v6  ;;  %10606 = vperm.xlu1 %14184, %v10604_v36   ;;  %v21223_v6 = vld [vmem:[#allocation43_spill] sm:$0xff]  ;;  %v21224_v36 = vld [vmem:[#allocation46_spill] sm:$0xff] }
 0x901   :  { %10412 = vmatpush1.msra.mxu0 %v21214_v21  ;;  %10728 = vmatprep.subr.mxu1 %v21215_v46  ;;  %v21225_v46 = vld [vmem:[#allocation50_spill] sm:$0xff] }
 0x902   :  { %10416 = vmatprep.subr.mxu0 %v21216_v26  ;;  %10734 = vmatpush1.msra.mxu1 %v21217_v53  ;;  %v21226_v53 = vld [vmem:[#allocation60_spill] sm:$0xff]  ;;  %v21260_v26 = vld [vmem:[#allocation102_spill] sm:$0xff] }
 0x903   :  { %10420 = vmatpush1.msra.mxu0 %v21218_v0  ;;  %10740 = vmatprep.subr.mxu1 %v21219_v15  ;;  %v21227_v15 = vld [vmem:[#allocation63_spill] sm:$0xff]  ;;  %v21258_v0 = vld [vmem:[#allocation93_spill] sm:$0xff] }
 0x904   :  { %10424 = vmatprep.subr.mxu0 %v21220_v34  ;;  %10746 = vmatpush1.msra.mxu1 %v21221_v8  ;;  %v21228_v8 = vld [vmem:[#allocation66_spill] sm:$0xff]  ;;  %v21253_v34 = vld [vmem:[#allocation136_spill] sm:$0xff] }
 0x905   :  { %10428 = vmatpush1.msra.mxu0 %v21222_v7  ;;  %10752 = vmatprep.subr.mxu1 %v21223_v6  ;;  %v21229_v6 = vld [vmem:[#allocation69_spill] sm:$0xff]  ;;  %v21251_v7 = vld [vmem:[#allocation135_spill] sm:$0xff] }
 0x906   :  { %10463 = vmatmul.mubr.f32.vlgmr.msra.gmra.mxu0 %v17677_v23  ;;  %10758 = vmatpush1.msra.mxu1 %v21224_v36  ;;  %v21230_v23 = vld [vmem:[#allocation72_spill] sm:$0xff]  ;;  %v21249_v36 = vld [vmem:[#allocation134_spill] sm:$0xff] }
 0x907   :  { %10764 = vmatprep.subr.mxu1 %v21225_v46  ;;  %10616 = vmatprep.subr.mxu0 %v20038_v29  ;;  %v21231_v46 = vld [vmem:[#allocation75_spill] sm:$0xff] }
 0x908   :  { %10770 = vmatpush1.msra.mxu1 %v21226_v53  ;;  %10618 = vmatpush1.msra.mxu0 %v20039_v20  ;;  %v21232_v53 = vld [vmem:[#allocation79_spill] sm:$0xff] }
 0x909   :  { %10776 = vmatprep.subr.mxu1 %v21227_v15  ;;  %10620 = vmatprep.subr.mxu0 %v20040_v43  ;;  %v21233_v15 = vld [vmem:[#allocation85_spill] sm:$0xff] }
 0x90a   :  { %10782 = vmatpush1.msra.mxu1 %v21228_v8  ;;  %10622 = vmatpush1.msra.mxu0 %v20041_v32  ;;  %v21234_v8 = vld [vmem:[#allocation89_spill] sm:$0xff] }
 0x90b   :  { %10788 = vmatprep.subr.mxu1 %v21229_v6  ;;  %10624 = vmatprep.subr.mxu0 %v20042_v16  ;;  %v21235_v6 = vld [vmem:[#allocation95_spill] sm:$0xff] }
 0x90c   :  { %10794 = vmatpush1.msra.mxu1 %v21230_v23  ;;  %10626 = vmatpush1.msra.mxu0 %v20045_v28  ;;  %v21236_v23 = vld [vmem:[#allocation98_spill] sm:$0xff] }
 0x90d   :  { %10800 = vmatprep.subr.mxu1 %v21231_v46  ;;  %10628 = vmatprep.subr.mxu0 %v20047_v30  ;;  %v21237_v46 = vld [vmem:[#allocation101_spill] sm:$0xff] }
 0x90e   :  { %10806 = vmatpush1.msra.mxu1 %v21232_v53  ;;  %10630 = vmatpush1.msra.mxu0 %v20049_v5  ;;  %v21238_v53 = vld [vmem:[#allocation104_spill] sm:$0xff] }
 0x90f   :  { %10812 = vmatprep.subr.mxu1 %v21233_v15  ;;  %10632 = vmatprep.subr.mxu0 %v20051_v35  ;;  %v21239_v15 = vld [vmem:[#allocation107_spill] sm:$0xff] }
 0x910   :  { %10818 = vmatpush1.msra.mxu1 %v21234_v8  ;;  %10634 = vmatpush1.msra.mxu0 %v20053_v59  ;;  %v21240_v8 = vld [vmem:[#allocation110_spill] sm:$0xff] }
 0x911   :  { %10824 = vmatprep.subr.mxu1 %v21235_v6  ;;  %10636 = vmatprep.subr.mxu0 %v20055_v10  ;;  %v21241_v6 = vld [vmem:[#allocation116_spill] sm:$0xff] }
 0x912   :  { %10830 = vmatpush1.msra.mxu1 %v21236_v23  ;;  %10638 = vmatpush1.msra.mxu0 %v20057_v48  ;;  %v21242_v23 = vld [vmem:[#allocation119_spill] sm:$0xff] }
 0x913   :  { %10836 = vmatprep.subr.mxu1 %v21237_v46  ;;  %10640 = vmatprep.subr.mxu0 %v20059_v3  ;;  %v21243_v46 = vld [vmem:[#allocation122_spill] sm:$0xff] }
 0x914   :  { %10842 = vmatpush1.msra.mxu1 %v21238_v53  ;;  %10642 = vmatpush1.msra.mxu0 %v20061_v63  ;;  %v21244_v53 = vld [vmem:[#allocation125_spill] sm:$0xff] }
 0x915   :  { %10848 = vmatprep.subr.mxu1 %v21239_v15  ;;  %10644 = vmatprep.subr.mxu0 %v20063_v40  ;;  %v21245_v15 = vld [vmem:[#allocation127_spill] sm:$0xff] }
 0x916   :  { %10854 = vmatpush1.msra.mxu1 %v21240_v8  ;;  %10646 = vmatpush1.msra.mxu0 %v20065_v33  ;;  %v21246_v8 = vld [vmem:[#allocation130_spill] sm:$0xff]  ;;  %v9198_v41 = vpop.f32.mrf.mxu1 }
 0x917   :  { %10860 = vmatprep.subr.mxu1 %v21241_v6  ;;  %10648 = vmatprep.subr.mxu0 %v20067_v58  ;;  %v21247_v6 = vld [vmem:[#allocation132_spill] sm:$0xff] }
 0x918   :  { %10866 = vmatpush1.msra.mxu1 %v21242_v23  ;;  %10650 = vmatpush1.msra.mxu0 %v20069_v1  ;;  %v21248_v23 = vld [vmem:[#allocation65_spill] sm:$0xff]  ;;  %v9200_v52 = vpop.f32.mrf.mxu1 }
 0x919   :  { %10872 = vmatprep.subr.mxu1 %v21243_v46  ;;  %10652 = vmatprep.subr.mxu0 %v20071_v25  ;;  %v21250_v46 = vld [vmem:[#allocation70_spill] sm:$0xff] }
 0x91a   :  { %10878 = vmatpush1.msra.mxu1 %v21244_v53  ;;  %10654 = vmatpush1.msra.mxu0 %v20073_v62  ;;  %v21252_v53 = vld [vmem:[#allocation74_spill] sm:$0xff] }
 0x91b   :  { %10884 = vmatprep.subr.mxu1 %v21245_v15  ;;  %10656 = vmatprep.subr.mxu0 %v20075_v27  ;;  %v21255_v15 = vld [vmem:[#allocation81_spill] sm:$0xff] }
 0x91c   :  { %10890 = vmatpush1.msra.mxu1 %v21246_v8  ;;  %10658 = vmatpush1.msra.mxu0 %v20077_v51  ;;  %v21254_v8 = vld [vmem:[#allocation78_spill] sm:$0xff] }
 0x91d   :  { %10896 = vmatprep.subr.mxu1 %v21247_v6  ;;  %10660 = vmatprep.subr.mxu0 %v21248_v23  ;;  %v21256_v6 = vld [vmem:[#allocation84_spill] sm:$0xff] }
 0x91e   :  { %10902 = vmatpush1.msra.mxu1 %v21249_v36  ;;  %10662 = vmatpush1.msra.mxu0 %v21250_v46  ;;  %v21257_v36 = vld [vmem:[#allocation88_spill] sm:$0xff]  ;;  %v8966_v21 = vpop.f32.mrf.mxu0 }
 0x91f   :  { %10908 = vmatprep.subr.mxu1 %v21251_v7  ;;  %10664 = vmatprep.subr.mxu0 %v21252_v53  ;;  %v21259_v7 = vld [vmem:[#allocation97_spill] sm:$0xff]  ;;  %v9199_v13 = vadd.f32 %v9198_v41, %v8966_v21  ;;  %v14159_v41 = vld [vmem:[%s18931_s1 + $0xa0] sm:$0xff] }
 0x920   :  { %10914 = vmatpush1.msra.mxu1 %v21253_v34  ;;  %10947 = vmatprep.mubr.f32.mxu1 %v19817_v55  ;;  %v21261_v34 = vld [vmem:[#allocation16_spill] sm:$0xff]  ;;  %v8968_v54 = vpop.f32.mrf.mxu0 }
 0x921   :  { %11093 = vmatprep.subr.mxu1 %v20038_v29  ;;  %10666 = vmatpush1.msra.mxu0 %v21254_v8  ;;  %v9201_v2 = vadd.f32 %v9200_v52, %v8968_v54 }
 0x922   :  { %10668 = vmatprep.subr.mxu0 %v21255_v15  ;;  %10711 = vmatprep.mubr.f32.mxu0 %v19817_v55 }
 0x923   :  { %10670 = vmatpush1.msra.mxu0 %v21256_v6 }
 0x924   :  { %10672 = vmatprep.subr.mxu0 %v21257_v36 }
 0x925   :  { %10674 = vmatpush1.msra.mxu0 %v21258_v0 }
 0x926   :  { %10676 = vmatprep.subr.mxu0 %v21259_v7 }
 0x927   :  { %10678 = vmatpush1.msra.mxu0 %v21260_v26 }
 0x928   :  { %10957 = vmatprep.subr.mxu0 %v21261_v34 }
 0x936   :  { %v9441_v50 = vpop.f32.mrf.mxu1 }
 0x938   :  { %v9443_v44 = vpop.f32.mrf.mxu1 }
 0x93f   :  { %v9335_v18 = vpop.f32.mrf.mxu0 }
 0x940   :  { %v9336_v39 = vadd.f32 %v9335_v18, %v9199_v13 }
 0x941   :  { %v9337_v9 = vpop.f32.mrf.mxu0 }
 0x942   :  { %v9338_v31 = vadd.f32 %v9337_v9, %v9201_v2  ;;  %v9442_v42 = vadd.f32 %v9441_v50, %v9336_v39 }
 0x944   :  { %v9444_v17 = vadd.f32 %v9443_v44, %v9338_v31 }
 0x958   :  { %v9713_v57 = vpop.f32.mrf.mxu1 }
 0x95a   :  { %v9715_v34 = vpop.f32.mrf.mxu1 }
 0x961   :  { %v9609_v45 = vpop.f32.mrf.mxu0 }
 0x962   :  { %v9610_v37 = vadd.f32 %v9609_v45, %v9442_v42 }
 0x963   :  { %v9611_v12 = vpop.f32.mrf.mxu0 }
 0x964   :  { %v9612_v56 = vadd.f32 %v9611_v12, %v9444_v17  ;;  %v9714_v24 = vadd.f32 %v9713_v57, %v9610_v37 }
 0x966   :  { %v9716_v22 = vadd.f32 %v9715_v34, %v9612_v56  ;;  %v10573_v18 = vadd.f32 %v14159_v41, %v9714_v24 }
 0x968   :  { %v10574_v54 = vadd.f32 %v14160_v11, %v9716_v22  ;;  %v14163_v9 = vmul.f32 -1.442695, %v10573_v18 }
 0x96a   :  { %v14164_v52 = vmul.f32 -1.442695, %v10574_v54 }
 0x96c   :  { %14265 = vpow2.f32 %v14164_v52  ;;  %v14161_v52 = vld [vmem:[%s18931_s1 + $0xb0] sm:$0xff] }
 0x96d   :  { %14267 = vpow2.f32 %v14163_v9 }
 0x979   :  { %v14266_v12 = vpop.eup %14265 }
 0x97a   :  { %v10053_v13 = vpop.f32.mrf.mxu1  ;;  %v14268_v42 = vpop.eup %14267  ;;  %v10586_v21 = vadd.f32 1.0, %v14266_v12  ;;  %v21262_v12 = vld [vmem:[#allocation11_spill] sm:$0xff] }
 0x97b   :  { %v10580_v18 = vadd.f32 1.0, %v14268_v42 }
 0x97c   :  { %v10055_v34 = vpop.f32.mrf.mxu1  ;;  %14269 = vrcp.f32 %v10586_v21  ;;  %v10607_v21 = vpop.permute.xlu1 %10606 }
 0x97d   :  { %14271 = vrcp.f32 %v10580_v18  ;;  %vm10608_vm12 = vcmp.eq.s32.totalorder %v10607_v21, 1  ;;  %v21277_v21 = vld [vmem:[#allocation58_spill] sm:$0xff] }
 0x983   :  { %v9821_v2 = vpop.f32.mrf.mxu0 }
 0x984   :  { %v10054_v31 = vadd.f32 %v10053_v13, %v9821_v2 }
 0x985   :  { %v9823_v50 = vpop.f32.mrf.mxu0 }
 0x986   :  { %v10056_v56 = vadd.f32 %v10055_v34, %v9823_v50 }
 0x99c   :  { %v10296_v57 = vpop.f32.mrf.mxu1 }
 0x99e   :  { %v10298_v37 = vpop.f32.mrf.mxu1 }
 0x9a5   :  { %v10190_v45 = vpop.f32.mrf.mxu0 }
 0x9a6   :  { %v10191_v44 = vadd.f32 %v10190_v45, %v10054_v31  ;;  %v14162_v45 = vld [vmem:[%s18931_s1 + $0xb8] sm:$0xff] }
 0x9a7   :  { %v10192_v17 = vpop.f32.mrf.mxu0 }
 0x9a8   :  { %v10193_v39 = vadd.f32 %v10192_v17, %v10056_v56  ;;  %v10297_v11 = vadd.f32 %v10296_v57, %v10191_v44  ;;  %v14270_v56 = vpop.eup %14269 }
 0x9a9   :  { %v14272_v44 = vpop.eup %14271 }
 0x9aa   :  { %v10299_v54 = vadd.f32 %v10298_v37, %v10193_v39  ;;  %v10596_v37 = vmul.f32 %v14270_v56, %v21262_v12  ;;  %v21269_v56 = vld [vmem:[#allocation27_spill] sm:$0xff]  ;;  %v21272_v12 = vld [vmem:[#allocation41_spill] sm:$0xff] }
 0x9be   :  { %v10568_v24 = vpop.f32.mrf.mxu1 }
 0x9c0   :  { %v10570_v50 = vpop.f32.mrf.mxu1 }
 0x9c6   :  { %v10464_v22 = vpop.f32.mrf.mxu0 }
 0x9c7   :  { %v10465_v41 = vadd.f32 %v10464_v22, %v10297_v11 }
 0x9c8   :  { %v10466_v9 = vpop.f32.mrf.mxu0 }
 0x9c9   :  { %v10569_v2 = vadd.f32 %v10568_v24, %v10465_v41  ;;  %v10467_v13 = vadd.f32 %v10466_v9, %v10299_v54 }
 0x9cb   :  { %v10575_v34 = vadd.f32 %v14161_v52, %v10569_v2  ;;  %v10571_v31 = vadd.f32 %v10570_v50, %v10467_v13  ;;  %v21264_v52 = vld [vmem:[#allocation12_spill] sm:$0xff] }
 0x9cd   :  { %14273 = vtanh.f32 %v10575_v34  ;;  %v10576_v57 = vadd.f32 %v14162_v45, %v10571_v31  ;;  %v21266_v31 = vld [vmem:[#allocation18_spill] sm:$0xff] }
 0x9cf   :  { %v14165_v17 = vmul.f32 -1.442695, %v10576_v57  ;;  %v21267_v57 = vld [vmem:[#allocation20_spill] sm:$0xff] }
 0x9d1   :  { %14275 = vpow2.f32 %v14165_v17  ;;  %v21268_v17 = vld [vmem:[#allocation23_spill] sm:$0xff] }
 0x9da   :  { %v14274_v39 = vpop.eup %14273 }
 0x9db   :  { %v10597_v42 = vmul.f32 %v14274_v39, %v14272_v44  ;;  %v21270_v44 = vld [vmem:[#allocation30_spill] sm:$0xff]  ;;  %v21271_v39 = vld [vmem:[#allocation33_spill] sm:$0xff] }
 0x9dd   :  { %v18112_v11 = vadd.f32 %v10597_v42, %v10596_v37  ;;  %v21273_v37 = vld [vmem:[#allocation44_spill] sm:$0xff] }
 0x9de   :  { %v14276_v24 = vpop.eup %14275  ;;  %v21274_v42 = vld [vmem:[#allocation48_spill] sm:$0xff] }
 0x9df   :  { %21263 = vst [vmem:[#allocation13_spill] sm:$0xff] %v18112_v11  ;;  %v10593_v22 = vadd.f32 1.0, %v14276_v24  ;;  %14277 = vtanh.f32 %v18112_v11  ;;  %v21275_v24 = vld [vmem:[#allocation52_spill] sm:$0xff]  ;;  %v21370_v11 = vld [vmem:[#allocation257_spill] sm:$0xff] }
 0x9e1   :  { %14279 = vrcp.f32 %v10593_v22  ;;  %v21276_v22 = vld [vmem:[#allocation55_spill] sm:$0xff] }
 0x9ec   :  { %v14278_v41 = vpop.eup %14277 }
 0x9ee   :  { %v14280_v54 = vpop.eup %14279 }
 0x9ef   :  { %v10600_v18 = vmul.f32 %v14280_v54, %v14278_v41  ;;  %v21278_v41 = vld [vmem:[#allocation62_spill] sm:$0xff]  ;;  %v21279_v54 = vld [vmem:[#allocation68_spill] sm:$0xff] }
 0x9f1   :  { %v18116_v9 = vsel %vm10608_vm12, %v10600_v18, %v21264_v52  ;;  %v18118_v2 = vand.u32 4294901760, %v10600_v18  ;;  %v21281_v52 = vld [vmem:[#allocation77_spill] sm:$0xff] }
 0x9f2   :  { %21265 = vst [vmem:[#allocation14_spill] sm:$0xff] %v18116_v9  ;;  %v21368_v9 = vld [vmem:[#allocation256_spill] sm:$0xff] }
 0x9f3   :  { %v18121_v13 = vsub.f32 %v10600_v18, %v18118_v2  ;;  %10949 = vmatmul.mubr.f32.vlgmr.msra.gmra.mxu1 %v18118_v2  ;;  %v21280_v18 = vld [vmem:[#allocation71_spill] sm:$0xff] }
 0x9f4   :  { %11095 = vmatpush1.msra.mxu1 %v20039_v20  ;;  %11188 = vmatprep.mubr.f32.mxu1 %v19817_v55 }
 0x9f5   :  { %11097 = vmatprep.subr.mxu1 %v20040_v43  ;;  %v18128_v50 = vand.u32 4294901760, %v18121_v13 }
 0x9f6   :  { %11099 = vmatpush1.msra.mxu1 %v20041_v32 }
 0x9f7   :  { %11101 = vmatprep.subr.mxu1 %v20042_v16  ;;  %v10715_v45 = vsub.f32 %v18121_v13, %v18128_v50 }
 0x9f8   :  { %11103 = vmatpush1.msra.mxu1 %v20045_v28 }
 0x9f9   :  { %11105 = vmatprep.subr.mxu1 %v20047_v30  ;;  %v18136_v34 = vand.u32 4294901760, %v10715_v45  ;;  %v21282_v45 = vld [vmem:[#allocation80_spill] sm:$0xff] }
 0x9fa   :  { %11107 = vmatpush1.msra.mxu1 %v20049_v5 }
 0x9fb   :  { %11109 = vmatprep.subr.mxu1 %v20051_v35  ;;  %10717 = vmatmul.mubr.f32.vlgmr.msra.gmra.mxu0 %v18136_v34 }
 0x9fc   :  { %10960 = vmatpush1.msra.mxu0 %v21266_v31  ;;  %11111 = vmatpush1.msra.mxu1 %v20053_v59  ;;  %v21366_v31 = vld [vmem:[#allocation255_spill] sm:$0xff] }
 0x9fd   :  { %10963 = vmatprep.subr.mxu0 %v21267_v57  ;;  %11113 = vmatprep.subr.mxu1 %v20055_v10  ;;  %v21364_v57 = vld [vmem:[#allocation254_spill] sm:$0xff] }
 0x9fe   :  { %10966 = vmatpush1.msra.mxu0 %v21268_v17  ;;  %11115 = vmatpush1.msra.mxu1 %v20057_v48  ;;  %v21362_v17 = vld [vmem:[#allocation252_spill] sm:$0xff] }
 0x9ff   :  { %10969 = vmatprep.subr.mxu0 %v21269_v56  ;;  %11117 = vmatprep.subr.mxu1 %v20059_v3  ;;  %v21360_v56 = vld [vmem:[#allocation250_spill] sm:$0xff] }
 0xa00   :  { %10972 = vmatpush1.msra.mxu0 %v21270_v44  ;;  %11119 = vmatpush1.msra.mxu1 %v20061_v63  ;;  %v21358_v44 = vld [vmem:[#allocation248_spill] sm:$0xff] }
 0xa01   :  { %10975 = vmatprep.subr.mxu0 %v21271_v39  ;;  %11121 = vmatprep.subr.mxu1 %v20063_v40  ;;  %v21356_v39 = vld [vmem:[#allocation246_spill] sm:$0xff] }
 0xa02   :  { %10978 = vmatpush1.msra.mxu0 %v21272_v12  ;;  %11123 = vmatpush1.msra.mxu1 %v20065_v33  ;;  %v21332_v12 = vld [vmem:[#allocation181_spill] sm:$0xff] }
 0xa03   :  { %10981 = vmatprep.subr.mxu0 %v21273_v37  ;;  %11125 = vmatprep.subr.mxu1 %v20067_v58  ;;  %v21330_v37 = vld [vmem:[#allocation178_spill] sm:$0xff] }
 0xa04   :  { %10984 = vmatpush1.msra.mxu0 %v21274_v42  ;;  %11127 = vmatpush1.msra.mxu1 %v20069_v1  ;;  %v21329_v42 = vld [vmem:[#allocation123_spill] sm:$0xff] }
 0xa05   :  { %10987 = vmatprep.subr.mxu0 %v21275_v24  ;;  %11129 = vmatprep.subr.mxu1 %v20071_v25  ;;  %v21327_v24 = vld [vmem:[#allocation121_spill] sm:$0xff] }
 0xa06   :  { %10990 = vmatpush1.msra.mxu0 %v21276_v22  ;;  %11131 = vmatpush1.msra.mxu1 %v20073_v62  ;;  %v21325_v22 = vld [vmem:[#allocation117_spill] sm:$0xff] }
 0xa07   :  { %10993 = vmatprep.subr.mxu0 %v21277_v21  ;;  %11133 = vmatprep.subr.mxu1 %v20075_v27  ;;  %v21283_v21 = vld [vmem:[#allocation83_spill] sm:$0xff] }
 0xa08   :  { %10996 = vmatpush1.msra.mxu0 %v21278_v41  ;;  %11135 = vmatpush1.msra.mxu1 %v20077_v51  ;;  %v21284_v41 = vld [vmem:[#allocation87_spill] sm:$0xff] }
 0xa09   :  { %10999 = vmatprep.subr.mxu0 %v21279_v54  ;;  %11137 = vmatprep.subr.mxu1 %v21248_v23  ;;  %v21285_v54 = vld [vmem:[#allocation91_spill] sm:$0xff] }
 0xa0a   :  { %11002 = vmatpush1.msra.mxu0 %v21280_v18  ;;  %11139 = vmatpush1.msra.mxu1 %v21250_v46  ;;  %v21286_v18 = vld [vmem:[#allocation94_spill] sm:$0xff] }
 0xa0b   :  { %11005 = vmatprep.subr.mxu0 %v21281_v52  ;;  %11141 = vmatprep.subr.mxu1 %v21252_v53  ;;  %v21287_v52 = vld [vmem:[#allocation100_spill] sm:$0xff] }
 0xa0c   :  { %11008 = vmatpush1.msra.mxu0 %v21282_v45  ;;  %11143 = vmatpush1.msra.mxu1 %v21254_v8  ;;  %v21288_v45 = vld [vmem:[#allocation103_spill] sm:$0xff] }
 0xa0d   :  { %11011 = vmatprep.subr.mxu0 %v21283_v21  ;;  %11145 = vmatprep.subr.mxu1 %v21255_v15  ;;  %v21289_v21 = vld [vmem:[#allocation106_spill] sm:$0xff] }
 0xa0e   :  { %11014 = vmatpush1.msra.mxu0 %v21284_v41  ;;  %11147 = vmatpush1.msra.mxu1 %v21256_v6  ;;  %v21295_v41 = vld [vmem:[#allocation126_spill] sm:$0xff] }
 0xa0f   :  { %11017 = vmatprep.subr.mxu0 %v21285_v54  ;;  %11149 = vmatprep.subr.mxu1 %v21257_v36  ;;  %v21290_v54 = vld [vmem:[#allocation109_spill] sm:$0xff] }
 0xa10   :  { %11020 = vmatpush1.msra.mxu0 %v21286_v18  ;;  %11151 = vmatpush1.msra.mxu1 %v21258_v0  ;;  %v21291_v18 = vld [vmem:[#allocation112_spill] sm:$0xff] }
 0xa11   :  { %11023 = vmatprep.subr.mxu0 %v21287_v52  ;;  %11153 = vmatprep.subr.mxu1 %v21259_v7  ;;  %v21292_v52 = vld [vmem:[#allocation115_spill] sm:$0xff] }
 0xa12   :  { %11026 = vmatpush1.msra.mxu0 %v21288_v45  ;;  %11155 = vmatpush1.msra.mxu1 %v21260_v26  ;;  %v21293_v45 = vld [vmem:[#allocation118_spill] sm:$0xff] }
 0xa13   :  { %11029 = vmatprep.subr.mxu0 %v21289_v21  ;;  %11192 = vmatmul.mubr.f32.vlgmr.msra.gmra.mxu1 %v18128_v50  ;;  %v21294_v21 = vld [vmem:[#allocation124_spill] sm:$0xff] }
 0xa14   :  { %11367 = vmatprep.subr.mxu1 %v20038_v29  ;;  %11032 = vmatpush1.msra.mxu0 %v21290_v54  ;;  %v21296_v54 = vld [vmem:[#allocation129_spill] sm:$0xff] }
 0xa15   :  { %11369 = vmatpush1.msra.mxu1 %v20039_v20  ;;  %11035 = vmatprep.subr.mxu0 %v21291_v18  ;;  %v21302_v18 = vld [vmem:[#allocation35_spill] sm:$0xff] }
 0xa16   :  { %11371 = vmatprep.subr.mxu1 %v20040_v43  ;;  %11038 = vmatpush1.msra.mxu0 %v21292_v52  ;;  %v21297_v52 = vld [vmem:[#allocation21_spill] sm:$0xff] }
 0xa17   :  { %11373 = vmatpush1.msra.mxu1 %v20041_v32  ;;  %11041 = vmatprep.subr.mxu0 %v21293_v45  ;;  %v21298_v45 = vld [vmem:[#allocation25_spill] sm:$0xff] }
 0xa18   :  { %11375 = vmatprep.subr.mxu1 %v20042_v16  ;;  %11044 = vmatpush1.msra.mxu0 %v21294_v21  ;;  %v21299_v21 = vld [vmem:[#allocation26_spill] sm:$0xff] }
 0xa19   :  { %11377 = vmatpush1.msra.mxu1 %v20045_v28  ;;  %11047 = vmatprep.subr.mxu0 %v21295_v41  ;;  %v21300_v41 = vld [vmem:[#allocation29_spill] sm:$0xff] }
 0xa1a   :  { %11379 = vmatprep.subr.mxu1 %v20047_v30  ;;  %11050 = vmatpush1.msra.mxu0 %v21296_v54  ;;  %v21301_v54 = vld [vmem:[#allocation32_spill] sm:$0xff] }
 0xa1b   :  { %11083 = vmatprep.mubr.f32.mxu0 %v19817_v55  ;;  %11381 = vmatpush1.msra.mxu1 %v20049_v5 }
 0xa1c   :  { %11086 = vmatmul.mubr.f32.vlgmr.msra.gmra.mxu0 %v18121_v13  ;;  %11201 = vmatprep.subr.mxu0 %v21297_v52  ;;  %v21303_v52 = vld [vmem:[#allocation39_spill] sm:$0xff] }
 0xa1d   :  { %11383 = vmatprep.subr.mxu1 %v20051_v35  ;;  %11205 = vmatpush1.msra.mxu0 %v21298_v45  ;;  %v21304_v45 = vld [vmem:[#allocation47_spill] sm:$0xff] }
 0xa1e   :  { %11385 = vmatpush1.msra.mxu1 %v20053_v59  ;;  %11209 = vmatprep.subr.mxu0 %v21299_v21  ;;  %v21305_v21 = vld [vmem:[#allocation51_spill] sm:$0xff] }
 0xa1f   :  { %11387 = vmatprep.subr.mxu1 %v20055_v10  ;;  %11213 = vmatpush1.msra.mxu0 %v21300_v41  ;;  %v21306_v41 = vld [vmem:[#allocation54_spill] sm:$0xff] }
 0xa20   :  { %11389 = vmatpush1.msra.mxu1 %v20057_v48  ;;  %11217 = vmatprep.subr.mxu0 %v21301_v54  ;;  %v21307_v54 = vld [vmem:[#allocation57_spill] sm:$0xff] }
 0xa21   :  { %11391 = vmatprep.subr.mxu1 %v20059_v3  ;;  %11221 = vmatpush1.msra.mxu0 %v21302_v18  ;;  %v21308_v18 = vld [vmem:[#allocation61_spill] sm:$0xff] }
 0xa22   :  { %11393 = vmatpush1.msra.mxu1 %v20061_v63  ;;  %11225 = vmatprep.subr.mxu0 %v21303_v52  ;;  %v21309_v52 = vld [vmem:[#allocation64_spill] sm:$0xff] }
 0xa23   :  { %11395 = vmatprep.subr.mxu1 %v20063_v40  ;;  %11229 = vmatpush1.msra.mxu0 %v21304_v45  ;;  %v21310_v45 = vld [vmem:[#allocation67_spill] sm:$0xff] }
 0xa24   :  { %11397 = vmatpush1.msra.mxu1 %v20065_v33  ;;  %11233 = vmatprep.subr.mxu0 %v21305_v21  ;;  %v21311_v21 = vld [vmem:[#allocation73_spill] sm:$0xff] }
 0xa25   :  { %11399 = vmatprep.subr.mxu1 %v20067_v58  ;;  %11237 = vmatpush1.msra.mxu0 %v21306_v41  ;;  %v21312_v41 = vld [vmem:[#allocation76_spill] sm:$0xff] }
 0xa26   :  { %11401 = vmatpush1.msra.mxu1 %v20069_v1  ;;  %11241 = vmatprep.subr.mxu0 %v21307_v54  ;;  %v21313_v54 = vld [vmem:[#allocation82_spill] sm:$0xff] }
 0xa27   :  { %11403 = vmatprep.subr.mxu1 %v20071_v25  ;;  %11245 = vmatpush1.msra.mxu0 %v21308_v18  ;;  %v21314_v18 = vld [vmem:[#allocation86_spill] sm:$0xff] }
 0xa28   :  { %11405 = vmatpush1.msra.mxu1 %v20073_v62  ;;  %11249 = vmatprep.subr.mxu0 %v21309_v52  ;;  %v21315_v52 = vld [vmem:[#allocation90_spill] sm:$0xff] }
 0xa29   :  { %11407 = vmatprep.subr.mxu1 %v20075_v27  ;;  %11253 = vmatpush1.msra.mxu0 %v21310_v45  ;;  %v21316_v45 = vld [vmem:[#allocation92_spill] sm:$0xff] }
 0xa2a   :  { %11409 = vmatpush1.msra.mxu1 %v20077_v51  ;;  %11257 = vmatprep.subr.mxu0 %v21311_v21  ;;  %v21317_v21 = vld [vmem:[#allocation96_spill] sm:$0xff] }
 0xa2b   :  { %11411 = vmatprep.subr.mxu1 %v21248_v23  ;;  %11261 = vmatpush1.msra.mxu0 %v21312_v41  ;;  %v21318_v41 = vld [vmem:[#allocation99_spill] sm:$0xff]  ;;  %v21389_v23 = vld [vmem:[#allocation144_spill] sm:$0xff] }
 0xa2c   :  { %11413 = vmatpush1.msra.mxu1 %v21250_v46  ;;  %11265 = vmatprep.subr.mxu0 %v21313_v54  ;;  %v21319_v54 = vld [vmem:[#allocation105_spill] sm:$0xff]  ;;  %v21388_v46 = vld [vmem:[#allocation143_spill] sm:$0xff] }
 0xa2d   :  { %11415 = vmatprep.subr.mxu1 %v21252_v53  ;;  %11269 = vmatpush1.msra.mxu0 %v21314_v18  ;;  %v21320_v18 = vld [vmem:[#allocation108_spill] sm:$0xff]  ;;  %v21387_v53 = vld [vmem:[#allocation142_spill] sm:$0xff] }
 0xa2e   :  { %11417 = vmatpush1.msra.mxu1 %v21254_v8  ;;  %11273 = vmatprep.subr.mxu0 %v21315_v52  ;;  %v21323_v52 = vld [vmem:[#allocation114_spill] sm:$0xff]  ;;  %v21386_v8 = vld [vmem:[#allocation140_spill] sm:$0xff] }
 0xa2f   :  { %11419 = vmatprep.subr.mxu1 %v21255_v15  ;;  %11277 = vmatpush1.msra.mxu0 %v21316_v45  ;;  %v21321_v45 = vld [vmem:[#allocation111_spill] sm:$0xff] }
 0xa30   :  { %11421 = vmatpush1.msra.mxu1 %v21256_v6  ;;  %11281 = vmatprep.subr.mxu0 %v21317_v21  ;;  %v21322_v21 = vld [vmem:[#allocation167_spill] sm:$0xff]  ;;  %v21384_v6 = vld [vmem:[#allocation232_spill] sm:$0xff] }
 0xa31   :  { %11423 = vmatprep.subr.mxu1 %v21257_v36  ;;  %11285 = vmatpush1.msra.mxu0 %v21318_v41  ;;  %v21324_v41 = vld [vmem:[#allocation170_spill] sm:$0xff]  ;;  %v21383_v36 = vld [vmem:[#allocation229_spill] sm:$0xff]  ;;  %v21385_v15 = vld [vmem:[#allocation139_spill] sm:$0xff] }
 0xa32   :  { %11425 = vmatpush1.msra.mxu1 %v21258_v0  ;;  %11289 = vmatprep.subr.mxu0 %v21319_v54  ;;  %v21326_v54 = vld [vmem:[#allocation174_spill] sm:$0xff]  ;;  %v21376_v0 = vld [vmem:[#allocation260_spill] sm:$0xff] }
 0xa33   :  { %11427 = vmatprep.subr.mxu1 %v21259_v7  ;;  %11293 = vmatpush1.msra.mxu0 %v21320_v18  ;;  %v21328_v18 = vld [vmem:[#allocation177_spill] sm:$0xff]  ;;  %v21374_v7 = vld [vmem:[#allocation259_spill] sm:$0xff] }
 0xa34   :  { %11429 = vmatpush1.msra.mxu1 %v21260_v26  ;;  %11462 = vmatprep.mubr.f32.mxu1 %v19817_v55  ;;  %v21372_v26 = vld [vmem:[#allocation258_spill] sm:$0xff] }
 0xa35   :  { %11297 = vmatprep.subr.mxu0 %v21321_v45  ;;  %11464 = vmatmul.mubr.f32.vlgmr.msra.gmra.mxu1 %v18118_v2  ;;  %v21331_v45 = vld [vmem:[#allocation128_spill] sm:$0xff] }
 0xa36   :  { %11583 = vmatprep.subr.mxu1 %v21322_v21  ;;  %11301 = vmatpush1.msra.mxu0 %v21323_v52  ;;  %v21333_v21 = vld [vmem:[#allocation131_spill] sm:$0xff]  ;;  %v21334_v52 = vld [vmem:[#allocation186_spill] sm:$0xff] }
 0xa37   :  { %11589 = vmatpush1.msra.mxu1 %v21324_v41  ;;  %11305 = vmatprep.subr.mxu0 %v21325_v22  ;;  %v21335_v41 = vld [vmem:[#allocation133_spill] sm:$0xff]  ;;  %v21354_v22 = vld [vmem:[#allocation243_spill] sm:$0xff] }
 0xa38   :  { %11595 = vmatprep.subr.mxu1 %v21326_v54  ;;  %11309 = vmatpush1.msra.mxu0 %v21327_v24  ;;  %v21336_v54 = vld [vmem:[#allocation192_spill] sm:$0xff] }
 0xa39   :  { %11601 = vmatpush1.msra.mxu1 %v21328_v18  ;;  %11313 = vmatprep.subr.mxu0 %v21329_v42  ;;  %v21337_v42 = vld [vmem:[#allocation195_spill] sm:$0xff]  ;;  %v21350_v18 = vld [vmem:[#allocation237_spill] sm:$0xff]  ;;  %v21352_v24 = vld [vmem:[#allocation240_spill] sm:$0xff] }
 0xa3a   :  { %11607 = vmatprep.subr.mxu1 %v21330_v37  ;;  %11317 = vmatpush1.msra.mxu0 %v21331_v45  ;;  %v21338_v45 = vld [vmem:[#allocation196_spill] sm:$0xff]  ;;  %v21348_v37 = vld [vmem:[#allocation235_spill] sm:$0xff] }
 0xa3b   :  { %11613 = vmatpush1.msra.mxu1 %v21332_v12  ;;  %11321 = vmatprep.subr.mxu0 %v21333_v21  ;;  %v21339_v21 = vld [vmem:[#allocation199_spill] sm:$0xff]  ;;  %v21346_v12 = vld [vmem:[#allocation226_spill] sm:$0xff] }
 0xa3c   :  { %11619 = vmatprep.subr.mxu1 %v21334_v52  ;;  %11325 = vmatpush1.msra.mxu0 %v21335_v41  ;;  %v21340_v41 = vld [vmem:[#allocation203_spill] sm:$0xff] }
 0xa3d   :  { %11358 = vmatprep.mubr.f32.mxu0 %v19817_v55  ;;  %11625 = vmatpush1.msra.mxu1 %v21336_v54  ;;  %v21341_v54 = vld [vmem:[#allocation206_spill] sm:$0xff]  ;;  %v21342_v52 = vld [vmem:[#allocation215_spill] sm:$0xff] }
 0xa3e   :  { %11360 = vmatmul.mubr.f32.vlgmr.msra.gmra.mxu0 %v18118_v2  ;;  %11471 = vmatprep.subr.mxu0 %v15103_v49 }
 0xa3f   :  { %11631 = vmatprep.subr.mxu1 %v21337_v42  ;;  %11473 = vmatpush1.msra.mxu0 %v15113_v60  ;;  %v21343_v42 = vld [vmem:[#allocation219_spill] sm:$0xff] }
 0xa40   :  { %11637 = vmatpush1.msra.mxu1 %v21338_v45  ;;  %11475 = vmatprep.subr.mxu0 %v15120_v14  ;;  %v21344_v45 = vld [vmem:[#allocation223_spill] sm:$0xff] }
 0xa41   :  { %11643 = vmatprep.subr.mxu1 %v21339_v21  ;;  %11477 = vmatpush1.msra.mxu0 %v15124_v61  ;;  %v21345_v21 = vld [vmem:[#allocation148_spill] sm:$0xff] }
 0xa42   :  { %11649 = vmatpush1.msra.mxu1 %v21340_v41  ;;  %11479 = vmatprep.subr.mxu0 %v19988_v47  ;;  %v21347_v41 = vld [vmem:[#allocation149_spill] sm:$0xff] }
 0xa43   :  { %11655 = vmatprep.subr.mxu1 %v21341_v54  ;;  %11481 = vmatpush1.msra.mxu0 %v19989_v4  ;;  %v21349_v54 = vld [vmem:[#allocation151_spill] sm:$0xff] }
 0xa44   :  { %11661 = vmatpush1.msra.mxu1 %v21342_v52  ;;  %11483 = vmatprep.subr.mxu0 %v19991_v38  ;;  %v21351_v52 = vld [vmem:[#allocation154_spill] sm:$0xff] }
 0xa45   :  { %11667 = vmatprep.subr.mxu1 %v21343_v42  ;;  %11485 = vmatpush1.msra.mxu0 %v20183_v19  ;;  %v21353_v42 = vld [vmem:[#allocation157_spill] sm:$0xff] }
 0xa46   :  { %11673 = vmatpush1.msra.mxu1 %v21344_v45  ;;  %11487 = vmatprep.subr.mxu0 %v21345_v21  ;;  %v21355_v45 = vld [vmem:[#allocation162_spill] sm:$0xff] }
 0xa47   :  { %11679 = vmatprep.subr.mxu1 %v21346_v12  ;;  %11489 = vmatpush1.msra.mxu0 %v21347_v41  ;;  %v21357_v12 = vld [vmem:[#allocation165_spill] sm:$0xff] }
 0xa48   :  { %11685 = vmatpush1.msra.mxu1 %v21348_v37  ;;  %11491 = vmatprep.subr.mxu0 %v21349_v54  ;;  %v21359_v37 = vld [vmem:[#allocation171_spill] sm:$0xff] }
 0xa49   :  { %11691 = vmatprep.subr.mxu1 %v21350_v18  ;;  %11493 = vmatpush1.msra.mxu0 %v21351_v52  ;;  %v21361_v18 = vld [vmem:[#allocation175_spill] sm:$0xff] }
 0xa4a   :  { %11697 = vmatpush1.msra.mxu1 %v21352_v24  ;;  %11495 = vmatprep.subr.mxu0 %v21353_v42  ;;  %v21363_v24 = vld [vmem:[#allocation184_spill] sm:$0xff] }
 0xa4b   :  { %11703 = vmatprep.subr.mxu1 %v21354_v22  ;;  %11497 = vmatpush1.msra.mxu0 %v21355_v45  ;;  %v21365_v22 = vld [vmem:[#allocation187_spill] sm:$0xff] }
 0xa4c   :  { %11709 = vmatpush1.msra.mxu1 %v21356_v39  ;;  %11499 = vmatprep.subr.mxu0 %v21357_v12  ;;  %v21367_v39 = vld [vmem:[#allocation189_spill] sm:$0xff] }
 0xa4d   :  { %11715 = vmatprep.subr.mxu1 %v21358_v44  ;;  %11501 = vmatpush1.msra.mxu0 %v21359_v37  ;;  %v21369_v44 = vld [vmem:[#allocation190_spill] sm:$0xff] }
 0xa4e   :  { %11721 = vmatpush1.msra.mxu1 %v21360_v56  ;;  %11503 = vmatprep.subr.mxu0 %v21361_v18  ;;  %v21371_v56 = vld [vmem:[#allocation193_spill] sm:$0xff] }
 0xa4f   :  { %11727 = vmatprep.subr.mxu1 %v21362_v17  ;;  %11505 = vmatpush1.msra.mxu0 %v21363_v24  ;;  %v21373_v17 = vld [vmem:[#allocation200_spill] sm:$0xff] }
 0xa50   :  { %11733 = vmatpush1.msra.mxu1 %v21364_v57  ;;  %11507 = vmatprep.subr.mxu0 %v21365_v22  ;;  %v21375_v57 = vld [vmem:[#allocation204_spill] sm:$0xff] }
 0xa51   :  { %11739 = vmatprep.subr.mxu1 %v21366_v31  ;;  %11509 = vmatpush1.msra.mxu0 %v21367_v39  ;;  %v21377_v31 = vld [vmem:[#allocation207_spill] sm:$0xff] }
 0xa52   :  { %11745 = vmatpush1.msra.mxu1 %v21368_v9  ;;  %11511 = vmatprep.subr.mxu0 %v21369_v44  ;;  %v21382_v9 = vld [vmem:[#allocation224_spill] sm:$0xff] }
 0xa53   :  { %11751 = vmatprep.subr.mxu1 %v21370_v11  ;;  %11513 = vmatpush1.msra.mxu0 %v21371_v56  ;;  %v21378_v11 = vld [vmem:[#allocation209_spill] sm:$0xff] }
 0xa54   :  { %11757 = vmatpush1.msra.mxu1 %v21372_v26  ;;  %11515 = vmatprep.subr.mxu0 %v21373_v17  ;;  %v21379_v26 = vld [vmem:[#allocation212_spill] sm:$0xff] }
 0xa55   :  { %11763 = vmatprep.subr.mxu1 %v21374_v7  ;;  %11517 = vmatpush1.msra.mxu0 %v21375_v57  ;;  %v21380_v7 = vld [vmem:[#allocation216_spill] sm:$0xff] }
 0xa56   :  { %11769 = vmatpush1.msra.mxu1 %v21376_v0  ;;  %11802 = vmatprep.mubr.f32.mxu1 %v19817_v55  ;;  %v21381_v0 = vld [vmem:[#allocation220_spill] sm:$0xff] }
 0xa57   :  { %11519 = vmatprep.subr.mxu0 %v21377_v31  ;;  %11804 = vmatmul.mubr.f32.vlgmr.msra.gmra.mxu1 %v18118_v2 }
 0xa58   :  { %11948 = vmatprep.subr.mxu1 %v15103_v49  ;;  %11521 = vmatpush1.msra.mxu0 %v21378_v11 }
 0xa59   :  { %11950 = vmatpush1.msra.mxu1 %v15113_v60  ;;  %11523 = vmatprep.subr.mxu0 %v21379_v26 }
 0xa5a   :  { %11952 = vmatprep.subr.mxu1 %v15120_v14  ;;  %11525 = vmatpush1.msra.mxu0 %v21380_v7 }
 0xa5b   :  { %11954 = vmatpush1.msra.mxu1 %v15124_v61  ;;  %11527 = vmatprep.subr.mxu0 %v21381_v0 }
 0xa5c   :  { %11956 = vmatprep.subr.mxu1 %v19988_v47  ;;  %11529 = vmatpush1.msra.mxu0 %v21382_v9 }
 0xa5d   :  { %11958 = vmatpush1.msra.mxu1 %v19989_v4  ;;  %11531 = vmatprep.subr.mxu0 %v21383_v36 }
 0xa5e   :  { %11960 = vmatprep.subr.mxu1 %v19991_v38  ;;  %11533 = vmatpush1.msra.mxu0 %v21384_v6 }
 0xa5f   :  { %11566 = vmatprep.mubr.f32.mxu0 %v19817_v55  ;;  %11962 = vmatpush1.msra.mxu1 %v20183_v19 }
 0xa60   :  { %11572 = vmatmul.mubr.f32.vlgmr.msra.gmra.mxu0 %v18136_v34  ;;  %11812 = vmatprep.subr.mxu0 %v21385_v15  ;;  %v21390_v34 = vld [vmem:[#allocation147_spill] sm:$0xff]  ;;  %v21391_v15 = vld [vmem:[#allocation153_spill] sm:$0xff] }
 0xa61   :  { %11964 = vmatprep.subr.mxu1 %v21345_v21  ;;  %11815 = vmatpush1.msra.mxu0 %v21386_v8  ;;  %v21392_v8 = vld [vmem:[#allocation159_spill] sm:$0xff] }
 0xa62   :  { %11966 = vmatpush1.msra.mxu1 %v21347_v41  ;;  %11818 = vmatprep.subr.mxu0 %v21387_v53  ;;  %v21393_v53 = vld [vmem:[#allocation160_spill] sm:$0xff] }
 0xa63   :  { %11968 = vmatprep.subr.mxu1 %v21349_v54  ;;  %11821 = vmatpush1.msra.mxu0 %v21388_v46  ;;  %v21394_v46 = vld [vmem:[#allocation161_spill] sm:$0xff] }
 0xa64   :  { %11970 = vmatpush1.msra.mxu1 %v21351_v52  ;;  %11824 = vmatprep.subr.mxu0 %v21389_v23  ;;  %v21395_v23 = vld [vmem:[#allocation164_spill] sm:$0xff] }
 0xa65   :  { %11972 = vmatprep.subr.mxu1 %v21353_v42  ;;  %11827 = vmatpush1.msra.mxu0 %v21390_v34  ;;  %v21396_v34 = vld [vmem:[#allocation166_spill] sm:$0xff] }
 0xa66   :  { %11974 = vmatpush1.msra.mxu1 %v21355_v45  ;;  %11830 = vmatprep.subr.mxu0 %v21391_v15  ;;  %v21397_v15 = vld [vmem:[#allocation169_spill] sm:$0xff] }
 0xa67   :  { %11976 = vmatprep.subr.mxu1 %v21357_v12  ;;  %11833 = vmatpush1.msra.mxu0 %v21392_v8  ;;  %v21398_v8 = vld [vmem:[#allocation180_spill] sm:$0xff] }
 0xa68   :  { %11978 = vmatpush1.msra.mxu1 %v21359_v37  ;;  %11836 = vmatprep.subr.mxu0 %v21393_v53  ;;  %v21399_v53 = vld [vmem:[#allocation183_spill] sm:$0xff] }
 0xa69   :  { %11980 = vmatprep.subr.mxu1 %v21361_v18  ;;  %11839 = vmatpush1.msra.mxu0 %v21394_v46  ;;  %v21400_v46 = vld [vmem:[#allocation185_spill] sm:$0xff] }
 0xa6a   :  { %11982 = vmatpush1.msra.mxu1 %v21363_v24  ;;  %11842 = vmatprep.subr.mxu0 %v21395_v23  ;;  %v21401_v23 = vld [vmem:[#allocation188_spill] sm:$0xff] }
 0xa6b   :  { %11984 = vmatprep.subr.mxu1 %v21365_v22  ;;  %11845 = vmatpush1.msra.mxu0 %v21396_v34  ;;  %v21402_v34 = vld [vmem:[#allocation198_spill] sm:$0xff] }
 0xa6c   :  { %11986 = vmatpush1.msra.mxu1 %v21367_v39  ;;  %11848 = vmatprep.subr.mxu0 %v21397_v15  ;;  %v21403_v15 = vld [vmem:[#allocation202_spill] sm:$0xff] }
 0xa6d   :  { %11988 = vmatprep.subr.mxu1 %v21369_v44  ;;  %11851 = vmatpush1.msra.mxu0 %v21398_v8  ;;  %v21404_v8 = vld [vmem:[#allocation205_spill] sm:$0xff] }
 0xa6e   :  { %11990 = vmatpush1.msra.mxu1 %v21371_v56  ;;  %11854 = vmatprep.subr.mxu0 %v21399_v53  ;;  %v21405_v53 = vld [vmem:[#allocation208_spill] sm:$0xff] }
 0xa6f   :  { %11992 = vmatprep.subr.mxu1 %v21373_v17  ;;  %11857 = vmatpush1.msra.mxu0 %v21400_v46  ;;  %v21406_v46 = vld [vmem:[#allocation211_spill] sm:$0xff] }
 0xa70   :  { %11994 = vmatpush1.msra.mxu1 %v21375_v57  ;;  %11860 = vmatprep.subr.mxu0 %v21401_v23  ;;  %v21407_v23 = vld [vmem:[#allocation214_spill] sm:$0xff] }
 0xa71   :  { %11996 = vmatprep.subr.mxu1 %v21377_v31  ;;  %11863 = vmatpush1.msra.mxu0 %v21402_v34  ;;  %v21408_v34 = vld [vmem:[#allocation218_spill] sm:$0xff] }
 0xa72   :  { %11998 = vmatpush1.msra.mxu1 %v21378_v11  ;;  %11866 = vmatprep.subr.mxu0 %v21403_v15  ;;  %v21448_v15 = vld [vmem:[#allocation247_spill] sm:$0xff] }
 0xa73   :  { %12000 = vmatprep.subr.mxu1 %v21379_v26  ;;  %11869 = vmatpush1.msra.mxu0 %v21404_v8  ;;  %v21409_v8 = vld [vmem:[#allocation222_spill] sm:$0xff] }
 0xa74   :  { %12002 = vmatpush1.msra.mxu1 %v21380_v7  ;;  %11872 = vmatprep.subr.mxu0 %v21405_v53  ;;  %v21410_v53 = vld [vmem:[#allocation228_spill] sm:$0xff] }
 0xa75   :  { %12004 = vmatprep.subr.mxu1 %v21381_v0  ;;  %11875 = vmatpush1.msra.mxu0 %v21406_v46  ;;  %v21411_v46 = vld [vmem:[#allocation231_spill] sm:$0xff] }
 0xa76   :  { %12006 = vmatpush1.msra.mxu1 %v21382_v9  ;;  %11878 = vmatprep.subr.mxu0 %v21407_v23  ;;  %v21412_v23 = vld [vmem:[#allocation234_spill] sm:$0xff] }
 0xa77   :  { %12008 = vmatprep.subr.mxu1 %v21383_v36  ;;  %11881 = vmatpush1.msra.mxu0 %v21408_v34  ;;  %v21413_v34 = vld [vmem:[#allocation236_spill] sm:$0xff] }
 0xa78   :  { %12010 = vmatpush1.msra.mxu1 %v21384_v6  ;;  %12043 = vmatprep.mubr.f32.mxu1 %v19817_v55 }
 0xa79   :  { %11884 = vmatprep.subr.mxu0 %v21409_v8  ;;  %12047 = vmatmul.mubr.f32.vlgmr.msra.gmra.mxu1 %v18128_v50  ;;  %v21414_v8 = vld [vmem:[#allocation239_spill] sm:$0xff]  ;;  %v21415_v50 = vld [vmem:[#allocation242_spill] sm:$0xff] }
 0xa7a   :  { %12222 = vmatprep.subr.mxu1 %v15103_v49  ;;  %11887 = vmatpush1.msra.mxu0 %v21410_v53  ;;  %v21416_v53 = vld [vmem:[#allocation245_spill] sm:$0xff] }
 0xa7b   :  { %12224 = vmatpush1.msra.mxu1 %v15113_v60  ;;  %11890 = vmatprep.subr.mxu0 %v21411_v46  ;;  %v21443_v46 = vld [vmem:[#allocation233_spill] sm:$0xff] }
 0xa7c   :  { %12226 = vmatprep.subr.mxu1 %v15120_v14  ;;  %11893 = vmatpush1.msra.mxu0 %v21412_v23  ;;  %v21417_v23 = vld [vmem:[#allocation146_spill] sm:$0xff] }
 0xa7d   :  { %12228 = vmatpush1.msra.mxu1 %v15124_v61  ;;  %11896 = vmatprep.subr.mxu0 %v21413_v34  ;;  %v21418_v34 = vld [vmem:[#allocation150_spill] sm:$0xff] }
 0xa7e   :  { %12230 = vmatprep.subr.mxu1 %v19988_v47  ;;  %11899 = vmatpush1.msra.mxu0 %v21414_v8  ;;  %v21419_v8 = vld [vmem:[#allocation152_spill] sm:$0xff] }
 0xa7f   :  { %12232 = vmatpush1.msra.mxu1 %v19989_v4  ;;  %11902 = vmatprep.subr.mxu0 %v21415_v50  ;;  %v21420_v50 = vld [vmem:[#allocation155_spill] sm:$0xff] }
 0xa80   :  { %12234 = vmatprep.subr.mxu1 %v19991_v38  ;;  %11905 = vmatpush1.msra.mxu0 %v21416_v53  ;;  %v21421_v53 = vld [vmem:[#allocation156_spill] sm:$0xff] }
 0xa81   :  { %11938 = vmatprep.mubr.f32.mxu0 %v19817_v55  ;;  %12236 = vmatpush1.msra.mxu1 %v20183_v19 }
 0xa82   :  { %11941 = vmatmul.mubr.f32.vlgmr.msra.gmra.mxu0 %v18121_v13  ;;  %12056 = vmatprep.subr.mxu0 %v21417_v23  ;;  %v21422_v13 = vld [vmem:[#allocation158_spill] sm:$0xff]  ;;  %v21423_v23 = vld [vmem:[#allocation163_spill] sm:$0xff] }
 0xa83   :  { %12238 = vmatprep.subr.mxu1 %v21345_v21  ;;  %12060 = vmatpush1.msra.mxu0 %v21418_v34  ;;  %v21424_v34 = vld [vmem:[#allocation168_spill] sm:$0xff]  ;;  %v14167_v21 = vld [vmem:[%s18931_s1 + $0xc8] sm:$0xff] }
 0xa84   :  { %12240 = vmatpush1.msra.mxu1 %v21347_v41  ;;  %12064 = vmatprep.subr.mxu0 %v21419_v8  ;;  %v21425_v8 = vld [vmem:[#allocation172_spill] sm:$0xff] }
 0xa85   :  { %12242 = vmatprep.subr.mxu1 %v21349_v54  ;;  %12068 = vmatpush1.msra.mxu0 %v21420_v50  ;;  %v21426_v50 = vld [vmem:[#allocation173_spill] sm:$0xff] }
 0xa86   :  { %12244 = vmatpush1.msra.mxu1 %v21351_v52  ;;  %12072 = vmatprep.subr.mxu0 %v21421_v53  ;;  %v21427_v53 = vld [vmem:[#allocation176_spill] sm:$0xff] }
 0xa87   :  { %12246 = vmatprep.subr.mxu1 %v21353_v42  ;;  %12076 = vmatpush1.msra.mxu0 %v21422_v13  ;;  %v21428_v13 = vld [vmem:[#allocation179_spill] sm:$0xff] }
 0xa88   :  { %12248 = vmatpush1.msra.mxu1 %v21355_v45  ;;  %12080 = vmatprep.subr.mxu0 %v21423_v23  ;;  %v21429_v23 = vld [vmem:[#allocation182_spill] sm:$0xff] }
 0xa89   :  { %12250 = vmatprep.subr.mxu1 %v21357_v12  ;;  %12084 = vmatpush1.msra.mxu0 %v21424_v34  ;;  %v21430_v34 = vld [vmem:[#allocation191_spill] sm:$0xff] }
 0xa8a   :  { %12252 = vmatpush1.msra.mxu1 %v21359_v37  ;;  %12088 = vmatprep.subr.mxu0 %v21425_v8  ;;  %v21431_v8 = vld [vmem:[#allocation194_spill] sm:$0xff] }
 0xa8b   :  { %12254 = vmatprep.subr.mxu1 %v21361_v18  ;;  %12092 = vmatpush1.msra.mxu0 %v21426_v50  ;;  %v21432_v50 = vld [vmem:[#allocation197_spill] sm:$0xff] }
 0xa8c   :  { %12256 = vmatpush1.msra.mxu1 %v21363_v24  ;;  %12096 = vmatprep.subr.mxu0 %v21427_v53  ;;  %v21433_v53 = vld [vmem:[#allocation201_spill] sm:$0xff] }
 0xa8d   :  { %12258 = vmatprep.subr.mxu1 %v21365_v22  ;;  %12100 = vmatpush1.msra.mxu0 %v21428_v13  ;;  %v21434_v13 = vld [vmem:[#allocation210_spill] sm:$0xff] }
 0xa8e   :  { %12260 = vmatpush1.msra.mxu1 %v21367_v39  ;;  %12104 = vmatprep.subr.mxu0 %v21429_v23  ;;  %v21435_v23 = vld [vmem:[#allocation213_spill] sm:$0xff] }
 0xa8f   :  { %12262 = vmatprep.subr.mxu1 %v21369_v44  ;;  %12108 = vmatpush1.msra.mxu0 %v21430_v34  ;;  %v21436_v34 = vld [vmem:[#allocation217_spill] sm:$0xff] }
 0xa90   :  { %12264 = vmatpush1.msra.mxu1 %v21371_v56  ;;  %12112 = vmatprep.subr.mxu0 %v21431_v8  ;;  %v21437_v8 = vld [vmem:[#allocation221_spill] sm:$0xff] }
 0xa91   :  { %12266 = vmatprep.subr.mxu1 %v21373_v17  ;;  %12116 = vmatpush1.msra.mxu0 %v21432_v50  ;;  %v21438_v50 = vld [vmem:[#allocation225_spill] sm:$0xff] }
 0xa92   :  { %12268 = vmatpush1.msra.mxu1 %v21375_v57  ;;  %12120 = vmatprep.subr.mxu0 %v21433_v53  ;;  %v21439_v53 = vld [vmem:[#allocation137_spill] sm:$0xff] }
 0xa93   :  { %12270 = vmatprep.subr.mxu1 %v21377_v31  ;;  %12124 = vmatpush1.msra.mxu0 %v21434_v13  ;;  %vm12355_vm13 = vcmp.eq.s32.totalorder %v21439_v53, 6  ;;  %v21440_v13 = vld [vmem:[#allocation227_spill] sm:$0xff]  ;;  %v21445_v53 = vld [vmem:[#allocation241_spill] sm:$0xff] }
 0xa94   :  { %12272 = vmatpush1.msra.mxu1 %v21378_v11  ;;  %12128 = vmatprep.subr.mxu0 %v21435_v23  ;;  %v21441_v23 = vld [vmem:[#allocation230_spill] sm:$0xff] }
 0xa95   :  { %12274 = vmatprep.subr.mxu1 %v21379_v26  ;;  %12132 = vmatpush1.msra.mxu0 %v21436_v34  ;;  %v21442_v34 = vmov 0  }
 0xa96   :  { %12276 = vmatpush1.msra.mxu1 %v21380_v7  ;;  %12136 = vmatprep.subr.mxu0 %v21437_v8  ;;  %v12356_v8 = vsel %vm12355_vm13, 1, %v21442_v34  ;;  %v21450_v34 = vld [vmem:[#allocation249_spill] sm:$0xff] }
 0xa97   :  { %12278 = vmatprep.subr.mxu1 %v21381_v0  ;;  %12140 = vmatpush1.msra.mxu0 %v21438_v50  ;;  %v21444_v50 = vld [vmem:[#allocation238_spill] sm:$0xff] }
 0xa98   :  { %12280 = vmatpush1.msra.mxu1 %v21382_v9  ;;  %12144 = vmatprep.subr.mxu0 %v21440_v13  ;;  %v21446_v13 = vld [vmem:[#allocation244_spill] sm:$0xff]  ;;  %v21454_v9 = vld [vmem:[#allocation253_spill] sm:$0xff] }
 0xa99   :  { %12282 = vmatprep.subr.mxu1 %v21383_v36  ;;  %12148 = vmatpush1.msra.mxu0 %v21441_v23  ;;  %v21447_v23 = vld [vmem:[#allocation34_spill] sm:$0xff]  ;;  %v21452_v36 = vld [vmem:[#allocation251_spill] sm:$0xff] }
 0xa9a   :  { %12284 = vmatpush1.msra.mxu1 %v21384_v6  ;;  %12317 = vmatprep.mubr.f32.mxu1 %v19817_v55  ;;  %v21449_v6 = vld [vmem:[#allocation37_spill] sm:$0xff] }
 0xa9b   :  { %12152 = vmatprep.subr.mxu0 %v21443_v46  ;;  %12319 = vmatmul.mubr.f32.vlgmr.msra.gmra.mxu1 %v18118_v2  ;;  %v21451_v46 = vld [vmem:[#allocation38_spill] sm:$0xff] }
 0xa9c   :  { %12156 = vmatpush1.msra.mxu0 %v21444_v50  ;;  %12213 = vmatprep.mubr.f32.mxu0 %v19817_v55  ;;  %v21453_v50 = vld [vmem:[#allocation40_spill] sm:$0xff] }
 0xa9d   :  { %12160 = vmatprep.subr.mxu0 %v21445_v53  ;;  %12358 = vperm.xlu0 %14183, %v12356_v8   ;;  %v21455_v53 = vld [vmem:[#allocation43_spill] sm:$0xff]  ;;  %v21456_v8 = vld [vmem:[#allocation46_spill] sm:$0xff] }
 0xa9e   :  { %12164 = vmatpush1.msra.mxu0 %v21446_v13  ;;  %12480 = vmatprep.subr.mxu1 %v21447_v23  ;;  %v21457_v23 = vld [vmem:[#allocation50_spill] sm:$0xff] }
 0xa9f   :  { %12168 = vmatprep.subr.mxu0 %v21448_v15  ;;  %12486 = vmatpush1.msra.mxu1 %v21449_v6  ;;  %v21458_v6 = vld [vmem:[#allocation60_spill] sm:$0xff]  ;;  %v21492_v15 = vld [vmem:[#allocation102_spill] sm:$0xff] }
 0xaa0   :  { %12172 = vmatpush1.msra.mxu0 %v21450_v34  ;;  %12492 = vmatprep.subr.mxu1 %v21451_v46  ;;  %v21459_v46 = vld [vmem:[#allocation63_spill] sm:$0xff]  ;;  %v21490_v34 = vld [vmem:[#allocation93_spill] sm:$0xff] }
 0xaa1   :  { %12176 = vmatprep.subr.mxu0 %v21452_v36  ;;  %12498 = vmatpush1.msra.mxu1 %v21453_v50  ;;  %v21460_v50 = vld [vmem:[#allocation66_spill] sm:$0xff]  ;;  %v21485_v36 = vld [vmem:[#allocation136_spill] sm:$0xff] }
 0xaa2   :  { %12180 = vmatpush1.msra.mxu0 %v21454_v9  ;;  %12504 = vmatprep.subr.mxu1 %v21455_v53  ;;  %v21461_v53 = vld [vmem:[#allocation69_spill] sm:$0xff]  ;;  %v21483_v9 = vld [vmem:[#allocation135_spill] sm:$0xff] }
 0xaa3   :  { %12215 = vmatmul.mubr.f32.vlgmr.msra.gmra.mxu0 %v18118_v2  ;;  %12510 = vmatpush1.msra.mxu1 %v21456_v8  ;;  %v21462_v2 = vld [vmem:[#allocation72_spill] sm:$0xff]  ;;  %v21463_v8 = vld [vmem:[#allocation75_spill] sm:$0xff] }
 0xaa4   :  { %12516 = vmatprep.subr.mxu1 %v21457_v23  ;;  %12368 = vmatprep.subr.mxu0 %v20038_v29  ;;  %v21464_v23 = vld [vmem:[#allocation79_spill] sm:$0xff] }
 0xaa5   :  { %12522 = vmatpush1.msra.mxu1 %v21458_v6  ;;  %12370 = vmatpush1.msra.mxu0 %v20039_v20  ;;  %v21465_v6 = vld [vmem:[#allocation85_spill] sm:$0xff] }
 0xaa6   :  { %12528 = vmatprep.subr.mxu1 %v21459_v46  ;;  %12372 = vmatprep.subr.mxu0 %v20040_v43  ;;  %v21466_v46 = vld [vmem:[#allocation89_spill] sm:$0xff] }
 0xaa7   :  { %12534 = vmatpush1.msra.mxu1 %v21460_v50  ;;  %12374 = vmatpush1.msra.mxu0 %v20041_v32  ;;  %v21467_v50 = vld [vmem:[#allocation95_spill] sm:$0xff] }
 0xaa8   :  { %12540 = vmatprep.subr.mxu1 %v21461_v53  ;;  %12376 = vmatprep.subr.mxu0 %v20042_v16  ;;  %v21468_v53 = vld [vmem:[#allocation98_spill] sm:$0xff] }
 0xaa9   :  { %12546 = vmatpush1.msra.mxu1 %v21462_v2  ;;  %12378 = vmatpush1.msra.mxu0 %v20045_v28  ;;  %v21469_v2 = vld [vmem:[#allocation101_spill] sm:$0xff] }
 0xaaa   :  { %12552 = vmatprep.subr.mxu1 %v21463_v8  ;;  %12380 = vmatprep.subr.mxu0 %v20047_v30  ;;  %v21470_v8 = vld [vmem:[#allocation104_spill] sm:$0xff] }
 0xaab   :  { %12558 = vmatpush1.msra.mxu1 %v21464_v23  ;;  %12382 = vmatpush1.msra.mxu0 %v20049_v5  ;;  %v21471_v23 = vld [vmem:[#allocation107_spill] sm:$0xff] }
 0xaac   :  { %12564 = vmatprep.subr.mxu1 %v21465_v6  ;;  %12384 = vmatprep.subr.mxu0 %v20051_v35  ;;  %v21472_v6 = vld [vmem:[#allocation110_spill] sm:$0xff] }
 0xaad   :  { %12570 = vmatpush1.msra.mxu1 %v21466_v46  ;;  %12386 = vmatpush1.msra.mxu0 %v20053_v59  ;;  %v21473_v46 = vld [vmem:[#allocation116_spill] sm:$0xff] }
 0xaae   :  { %12576 = vmatprep.subr.mxu1 %v21467_v50  ;;  %12388 = vmatprep.subr.mxu0 %v20055_v10  ;;  %v21474_v50 = vld [vmem:[#allocation119_spill] sm:$0xff] }
 0xaaf   :  { %12582 = vmatpush1.msra.mxu1 %v21468_v53  ;;  %12390 = vmatpush1.msra.mxu0 %v20057_v48  ;;  %v21475_v53 = vld [vmem:[#allocation122_spill] sm:$0xff] }
 0xab0   :  { %12588 = vmatprep.subr.mxu1 %v21469_v2  ;;  %12392 = vmatprep.subr.mxu0 %v20059_v3  ;;  %v21476_v2 = vld [vmem:[#allocation125_spill] sm:$0xff] }
 0xab1   :  { %12594 = vmatpush1.msra.mxu1 %v21470_v8  ;;  %12394 = vmatpush1.msra.mxu0 %v20061_v63  ;;  %v21477_v8 = vld [vmem:[#allocation127_spill] sm:$0xff] }
 0xab2   :  { %12600 = vmatprep.subr.mxu1 %v21471_v23  ;;  %12396 = vmatprep.subr.mxu0 %v20063_v40  ;;  %v21478_v23 = vld [vmem:[#allocation130_spill] sm:$0xff] }
 0xab3   :  { %12606 = vmatpush1.msra.mxu1 %v21472_v6  ;;  %12398 = vmatpush1.msra.mxu0 %v20065_v33  ;;  %v21479_v6 = vld [vmem:[#allocation132_spill] sm:$0xff]  ;;  %v10950_v7 = vpop.f32.mrf.mxu1 }
 0xab4   :  { %12612 = vmatprep.subr.mxu1 %v21473_v46  ;;  %12400 = vmatprep.subr.mxu0 %v20067_v58  ;;  %v21480_v46 = vld [vmem:[#allocation65_spill] sm:$0xff] }
 0xab5   :  { %12618 = vmatpush1.msra.mxu1 %v21474_v50  ;;  %12402 = vmatpush1.msra.mxu0 %v20069_v1  ;;  %v21481_v50 = vld [vmem:[#allocation134_spill] sm:$0xff]  ;;  %v10952_v11 = vpop.f32.mrf.mxu1 }
 0xab6   :  { %12624 = vmatprep.subr.mxu1 %v21475_v53  ;;  %12404 = vmatprep.subr.mxu0 %v20071_v25  ;;  %v21482_v53 = vld [vmem:[#allocation70_spill] sm:$0xff] }
 0xab7   :  { %12630 = vmatpush1.msra.mxu1 %v21476_v2  ;;  %12406 = vmatpush1.msra.mxu0 %v20073_v62  ;;  %v21484_v2 = vld [vmem:[#allocation74_spill] sm:$0xff] }
 0xab8   :  { %12636 = vmatprep.subr.mxu1 %v21477_v8  ;;  %12408 = vmatprep.subr.mxu0 %v20075_v27  ;;  %v21486_v8 = vld [vmem:[#allocation78_spill] sm:$0xff] }
 0xab9   :  { %12642 = vmatpush1.msra.mxu1 %v21478_v23  ;;  %12410 = vmatpush1.msra.mxu0 %v20077_v51  ;;  %v21487_v23 = vld [vmem:[#allocation81_spill] sm:$0xff] }
 0xaba   :  { %12648 = vmatprep.subr.mxu1 %v21479_v6  ;;  %12412 = vmatprep.subr.mxu0 %v21480_v46  ;;  %v21488_v6 = vld [vmem:[#allocation84_spill] sm:$0xff] }
 0xabb   :  { %12654 = vmatpush1.msra.mxu1 %v21481_v50  ;;  %12414 = vmatpush1.msra.mxu0 %v21482_v53  ;;  %v21489_v50 = vld [vmem:[#allocation88_spill] sm:$0xff]  ;;  %v10718_v13 = vpop.f32.mrf.mxu0 }
 0xabc   :  { %12660 = vmatprep.subr.mxu1 %v21483_v9  ;;  %12416 = vmatprep.subr.mxu0 %v21484_v2  ;;  %v21491_v9 = vld [vmem:[#allocation97_spill] sm:$0xff]  ;;  %v10951_v17 = vadd.f32 %v10950_v7, %v10718_v13  ;;  %v14166_v7 = vld [vmem:[%s18931_s1 + $0xc0] sm:$0xff] }
 0xabd   :  { %12666 = vmatpush1.msra.mxu1 %v21485_v36  ;;  %12699 = vmatprep.mubr.f32.mxu1 %v19817_v55  ;;  %v21493_v36 = vld [vmem:[#allocation16_spill] sm:$0xff]  ;;  %v10720_v0 = vpop.f32.mrf.mxu0 }
 0xabe   :  { %12845 = vmatprep.subr.mxu1 %v20038_v29  ;;  %12418 = vmatpush1.msra.mxu0 %v21486_v8  ;;  %v10953_v57 = vadd.f32 %v10952_v11, %v10720_v0 }
 0xabf   :  { %12420 = vmatprep.subr.mxu0 %v21487_v23  ;;  %12463 = vmatprep.mubr.f32.mxu0 %v19817_v55 }
 0xac0   :  { %12422 = vmatpush1.msra.mxu0 %v21488_v6 }
 0xac1   :  { %12424 = vmatprep.subr.mxu0 %v21489_v50 }
 0xac2   :  { %12426 = vmatpush1.msra.mxu0 %v21490_v34 }
 0xac3   :  { %12428 = vmatprep.subr.mxu0 %v21491_v9 }
 0xac4   :  { %12430 = vmatpush1.msra.mxu0 %v21492_v15 }
 0xac5   :  { %12709 = vmatprep.subr.mxu0 %v21493_v36 }
 0xad3   :  { %v11193_v56 = vpop.f32.mrf.mxu1 }
 0xad5   :  { %v11195_v24 = vpop.f32.mrf.mxu1 }
 0xadc   :  { %v11087_v26 = vpop.f32.mrf.mxu0 }
 0xadd   :  { %v11088_v22 = vadd.f32 %v11087_v26, %v10951_v17 }
 0xade   :  { %v11089_v31 = vpop.f32.mrf.mxu0 }
 0xadf   :  { %v11090_v39 = vadd.f32 %v11089_v31, %v10953_v57  ;;  %v11194_v45 = vadd.f32 %v11193_v56, %v11088_v22 }
 0xae1   :  { %v11196_v37 = vadd.f32 %v11195_v24, %v11090_v39 }
 0xaf5   :  { %v11465_v12 = vpop.f32.mrf.mxu1 }
 0xaf7   :  { %v11467_v36 = vpop.f32.mrf.mxu1 }
 0xafe   :  { %v11361_v44 = vpop.f32.mrf.mxu0 }
 0xaff   :  { %v11362_v52 = vadd.f32 %v11361_v44, %v11194_v45 }
 0xb00   :  { %v11363_v18 = vpop.f32.mrf.mxu0 }
 0xb01   :  { %v11364_v42 = vadd.f32 %v11363_v18, %v11196_v37  ;;  %v11466_v41 = vadd.f32 %v11465_v12, %v11362_v52 }
 0xb03   :  { %v11468_v54 = vadd.f32 %v11467_v36, %v11364_v42  ;;  %v12325_v26 = vadd.f32 %v14166_v7, %v11466_v41 }
 0xb05   :  { %v12326_v0 = vadd.f32 %v14167_v21, %v11468_v54  ;;  %v14170_v31 = vmul.f32 -1.442695, %v12325_v26 }
 0xb07   :  { %v14171_v11 = vmul.f32 -1.442695, %v12326_v0 }
 0xb09   :  { %14281 = vpow2.f32 %v14171_v11  ;;  %v14168_v11 = vld [vmem:[%s18931_s1 + $0xd0] sm:$0xff] }
 0xb0a   :  { %14283 = vpow2.f32 %v14170_v31 }
 0xb16   :  { %v14282_v52 = vpop.eup %14281 }
 0xb17   :  { %v11805_v17 = vpop.f32.mrf.mxu1  ;;  %v14284_v13 = vpop.eup %14283  ;;  %v12338_v36 = vadd.f32 1.0, %v14282_v52  ;;  %v21494_v52 = vld [vmem:[#allocation13_spill] sm:$0xff] }
 0xb18   :  { %v12332_v26 = vadd.f32 1.0, %v14284_v13 }
 0xb19   :  { %v11807_v39 = vpop.f32.mrf.mxu1  ;;  %14285 = vrcp.f32 %v12338_v36  ;;  %v12359_v36 = vpop.permute.xlu0 %12358 }
 0xb1a   :  { %14287 = vrcp.f32 %v12332_v26  ;;  %vm12360_vm14 = vcmp.eq.s32.totalorder %v12359_v36, 1  ;;  %v21507_v36 = vld [vmem:[#allocation58_spill] sm:$0xff] }
 0xb20   :  { %v11573_v57 = vpop.f32.mrf.mxu0 }
 0xb21   :  { %v11806_v12 = vadd.f32 %v11805_v17, %v11573_v57 }
 0xb22   :  { %v11575_v56 = vpop.f32.mrf.mxu0 }
 0xb23   :  { %v11808_v24 = vadd.f32 %v11807_v39, %v11575_v56 }
 0xb39   :  { %v12048_v37 = vpop.f32.mrf.mxu1 }
 0xb3b   :  { %v12050_v45 = vpop.f32.mrf.mxu1 }
 0xb42   :  { %v11942_v44 = vpop.f32.mrf.mxu0 }
 0xb43   :  { %v11943_v22 = vadd.f32 %v11942_v44, %v11806_v12  ;;  %v14169_v44 = vld [vmem:[%s18931_s1 + $0xd8] sm:$0xff] }
 0xb44   :  { %v11944_v42 = vpop.f32.mrf.mxu0 }
 0xb45   :  { %v11945_v18 = vadd.f32 %v11944_v42, %v11808_v24  ;;  %v12049_v21 = vadd.f32 %v12048_v37, %v11943_v22  ;;  %v14286_v24 = vpop.eup %14285 }
 0xb46   :  { %v14288_v22 = vpop.eup %14287 }
 0xb47   :  { %v12051_v0 = vadd.f32 %v12050_v45, %v11945_v18  ;;  %v12348_v45 = vmul.f32 %v14286_v24, %v21494_v52  ;;  %v21499_v24 = vld [vmem:[#allocation27_spill] sm:$0xff]  ;;  %v21502_v52 = vld [vmem:[#allocation41_spill] sm:$0xff] }
 0xb5b   :  { %v12320_v41 = vpop.f32.mrf.mxu1 }
 0xb5d   :  { %v12322_v56 = vpop.f32.mrf.mxu1 }
 0xb63   :  { %v12216_v54 = vpop.f32.mrf.mxu0 }
 0xb64   :  { %v12217_v7 = vadd.f32 %v12216_v54, %v12049_v21 }
 0xb65   :  { %v12218_v31 = vpop.f32.mrf.mxu0 }
 0xb66   :  { %v12321_v57 = vadd.f32 %v12320_v41, %v12217_v7  ;;  %v12219_v17 = vadd.f32 %v12218_v31, %v12051_v0 }
 0xb68   :  { %v12327_v39 = vadd.f32 %v14168_v11, %v12321_v57  ;;  %v12323_v12 = vadd.f32 %v12322_v56, %v12219_v17  ;;  %v21495_v11 = vld [vmem:[#allocation14_spill] sm:$0xff] }
 0xb6a   :  { %14289 = vtanh.f32 %v12327_v39  ;;  %v12328_v37 = vadd.f32 %v14169_v44, %v12323_v12  ;;  %v21496_v12 = vld [vmem:[#allocation18_spill] sm:$0xff] }
 0xb6c   :  { %v14172_v42 = vmul.f32 -1.442695, %v12328_v37  ;;  %v21497_v37 = vld [vmem:[#allocation20_spill] sm:$0xff] }
 0xb6e   :  { %14291 = vpow2.f32 %v14172_v42  ;;  %v21498_v42 = vld [vmem:[#allocation23_spill] sm:$0xff] }
 0xb77   :  { %v14290_v18 = vpop.eup %14289 }
 0xb78   :  { %v12349_v13 = vmul.f32 %v14290_v18, %v14288_v22  ;;  %v21500_v22 = vld [vmem:[#allocation30_spill] sm:$0xff]  ;;  %v21501_v18 = vld [vmem:[#allocation33_spill] sm:$0xff] }
 0xb7a   :  { %v18553_v21 = vadd.f32 %v12349_v13, %v12348_v45  ;;  %v21503_v45 = vld [vmem:[#allocation44_spill] sm:$0xff] }
 0xb7b   :  { %v14292_v41 = vpop.eup %14291  ;;  %v21504_v13 = vld [vmem:[#allocation48_spill] sm:$0xff] }
 0xb7c   :  { %v12345_v54 = vadd.f32 1.0, %v14292_v41  ;;  %14293 = vtanh.f32 %v18553_v21  ;;  %v21505_v41 = vld [vmem:[#allocation52_spill] sm:$0xff] }
 0xb7e   :  { %14295 = vrcp.f32 %v12345_v54  ;;  %v21506_v54 = vld [vmem:[#allocation55_spill] sm:$0xff] }
 0xb89   :  { %v14294_v7 = vpop.eup %14293 }
 0xb8b   :  { %v14296_v0 = vpop.eup %14295 }
 0xb8c   :  { %v12352_v26 = vmul.f32 %v14296_v0, %v14294_v7  ;;  %v21508_v7 = vld [vmem:[#allocation62_spill] sm:$0xff]  ;;  %v21509_v0 = vld [vmem:[#allocation68_spill] sm:$0xff] }
 0xb8e   :  { %v18557_v31 = vsel %vm12360_vm14, %v12352_v26, %v21495_v11  ;;  %v18559_v57 = vand.u32 4294901760, %v12352_v26  ;;  %v21511_v11 = vld [vmem:[#allocation77_spill] sm:$0xff] }
 0xb90   :  { %v18562_v17 = vsub.f32 %v12352_v26, %v18559_v57  ;;  %12701 = vmatmul.mubr.f32.vlgmr.msra.gmra.mxu1 %v18559_v57  ;;  %v21510_v26 = vld [vmem:[#allocation71_spill] sm:$0xff] }
 0xb91   :  { %12847 = vmatpush1.msra.mxu1 %v20039_v20  ;;  %12940 = vmatprep.mubr.f32.mxu1 %v19817_v55 }
 0xb92   :  { %12849 = vmatprep.subr.mxu1 %v20040_v43  ;;  %v18569_v56 = vand.u32 4294901760, %v18562_v17 }
 0xb93   :  { %12851 = vmatpush1.msra.mxu1 %v20041_v32 }
 0xb94   :  { %12853 = vmatprep.subr.mxu1 %v20042_v16  ;;  %v12467_v44 = vsub.f32 %v18562_v17, %v18569_v56 }
 0xb95   :  { %12855 = vmatpush1.msra.mxu1 %v20045_v28 }
 0xb96   :  { %12857 = vmatprep.subr.mxu1 %v20047_v30  ;;  %v18577_v39 = vand.u32 4294901760, %v12467_v44  ;;  %v21512_v44 = vld [vmem:[#allocation80_spill] sm:$0xff] }
 0xb97   :  { %12859 = vmatpush1.msra.mxu1 %v20049_v5 }
 0xb98   :  { %12861 = vmatprep.subr.mxu1 %v20051_v35  ;;  %12469 = vmatmul.mubr.f32.vlgmr.msra.gmra.mxu0 %v18577_v39 }
 0xb99   :  { %12712 = vmatpush1.msra.mxu0 %v21496_v12  ;;  %12863 = vmatpush1.msra.mxu1 %v20053_v59  ;;  %v21513_v12 = vld [vmem:[#allocation83_spill] sm:$0xff] }
 0xb9a   :  { %12715 = vmatprep.subr.mxu0 %v21497_v37  ;;  %12865 = vmatprep.subr.mxu1 %v20055_v10  ;;  %v21514_v37 = vld [vmem:[#allocation87_spill] sm:$0xff] }
 0xb9b   :  { %12718 = vmatpush1.msra.mxu0 %v21498_v42  ;;  %12867 = vmatpush1.msra.mxu1 %v20057_v48  ;;  %v21515_v42 = vld [vmem:[#allocation91_spill] sm:$0xff] }
 0xb9c   :  { %12721 = vmatprep.subr.mxu0 %v21499_v24  ;;  %12869 = vmatprep.subr.mxu1 %v20059_v3  ;;  %v21516_v24 = vld [vmem:[#allocation94_spill] sm:$0xff] }
 0xb9d   :  { %12724 = vmatpush1.msra.mxu0 %v21500_v22  ;;  %12871 = vmatpush1.msra.mxu1 %v20061_v63  ;;  %v21517_v22 = vld [vmem:[#allocation100_spill] sm:$0xff] }
 0xb9e   :  { %12727 = vmatprep.subr.mxu0 %v21501_v18  ;;  %12873 = vmatprep.subr.mxu1 %v20063_v40  ;;  %v21518_v18 = vld [vmem:[#allocation103_spill] sm:$0xff] }
 0xb9f   :  { %12730 = vmatpush1.msra.mxu0 %v21502_v52  ;;  %12875 = vmatpush1.msra.mxu1 %v20065_v33  ;;  %v21519_v52 = vld [vmem:[#allocation106_spill] sm:$0xff] }
 0xba0   :  { %12733 = vmatprep.subr.mxu0 %v21503_v45  ;;  %12877 = vmatprep.subr.mxu1 %v20067_v58  ;;  %v21520_v45 = vld [vmem:[#allocation109_spill] sm:$0xff] }
 0xba1   :  { %12736 = vmatpush1.msra.mxu0 %v21504_v13  ;;  %12879 = vmatpush1.msra.mxu1 %v20069_v1  ;;  %v21521_v13 = vld [vmem:[#allocation112_spill] sm:$0xff] }
 0xba2   :  { %12739 = vmatprep.subr.mxu0 %v21505_v41  ;;  %12881 = vmatprep.subr.mxu1 %v20071_v25  ;;  %v21522_v41 = vld [vmem:[#allocation115_spill] sm:$0xff] }
 0xba3   :  { %12742 = vmatpush1.msra.mxu0 %v21506_v54  ;;  %12883 = vmatpush1.msra.mxu1 %v20073_v62  ;;  %v21523_v54 = vld [vmem:[#allocation118_spill] sm:$0xff] }
 0xba4   :  { %12745 = vmatprep.subr.mxu0 %v21507_v36  ;;  %12885 = vmatprep.subr.mxu1 %v20075_v27  ;;  %v21524_v36 = vld [vmem:[#allocation124_spill] sm:$0xff] }
 0xba5   :  { %12748 = vmatpush1.msra.mxu0 %v21508_v7  ;;  %12887 = vmatpush1.msra.mxu1 %v20077_v51  ;;  %v21554_v7 = vld [vmem:[#allocation170_spill] sm:$0xff] }
 0xba6   :  { %12751 = vmatprep.subr.mxu0 %v21509_v0  ;;  %12889 = vmatprep.subr.mxu1 %v21480_v46  ;;  %v21556_v0 = vld [vmem:[#allocation174_spill] sm:$0xff] }
 0xba7   :  { %12754 = vmatpush1.msra.mxu0 %v21510_v26  ;;  %12891 = vmatpush1.msra.mxu1 %v21482_v53  ;;  %v21558_v26 = vld [vmem:[#allocation177_spill] sm:$0xff] }
 0xba8   :  { %12757 = vmatprep.subr.mxu0 %v21511_v11  ;;  %12893 = vmatprep.subr.mxu1 %v21484_v2  ;;  %v21560_v11 = vld [vmem:[#allocation178_spill] sm:$0xff] }
 0xba9   :  { %12760 = vmatpush1.msra.mxu0 %v21512_v44  ;;  %12895 = vmatpush1.msra.mxu1 %v21486_v8  ;;  %v21561_v44 = vld [vmem:[#allocation128_spill] sm:$0xff] }
 0xbaa   :  { %12763 = vmatprep.subr.mxu0 %v21513_v12  ;;  %12897 = vmatprep.subr.mxu1 %v21487_v23  ;;  %v21562_v12 = vld [vmem:[#allocation181_spill] sm:$0xff] }
 0xbab   :  { %12766 = vmatpush1.msra.mxu0 %v21514_v37  ;;  %12899 = vmatpush1.msra.mxu1 %v21488_v6  ;;  %v21563_v37 = vld [vmem:[#allocation131_spill] sm:$0xff] }
 0xbac   :  { %12769 = vmatprep.subr.mxu0 %v21515_v42  ;;  %12901 = vmatprep.subr.mxu1 %v21489_v50  ;;  %v21564_v42 = vld [vmem:[#allocation186_spill] sm:$0xff] }
 0xbad   :  { %12772 = vmatpush1.msra.mxu0 %v21516_v24  ;;  %12903 = vmatpush1.msra.mxu1 %v21490_v34  ;;  %v21565_v24 = vld [vmem:[#allocation133_spill] sm:$0xff] }
 0xbae   :  { %12775 = vmatprep.subr.mxu0 %v21517_v22  ;;  %12905 = vmatprep.subr.mxu1 %v21491_v9  ;;  %v21566_v22 = vld [vmem:[#allocation192_spill] sm:$0xff] }
 0xbaf   :  { %12778 = vmatpush1.msra.mxu0 %v21518_v18  ;;  %12907 = vmatpush1.msra.mxu1 %v21492_v15  ;;  %v21567_v18 = vld [vmem:[#allocation195_spill] sm:$0xff] }
 0xbb0   :  { %12781 = vmatprep.subr.mxu0 %v21519_v52  ;;  %12944 = vmatmul.mubr.f32.vlgmr.msra.gmra.mxu1 %v18569_v56  ;;  %v21568_v52 = vld [vmem:[#allocation196_spill] sm:$0xff] }
 0xbb1   :  { %13119 = vmatprep.subr.mxu1 %v20038_v29  ;;  %12784 = vmatpush1.msra.mxu0 %v21520_v45  ;;  %v21525_v29 = vld [vmem:[#allocation126_spill] sm:$0xff]  ;;  %v21569_v45 = vld [vmem:[#allocation199_spill] sm:$0xff] }
 0xbb2   :  { %13121 = vmatpush1.msra.mxu1 %v20039_v20  ;;  %12787 = vmatprep.subr.mxu0 %v21521_v13  ;;  %v21526_v20 = vld [vmem:[#allocation129_spill] sm:$0xff]  ;;  %v21570_v13 = vld [vmem:[#allocation203_spill] sm:$0xff] }
 0xbb3   :  { %13123 = vmatprep.subr.mxu1 %v20040_v43  ;;  %12790 = vmatpush1.msra.mxu0 %v21522_v41  ;;  %v21527_v43 = vld [vmem:[#allocation21_spill] sm:$0xff]  ;;  %v21571_v41 = vld [vmem:[#allocation206_spill] sm:$0xff] }
 0xbb4   :  { %13125 = vmatpush1.msra.mxu1 %v20041_v32  ;;  %12793 = vmatprep.subr.mxu0 %v21523_v54  ;;  %v21531_v32 = vld [vmem:[#allocation32_spill] sm:$0xff]  ;;  %v21572_v54 = vld [vmem:[#allocation215_spill] sm:$0xff] }
 0xbb5   :  { %13127 = vmatprep.subr.mxu1 %v20042_v16  ;;  %12796 = vmatpush1.msra.mxu0 %v21524_v36  ;;  %v21528_v16 = vld [vmem:[#allocation25_spill] sm:$0xff]  ;;  %v21573_v36 = vld [vmem:[#allocation219_spill] sm:$0xff] }
 0xbb6   :  { %13129 = vmatpush1.msra.mxu1 %v20045_v28  ;;  %12799 = vmatprep.subr.mxu0 %v21525_v29  ;;  %v21529_v28 = vld [vmem:[#allocation26_spill] sm:$0xff]  ;;  %v21574_v29 = vld [vmem:[#allocation223_spill] sm:$0xff] }
 0xbb7   :  { %13131 = vmatprep.subr.mxu1 %v20047_v30  ;;  %12802 = vmatpush1.msra.mxu0 %v21526_v20  ;;  %v21530_v30 = vld [vmem:[#allocation29_spill] sm:$0xff]  ;;  %v21575_v20 = vld [vmem:[#allocation148_spill] sm:$0xff] }
 0xbb8   :  { %12835 = vmatprep.mubr.f32.mxu0 %v19817_v55  ;;  %13133 = vmatpush1.msra.mxu1 %v20049_v5  ;;  %v21532_v5 = vld [vmem:[#allocation35_spill] sm:$0xff] }
 0xbb9   :  { %12838 = vmatmul.mubr.f32.vlgmr.msra.gmra.mxu0 %v18562_v17  ;;  %12953 = vmatprep.subr.mxu0 %v21527_v43  ;;  %v21576_v43 = vld [vmem:[#allocation226_spill] sm:$0xff] }
 0xbba   :  { %13135 = vmatprep.subr.mxu1 %v20051_v35  ;;  %12957 = vmatpush1.msra.mxu0 %v21528_v16  ;;  %v21533_v35 = vld [vmem:[#allocation39_spill] sm:$0xff]  ;;  %v21577_v16 = vld [vmem:[#allocation149_spill] sm:$0xff] }
 0xbbb   :  { %13137 = vmatpush1.msra.mxu1 %v20053_v59  ;;  %12961 = vmatprep.subr.mxu0 %v21529_v28  ;;  %v21534_v59 = vld [vmem:[#allocation47_spill] sm:$0xff] }
 0xbbc   :  { %13139 = vmatprep.subr.mxu1 %v20055_v10  ;;  %12965 = vmatpush1.msra.mxu0 %v21530_v30  ;;  %v21535_v10 = vld [vmem:[#allocation51_spill] sm:$0xff] }
 0xbbd   :  { %13141 = vmatpush1.msra.mxu1 %v20057_v48  ;;  %12969 = vmatprep.subr.mxu0 %v21531_v32  ;;  %v21536_v48 = vld [vmem:[#allocation54_spill] sm:$0xff]  ;;  %v21578_v28 = vld [vmem:[#allocation235_spill] sm:$0xff]  ;;  %v21580_v32 = vld [vmem:[#allocation237_spill] sm:$0xff] }
 0xbbe   :  { %13143 = vmatprep.subr.mxu1 %v20059_v3  ;;  %12973 = vmatpush1.msra.mxu0 %v21532_v5  ;;  %v21537_v3 = vld [vmem:[#allocation57_spill] sm:$0xff]  ;;  %v21579_v30 = vld [vmem:[#allocation151_spill] sm:$0xff]  ;;  %v21581_v5 = vld [vmem:[#allocation154_spill] sm:$0xff] }
 0xbbf   :  { %13145 = vmatpush1.msra.mxu1 %v20061_v63  ;;  %12977 = vmatprep.subr.mxu0 %v21533_v35  ;;  %v21538_v63 = vld [vmem:[#allocation61_spill] sm:$0xff]  ;;  %v21582_v35 = vld [vmem:[#allocation240_spill] sm:$0xff] }
 0xbc0   :  { %13147 = vmatprep.subr.mxu1 %v20063_v40  ;;  %12981 = vmatpush1.msra.mxu0 %v21534_v59  ;;  %v21539_v40 = vld [vmem:[#allocation64_spill] sm:$0xff]  ;;  %v21583_v59 = vld [vmem:[#allocation157_spill] sm:$0xff] }
 0xbc1   :  { %13149 = vmatpush1.msra.mxu1 %v20065_v33  ;;  %12985 = vmatprep.subr.mxu0 %v21535_v10  ;;  %v21540_v33 = vld [vmem:[#allocation67_spill] sm:$0xff] }
 0xbc2   :  { %13151 = vmatprep.subr.mxu1 %v20067_v58  ;;  %12989 = vmatpush1.msra.mxu0 %v21536_v48  ;;  %v21541_v58 = vld [vmem:[#allocation73_spill] sm:$0xff]  ;;  %v21584_v10 = vld [vmem:[#allocation243_spill] sm:$0xff]  ;;  %v21585_v48 = vld [vmem:[#allocation162_spill] sm:$0xff] }
 0xbc3   :  { %13153 = vmatpush1.msra.mxu1 %v20069_v1  ;;  %12993 = vmatprep.subr.mxu0 %v21537_v3  ;;  %v21542_v1 = vld [vmem:[#allocation76_spill] sm:$0xff]  ;;  %v21586_v3 = vld [vmem:[#allocation246_spill] sm:$0xff] }
 0xbc4   :  { %13155 = vmatprep.subr.mxu1 %v20071_v25  ;;  %12997 = vmatpush1.msra.mxu0 %v21538_v63  ;;  %v21543_v25 = vld [vmem:[#allocation82_spill] sm:$0xff]  ;;  %v21587_v63 = vld [vmem:[#allocation165_spill] sm:$0xff] }
 0xbc5   :  { %13157 = vmatpush1.msra.mxu1 %v20073_v62  ;;  %13001 = vmatprep.subr.mxu0 %v21539_v40  ;;  %v21544_v62 = vld [vmem:[#allocation86_spill] sm:$0xff]  ;;  %v21588_v40 = vld [vmem:[#allocation248_spill] sm:$0xff] }
 0xbc6   :  { %13159 = vmatprep.subr.mxu1 %v20075_v27  ;;  %13005 = vmatpush1.msra.mxu0 %v21540_v33  ;;  %v21545_v27 = vld [vmem:[#allocation90_spill] sm:$0xff]  ;;  %v21589_v33 = vld [vmem:[#allocation171_spill] sm:$0xff] }
 0xbc7   :  { %13161 = vmatpush1.msra.mxu1 %v20077_v51  ;;  %13009 = vmatprep.subr.mxu0 %v21541_v58  ;;  %v21546_v51 = vld [vmem:[#allocation92_spill] sm:$0xff]  ;;  %v21590_v58 = vld [vmem:[#allocation250_spill] sm:$0xff] }
 0xbc8   :  { %13163 = vmatprep.subr.mxu1 %v21480_v46  ;;  %13013 = vmatpush1.msra.mxu0 %v21542_v1  ;;  %v21547_v46 = vld [vmem:[#allocation96_spill] sm:$0xff]  ;;  %v21591_v1 = vld [vmem:[#allocation175_spill] sm:$0xff] }
 0xbc9   :  { %13165 = vmatpush1.msra.mxu1 %v21482_v53  ;;  %13017 = vmatprep.subr.mxu0 %v21543_v25  ;;  %v21548_v53 = vld [vmem:[#allocation99_spill] sm:$0xff]  ;;  %v21592_v25 = vld [vmem:[#allocation252_spill] sm:$0xff] }
 0xbca   :  { %13167 = vmatprep.subr.mxu1 %v21484_v2  ;;  %13021 = vmatpush1.msra.mxu0 %v21544_v62  ;;  %v21549_v2 = vld [vmem:[#allocation105_spill] sm:$0xff]  ;;  %v21593_v62 = vld [vmem:[#allocation184_spill] sm:$0xff] }
 0xbcb   :  { %13169 = vmatpush1.msra.mxu1 %v21486_v8  ;;  %13025 = vmatprep.subr.mxu0 %v21545_v27  ;;  %v21550_v8 = vld [vmem:[#allocation108_spill] sm:$0xff]  ;;  %v21594_v27 = vld [vmem:[#allocation254_spill] sm:$0xff] }
 0xbcc   :  { %13171 = vmatprep.subr.mxu1 %v21487_v23  ;;  %13029 = vmatpush1.msra.mxu0 %v21546_v51  ;;  %v21551_v23 = vld [vmem:[#allocation111_spill] sm:$0xff] }
 0xbcd   :  { %13173 = vmatpush1.msra.mxu1 %v21488_v6  ;;  %13033 = vmatprep.subr.mxu0 %v21547_v46  ;;  %v21552_v6 = vld [vmem:[#allocation167_spill] sm:$0xff] }
 0xbce   :  { %13175 = vmatprep.subr.mxu1 %v21489_v50  ;;  %13037 = vmatpush1.msra.mxu0 %v21548_v53  ;;  %v21553_v50 = vld [vmem:[#allocation114_spill] sm:$0xff]  ;;  %v21595_v51 = vld [vmem:[#allocation187_spill] sm:$0xff]  ;;  %v21597_v53 = vld [vmem:[#allocation189_spill] sm:$0xff] }
 0xbcf   :  { %13177 = vmatpush1.msra.mxu1 %v21490_v34  ;;  %13041 = vmatprep.subr.mxu0 %v21549_v2  ;;  %v21555_v34 = vld [vmem:[#allocation117_spill] sm:$0xff]  ;;  %v21596_v46 = vld [vmem:[#allocation255_spill] sm:$0xff]  ;;  %v21598_v2 = vld [vmem:[#allocation256_spill] sm:$0xff] }
 0xbd0   :  { %13179 = vmatprep.subr.mxu1 %v21491_v9  ;;  %13045 = vmatpush1.msra.mxu0 %v21550_v8  ;;  %v21557_v9 = vld [vmem:[#allocation121_spill] sm:$0xff]  ;;  %v21599_v8 = vld [vmem:[#allocation190_spill] sm:$0xff] }
 0xbd1   :  { %13181 = vmatpush1.msra.mxu1 %v21492_v15  ;;  %13214 = vmatprep.mubr.f32.mxu1 %v19817_v55  ;;  %v21559_v15 = vld [vmem:[#allocation123_spill] sm:$0xff] }
 0xbd2   :  { %13049 = vmatprep.subr.mxu0 %v21551_v23  ;;  %13216 = vmatmul.mubr.f32.vlgmr.msra.gmra.mxu1 %v18559_v57  ;;  %v21600_v23 = vld [vmem:[#allocation257_spill] sm:$0xff] }
 0xbd3   :  { %13335 = vmatprep.subr.mxu1 %v21552_v6  ;;  %13053 = vmatpush1.msra.mxu0 %v21553_v50  ;;  %v21601_v6 = vld [vmem:[#allocation193_spill] sm:$0xff]  ;;  %v21602_v50 = vld [vmem:[#allocation258_spill] sm:$0xff] }
 0xbd4   :  { %13341 = vmatpush1.msra.mxu1 %v21554_v7  ;;  %13057 = vmatprep.subr.mxu0 %v21555_v34  ;;  %v21603_v7 = vld [vmem:[#allocation200_spill] sm:$0xff]  ;;  %v21604_v34 = vld [vmem:[#allocation259_spill] sm:$0xff] }
 0xbd5   :  { %13347 = vmatprep.subr.mxu1 %v21556_v0  ;;  %13061 = vmatpush1.msra.mxu0 %v21557_v9  ;;  %v21605_v0 = vld [vmem:[#allocation204_spill] sm:$0xff] }
 0xbd6   :  { %13353 = vmatpush1.msra.mxu1 %v21558_v26  ;;  %13065 = vmatprep.subr.mxu0 %v21559_v15  ;;  %v21606_v9 = vld [vmem:[#allocation260_spill] sm:$0xff]  ;;  %v21607_v26 = vld [vmem:[#allocation207_spill] sm:$0xff]  ;;  %v21608_v15 = vld [vmem:[#allocation209_spill] sm:$0xff] }
 0xbd7   :  { %13359 = vmatprep.subr.mxu1 %v21560_v11  ;;  %13069 = vmatpush1.msra.mxu0 %v21561_v44  ;;  %v21609_v11 = vld [vmem:[#allocation212_spill] sm:$0xff] }
 0xbd8   :  { %13365 = vmatpush1.msra.mxu1 %v21562_v12  ;;  %13073 = vmatprep.subr.mxu0 %v21563_v37  ;;  %v21610_v44 = vld [vmem:[#allocation216_spill] sm:$0xff] }
 0xbd9   :  { %13371 = vmatprep.subr.mxu1 %v21564_v42  ;;  %13077 = vmatpush1.msra.mxu0 %v21565_v24  ;;  %v21611_v12 = vld [vmem:[#allocation220_spill] sm:$0xff]  ;;  %v21613_v42 = vld [vmem:[#allocation229_spill] sm:$0xff] }
 0xbda   :  { %13110 = vmatprep.mubr.f32.mxu0 %v19817_v55  ;;  %13377 = vmatpush1.msra.mxu1 %v21566_v22  ;;  %v21612_v37 = vld [vmem:[#allocation224_spill] sm:$0xff]  ;;  %v21615_v22 = vld [vmem:[#allocation139_spill] sm:$0xff] }
 0xbdb   :  { %13112 = vmatmul.mubr.f32.vlgmr.msra.gmra.mxu0 %v18559_v57  ;;  %13223 = vmatprep.subr.mxu0 %v15103_v49  ;;  %v21614_v24 = vld [vmem:[#allocation232_spill] sm:$0xff] }
 0xbdc   :  { %13383 = vmatprep.subr.mxu1 %v21567_v18  ;;  %13225 = vmatpush1.msra.mxu0 %v15113_v60  ;;  %v21616_v18 = vld [vmem:[#allocation140_spill] sm:$0xff] }
 0xbdd   :  { %13389 = vmatpush1.msra.mxu1 %v21568_v52  ;;  %13227 = vmatprep.subr.mxu0 %v15120_v14  ;;  %v21617_v52 = vld [vmem:[#allocation142_spill] sm:$0xff] }
 0xbde   :  { %13395 = vmatprep.subr.mxu1 %v21569_v45  ;;  %13229 = vmatpush1.msra.mxu0 %v15124_v61  ;;  %v21618_v45 = vld [vmem:[#allocation143_spill] sm:$0xff] }
 0xbdf   :  { %13401 = vmatpush1.msra.mxu1 %v21570_v13  ;;  %13231 = vmatprep.subr.mxu0 %v19988_v47  ;;  %v21619_v13 = vld [vmem:[#allocation144_spill] sm:$0xff] }
 0xbe0   :  { %13407 = vmatprep.subr.mxu1 %v21571_v41  ;;  %13233 = vmatpush1.msra.mxu0 %v19989_v4  ;;  %v21621_v41 = vld [vmem:[#allocation153_spill] sm:$0xff] }
 0xbe1   :  { %13413 = vmatpush1.msra.mxu1 %v21572_v54  ;;  %13235 = vmatprep.subr.mxu0 %v19991_v38  ;;  %v21622_v54 = vld [vmem:[#allocation159_spill] sm:$0xff] }
 0xbe2   :  { %13419 = vmatprep.subr.mxu1 %v21573_v36  ;;  %13237 = vmatpush1.msra.mxu0 %v20183_v19  ;;  %v21623_v36 = vld [vmem:[#allocation160_spill] sm:$0xff] }
 0xbe3   :  { %13425 = vmatpush1.msra.mxu1 %v21574_v29  ;;  %13239 = vmatprep.subr.mxu0 %v21575_v20  ;;  %v21624_v29 = vld [vmem:[#allocation161_spill] sm:$0xff] }
 0xbe4   :  { %13431 = vmatprep.subr.mxu1 %v21576_v43  ;;  %13241 = vmatpush1.msra.mxu0 %v21577_v16  ;;  %v21625_v43 = vld [vmem:[#allocation164_spill] sm:$0xff] }
 0xbe5   :  { %13437 = vmatpush1.msra.mxu1 %v21578_v28  ;;  %13243 = vmatprep.subr.mxu0 %v21579_v30  ;;  %v21626_v28 = vld [vmem:[#allocation166_spill] sm:$0xff] }
 0xbe6   :  { %13443 = vmatprep.subr.mxu1 %v21580_v32  ;;  %13245 = vmatpush1.msra.mxu0 %v21581_v5  ;;  %v21627_v32 = vld [vmem:[#allocation169_spill] sm:$0xff] }
 0xbe7   :  { %13449 = vmatpush1.msra.mxu1 %v21582_v35  ;;  %13247 = vmatprep.subr.mxu0 %v21583_v59  ;;  %v21628_v35 = vld [vmem:[#allocation180_spill] sm:$0xff] }
 0xbe8   :  { %13455 = vmatprep.subr.mxu1 %v21584_v10  ;;  %13249 = vmatpush1.msra.mxu0 %v21585_v48  ;;  %v21629_v10 = vld [vmem:[#allocation183_spill] sm:$0xff] }
 0xbe9   :  { %13461 = vmatpush1.msra.mxu1 %v21586_v3  ;;  %13251 = vmatprep.subr.mxu0 %v21587_v63  ;;  %v21630_v3 = vld [vmem:[#allocation185_spill] sm:$0xff] }
 0xbea   :  { %13467 = vmatprep.subr.mxu1 %v21588_v40  ;;  %13253 = vmatpush1.msra.mxu0 %v21589_v33  ;;  %v21631_v40 = vld [vmem:[#allocation188_spill] sm:$0xff] }
 0xbeb   :  { %13473 = vmatpush1.msra.mxu1 %v21590_v58  ;;  %13255 = vmatprep.subr.mxu0 %v21591_v1  ;;  %v21632_v58 = vld [vmem:[#allocation198_spill] sm:$0xff] }
 0xbec   :  { %13479 = vmatprep.subr.mxu1 %v21592_v25  ;;  %13257 = vmatpush1.msra.mxu0 %v21593_v62  ;;  %v21633_v25 = vld [vmem:[#allocation202_spill] sm:$0xff] }
 0xbed   :  { %13485 = vmatpush1.msra.mxu1 %v21594_v27  ;;  %13259 = vmatprep.subr.mxu0 %v21595_v51  ;;  %v21634_v27 = vld [vmem:[#allocation205_spill] sm:$0xff] }
 0xbee   :  { %13491 = vmatprep.subr.mxu1 %v21596_v46  ;;  %13261 = vmatpush1.msra.mxu0 %v21597_v53  ;;  %v21635_v46 = vld [vmem:[#allocation208_spill] sm:$0xff] }
 0xbef   :  { %13497 = vmatpush1.msra.mxu1 %v21598_v2  ;;  %13263 = vmatprep.subr.mxu0 %v21599_v8  ;;  %v21636_v2 = vld [vmem:[#allocation211_spill] sm:$0xff] }
 0xbf0   :  { %13503 = vmatprep.subr.mxu1 %v21600_v23  ;;  %13265 = vmatpush1.msra.mxu0 %v21601_v6  ;;  %v21637_v23 = vld [vmem:[#allocation214_spill] sm:$0xff] }
 0xbf1   :  { %13509 = vmatpush1.msra.mxu1 %v21602_v50  ;;  %13267 = vmatprep.subr.mxu0 %v21603_v7  ;;  %v21638_v50 = vld [vmem:[#allocation218_spill] sm:$0xff] }
 0xbf2   :  { %13515 = vmatprep.subr.mxu1 %v21604_v34  ;;  %13269 = vmatpush1.msra.mxu0 %v21605_v0  ;;  %v21639_v34 = vld [vmem:[#allocation222_spill] sm:$0xff] }
 0xbf3   :  { %13521 = vmatpush1.msra.mxu1 %v21606_v9  ;;  %13554 = vmatprep.mubr.f32.mxu1 %v19817_v55  ;;  %v21640_v9 = vld [vmem:[#allocation228_spill] sm:$0xff] }
 0xbf4   :  { %13271 = vmatprep.subr.mxu0 %v21607_v26  ;;  %13556 = vmatmul.mubr.f32.vlgmr.msra.gmra.mxu1 %v18559_v57 }
 0xbf5   :  { %13700 = vmatprep.subr.mxu1 %v15103_v49  ;;  %13273 = vmatpush1.msra.mxu0 %v21608_v15 }
 0xbf6   :  { %13702 = vmatpush1.msra.mxu1 %v15113_v60  ;;  %13275 = vmatprep.subr.mxu0 %v21609_v11 }
 0xbf7   :  { %13704 = vmatprep.subr.mxu1 %v15120_v14  ;;  %13277 = vmatpush1.msra.mxu0 %v21610_v44 }
 0xbf8   :  { %13706 = vmatpush1.msra.mxu1 %v15124_v61  ;;  %13279 = vmatprep.subr.mxu0 %v21611_v12 }
 0xbf9   :  { %13708 = vmatprep.subr.mxu1 %v19988_v47  ;;  %13281 = vmatpush1.msra.mxu0 %v21612_v37 }
 0xbfa   :  { %13710 = vmatpush1.msra.mxu1 %v19989_v4  ;;  %13283 = vmatprep.subr.mxu0 %v21613_v42 }
 0xbfb   :  { %13712 = vmatprep.subr.mxu1 %v19991_v38  ;;  %13285 = vmatpush1.msra.mxu0 %v21614_v24 }
 0xbfc   :  { %13318 = vmatprep.mubr.f32.mxu0 %v19817_v55  ;;  %13714 = vmatpush1.msra.mxu1 %v20183_v19 }
 0xbfd   :  { %13324 = vmatmul.mubr.f32.vlgmr.msra.gmra.mxu0 %v18577_v39  ;;  %13564 = vmatprep.subr.mxu0 %v21615_v22  ;;  %v21620_v39 = vld [vmem:[#allocation147_spill] sm:$0xff] }
 0xbfe   :  { %13716 = vmatprep.subr.mxu1 %v21575_v20  ;;  %13567 = vmatpush1.msra.mxu0 %v21616_v18  ;;  %v21641_v22 = vld [vmem:[#allocation231_spill] sm:$0xff]  ;;  %v21642_v18 = vld [vmem:[#allocation234_spill] sm:$0xff] }
 0xbff   :  { %13718 = vmatpush1.msra.mxu1 %v21577_v16  ;;  %13570 = vmatprep.subr.mxu0 %v21617_v52  ;;  %v21643_v52 = vld [vmem:[#allocation236_spill] sm:$0xff] }
 0xc00   :  { %13720 = vmatprep.subr.mxu1 %v21579_v30  ;;  %13573 = vmatpush1.msra.mxu0 %v21618_v45  ;;  %v21644_v45 = vld [vmem:[#allocation239_spill] sm:$0xff] }
 0xc01   :  { %13722 = vmatpush1.msra.mxu1 %v21581_v5  ;;  %13576 = vmatprep.subr.mxu0 %v21619_v13  ;;  %v21677_v13 = vld [vmem:[#allocation247_spill] sm:$0xff] }
 0xc02   :  { %13724 = vmatprep.subr.mxu1 %v21583_v59  ;;  %13579 = vmatpush1.msra.mxu0 %v21620_v39  ;;  %v21679_v39 = vld [vmem:[#allocation251_spill] sm:$0xff] }
 0xc03   :  { %13726 = vmatpush1.msra.mxu1 %v21585_v48  ;;  %13582 = vmatprep.subr.mxu0 %v21621_v41  ;;  %v21680_v41 = vld [vmem:[#allocation253_spill] sm:$0xff] }
 0xc04   :  { %13728 = vmatprep.subr.mxu1 %v21587_v63  ;;  %13585 = vmatpush1.msra.mxu0 %v21622_v54 }
 0xc05   :  { %13730 = vmatpush1.msra.mxu1 %v21589_v33  ;;  %13588 = vmatprep.subr.mxu0 %v21623_v36 }
 0xc06   :  { %13732 = vmatprep.subr.mxu1 %v21591_v1  ;;  %13591 = vmatpush1.msra.mxu0 %v21624_v29 }
 0xc07   :  { %13734 = vmatpush1.msra.mxu1 %v21593_v62  ;;  %13594 = vmatprep.subr.mxu0 %v21625_v43 }
 0xc08   :  { %13736 = vmatprep.subr.mxu1 %v21595_v51  ;;  %13597 = vmatpush1.msra.mxu0 %v21626_v28 }
 0xc09   :  { %13738 = vmatpush1.msra.mxu1 %v21597_v53  ;;  %13600 = vmatprep.subr.mxu0 %v21627_v32 }
 0xc0a   :  { %13740 = vmatprep.subr.mxu1 %v21599_v8  ;;  %13603 = vmatpush1.msra.mxu0 %v21628_v35 }
 0xc0b   :  { %13742 = vmatpush1.msra.mxu1 %v21601_v6  ;;  %13606 = vmatprep.subr.mxu0 %v21629_v10 }
 0xc0c   :  { %13744 = vmatprep.subr.mxu1 %v21603_v7  ;;  %13609 = vmatpush1.msra.mxu0 %v21630_v3 }
 0xc0d   :  { %13746 = vmatpush1.msra.mxu1 %v21605_v0  ;;  %13612 = vmatprep.subr.mxu0 %v21631_v40 }
 0xc0e   :  { %13748 = vmatprep.subr.mxu1 %v21607_v26  ;;  %13615 = vmatpush1.msra.mxu0 %v21632_v58 }
 0xc0f   :  { %13750 = vmatpush1.msra.mxu1 %v21608_v15  ;;  %13618 = vmatprep.subr.mxu0 %v21633_v25 }
 0xc10   :  { %13752 = vmatprep.subr.mxu1 %v21609_v11  ;;  %13621 = vmatpush1.msra.mxu0 %v21634_v27 }
 0xc11   :  { %13754 = vmatpush1.msra.mxu1 %v21610_v44  ;;  %13624 = vmatprep.subr.mxu0 %v21635_v46 }
 0xc12   :  { %13756 = vmatprep.subr.mxu1 %v21611_v12  ;;  %13627 = vmatpush1.msra.mxu0 %v21636_v2 }
 0xc13   :  { %13758 = vmatpush1.msra.mxu1 %v21612_v37  ;;  %13630 = vmatprep.subr.mxu0 %v21637_v23 }
 0xc14   :  { %13760 = vmatprep.subr.mxu1 %v21613_v42  ;;  %13633 = vmatpush1.msra.mxu0 %v21638_v50 }
 0xc15   :  { %13762 = vmatpush1.msra.mxu1 %v21614_v24  ;;  %13795 = vmatprep.mubr.f32.mxu1 %v19817_v55 }
 0xc16   :  { %13636 = vmatprep.subr.mxu0 %v21639_v34  ;;  %13799 = vmatmul.mubr.f32.vlgmr.msra.gmra.mxu1 %v18569_v56  ;;  %v21654_v56 = vld [vmem:[#allocation168_spill] sm:$0xff] }
 0xc17   :  { %13974 = vmatprep.subr.mxu1 %v15103_v49  ;;  %13639 = vmatpush1.msra.mxu0 %v21640_v9  ;;  %v21645_v49 = vld [vmem:[#allocation242_spill] sm:$0xff] }
 0xc18   :  { %13976 = vmatpush1.msra.mxu1 %v15113_v60  ;;  %13642 = vmatprep.subr.mxu0 %v21641_v22  ;;  %v21646_v60 = vld [vmem:[#allocation245_spill] sm:$0xff] }
 0xc19   :  { %13978 = vmatprep.subr.mxu1 %v15120_v14  ;;  %13645 = vmatpush1.msra.mxu0 %v21642_v18  ;;  %v21648_v14 = vld [vmem:[#allocation150_spill] sm:$0xff]  ;;  %v14174_v18 = vld [vmem:[%s18931_s1 + $0xe8] sm:$0xff] }
 0xc1a   :  { %13980 = vmatpush1.msra.mxu1 %v15124_v61  ;;  %13648 = vmatprep.subr.mxu0 %v21643_v52  ;;  %v21647_v61 = vld [vmem:[#allocation146_spill] sm:$0xff]  ;;  %v14173_v52 = vld [vmem:[%s18931_s1 + $0xe0] sm:$0xff] }
 0xc1b   :  { %13982 = vmatprep.subr.mxu1 %v19988_v47  ;;  %13651 = vmatpush1.msra.mxu0 %v21644_v45  ;;  %v21649_v47 = vld [vmem:[#allocation152_spill] sm:$0xff] }
 0xc1c   :  { %13984 = vmatpush1.msra.mxu1 %v19989_v4  ;;  %13654 = vmatprep.subr.mxu0 %v21645_v49  ;;  %v21650_v4 = vld [vmem:[#allocation155_spill] sm:$0xff] }
 0xc1d   :  { %13986 = vmatprep.subr.mxu1 %v19991_v38  ;;  %13657 = vmatpush1.msra.mxu0 %v21646_v60  ;;  %v21651_v38 = vld [vmem:[#allocation156_spill] sm:$0xff] }
 0xc1e   :  { %13690 = vmatprep.mubr.f32.mxu0 %v19817_v55  ;;  %13988 = vmatpush1.msra.mxu1 %v20183_v19  ;;  %v21652_v19 = vld [vmem:[#allocation158_spill] sm:$0xff] }
 0xc1f   :  { %13693 = vmatmul.mubr.f32.vlgmr.msra.gmra.mxu0 %v18562_v17  ;;  %13808 = vmatprep.subr.mxu0 %v21647_v61  ;;  %v21653_v17 = vld [vmem:[#allocation163_spill] sm:$0xff] }
 0xc20   :  { %13990 = vmatprep.subr.mxu1 %v21575_v20  ;;  %13812 = vmatpush1.msra.mxu0 %v21648_v14  ;;  %v21655_v20 = vld [vmem:[#allocation172_spill] sm:$0xff] }
 0xc21   :  { %13992 = vmatpush1.msra.mxu1 %v21577_v16  ;;  %13816 = vmatprep.subr.mxu0 %v21649_v47  ;;  %v21656_v16 = vld [vmem:[#allocation173_spill] sm:$0xff] }
 0xc22   :  { %13994 = vmatprep.subr.mxu1 %v21579_v30  ;;  %13820 = vmatpush1.msra.mxu0 %v21650_v4  ;;  %v21657_v30 = vld [vmem:[#allocation176_spill] sm:$0xff] }
 0xc23   :  { %13996 = vmatpush1.msra.mxu1 %v21581_v5  ;;  %13824 = vmatprep.subr.mxu0 %v21651_v38  ;;  %v21658_v5 = vld [vmem:[#allocation179_spill] sm:$0xff] }
 0xc24   :  { %13998 = vmatprep.subr.mxu1 %v21583_v59  ;;  %13828 = vmatpush1.msra.mxu0 %v21652_v19  ;;  %v21659_v59 = vld [vmem:[#allocation182_spill] sm:$0xff] }
 0xc25   :  { %14000 = vmatpush1.msra.mxu1 %v21585_v48  ;;  %13832 = vmatprep.subr.mxu0 %v21653_v17  ;;  %v21660_v48 = vld [vmem:[#allocation191_spill] sm:$0xff] }
 0xc26   :  { %14002 = vmatprep.subr.mxu1 %v21587_v63  ;;  %13836 = vmatpush1.msra.mxu0 %v21654_v56  ;;  %v21661_v63 = vld [vmem:[#allocation194_spill] sm:$0xff] }
 0xc27   :  { %14004 = vmatpush1.msra.mxu1 %v21589_v33  ;;  %13840 = vmatprep.subr.mxu0 %v21655_v20  ;;  %v21662_v33 = vld [vmem:[#allocation197_spill] sm:$0xff] }
 0xc28   :  { %14006 = vmatprep.subr.mxu1 %v21591_v1  ;;  %13844 = vmatpush1.msra.mxu0 %v21656_v16  ;;  %v21663_v1 = vld [vmem:[#allocation201_spill] sm:$0xff] }
 0xc29   :  { %14008 = vmatpush1.msra.mxu1 %v21593_v62  ;;  %13848 = vmatprep.subr.mxu0 %v21657_v30  ;;  %v21664_v62 = vld [vmem:[#allocation210_spill] sm:$0xff] }
 0xc2a   :  { %14010 = vmatprep.subr.mxu1 %v21595_v51  ;;  %13852 = vmatpush1.msra.mxu0 %v21658_v5  ;;  %v21665_v51 = vld [vmem:[#allocation213_spill] sm:$0xff] }
 0xc2b   :  { %14012 = vmatpush1.msra.mxu1 %v21597_v53  ;;  %13856 = vmatprep.subr.mxu0 %v21659_v59  ;;  %v21666_v53 = vld [vmem:[#allocation217_spill] sm:$0xff] }
 0xc2c   :  { %14014 = vmatprep.subr.mxu1 %v21599_v8  ;;  %13860 = vmatpush1.msra.mxu0 %v21660_v48  ;;  %v21667_v8 = vld [vmem:[#allocation221_spill] sm:$0xff] }
 0xc2d   :  { %14016 = vmatpush1.msra.mxu1 %v21601_v6  ;;  %13864 = vmatprep.subr.mxu0 %v21661_v63  ;;  %v21668_v6 = vld [vmem:[#allocation225_spill] sm:$0xff] }
 0xc2e   :  { %14018 = vmatprep.subr.mxu1 %v21603_v7  ;;  %13868 = vmatpush1.msra.mxu0 %v21662_v33  ;;  %v21669_v7 = vld [vmem:[#allocation137_spill] sm:$0xff] }
 0xc2f   :  { %14020 = vmatpush1.msra.mxu1 %v21605_v0  ;;  %13872 = vmatprep.subr.mxu0 %v21663_v1  ;;  %vm14107_vm15 = vcmp.eq.s32.totalorder %v21669_v7, 7  ;;  %v21670_v0 = vld [vmem:[#allocation227_spill] sm:$0xff]  ;;  %v14175_v7 = vld [vmem:[%s18931_s1 + $0xf0] sm:$0xff] }
 0xc30   :  { %14022 = vmatprep.subr.mxu1 %v21607_v26  ;;  %13876 = vmatpush1.msra.mxu0 %v21664_v62  ;;  %v21671_v26 = vld [vmem:[#allocation230_spill] sm:$0xff] }
 0xc31   :  { %14024 = vmatpush1.msra.mxu1 %v21608_v15  ;;  %13880 = vmatprep.subr.mxu0 %v21665_v51  ;;  %v21672_v15 = vmov 0  }
 0xc32   :  { %14026 = vmatprep.subr.mxu1 %v21609_v11  ;;  %13884 = vmatpush1.msra.mxu0 %v21666_v53  ;;  %v14108_v11 = vsel %vm14107_vm15, 1, %v21672_v15 }
 0xc33   :  { %14028 = vmatpush1.msra.mxu1 %v21610_v44  ;;  %13888 = vmatprep.subr.mxu0 %v21667_v8  ;;  %v21673_v44 = vld [vmem:[#allocation233_spill] sm:$0xff] }
 0xc34   :  { %14030 = vmatprep.subr.mxu1 %v21611_v12  ;;  %13892 = vmatpush1.msra.mxu0 %v21668_v6  ;;  %v21674_v12 = vld [vmem:[#allocation238_spill] sm:$0xff] }
 0xc35   :  { %14032 = vmatpush1.msra.mxu1 %v21612_v37  ;;  %13896 = vmatprep.subr.mxu0 %v21670_v0  ;;  %v21675_v37 = vld [vmem:[#allocation241_spill] sm:$0xff] }
 0xc36   :  { %14034 = vmatprep.subr.mxu1 %v21613_v42  ;;  %13900 = vmatpush1.msra.mxu0 %v21671_v26  ;;  %v21676_v42 = vld [vmem:[#allocation244_spill] sm:$0xff] }
 0xc37   :  { %14036 = vmatpush1.msra.mxu1 %v21614_v24  ;;  %14069 = vmatprep.mubr.f32.mxu1 %v19817_v55  ;;  %v21678_v24 = vld [vmem:[#allocation249_spill] sm:$0xff] }
 0xc38   :  { %13904 = vmatprep.subr.mxu0 %v21673_v44  ;;  %14071 = vmatmul.mubr.f32.vlgmr.msra.gmra.mxu1 %v18559_v57  ;;  %v14176_v44 = vld [vmem:[%s18931_s1 + $0xf8] sm:$0xff] }
 0xc39   :  { %13908 = vmatpush1.msra.mxu0 %v21674_v12  ;;  %13965 = vmatprep.mubr.f32.mxu0 %v19817_v55 }
 0xc3a   :  { %13912 = vmatprep.subr.mxu0 %v21675_v37  ;;  %14110 = vperm.xlu1 %14184, %v14108_v11  }
 0xc3b   :  { %13916 = vmatpush1.msra.mxu0 %v21676_v42 }
 0xc3c   :  { %13920 = vmatprep.subr.mxu0 %v21677_v13 }
 0xc3d   :  { %13924 = vmatpush1.msra.mxu0 %v21678_v24 }
 0xc3e   :  { %13928 = vmatprep.subr.mxu0 %v21679_v39 }
 0xc3f   :  { %13932 = vmatpush1.msra.mxu0 %v21680_v41 }
 0xc40   :  { %13967 = vmatmul.mubr.f32.vlgmr.msra.gmra.mxu0 %v18559_v57 }
 0xc50   :  { %v12702_v29 = vpop.f32.mrf.mxu1 }
 0xc52   :  { %v12704_v55 = vpop.f32.mrf.mxu1 }
 0xc58   :  { %v12470_v54 = vpop.f32.mrf.mxu0 }
 0xc59   :  { %v12703_v35 = vadd.f32 %v12702_v29, %v12470_v54 }
 0xc5a   :  { %v12472_v36 = vpop.f32.mrf.mxu0 }
 0xc5b   :  { %v12705_v32 = vadd.f32 %v12704_v55, %v12472_v36 }
 0xc70   :  { %v12945_v10 = vpop.f32.mrf.mxu1 }
 0xc72   :  { %v12947_v25 = vpop.f32.mrf.mxu1 }
 0xc79   :  { %v12839_v43 = vpop.f32.mrf.mxu0 }
 0xc7a   :  { %v12840_v58 = vadd.f32 %v12839_v43, %v12703_v35 }
 0xc7b   :  { %v12841_v28 = vpop.f32.mrf.mxu0 }
 0xc7c   :  { %v12842_v40 = vadd.f32 %v12841_v28, %v12705_v32  ;;  %v12946_v23 = vadd.f32 %v12945_v10, %v12840_v58 }
 0xc7e   :  { %v12948_v46 = vadd.f32 %v12947_v25, %v12842_v40 }
 0xc92   :  { %v13217_v2 = vpop.f32.mrf.mxu1 }
 0xc94   :  { %v13219_v57 = vpop.f32.mrf.mxu1 }
 0xc9b   :  { %v13113_v3 = vpop.f32.mrf.mxu0 }
 0xc9c   :  { %v13114_v34 = vadd.f32 %v13113_v3, %v12946_v23 }
 0xc9d   :  { %v13115_v27 = vpop.f32.mrf.mxu0 }
 0xc9e   :  { %v13116_v50 = vadd.f32 %v13115_v27, %v12948_v46  ;;  %v13218_v22 = vadd.f32 %v13217_v2, %v13114_v34 }
 0xca0   :  { %v13220_v9 = vadd.f32 %v13219_v57, %v13116_v50  ;;  %v14077_v49 = vadd.f32 %v14173_v52, %v13218_v22 }
 0xca2   :  { %v14078_v45 = vadd.f32 %v14174_v18, %v13220_v9  ;;  %v14177_v61 = vmul.f32 -1.442695, %v14077_v49 }
 0xca4   :  { %v14178_v60 = vmul.f32 -1.442695, %v14078_v45 }
 0xca6   :  { %14297 = vpow2.f32 %v14178_v60 }
 0xca7   :  { %14299 = vpow2.f32 %v14177_v61 }
 0xcb3   :  { %v14298_v59 = vpop.eup %14297 }
 0xcb4   :  { %v13557_v47 = vpop.f32.mrf.mxu1  ;;  %v14300_v63 = vpop.eup %14299  ;;  %v14090_v51 = vadd.f32 1.0, %v14298_v59 }
 0xcb5   :  { %v14084_v6 = vadd.f32 1.0, %v14300_v63  ;;  %v14111_v32 = vpop.permute.xlu1 %14110 }
 0xcb6   :  { %v13559_v19 = vpop.f32.mrf.mxu1  ;;  %14301 = vrcp.f32 %v14090_v51  ;;  %vm14112_vm0 = vcmp.eq.s32.totalorder %v14111_v32, 1 }
 0xcb7   :  { %14303 = vrcp.f32 %v14084_v6 }
 0xcbd   :  { %v13325_v14 = vpop.f32.mrf.mxu0 }
 0xcbe   :  { %v13558_v17 = vadd.f32 %v13557_v47, %v13325_v14 }
 0xcbf   :  { %v13327_v4 = vpop.f32.mrf.mxu0 }
 0xcc0   :  { %v13560_v16 = vadd.f32 %v13559_v19, %v13327_v4 }
 0xcc3   :  { %v14302_v24 = vpop.eup %14301 }
 0xcc4   :  { %v14304_v39 = vpop.eup %14303  ;;  %v14100_v54 = vmul.f32 %v14302_v24, %v18553_v21 }
 0xcd6   :  { %v13800_v56 = vpop.f32.mrf.mxu1 }
 0xcd8   :  { %v13802_v48 = vpop.f32.mrf.mxu1 }
 0xcdf   :  { %v13694_v38 = vpop.f32.mrf.mxu0 }
 0xce0   :  { %v13695_v30 = vadd.f32 %v13694_v38, %v13558_v17 }
 0xce1   :  { %v13696_v20 = vpop.f32.mrf.mxu0 }
 0xce2   :  { %v13697_v5 = vadd.f32 %v13696_v20, %v13560_v16  ;;  %v13801_v33 = vadd.f32 %v13800_v56, %v13695_v30 }
 0xce4   :  { %v13803_v8 = vadd.f32 %v13802_v48, %v13697_v5 }
 0xcf8   :  { %v14072_v1 = vpop.f32.mrf.mxu1 }
 0xcfa   :  { %v14074_v11 = vpop.f32.mrf.mxu1 }
 0xd00   :  { %v13968_v62 = vpop.f32.mrf.mxu0 }
 0xd01   :  { %v13969_v53 = vadd.f32 %v13968_v62, %v13801_v33 }
 0xd02   :  { %v13970_v0 = vpop.f32.mrf.mxu0 }
 0xd03   :  { %v14073_v26 = vadd.f32 %v14072_v1, %v13969_v53  ;;  %v13971_v15 = vadd.f32 %v13970_v0, %v13803_v8 }
 0xd05   :  { %v14079_v12 = vadd.f32 %v14175_v7, %v14073_v26  ;;  %v14075_v37 = vadd.f32 %v14074_v11, %v13971_v15 }
 0xd07   :  { %14305 = vtanh.f32 %v14079_v12  ;;  %v14080_v42 = vadd.f32 %v14176_v44, %v14075_v37 }
 0xd09   :  { %v14179_v13 = vmul.f32 -1.442695, %v14080_v42 }
 0xd0b   :  { %14307 = vpow2.f32 %v14179_v13 }
 0xd14   :  { %v14306_v41 = vpop.eup %14305 }
 0xd15   :  { %v14101_v36 = vmul.f32 %v14306_v41, %v14304_v39 }
 0xd17   :  { %v14102_v29 = vadd.f32 %v14101_v36, %v14100_v54 }
 0xd18   :  { %v14308_v43 = vpop.eup %14307 }
 0xd19   :  { %14115 = vst [vmem:[#allocation3] sm:$0xff] %v14102_v29  ;;  %v14097_v55 = vadd.f32 1.0, %v14308_v43  ;;  %14309 = vtanh.f32 %v14102_v29 }
 0xd1b   :  { %14311 = vrcp.f32 %v14097_v55 }
 0xd26   :  { %v14310_v28 = vpop.eup %14309 }
 0xd28   :  { %v14312_v35 = vpop.eup %14311 }
 0xd29   :  { %v14104_v10 = vmul.f32 %v14312_v35, %v14310_v28 }
 0xd2b   :  { %v14113_v3 = vsel %vm14112_vm0, %v14104_v10, %v18557_v31  ;;  %14114 = vst [vmem:[#allocation2] sm:$0xff] %v14104_v10 }
 0xd2c   :  { %14116 = vst [vmem:[#allocation4] sm:$0xff] %v14113_v3 }
 0xd2d PF:  {}
 0xd33   :  { %v14120_v40 = vld [vmem:[#allocation4] sm:$0xff] }
 0xd34   :  { %14121 = vst [vmem:[%s18934_s4] sm:$0xff] %v14120_v40 }

</bundles_post_ra>
